<compile_context>
chip_gen: v7x
topology: tpu7x:2x2x1
jax: 0.10.0
libtpu: 0.0.40
codegen_flags: <defaults>
</compile_context>

<pallas_src>
import functools

import jax
import jax.numpy as jnp
from jax.experimental import pallas as pl
from jax.experimental.pallas import tpu as pltpu


_VMEM_LIMIT = 24 * 1024 * 1024   # generous headroom even on v7x's 64 MiB
_MAX_TM = 512                    # cap M tile rows
_KSIZE = 4
_STRIDES = (2, 2, 1, 2, 2)
_EPS = 1e-5
_LRELU = 0.2


def _tc_cores_per_chip():
    """2 TensorCores on v7x / v4 / v5p (megacore), else 1."""
    try:
        kind = jax.devices()[0].device_kind.lower()
    except Exception:
        return 1
    if "v7" in kind or "v4" in kind or "v5p" in kind:
        return 2
    return 1


_TC_CORES = _tc_cores_per_chip()


# ----------------------------- Pallas kernels ------------------------------

def _write_stats(y, s1_ref, s2_ref, tm, m_valid):
    """Masked per-tile sum / sum-of-squares of the f32 accumulator.

    Only the tail tile can contain M-padding rows, so full tiles take the
    unmasked path (saves two (tm, CN) f32 multiplies per tile).
    """
    m = pl.program_id(0)
    last = pl.num_programs(0) - 1
    r8 = jax.lax.broadcasted_iota(jnp.int32, (8, 1), 0)

    @pl.when(m != last)
    def _():
        s1 = jnp.sum(y, axis=0, keepdims=True)
        s2 = jnp.sum(y * y, axis=0, keepdims=True)
        s1_ref[...] = jnp.where(r8 == 0, s1, 0.0)
        s2_ref[...] = jnp.where(r8 == 0, s2, 0.0)

    @pl.when(m == last)
    def _():
        row = m * tm + jax.lax.broadcasted_iota(jnp.int32, (tm, 1), 0)
        valid = (row < m_valid).astype(jnp.float32)
        yv = y * valid
        s1 = jnp.sum(yv, axis=0, keepdims=True)
        s2 = jnp.sum(yv * y, axis=0, keepdims=True)
        s1_ref[...] = jnp.where(r8 == 0, s1, 0.0)
        s2_ref[...] = jnp.where(r8 == 0, s2, 0.0)


def _conv_bias_stats_kernel(x_ref, w_ref, b_ref, y_ref, s1_ref, s2_ref, *,
                            tm, m_valid):
    """Layer 1: conv-as-matmul + bias; bf16 output + f32 per-tile stats."""
    y = jnp.dot(x_ref[...], w_ref[...],
                preferred_element_type=jnp.float32) + b_ref[...]
    _write_stats(y, s1_ref, s2_ref, tm, m_valid)
    y_ref[...] = y.astype(y_ref.dtype)


def _affine_lrelu_conv_stats_kernel(x_ref, ks_ref, kh_ref, w_ref, b_ref,
                                    y_ref, s1_ref, s2_ref, *, tm, m_valid):
    """Layers 2-4: fused (prev-layer BN affine + LeakyReLU) -> conv + bias.

    ks/kh are the previous layer's per-channel scale/shift repeated kh*kw
    times along K, so the affine + LReLU is applied directly to the patch
    tile (redundant VPU work hidden under the MXU).
    """
    z = x_ref[...].astype(jnp.float32) * ks_ref[...] + kh_ref[...]
    a = jnp.where(z > 0, z, _LRELU * z).astype(jnp.bfloat16)
    y = jnp.dot(a, w_ref[...],
                preferred_element_type=jnp.float32) + b_ref[...]
    _write_stats(y, s1_ref, s2_ref, tm, m_valid)
    y_ref[...] = y.astype(y_ref.dtype)


# --------------------------- pallas_call wrappers ---------------------------

def _cparams():
    return pltpu.CompilerParams(
        dimension_semantics=("parallel",),
        vmem_limit_bytes=_VMEM_LIMIT,
    )


def _out_shapes(mp, mt, cn):
    return (
        jax.ShapeDtypeStruct((mp, cn), jnp.bfloat16),       # pre-BN conv out
        jax.ShapeDtypeStruct((mt * 8, cn), jnp.float32),     # per-tile sum
        jax.ShapeDtypeStruct((mt * 8, cn), jnp.float32),     # per-tile sum sq
    )


def _out_specs(tm, cn):
    return (
        pl.BlockSpec((tm, cn), lambda m: (m, 0)),
        pl.BlockSpec((8, cn), lambda m: (m, 0)),
        pl.BlockSpec((8, cn), lambda m: (m, 0)),
    )


def pallas_conv_stats(cols, wt, bias, m_valid, tm):
    mp, kdim = cols.shape
    cn = wt.shape[1]
    mt = mp // tm
    kern = functools.partial(_conv_bias_stats_kernel, tm=tm, m_valid=m_valid)
    return pl.pallas_call(
        kern,
        out_shape=_out_shapes(mp, mt, cn),
        grid=(mt,),
        in_specs=[
            pl.BlockSpec((tm, kdim), lambda m: (m, 0)),
            pl.BlockSpec((kdim, cn), lambda m: (0, 0)),
            pl.BlockSpec((1, cn), lambda m: (0, 0)),
        ],
        out_specs=_out_specs(tm, cn),
        compiler_params=_cparams(),
    )(cols, wt, bias)


def pallas_affine_conv_stats(cols, k_scale, k_shift, wt, bias, m_valid, tm):
    mp, kdim = cols.shape
    cn = wt.shape[1]
    mt = mp // tm
    kern = functools.partial(_affine_lrelu_conv_stats_kernel,
                             tm=tm, m_valid=m_valid)
    return pl.pallas_call(
        kern,
        out_shape=_out_shapes(mp, mt, cn),
        grid=(mt,),
        in_specs=[
            pl.BlockSpec((tm, kdim), lambda m: (m, 0)),
            pl.BlockSpec((1, kdim), lambda m: (0, 0)),
            pl.BlockSpec((1, kdim), lambda m: (0, 0)),
            pl.BlockSpec((kdim, cn), lambda m: (0, 0)),
            pl.BlockSpec((1, cn), lambda m: (0, 0)),
        ],
        out_specs=_out_specs(tm, cn),
        compiler_params=_cparams(),
    )(cols, k_scale, k_shift, wt, bias)


# ------------------------------- JAX glue ----------------------------------

def _round_up(n, m):
    return ((n + m - 1) // m) * m


def _pad_axis(x, axis, target):
    pad = target - x.shape[axis]
    if pad <= 0:
        return x
    widths = [(0, 0)] * x.ndim
    widths[axis] = (0, pad)
    return jnp.pad(x, widths)


def _pick_tm(m_rows):
    """M tile rows: multiple of 16; split across 2 tiles on 2-TC parts."""
    if _TC_CORES > 1 and m_rows > 16:
        tm = _round_up((m_rows + _TC_CORES - 1) // _TC_CORES, 16)
    else:
        tm = _round_up(m_rows, 16)
    return min(_MAX_TM, tm)


def extract_patches(x, k, stride):
    """x: [N, H, W, Cs] -> patches [N*Ho*Wo, Cs*k*k], feature order (C, kh, kw)."""
    n, h, w, c = x.shape
    ho = (h - k) // stride + 1
    wo = (w - k) // stride + 1
    p = jax.lax.conv_general_dilated_patches(
        x, filter_shape=(k, k), window_strides=(stride, stride),
        padding="VALID", dimension_numbers=("NHWC", "HWIO", "NHWC"))
    return p.reshape(n * ho * wo, c * k * k), ho, wo


def init_params(key, im_chan=3, hidden_dim=16):
    """Deterministic synthetic params in the PyTorch layer shapes."""
    chans = [
        (im_chan, hidden_dim, True),
        (hidden_dim, hidden_dim * 2, True),
        (hidden_dim * 2, hidden_dim * 4, True),
        (hidden_dim * 4, hidden_dim * 4, True),
        (hidden_dim * 4, 1, False),
    ]
    params = []
    for cin, cout, has_bn in chans:
        key, kw, kb, kg, kbe = jax.random.split(key, 5)
        p = {
            "w": 0.02 * jax.random.normal(kw, (cout, cin, 4, 4), jnp.float32),
            "b": 0.01 * jax.random.normal(kb, (cout,), jnp.float32),
        }
        if has_bn:
            p["gamma"] = 1.0 + 0.1 * jax.random.normal(kg, (cout,), jnp.float32)
            p["beta"] = 0.1 * jax.random.normal(kbe, (cout,), jnp.float32)
        else:
            p["gamma"] = None
            p["beta"] = None
        params.append(p)
    return params


def pack_params(params):
    """One-time relayout (outside jit): weights -> [K, CN] bf16, padded vecs.

    K ordering is (Cin, kh, kw) to match conv_general_dilated_patches.
    Padded channels get zero weights/bias/gamma/beta so they stay exactly 0.
    """
    packed = []
    for p in params:
        w, b = p["w"], p["b"]
        cout, cin, kh, kw = w.shape
        if p["gamma"] is None:                      # final layer: keep PyTorch layout
            packed.append({"w": w.astype(jnp.float32),
                           "b": b.astype(jnp.float32)})
            continue
        cs_in = _round_up(cin, 16)                  # real K channels (bf16 pack)
        cs_out = _round_up(cout, 16)                # channels carried to next layer
        cn = _round_up(cout, 128)                   # lane-dense store width
        wt = jnp.transpose(w, (1, 2, 3, 0))         # (cin, kh, kw, cout)
        wt = jnp.pad(wt, ((0, cs_in - cin), (0, 0), (0, 0), (0, cn - cout)))
        wt = wt.reshape(cs_in * kh * kw, cn).astype(jnp.bfloat16)
        bp = jnp.pad(b, (0, cn - cout)).reshape(1, cn).astype(jnp.float32)
        gp = jnp.pad(p["gamma"], (0, cs_out - cout)).astype(jnp.float32)
        bep = jnp.pad(p["beta"], (0, cs_out - cout)).astype(jnp.float32)
        packed.append({"wt": wt, "b": bp, "gamma": gp, "beta": bep})
    return packed


def discriminator_forward(x_nchw, packed):
    """x: [N, C, H, W] float32 -> [N, 1] (== disc_pred.view(len(x), -1))."""
    n = x_nchw.shape[0]
    kk = _KSIZE * _KSIZE

    # Single NCHW->NHWC transpose; channels padded to the layer-1 K width.
    x = jnp.transpose(x_nchw, (0, 2, 3, 1)).astype(jnp.bfloat16)
    cs_in0 = packed[0]["wt"].shape[0] // kk
    h = _pad_axis(x, 3, cs_in0)

    scale = shift = None                            # prev layer's BN affine
    for p, stride in zip(packed, _STRIDES):
        if "wt" not in p:
            # Final block: prev BN affine + LReLU + tiny conv, pure XLA (M = N).
            a = h.astype(jnp.float32) * scale + shift
            a = jnp.where(a > 0, a, _LRELU * a)
            w5, b5 = p["w"], p["b"]
            cin5 = w5.shape[1]
            logits = jnp.einsum("nijc,ocij->no", a[..., :cin5], w5) + b5
            return logits

        wt, bp, gamma, beta = p["wt"], p["b"], p["gamma"], p["beta"]
        kdim = wt.shape[0]
        cs_out = gamma.shape[0]

        cols, ho, wo = extract_patches(h, _KSIZE, stride)   # [M, K] bf16
        m_rows = cols.shape[0]
        tm = _pick_tm(m_rows)
        mp = _round_up(m_rows, tm)
        cols = _pad_axis(cols, 0, mp)

        if scale is None:
            y, s1, s2 = pallas_conv_stats(cols, wt, bp, m_rows, tm)
        else:
            ks = jnp.repeat(scale, kk).reshape(1, kdim)     # (C, kh, kw) order
            kh_ = jnp.repeat(shift, kk).reshape(1, kdim)
            y, s1, s2 = pallas_affine_conv_stats(cols, ks, kh_, wt, bp,
                                                 m_rows, tm)

        # Tiny per-channel combine of per-tile partial sums (XLA).
        total = jnp.sum(s1, axis=0)[:cs_out]
        totsq = jnp.sum(s2, axis=0)[:cs_out]
        mean = total / float(m_rows)
        var = jnp.maximum(totsq / float(m_rows) - mean * mean, 0.0)
        inv = jax.lax.rsqrt(var + _EPS)
        scale = gamma * inv                          # padded channels -> 0
        shift = beta - mean * scale

        # Keep only the real (16-aligned) channels for the next layer's K.
        h = y[:m_rows, :cs_out].reshape(n, ho, wo, cs_out)

    raise AssertionError("final layer missing from packed params")


if __name__ == "__main__":
    key = jax.random.PRNGKey(0)
    kx, kp = jax.random.split(key)

    # 64x64 is the smallest "round" spatial size surviving the five 4x4 valid
    # convolutions of this DCGAN discriminator (64->31->14->11->4->1).
    batch, im_chan, spatial, hidden_dim = 2, 3, 64, 16

    x = jax.random.normal(kx, (batch, im_chan, spatial, spatial), jnp.float32)
    raw_params = init_params(kp, im_chan=im_chan, hidden_dim=hidden_dim)
    packed = pack_params(raw_params)                # packed once, outside jit

    fwd = jax.jit(discriminator_forward)
    out = jax.block_until_ready(fwd(x, packed))
    assert out.shape == (batch, 1), out.shape
    print("KERNEL_OK")
</pallas_src>

<mosaic_0001>
module attributes {stable_mosaic.version = 11 : i64} {
  func.func @_conv_bias_stats_kernel(%arg0: i32, %arg1: memref<512x256xbf16, #tpu.memory_space<vmem>>, %arg2: memref<256x128xbf16, #tpu.memory_space<vmem>>, %arg3: memref<1x128xf32, #tpu.memory_space<vmem>>, %arg4: memref<512x128xbf16, #tpu.memory_space<vmem>>, %arg5: memref<8x128xf32, #tpu.memory_space<vmem>>, %arg6: memref<8x128xf32, #tpu.memory_space<vmem>>) attributes {dimension_semantics = [#tpu.dimension_semantics<parallel>], iteration_bounds = array<i64: 4>, scalar_prefetch = 0 : i64, scratch_operands = 0 : i64, tpu.core_type = #tpu.core_type<tc>, window_params = [{transform_indices = @transform_0, window_bounds = array<i64: 512, 256>}, {pipeline_mode = #tpu.pipeline_mode<synchronous>, transform_indices = @transform_1, window_bounds = array<i64: 256, 128>}, {pipeline_mode = #tpu.pipeline_mode<synchronous>, transform_indices = @transform_2, window_bounds = array<i64: 1, 128>}, {transform_indices = @transform_3, window_bounds = array<i64: 512, 128>}, {transform_indices = @transform_4, window_bounds = array<i64: 8, 128>}, {transform_indices = @transform_5, window_bounds = array<i64: 8, 128>}]} {
    %c0 = arith.constant 0 : index
    %c0_0 = arith.constant 0 : index
    %0 = vector.load %arg1[%c0, %c0_0] : memref<512x256xbf16, #tpu.memory_space<vmem>>, vector<512x256xbf16>
    %c0_1 = arith.constant 0 : index
    %c0_2 = arith.constant 0 : index
    %1 = vector.load %arg2[%c0_1, %c0_2] : memref<256x128xbf16, #tpu.memory_space<vmem>>, vector<256x128xbf16>
    %cst = arith.constant dense<0.000000e+00> : vector<512x128xf32>
    %2 = tpu.matmul %0, %1, %cst {dimension_numbers = #tpu.dot_dimension_numbers<[1], [0], [0], [1], [0, 0, 1, 1], [], []>} : vector<512x256xbf16>, vector<256x128xbf16>, vector<512x128xf32> -> vector<512x128xf32>
    %c0_3 = arith.constant 0 : index
    %c0_4 = arith.constant 0 : index
    %3 = vector.load %arg3[%c0_3, %c0_4] : memref<1x128xf32, #tpu.memory_space<vmem>>, vector<1x128xf32>
    %4 = vector.broadcast %3 : vector<1x128xf32> to vector<512x128xf32>
    %5 = arith.addf %2, %4 : vector<512x128xf32>
    %6 = tpu.iota {dimensions = array<i32: 0>} : vector<8x1xi32>
    %c3_i32 = arith.constant 3 : i32
    %7 = arith.cmpi ne, %arg0, %c3_i32 : i32
    %8 = arith.extui %7 : i1 to i32
    %c0_i32 = arith.constant 0 : i32
    %9 = arith.cmpi ne, %8, %c0_i32 : i32
    scf.if %9 {
      %cst_9 = arith.constant dense<0.000000e+00> : vector<128xf32>
      %15 = vector.multi_reduction <add>, %5, %cst_9 [0] : vector<512x128xf32> to vector<128xf32>
      %16 = vector.shape_cast %15 : vector<128xf32> to vector<1x128xf32>
      %17 = arith.mulf %5, %5 : vector<512x128xf32>
      %cst_10 = arith.constant dense<0.000000e+00> : vector<128xf32>
      %18 = vector.multi_reduction <add>, %17, %cst_10 [0] : vector<512x128xf32> to vector<128xf32>
      %19 = vector.shape_cast %18 : vector<128xf32> to vector<1x128xf32>
      %c0_i32_11 = arith.constant 0 : i32
      %20 = vector.broadcast %c0_i32_11 : i32 to vector<8x1xi32>
      %21 = arith.cmpi eq, %6, %20 : vector<8x1xi32>
      %cst_12 = arith.constant 0.000000e+00 : f32
      %22 = vector.shape_cast %21 : vector<8x1xi1> to vector<8x1xi1>
      %23 = vector.broadcast %22 : vector<8x1xi1> to vector<8x128xi1>
      %24 = vector.shape_cast %16 : vector<1x128xf32> to vector<1x128xf32>
      %25 = vector.broadcast %24 : vector<1x128xf32> to vector<8x128xf32>
      %26 = vector.broadcast %cst_12 : f32 to vector<8x128xf32>
      %27 = arith.select %23, %25, %26 : vector<8x128xi1>, vector<8x128xf32>
      %c0_13 = arith.constant 0 : index
      %c0_14 = arith.constant 0 : index
      %28 = vector.load %arg5[%c0_13, %c0_14] : memref<8x128xf32, #tpu.memory_space<vmem>>, vector<8x128xf32>
      tpu.vector_store %arg5[%c0_13, %c0_14], %27 {strides = array<i32>} : memref<8x128xf32, #tpu.memory_space<vmem>>, vector<8x128xf32>,
      %c0_i32_15 = arith.constant 0 : i32
      %29 = vector.broadcast %c0_i32_15 : i32 to vector<8x1xi32>
      %30 = arith.cmpi eq, %6, %29 : vector<8x1xi32>
      %cst_16 = arith.constant 0.000000e+00 : f32
      %31 = vector.shape_cast %30 : vector<8x1xi1> to vector<8x1xi1>
      %32 = vector.broadcast %31 : vector<8x1xi1> to vector<8x128xi1>
      %33 = vector.shape_cast %19 : vector<1x128xf32> to vector<1x128xf32>
      %34 = vector.broadcast %33 : vector<1x128xf32> to vector<8x128xf32>
      %35 = vector.broadcast %cst_16 : f32 to vector<8x128xf32>
      %36 = arith.select %32, %34, %35 : vector<8x128xi1>, vector<8x128xf32>
      %c0_17 = arith.constant 0 : index
      %c0_18 = arith.constant 0 : index
      %37 = vector.load %arg6[%c0_17, %c0_18] : memref<8x128xf32, #tpu.memory_space<vmem>>, vector<8x128xf32>
      tpu.vector_store %arg6[%c0_17, %c0_18], %36 {strides = array<i32>} : memref<8x128xf32, #tpu.memory_space<vmem>>, vector<8x128xf32>,
    } else {
    }
    %c3_i32_5 = arith.constant 3 : i32
    %10 = arith.cmpi eq, %arg0, %c3_i32_5 : i32
    %11 = arith.extui %10 : i1 to i32
    %c0_i32_6 = arith.constant 0 : i32
    %12 = arith.cmpi ne, %11, %c0_i32_6 : i32
    scf.if %12 {
      %c512_i32 = arith.constant 512 : i32
      %15 = arith.muli %arg0, %c512_i32 : i32
      %16 = tpu.iota {dimensions = array<i32: 0>} : vector<512x1xi32>
      %17 = vector.broadcast %15 : i32 to vector<512x1xi32>
      %18 = arith.addi %17, %16 : vector<512x1xi32>
      %c1922_i32 = arith.constant 1922 : i32
      %19 = vector.broadcast %c1922_i32 : i32 to vector<512x1xi32>
      %20 = arith.cmpi slt, %18, %19 : vector<512x1xi32>
      %21 = arith.extui %20 : vector<512x1xi1> to vector<512x1xi32>
      %22 = arith.sitofp %21 : vector<512x1xi32> to vector<512x1xf32>
      %23 = vector.broadcast %22 : vector<512x1xf32> to vector<512x128xf32>
      %24 = arith.mulf %5, %23 : vector<512x128xf32>
      %cst_9 = arith.constant dense<0.000000e+00> : vector<128xf32>
      %25 = vector.multi_reduction <add>, %24, %cst_9 [0] : vector<512x128xf32> to vector<128xf32>
      %26 = vector.shape_cast %25 : vector<128xf32> to vector<1x128xf32>
      %27 = arith.mulf %24, %5 : vector<512x128xf32>
      %cst_10 = arith.constant dense<0.000000e+00> : vector<128xf32>
      %28 = vector.multi_reduction <add>, %27, %cst_10 [0] : vector<512x128xf32> to vector<128xf32>
      %29 = vector.shape_cast %28 : vector<128xf32> to vector<1x128xf32>
      %c0_i32_11 = arith.constant 0 : i32
      %30 = vector.broadcast %c0_i32_11 : i32 to vector<8x1xi32>
      %31 = arith.cmpi eq, %6, %30 : vector<8x1xi32>
      %cst_12 = arith.constant 0.000000e+00 : f32
      %32 = vector.shape_cast %31 : vector<8x1xi1> to vector<8x1xi1>
      %33 = vector.broadcast %32 : vector<8x1xi1> to vector<8x128xi1>
      %34 = vector.shape_cast %26 : vector<1x128xf32> to vector<1x128xf32>
      %35 = vector.broadcast %34 : vector<1x128xf32> to vector<8x128xf32>
      %36 = vector.broadcast %cst_12 : f32 to vector<8x128xf32>
      %37 = arith.select %33, %35, %36 : vector<8x128xi1>, vector<8x128xf32>
      %c0_13 = arith.constant 0 : index
      %c0_14 = arith.constant 0 : index
      %38 = vector.load %arg5[%c0_13, %c0_14] : memref<8x128xf32, #tpu.memory_space<vmem>>, vector<8x128xf32>
      tpu.vector_store %arg5[%c0_13, %c0_14], %37 {strides = array<i32>} : memref<8x128xf32, #tpu.memory_space<vmem>>, vector<8x128xf32>,
      %c0_i32_15 = arith.constant 0 : i32
      %39 = vector.broadcast %c0_i32_15 : i32 to vector<8x1xi32>
      %40 = arith.cmpi eq, %6, %39 : vector<8x1xi32>
      %cst_16 = arith.constant 0.000000e+00 : f32
      %41 = vector.shape_cast %40 : vector<8x1xi1> to vector<8x1xi1>
      %42 = vector.broadcast %41 : vector<8x1xi1> to vector<8x128xi1>
      %43 = vector.shape_cast %29 : vector<1x128xf32> to vector<1x128xf32>
      %44 = vector.broadcast %43 : vector<1x128xf32> to vector<8x128xf32>
      %45 = vector.broadcast %cst_16 : f32 to vector<8x128xf32>
      %46 = arith.select %42, %44, %45 : vector<8x128xi1>, vector<8x128xf32>
      %c0_17 = arith.constant 0 : index
      %c0_18 = arith.constant 0 : index
      %47 = vector.load %arg6[%c0_17, %c0_18] : memref<8x128xf32, #tpu.memory_space<vmem>>, vector<8x128xf32>
      tpu.vector_store %arg6[%c0_17, %c0_18], %46 {strides = array<i32>} : memref<8x128xf32, #tpu.memory_space<vmem>>, vector<8x128xf32>,
    } else {
    }
    %13 = arith.truncf %5 : vector<512x128xf32> to vector<512x128xbf16>
    %c0_7 = arith.constant 0 : index
    %c0_8 = arith.constant 0 : index
    %14 = vector.load %arg4[%c0_7, %c0_8] : memref<512x128xbf16, #tpu.memory_space<vmem>>, vector<512x128xbf16>
    tpu.vector_store %arg4[%c0_7, %c0_8], %13 {strides = array<i32>} : memref<512x128xbf16, #tpu.memory_space<vmem>>, vector<512x128xbf16>,
    return
  }
  func.func @transform_0(%arg0: i32) -> (i32, i32) {
    %c0_i32 = arith.constant 0 : i32
    %c0_i32_0 = arith.constant 0 : i32
    return %arg0, %c0_i32 : i32, i32
  }
  func.func @transform_1(%arg0: i32) -> (i32, i32) {
    %c0_i32 = arith.constant 0 : i32
    %c0_i32_0 = arith.constant 0 : i32
    %c0_i32_1 = arith.constant 0 : i32
    return %c0_i32, %c0_i32_0 : i32, i32
  }
  func.func @transform_2(%arg0: i32) -> (i32, i32) {
    %c0_i32 = arith.constant 0 : i32
    %c0_i32_0 = arith.constant 0 : i32
    %c0_i32_1 = arith.constant 0 : i32
    return %c0_i32, %c0_i32_0 : i32, i32
  }
  func.func @transform_3(%arg0: i32) -> (i32, i32) {
    %c0_i32 = arith.constant 0 : i32
    %c0_i32_0 = arith.constant 0 : i32
    return %arg0, %c0_i32 : i32, i32
  }
  func.func @transform_4(%arg0: i32) -> (i32, i32) {
    %c0_i32 = arith.constant 0 : i32
    %c0_i32_0 = arith.constant 0 : i32
    return %arg0, %c0_i32 : i32, i32
  }
  func.func @transform_5(%arg0: i32) -> (i32, i32) {
    %c0_i32 = arith.constant 0 : i32
    %c0_i32_0 = arith.constant 0 : i32
    return %arg0, %c0_i32 : i32, i32
  }
}

module attributes {stable_mosaic.version = 11 : i64} {
  func.func @_affine_lrelu_conv_stats_kernel(%arg0: i32, %arg1: memref<400x256xbf16, #tpu.memory_space<vmem>>, %arg2: memref<1x256xf32, #tpu.memory_space<vmem>>, %arg3: memref<1x256xf32, #tpu.memory_space<vmem>>, %arg4: memref<256x128xbf16, #tpu.memory_space<vmem>>, %arg5: memref<1x128xf32, #tpu.memory_space<vmem>>, %arg6: memref<400x128xbf16, #tpu.memory_space<vmem>>, %arg7: memref<8x128xf32, #tpu.memory_space<vmem>>, %arg8: memref<8x128xf32, #tpu.memory_space<vmem>>) attributes {dimension_semantics = [#tpu.dimension_semantics<parallel>], iteration_bounds = array<i64: 1>, scalar_prefetch = 0 : i64, scratch_operands = 0 : i64, tpu.core_type = #tpu.core_type<tc>, window_params = [{transform_indices = @transform_0, window_bounds = array<i64: 400, 256>}, {pipeline_mode = #tpu.pipeline_mode<synchronous>, transform_indices = @transform_1, window_bounds = array<i64: 1, 256>}, {pipeline_mode = #tpu.pipeline_mode<synchronous>, transform_indices = @transform_2, window_bounds = array<i64: 1, 256>}, {pipeline_mode = #tpu.pipeline_mode<synchronous>, transform_indices = @transform_3, window_bounds = array<i64: 256, 128>}, {pipeline_mode = #tpu.pipeline_mode<synchronous>, transform_indices = @transform_4, window_bounds = array<i64: 1, 128>}, {transform_indices = @transform_5, window_bounds = array<i64: 400, 128>}, {transform_indices = @transform_6, window_bounds = array<i64: 8, 128>}, {transform_indices = @transform_7, window_bounds = array<i64: 8, 128>}]} {
    %c0 = arith.constant 0 : index
    %c0_0 = arith.constant 0 : index
    %0 = vector.load %arg1[%c0, %c0_0] : memref<400x256xbf16, #tpu.memory_space<vmem>>, vector<400x256xbf16>
    %1 = arith.extf %0 : vector<400x256xbf16> to vector<400x256xf32>
    %c0_1 = arith.constant 0 : index
    %c0_2 = arith.constant 0 : index
    %2 = vector.load %arg2[%c0_1, %c0_2] : memref<1x256xf32, #tpu.memory_space<vmem>>, vector<1x256xf32>
    %3 = vector.broadcast %2 : vector<1x256xf32> to vector<400x256xf32>
    %4 = arith.mulf %1, %3 : vector<400x256xf32>
    %c0_3 = arith.constant 0 : index
    %c0_4 = arith.constant 0 : index
    %5 = vector.load %arg3[%c0_3, %c0_4] : memref<1x256xf32, #tpu.memory_space<vmem>>, vector<1x256xf32>
    %6 = vector.broadcast %5 : vector<1x256xf32> to vector<400x256xf32>
    %7 = arith.addf %4, %6 : vector<400x256xf32>
    %cst = arith.constant 0.000000e+00 : f32
    %8 = vector.broadcast %cst : f32 to vector<400x256xf32>
    %9 = arith.cmpf ogt, %7, %8 : vector<400x256xf32>
    %cst_5 = arith.constant 2.000000e-01 : f32
    %10 = vector.broadcast %cst_5 : f32 to vector<400x256xf32>
    %11 = arith.mulf %10, %7 : vector<400x256xf32>
    %12 = arith.select %9, %7, %11 : vector<400x256xi1>, vector<400x256xf32>
    %13 = arith.truncf %12 : vector<400x256xf32> to vector<400x256xbf16>
    %c0_6 = arith.constant 0 : index
    %c0_7 = arith.constant 0 : index
    %14 = vector.load %arg4[%c0_6, %c0_7] : memref<256x128xbf16, #tpu.memory_space<vmem>>, vector<256x128xbf16>
    %cst_8 = arith.constant dense<0.000000e+00> : vector<400x128xf32>
    %15 = tpu.matmul %13, %14, %cst_8 {dimension_numbers = #tpu.dot_dimension_numbers<[1], [0], [0], [1], [0, 0, 1, 1], [], []>} : vector<400x256xbf16>, vector<256x128xbf16>, vector<400x128xf32> -> vector<400x128xf32>
    %c0_9 = arith.constant 0 : index
    %c0_10 = arith.constant 0 : index
    %16 = vector.load %arg5[%c0_9, %c0_10] : memref<1x128xf32, #tpu.memory_space<vmem>>, vector<1x128xf32>
    %17 = vector.broadcast %16 : vector<1x128xf32> to vector<400x128xf32>
    %18 = arith.addf %15, %17 : vector<400x128xf32>
    %19 = tpu.iota {dimensions = array<i32: 0>} : vector<8x1xi32>
    %c0_i32 = arith.constant 0 : i32
    %20 = arith.cmpi ne, %arg0, %c0_i32 : i32
    %21 = arith.extui %20 : i1 to i32
    %c0_i32_11 = arith.constant 0 : i32
    %22 = arith.cmpi ne, %21, %c0_i32_11 : i32
    scf.if %22 {
      %cst_16 = arith.constant dense<0.000000e+00> : vector<128xf32>
      %28 = vector.multi_reduction <add>, %18, %cst_16 [0] : vector<400x128xf32> to vector<128xf32>
      %29 = vector.shape_cast %28 : vector<128xf32> to vector<1x128xf32>
      %30 = arith.mulf %18, %18 : vector<400x128xf32>
      %cst_17 = arith.constant dense<0.000000e+00> : vector<128xf32>
      %31 = vector.multi_reduction <add>, %30, %cst_17 [0] : vector<400x128xf32> to vector<128xf32>
      %32 = vector.shape_cast %31 : vector<128xf32> to vector<1x128xf32>
      %c0_i32_18 = arith.constant 0 : i32
      %33 = vector.broadcast %c0_i32_18 : i32 to vector<8x1xi32>
      %34 = arith.cmpi eq, %19, %33 : vector<8x1xi32>
      %cst_19 = arith.constant 0.000000e+00 : f32
      %35 = vector.shape_cast %34 : vector<8x1xi1> to vector<8x1xi1>
      %36 = vector.broadcast %35 : vector<8x1xi1> to vector<8x128xi1>
      %37 = vector.shape_cast %29 : vector<1x128xf32> to vector<1x128xf32>
      %38 = vector.broadcast %37 : vector<1x128xf32> to vector<8x128xf32>
      %39 = vector.broadcast %cst_19 : f32 to vector<8x128xf32>
      %40 = arith.select %36, %38, %39 : vector<8x128xi1>, vector<8x128xf32>
      %c0_20 = arith.constant 0 : index
      %c0_21 = arith.constant 0 : index
      %41 = vector.load %arg7[%c0_20, %c0_21] : memref<8x128xf32, #tpu.memory_space<vmem>>, vector<8x128xf32>
      tpu.vector_store %arg7[%c0_20, %c0_21], %40 {strides = array<i32>} : memref<8x128xf32, #tpu.memory_space<vmem>>, vector<8x128xf32>,
      %c0_i32_22 = arith.constant 0 : i32
      %42 = vector.broadcast %c0_i32_22 : i32 to vector<8x1xi32>
      %43 = arith.cmpi eq, %19, %42 : vector<8x1xi32>
      %cst_23 = arith.constant 0.000000e+00 : f32
      %44 = vector.shape_cast %43 : vector<8x1xi1> to vector<8x1xi1>
      %45 = vector.broadcast %44 : vector<8x1xi1> to vector<8x128xi1>
      %46 = vector.shape_cast %32 : vector<1x128xf32> to vector<1x128xf32>
      %47 = vector.broadcast %46 : vector<1x128xf32> to vector<8x128xf32>
      %48 = vector.broadcast %cst_23 : f32 to vector<8x128xf32>
      %49 = arith.select %45, %47, %48 : vector<8x128xi1>, vector<8x128xf32>
      %c0_24 = arith.constant 0 : index
      %c0_25 = arith.constant 0 : index
      %50 = vector.load %arg8[%c0_24, %c0_25] : memref<8x128xf32, #tpu.memory_space<vmem>>, vector<8x128xf32>
      tpu.vector_store %arg8[%c0_24, %c0_25], %49 {strides = array<i32>} : memref<8x128xf32, #tpu.memory_space<vmem>>, vector<8x128xf32>,
    } else {
    }
    %c0_i32_12 = arith.constant 0 : i32
    %23 = arith.cmpi eq, %arg0, %c0_i32_12 : i32
    %24 = arith.extui %23 : i1 to i32
    %c0_i32_13 = arith.constant 0 : i32
    %25 = arith.cmpi ne, %24, %c0_i32_13 : i32
    scf.if %25 {
      %c400_i32 = arith.constant 400 : i32
      %28 = arith.muli %arg0, %c400_i32 : i32
      %29 = tpu.iota {dimensions = array<i32: 0>} : vector<400x1xi32>
      %30 = vector.broadcast %28 : i32 to vector<400x1xi32>
      %31 = arith.addi %30, %29 : vector<400x1xi32>
      %c392_i32 = arith.constant 392 : i32
      %32 = vector.broadcast %c392_i32 : i32 to vector<400x1xi32>
      %33 = arith.cmpi slt, %31, %32 : vector<400x1xi32>
      %34 = arith.extui %33 : vector<400x1xi1> to vector<400x1xi32>
      %35 = arith.sitofp %34 : vector<400x1xi32> to vector<400x1xf32>
      %36 = vector.broadcast %35 : vector<400x1xf32> to vector<400x128xf32>
      %37 = arith.mulf %18, %36 : vector<400x128xf32>
      %cst_16 = arith.constant dense<0.000000e+00> : vector<128xf32>
      %38 = vector.multi_reduction <add>, %37, %cst_16 [0] : vector<400x128xf32> to vector<128xf32>
      %39 = vector.shape_cast %38 : vector<128xf32> to vector<1x128xf32>
      %40 = arith.mulf %37, %18 : vector<400x128xf32>
      %cst_17 = arith.constant dense<0.000000e+00> : vector<128xf32>
      %41 = vector.multi_reduction <add>, %40, %cst_17 [0] : vector<400x128xf32> to vector<128xf32>
      %42 = vector.shape_cast %41 : vector<128xf32> to vector<1x128xf32>
      %c0_i32_18 = arith.constant 0 : i32
      %43 = vector.broadcast %c0_i32_18 : i32 to vector<8x1xi32>
      %44 = arith.cmpi eq, %19, %43 : vector<8x1xi32>
      %cst_19 = arith.constant 0.000000e+00 : f32
      %45 = vector.shape_cast %44 : vector<8x1xi1> to vector<8x1xi1>
      %46 = vector.broadcast %45 : vector<8x1xi1> to vector<8x128xi1>
      %47 = vector.shape_cast %39 : vector<1x128xf32> to vector<1x128xf32>
      %48 = vector.broadcast %47 : vector<1x128xf32> to vector<8x128xf32>
      %49 = vector.broadcast %cst_19 : f32 to vector<8x128xf32>
      %50 = arith.select %46, %48, %49 : vector<8x128xi1>, vector<8x128xf32>
      %c0_20 = arith.constant 0 : index
      %c0_21 = arith.constant 0 : index
      %51 = vector.load %arg7[%c0_20, %c0_21] : memref<8x128xf32, #tpu.memory_space<vmem>>, vector<8x128xf32>
      tpu.vector_store %arg7[%c0_20, %c0_21], %50 {strides = array<i32>} : memref<8x128xf32, #tpu.memory_space<vmem>>, vector<8x128xf32>,
      %c0_i32_22 = arith.constant 0 : i32
      %52 = vector.broadcast %c0_i32_22 : i32 to vector<8x1xi32>
      %53 = arith.cmpi eq, %19, %52 : vector<8x1xi32>
      %cst_23 = arith.constant 0.000000e+00 : f32
      %54 = vector.shape_cast %53 : vector<8x1xi1> to vector<8x1xi1>
      %55 = vector.broadcast %54 : vector<8x1xi1> to vector<8x128xi1>
      %56 = vector.shape_cast %42 : vector<1x128xf32> to vector<1x128xf32>
      %57 = vector.broadcast %56 : vector<1x128xf32> to vector<8x128xf32>
      %58 = vector.broadcast %cst_23 : f32 to vector<8x128xf32>
      %59 = arith.select %55, %57, %58 : vector<8x128xi1>, vector<8x128xf32>
      %c0_24 = arith.constant 0 : index
      %c0_25 = arith.constant 0 : index
      %60 = vector.load %arg8[%c0_24, %c0_25] : memref<8x128xf32, #tpu.memory_space<vmem>>, vector<8x128xf32>
      tpu.vector_store %arg8[%c0_24, %c0_25], %59 {strides = array<i32>} : memref<8x128xf32, #tpu.memory_space<vmem>>, vector<8x128xf32>,
    } else {
    }
    %26 = arith.truncf %18 : vector<400x128xf32> to vector<400x128xbf16>
    %c0_14 = arith.constant 0 : index
    %c0_15 = arith.constant 0 : index
    %27 = vector.load %arg6[%c0_14, %c0_15] : memref<400x128xbf16, #tpu.memory_space<vmem>>, vector<400x128xbf16>
    tpu.vector_store %arg6[%c0_14, %c0_15], %26 {strides = array<i32>} : memref<400x128xbf16, #tpu.memory_space<vmem>>, vector<400x128xbf16>,
    return
  }
  func.func @transform_0(%arg0: i32) -> (i32, i32) {
    %c0_i32 = arith.constant 0 : i32
    %c0_i32_0 = arith.constant 0 : i32
    return %arg0, %c0_i32 : i32, i32
  }
  func.func @transform_1(%arg0: i32) -> (i32, i32) {
    %c0_i32 = arith.constant 0 : i32
    %c0_i32_0 = arith.constant 0 : i32
    %c0_i32_1 = arith.constant 0 : i32
    return %c0_i32, %c0_i32_0 : i32, i32
  }
  func.func @transform_2(%arg0: i32) -> (i32, i32) {
    %c0_i32 = arith.constant 0 : i32
    %c0_i32_0 = arith.constant 0 : i32
    %c0_i32_1 = arith.constant 0 : i32
    return %c0_i32, %c0_i32_0 : i32, i32
  }
  func.func @transform_3(%arg0: i32) -> (i32, i32) {
    %c0_i32 = arith.constant 0 : i32
    %c0_i32_0 = arith.constant 0 : i32
    %c0_i32_1 = arith.constant 0 : i32
    return %c0_i32, %c0_i32_0 : i32, i32
  }
  func.func @transform_4(%arg0: i32) -> (i32, i32) {
    %c0_i32 = arith.constant 0 : i32
    %c0_i32_0 = arith.constant 0 : i32
    %c0_i32_1 = arith.constant 0 : i32
    return %c0_i32, %c0_i32_0 : i32, i32
  }
  func.func @transform_5(%arg0: i32) -> (i32, i32) {
    %c0_i32 = arith.constant 0 : i32
    %c0_i32_0 = arith.constant 0 : i32
    return %arg0, %c0_i32 : i32, i32
  }
  func.func @transform_6(%arg0: i32) -> (i32, i32) {
    %c0_i32 = arith.constant 0 : i32
    %c0_i32_0 = arith.constant 0 : i32
    return %arg0, %c0_i32 : i32, i32
  }
  func.func @transform_7(%arg0: i32) -> (i32, i32) {
    %c0_i32 = arith.constant 0 : i32
    %c0_i32_0 = arith.constant 0 : i32
    return %arg0, %c0_i32 : i32, i32
  }
}

module attributes {stable_mosaic.version = 11 : i64} {
  func.func @_affine_lrelu_conv_stats_kernel(%arg0: i32, %arg1: memref<256x512xbf16, #tpu.memory_space<vmem>>, %arg2: memref<1x512xf32, #tpu.memory_space<vmem>>, %arg3: memref<1x512xf32, #tpu.memory_space<vmem>>, %arg4: memref<512x128xbf16, #tpu.memory_space<vmem>>, %arg5: memref<1x128xf32, #tpu.memory_space<vmem>>, %arg6: memref<256x128xbf16, #tpu.memory_space<vmem>>, %arg7: memref<8x128xf32, #tpu.memory_space<vmem>>, %arg8: memref<8x128xf32, #tpu.memory_space<vmem>>) attributes {dimension_semantics = [#tpu.dimension_semantics<parallel>], iteration_bounds = array<i64: 1>, scalar_prefetch = 0 : i64, scratch_operands = 0 : i64, tpu.core_type = #tpu.core_type<tc>, window_params = [{transform_indices = @transform_0, window_bounds = array<i64: 256, 512>}, {pipeline_mode = #tpu.pipeline_mode<synchronous>, transform_indices = @transform_1, window_bounds = array<i64: 1, 512>}, {pipeline_mode = #tpu.pipeline_mode<synchronous>, transform_indices = @transform_2, window_bounds = array<i64: 1, 512>}, {pipeline_mode = #tpu.pipeline_mode<synchronous>, transform_indices = @transform_3, window_bounds = array<i64: 512, 128>}, {pipeline_mode = #tpu.pipeline_mode<synchronous>, transform_indices = @transform_4, window_bounds = array<i64: 1, 128>}, {transform_indices = @transform_5, window_bounds = array<i64: 256, 128>}, {transform_indices = @transform_6, window_bounds = array<i64: 8, 128>}, {transform_indices = @transform_7, window_bounds = array<i64: 8, 128>}]} {
    %c0 = arith.constant 0 : index
    %c0_0 = arith.constant 0 : index
    %0 = vector.load %arg1[%c0, %c0_0] : memref<256x512xbf16, #tpu.memory_space<vmem>>, vector<256x512xbf16>
    %1 = arith.extf %0 : vector<256x512xbf16> to vector<256x512xf32>
    %c0_1 = arith.constant 0 : index
    %c0_2 = arith.constant 0 : index
    %2 = vector.load %arg2[%c0_1, %c0_2] : memref<1x512xf32, #tpu.memory_space<vmem>>, vector<1x512xf32>
    %3 = vector.broadcast %2 : vector<1x512xf32> to vector<256x512xf32>
    %4 = arith.mulf %1, %3 : vector<256x512xf32>
    %c0_3 = arith.constant 0 : index
    %c0_4 = arith.constant 0 : index
    %5 = vector.load %arg3[%c0_3, %c0_4] : memref<1x512xf32, #tpu.memory_space<vmem>>, vector<1x512xf32>
    %6 = vector.broadcast %5 : vector<1x512xf32> to vector<256x512xf32>
    %7 = arith.addf %4, %6 : vector<256x512xf32>
    %cst = arith.constant 0.000000e+00 : f32
    %8 = vector.broadcast %cst : f32 to vector<256x512xf32>
    %9 = arith.cmpf ogt, %7, %8 : vector<256x512xf32>
    %cst_5 = arith.constant 2.000000e-01 : f32
    %10 = vector.broadcast %cst_5 : f32 to vector<256x512xf32>
    %11 = arith.mulf %10, %7 : vector<256x512xf32>
    %12 = arith.select %9, %7, %11 : vector<256x512xi1>, vector<256x512xf32>
    %13 = arith.truncf %12 : vector<256x512xf32> to vector<256x512xbf16>
    %c0_6 = arith.constant 0 : index
    %c0_7 = arith.constant 0 : index
    %14 = vector.load %arg4[%c0_6, %c0_7] : memref<512x128xbf16, #tpu.memory_space<vmem>>, vector<512x128xbf16>
    %cst_8 = arith.constant dense<0.000000e+00> : vector<256x128xf32>
    %15 = tpu.matmul %13, %14, %cst_8 {dimension_numbers = #tpu.dot_dimension_numbers<[1], [0], [0], [1], [0, 0, 1, 1], [], []>} : vector<256x512xbf16>, vector<512x128xbf16>, vector<256x128xf32> -> vector<256x128xf32>
    %c0_9 = arith.constant 0 : index
    %c0_10 = arith.constant 0 : index
    %16 = vector.load %arg5[%c0_9, %c0_10] : memref<1x128xf32, #tpu.memory_space<vmem>>, vector<1x128xf32>
    %17 = vector.broadcast %16 : vector<1x128xf32> to vector<256x128xf32>
    %18 = arith.addf %15, %17 : vector<256x128xf32>
    %19 = tpu.iota {dimensions = array<i32: 0>} : vector<8x1xi32>
    %c0_i32 = arith.constant 0 : i32
    %20 = arith.cmpi ne, %arg0, %c0_i32 : i32
    %21 = arith.extui %20 : i1 to i32
    %c0_i32_11 = arith.constant 0 : i32
    %22 = arith.cmpi ne, %21, %c0_i32_11 : i32
    scf.if %22 {
      %cst_16 = arith.constant dense<0.000000e+00> : vector<128xf32>
      %28 = vector.multi_reduction <add>, %18, %cst_16 [0] : vector<256x128xf32> to vector<128xf32>
      %29 = vector.shape_cast %28 : vector<128xf32> to vector<1x128xf32>
      %30 = arith.mulf %18, %18 : vector<256x128xf32>
      %cst_17 = arith.constant dense<0.000000e+00> : vector<128xf32>
      %31 = vector.multi_reduction <add>, %30, %cst_17 [0] : vector<256x128xf32> to vector<128xf32>
      %32 = vector.shape_cast %31 : vector<128xf32> to vector<1x128xf32>
      %c0_i32_18 = arith.constant 0 : i32
      %33 = vector.broadcast %c0_i32_18 : i32 to vector<8x1xi32>
      %34 = arith.cmpi eq, %19, %33 : vector<8x1xi32>
      %cst_19 = arith.constant 0.000000e+00 : f32
      %35 = vector.shape_cast %34 : vector<8x1xi1> to vector<8x1xi1>
      %36 = vector.broadcast %35 : vector<8x1xi1> to vector<8x128xi1>
      %37 = vector.shape_cast %29 : vector<1x128xf32> to vector<1x128xf32>
      %38 = vector.broadcast %37 : vector<1x128xf32> to vector<8x128xf32>
      %39 = vector.broadcast %cst_19 : f32 to vector<8x128xf32>
      %40 = arith.select %36, %38, %39 : vector<8x128xi1>, vector<8x128xf32>
      %c0_20 = arith.constant 0 : index
      %c0_21 = arith.constant 0 : index
      %41 = vector.load %arg7[%c0_20, %c0_21] : memref<8x128xf32, #tpu.memory_space<vmem>>, vector<8x128xf32>
      tpu.vector_store %arg7[%c0_20, %c0_21], %40 {strides = array<i32>} : memref<8x128xf32, #tpu.memory_space<vmem>>, vector<8x128xf32>,
      %c0_i32_22 = arith.constant 0 : i32
      %42 = vector.broadcast %c0_i32_22 : i32 to vector<8x1xi32>
      %43 = arith.cmpi eq, %19, %42 : vector<8x1xi32>
      %cst_23 = arith.constant 0.000000e+00 : f32
      %44 = vector.shape_cast %43 : vector<8x1xi1> to vector<8x1xi1>
      %45 = vector.broadcast %44 : vector<8x1xi1> to vector<8x128xi1>
      %46 = vector.shape_cast %32 : vector<1x128xf32> to vector<1x128xf32>
      %47 = vector.broadcast %46 : vector<1x128xf32> to vector<8x128xf32>
      %48 = vector.broadcast %cst_23 : f32 to vector<8x128xf32>
      %49 = arith.select %45, %47, %48 : vector<8x128xi1>, vector<8x128xf32>
      %c0_24 = arith.constant 0 : index
      %c0_25 = arith.constant 0 : index
      %50 = vector.load %arg8[%c0_24, %c0_25] : memref<8x128xf32, #tpu.memory_space<vmem>>, vector<8x128xf32>
      tpu.vector_store %arg8[%c0_24, %c0_25], %49 {strides = array<i32>} : memref<8x128xf32, #tpu.memory_space<vmem>>, vector<8x128xf32>,
    } else {
    }
    %c0_i32_12 = arith.constant 0 : i32
    %23 = arith.cmpi eq, %arg0, %c0_i32_12 : i32
    %24 = arith.extui %23 : i1 to i32
    %c0_i32_13 = arith.constant 0 : i32
    %25 = arith.cmpi ne, %24, %c0_i32_13 : i32
    scf.if %25 {
      %c256_i32 = arith.constant 256 : i32
      %28 = arith.muli %arg0, %c256_i32 : i32
      %29 = tpu.iota {dimensions = array<i32: 0>} : vector<256x1xi32>
      %30 = vector.broadcast %28 : i32 to vector<256x1xi32>
      %31 = arith.addi %30, %29 : vector<256x1xi32>
      %c242_i32 = arith.constant 242 : i32
      %32 = vector.broadcast %c242_i32 : i32 to vector<256x1xi32>
      %33 = arith.cmpi slt, %31, %32 : vector<256x1xi32>
      %34 = arith.extui %33 : vector<256x1xi1> to vector<256x1xi32>
      %35 = arith.sitofp %34 : vector<256x1xi32> to vector<256x1xf32>
      %36 = vector.broadcast %35 : vector<256x1xf32> to vector<256x128xf32>
      %37 = arith.mulf %18, %36 : vector<256x128xf32>
      %cst_16 = arith.constant dense<0.000000e+00> : vector<128xf32>
      %38 = vector.multi_reduction <add>, %37, %cst_16 [0] : vector<256x128xf32> to vector<128xf32>
      %39 = vector.shape_cast %38 : vector<128xf32> to vector<1x128xf32>
      %40 = arith.mulf %37, %18 : vector<256x128xf32>
      %cst_17 = arith.constant dense<0.000000e+00> : vector<128xf32>
      %41 = vector.multi_reduction <add>, %40, %cst_17 [0] : vector<256x128xf32> to vector<128xf32>
      %42 = vector.shape_cast %41 : vector<128xf32> to vector<1x128xf32>
      %c0_i32_18 = arith.constant 0 : i32
      %43 = vector.broadcast %c0_i32_18 : i32 to vector<8x1xi32>
      %44 = arith.cmpi eq, %19, %43 : vector<8x1xi32>
      %cst_19 = arith.constant 0.000000e+00 : f32
      %45 = vector.shape_cast %44 : vector<8x1xi1> to vector<8x1xi1>
      %46 = vector.broadcast %45 : vector<8x1xi1> to vector<8x128xi1>
      %47 = vector.shape_cast %39 : vector<1x128xf32> to vector<1x128xf32>
      %48 = vector.broadcast %47 : vector<1x128xf32> to vector<8x128xf32>
      %49 = vector.broadcast %cst_19 : f32 to vector<8x128xf32>
      %50 = arith.select %46, %48, %49 : vector<8x128xi1>, vector<8x128xf32>
      %c0_20 = arith.constant 0 : index
      %c0_21 = arith.constant 0 : index
      %51 = vector.load %arg7[%c0_20, %c0_21] : memref<8x128xf32, #tpu.memory_space<vmem>>, vector<8x128xf32>
      tpu.vector_store %arg7[%c0_20, %c0_21], %50 {strides = array<i32>} : memref<8x128xf32, #tpu.memory_space<vmem>>, vector<8x128xf32>,
      %c0_i32_22 = arith.constant 0 : i32
      %52 = vector.broadcast %c0_i32_22 : i32 to vector<8x1xi32>
      %53 = arith.cmpi eq, %19, %52 : vector<8x1xi32>
      %cst_23 = arith.constant 0.000000e+00 : f32
      %54 = vector.shape_cast %53 : vector<8x1xi1> to vector<8x1xi1>
      %55 = vector.broadcast %54 : vector<8x1xi1> to vector<8x128xi1>
      %56 = vector.shape_cast %42 : vector<1x128xf32> to vector<1x128xf32>
      %57 = vector.broadcast %56 : vector<1x128xf32> to vector<8x128xf32>
      %58 = vector.broadcast %cst_23 : f32 to vector<8x128xf32>
      %59 = arith.select %55, %57, %58 : vector<8x128xi1>, vector<8x128xf32>
      %c0_24 = arith.constant 0 : index
      %c0_25 = arith.constant 0 : index
      %60 = vector.load %arg8[%c0_24, %c0_25] : memref<8x128xf32, #tpu.memory_space<vmem>>, vector<8x128xf32>
      tpu.vector_store %arg8[%c0_24, %c0_25], %59 {strides = array<i32>} : memref<8x128xf32, #tpu.memory_space<vmem>>, vector<8x128xf32>,
    } else {
    }
    %26 = arith.truncf %18 : vector<256x128xf32> to vector<256x128xbf16>
    %c0_14 = arith.constant 0 : index
    %c0_15 = arith.constant 0 : index
    %27 = vector.load %arg6[%c0_14, %c0_15] : memref<256x128xbf16, #tpu.memory_space<vmem>>, vector<256x128xbf16>
    tpu.vector_store %arg6[%c0_14, %c0_15], %26 {strides = array<i32>} : memref<256x128xbf16, #tpu.memory_space<vmem>>, vector<256x128xbf16>,
    return
  }
  func.func @transform_0(%arg0: i32) -> (i32, i32) {
    %c0_i32 = arith.constant 0 : i32
    %c0_i32_0 = arith.constant 0 : i32
    return %arg0, %c0_i32 : i32, i32
  }
  func.func @transform_1(%arg0: i32) -> (i32, i32) {
    %c0_i32 = arith.constant 0 : i32
    %c0_i32_0 = arith.constant 0 : i32
    %c0_i32_1 = arith.constant 0 : i32
    return %c0_i32, %c0_i32_0 : i32, i32
  }
  func.func @transform_2(%arg0: i32) -> (i32, i32) {
    %c0_i32 = arith.constant 0 : i32
    %c0_i32_0 = arith.constant 0 : i32
    %c0_i32_1 = arith.constant 0 : i32
    return %c0_i32, %c0_i32_0 : i32, i32
  }
  func.func @transform_3(%arg0: i32) -> (i32, i32) {
    %c0_i32 = arith.constant 0 : i32
    %c0_i32_0 = arith.constant 0 : i32
    %c0_i32_1 = arith.constant 0 : i32
    return %c0_i32, %c0_i32_0 : i32, i32
  }
  func.func @transform_4(%arg0: i32) -> (i32, i32) {
    %c0_i32 = arith.constant 0 : i32
    %c0_i32_0 = arith.constant 0 : i32
    %c0_i32_1 = arith.constant 0 : i32
    return %c0_i32, %c0_i32_0 : i32, i32
  }
  func.func @transform_5(%arg0: i32) -> (i32, i32) {
    %c0_i32 = arith.constant 0 : i32
    %c0_i32_0 = arith.constant 0 : i32
    return %arg0, %c0_i32 : i32, i32
  }
  func.func @transform_6(%arg0: i32) -> (i32, i32) {
    %c0_i32 = arith.constant 0 : i32
    %c0_i32_0 = arith.constant 0 : i32
    return %arg0, %c0_i32 : i32, i32
  }
  func.func @transform_7(%arg0: i32) -> (i32, i32) {
    %c0_i32 = arith.constant 0 : i32
    %c0_i32_0 = arith.constant 0 : i32
    return %arg0, %c0_i32 : i32, i32
  }
}

module attributes {stable_mosaic.version = 11 : i64} {
  func.func @_affine_lrelu_conv_stats_kernel(%arg0: i32, %arg1: memref<32x1024xbf16, #tpu.memory_space<vmem>>, %arg2: memref<1x1024xf32, #tpu.memory_space<vmem>>, %arg3: memref<1x1024xf32, #tpu.memory_space<vmem>>, %arg4: memref<1024x128xbf16, #tpu.memory_space<vmem>>, %arg5: memref<1x128xf32, #tpu.memory_space<vmem>>, %arg6: memref<32x128xbf16, #tpu.memory_space<vmem>>, %arg7: memref<8x128xf32, #tpu.memory_space<vmem>>, %arg8: memref<8x128xf32, #tpu.memory_space<vmem>>) attributes {dimension_semantics = [#tpu.dimension_semantics<parallel>], iteration_bounds = array<i64: 1>, scalar_prefetch = 0 : i64, scratch_operands = 0 : i64, tpu.core_type = #tpu.core_type<tc>, window_params = [{transform_indices = @transform_0, window_bounds = array<i64: 32, 1024>}, {pipeline_mode = #tpu.pipeline_mode<synchronous>, transform_indices = @transform_1, window_bounds = array<i64: 1, 1024>}, {pipeline_mode = #tpu.pipeline_mode<synchronous>, transform_indices = @transform_2, window_bounds = array<i64: 1, 1024>}, {pipeline_mode = #tpu.pipeline_mode<synchronous>, transform_indices = @transform_3, window_bounds = array<i64: 1024, 128>}, {pipeline_mode = #tpu.pipeline_mode<synchronous>, transform_indices = @transform_4, window_bounds = array<i64: 1, 128>}, {transform_indices = @transform_5, window_bounds = array<i64: 32, 128>}, {transform_indices = @transform_6, window_bounds = array<i64: 8, 128>}, {transform_indices = @transform_7, window_bounds = array<i64: 8, 128>}]} {
    %c0 = arith.constant 0 : index
    %c0_0 = arith.constant 0 : index
    %0 = vector.load %arg1[%c0, %c0_0] : memref<32x1024xbf16, #tpu.memory_space<vmem>>, vector<32x1024xbf16>
    %1 = arith.extf %0 : vector<32x1024xbf16> to vector<32x1024xf32>
    %c0_1 = arith.constant 0 : index
    %c0_2 = arith.constant 0 : index
    %2 = vector.load %arg2[%c0_1, %c0_2] : memref<1x1024xf32, #tpu.memory_space<vmem>>, vector<1x1024xf32>
    %3 = vector.broadcast %2 : vector<1x1024xf32> to vector<32x1024xf32>
    %4 = arith.mulf %1, %3 : vector<32x1024xf32>
    %c0_3 = arith.constant 0 : index
    %c0_4 = arith.constant 0 : index
    %5 = vector.load %arg3[%c0_3, %c0_4] : memref<1x1024xf32, #tpu.memory_space<vmem>>, vector<1x1024xf32>
    %6 = vector.broadcast %5 : vector<1x1024xf32> to vector<32x1024xf32>
    %7 = arith.addf %4, %6 : vector<32x1024xf32>
    %cst = arith.constant 0.000000e+00 : f32
    %8 = vector.broadcast %cst : f32 to vector<32x1024xf32>
    %9 = arith.cmpf ogt, %7, %8 : vector<32x1024xf32>
    %cst_5 = arith.constant 2.000000e-01 : f32
    %10 = vector.broadcast %cst_5 : f32 to vector<32x1024xf32>
    %11 = arith.mulf %10, %7 : vector<32x1024xf32>
    %12 = arith.select %9, %7, %11 : vector<32x1024xi1>, vector<32x1024xf32>
    %13 = arith.truncf %12 : vector<32x1024xf32> to vector<32x1024xbf16>
    %c0_6 = arith.constant 0 : index
    %c0_7 = arith.constant 0 : index
    %14 = vector.load %arg4[%c0_6, %c0_7] : memref<1024x128xbf16, #tpu.memory_space<vmem>>, vector<1024x128xbf16>
    %cst_8 = arith.constant dense<0.000000e+00> : vector<32x128xf32>
    %15 = tpu.matmul %13, %14, %cst_8 {dimension_numbers = #tpu.dot_dimension_numbers<[1], [0], [0], [1], [0, 0, 1, 1], [], []>} : vector<32x1024xbf16>, vector<1024x128xbf16>, vector<32x128xf32> -> vector<32x128xf32>
    %c0_9 = arith.constant 0 : index
    %c0_10 = arith.constant 0 : index
    %16 = vector.load %arg5[%c0_9, %c0_10] : memref<1x128xf32, #tpu.memory_space<vmem>>, vector<1x128xf32>
    %17 = vector.broadcast %16 : vector<1x128xf32> to vector<32x128xf32>
    %18 = arith.addf %15, %17 : vector<32x128xf32>
    %19 = tpu.iota {dimensions = array<i32: 0>} : vector<8x1xi32>
    %c0_i32 = arith.constant 0 : i32
    %20 = arith.cmpi ne, %arg0, %c0_i32 : i32
    %21 = arith.extui %20 : i1 to i32
    %c0_i32_11 = arith.constant 0 : i32
    %22 = arith.cmpi ne, %21, %c0_i32_11 : i32
    scf.if %22 {
      %cst_16 = arith.constant dense<0.000000e+00> : vector<128xf32>
      %28 = vector.multi_reduction <add>, %18, %cst_16 [0] : vector<32x128xf32> to vector<128xf32>
      %29 = vector.shape_cast %28 : vector<128xf32> to vector<1x128xf32>
      %30 = arith.mulf %18, %18 : vector<32x128xf32>
      %cst_17 = arith.constant dense<0.000000e+00> : vector<128xf32>
      %31 = vector.multi_reduction <add>, %30, %cst_17 [0] : vector<32x128xf32> to vector<128xf32>
      %32 = vector.shape_cast %31 : vector<128xf32> to vector<1x128xf32>
      %c0_i32_18 = arith.constant 0 : i32
      %33 = vector.broadcast %c0_i32_18 : i32 to vector<8x1xi32>
      %34 = arith.cmpi eq, %19, %33 : vector<8x1xi32>
      %cst_19 = arith.constant 0.000000e+00 : f32
      %35 = vector.shape_cast %34 : vector<8x1xi1> to vector<8x1xi1>
      %36 = vector.broadcast %35 : vector<8x1xi1> to vector<8x128xi1>
      %37 = vector.shape_cast %29 : vector<1x128xf32> to vector<1x128xf32>
      %38 = vector.broadcast %37 : vector<1x128xf32> to vector<8x128xf32>
      %39 = vector.broadcast %cst_19 : f32 to vector<8x128xf32>
      %40 = arith.select %36, %38, %39 : vector<8x128xi1>, vector<8x128xf32>
      %c0_20 = arith.constant 0 : index
      %c0_21 = arith.constant 0 : index
      %41 = vector.load %arg7[%c0_20, %c0_21] : memref<8x128xf32, #tpu.memory_space<vmem>>, vector<8x128xf32>
      tpu.vector_store %arg7[%c0_20, %c0_21], %40 {strides = array<i32>} : memref<8x128xf32, #tpu.memory_space<vmem>>, vector<8x128xf32>,
      %c0_i32_22 = arith.constant 0 : i32
      %42 = vector.broadcast %c0_i32_22 : i32 to vector<8x1xi32>
      %43 = arith.cmpi eq, %19, %42 : vector<8x1xi32>
      %cst_23 = arith.constant 0.000000e+00 : f32
      %44 = vector.shape_cast %43 : vector<8x1xi1> to vector<8x1xi1>
      %45 = vector.broadcast %44 : vector<8x1xi1> to vector<8x128xi1>
      %46 = vector.shape_cast %32 : vector<1x128xf32> to vector<1x128xf32>
      %47 = vector.broadcast %46 : vector<1x128xf32> to vector<8x128xf32>
      %48 = vector.broadcast %cst_23 : f32 to vector<8x128xf32>
      %49 = arith.select %45, %47, %48 : vector<8x128xi1>, vector<8x128xf32>
      %c0_24 = arith.constant 0 : index
      %c0_25 = arith.constant 0 : index
      %50 = vector.load %arg8[%c0_24, %c0_25] : memref<8x128xf32, #tpu.memory_space<vmem>>, vector<8x128xf32>
      tpu.vector_store %arg8[%c0_24, %c0_25], %49 {strides = array<i32>} : memref<8x128xf32, #tpu.memory_space<vmem>>, vector<8x128xf32>,
    } else {
    }
    %c0_i32_12 = arith.constant 0 : i32
    %23 = arith.cmpi eq, %arg0, %c0_i32_12 : i32
    %24 = arith.extui %23 : i1 to i32
    %c0_i32_13 = arith.constant 0 : i32
    %25 = arith.cmpi ne, %24, %c0_i32_13 : i32
    scf.if %25 {
      %c32_i32 = arith.constant 32 : i32
      %28 = arith.muli %arg0, %c32_i32 : i32
      %29 = tpu.iota {dimensions = array<i32: 0>} : vector<32x1xi32>
      %30 = vector.broadcast %28 : i32 to vector<32x1xi32>
      %31 = arith.addi %30, %29 : vector<32x1xi32>
      %c32_i32_16 = arith.constant 32 : i32
      %32 = vector.broadcast %c32_i32_16 : i32 to vector<32x1xi32>
      %33 = arith.cmpi slt, %31, %32 : vector<32x1xi32>
      %34 = arith.extui %33 : vector<32x1xi1> to vector<32x1xi32>
      %35 = arith.sitofp %34 : vector<32x1xi32> to vector<32x1xf32>
      %36 = vector.broadcast %35 : vector<32x1xf32> to vector<32x128xf32>
      %37 = arith.mulf %18, %36 : vector<32x128xf32>
      %cst_17 = arith.constant dense<0.000000e+00> : vector<128xf32>
      %38 = vector.multi_reduction <add>, %37, %cst_17 [0] : vector<32x128xf32> to vector<128xf32>
      %39 = vector.shape_cast %38 : vector<128xf32> to vector<1x128xf32>
      %40 = arith.mulf %37, %18 : vector<32x128xf32>
      %cst_18 = arith.constant dense<0.000000e+00> : vector<128xf32>
      %41 = vector.multi_reduction <add>, %40, %cst_18 [0] : vector<32x128xf32> to vector<128xf32>
      %42 = vector.shape_cast %41 : vector<128xf32> to vector<1x128xf32>
      %c0_i32_19 = arith.constant 0 : i32
      %43 = vector.broadcast %c0_i32_19 : i32 to vector<8x1xi32>
      %44 = arith.cmpi eq, %19, %43 : vector<8x1xi32>
      %cst_20 = arith.constant 0.000000e+00 : f32
      %45 = vector.shape_cast %44 : vector<8x1xi1> to vector<8x1xi1>
      %46 = vector.broadcast %45 : vector<8x1xi1> to vector<8x128xi1>
      %47 = vector.shape_cast %39 : vector<1x128xf32> to vector<1x128xf32>
      %48 = vector.broadcast %47 : vector<1x128xf32> to vector<8x128xf32>
      %49 = vector.broadcast %cst_20 : f32 to vector<8x128xf32>
      %50 = arith.select %46, %48, %49 : vector<8x128xi1>, vector<8x128xf32>
      %c0_21 = arith.constant 0 : index
      %c0_22 = arith.constant 0 : index
      %51 = vector.load %arg7[%c0_21, %c0_22] : memref<8x128xf32, #tpu.memory_space<vmem>>, vector<8x128xf32>
      tpu.vector_store %arg7[%c0_21, %c0_22], %50 {strides = array<i32>} : memref<8x128xf32, #tpu.memory_space<vmem>>, vector<8x128xf32>,
      %c0_i32_23 = arith.constant 0 : i32
      %52 = vector.broadcast %c0_i32_23 : i32 to vector<8x1xi32>
      %53 = arith.cmpi eq, %19, %52 : vector<8x1xi32>
      %cst_24 = arith.constant 0.000000e+00 : f32
      %54 = vector.shape_cast %53 : vector<8x1xi1> to vector<8x1xi1>
      %55 = vector.broadcast %54 : vector<8x1xi1> to vector<8x128xi1>
      %56 = vector.shape_cast %42 : vector<1x128xf32> to vector<1x128xf32>
      %57 = vector.broadcast %56 : vector<1x128xf32> to vector<8x128xf32>
      %58 = vector.broadcast %cst_24 : f32 to vector<8x128xf32>
      %59 = arith.select %55, %57, %58 : vector<8x128xi1>, vector<8x128xf32>
      %c0_25 = arith.constant 0 : index
      %c0_26 = arith.constant 0 : index
      %60 = vector.load %arg8[%c0_25, %c0_26] : memref<8x128xf32, #tpu.memory_space<vmem>>, vector<8x128xf32>
      tpu.vector_store %arg8[%c0_25, %c0_26], %59 {strides = array<i32>} : memref<8x128xf32, #tpu.memory_space<vmem>>, vector<8x128xf32>,
    } else {
    }
    %26 = arith.truncf %18 : vector<32x128xf32> to vector<32x128xbf16>
    %c0_14 = arith.constant 0 : index
    %c0_15 = arith.constant 0 : index
    %27 = vector.load %arg6[%c0_14, %c0_15] : memref<32x128xbf16, #tpu.memory_space<vmem>>, vector<32x128xbf16>
    tpu.vector_store %arg6[%c0_14, %c0_15], %26 {strides = array<i32>} : memref<32x128xbf16, #tpu.memory_space<vmem>>, vector<32x128xbf16>,
    return
  }
  func.func @transform_0(%arg0: i32) -> (i32, i32) {
    %c0_i32 = arith.constant 0 : i32
    %c0_i32_0 = arith.constant 0 : i32
    return %arg0, %c0_i32 : i32, i32
  }
  func.func @transform_1(%arg0: i32) -> (i32, i32) {
    %c0_i32 = arith.constant 0 : i32
    %c0_i32_0 = arith.constant 0 : i32
    %c0_i32_1 = arith.constant 0 : i32
    return %c0_i32, %c0_i32_0 : i32, i32
  }
  func.func @transform_2(%arg0: i32) -> (i32, i32) {
    %c0_i32 = arith.constant 0 : i32
    %c0_i32_0 = arith.constant 0 : i32
    %c0_i32_1 = arith.constant 0 : i32
    return %c0_i32, %c0_i32_0 : i32, i32
  }
  func.func @transform_3(%arg0: i32) -> (i32, i32) {
    %c0_i32 = arith.constant 0 : i32
    %c0_i32_0 = arith.constant 0 : i32
    %c0_i32_1 = arith.constant 0 : i32
    return %c0_i32, %c0_i32_0 : i32, i32
  }
  func.func @transform_4(%arg0: i32) -> (i32, i32) {
    %c0_i32 = arith.constant 0 : i32
    %c0_i32_0 = arith.constant 0 : i32
    %c0_i32_1 = arith.constant 0 : i32
    return %c0_i32, %c0_i32_0 : i32, i32
  }
  func.func @transform_5(%arg0: i32) -> (i32, i32) {
    %c0_i32 = arith.constant 0 : i32
    %c0_i32_0 = arith.constant 0 : i32
    return %arg0, %c0_i32 : i32, i32
  }
  func.func @transform_6(%arg0: i32) -> (i32, i32) {
    %c0_i32 = arith.constant 0 : i32
    %c0_i32_0 = arith.constant 0 : i32
    return %arg0, %c0_i32 : i32, i32
  }
  func.func @transform_7(%arg0: i32) -> (i32, i32) {
    %c0_i32 = arith.constant 0 : i32
    %c0_i32_0 = arith.constant 0 : i32
    return %arg0, %c0_i32 : i32, i32
  }
}

</mosaic_0001>

<bundles_post_ra>
// kernel: discriminator_forward.4
= control target key start
LH: loop header
LB: loop body
LE: loop exit
PB: predicated region body
PF: predicated region fallthrough
CT: control target
= control target key end

     0   :  { %s2988_s18 = smov 0   ;;  %s4305_s0 = inlined_call_operand.vmem [shape: bf16[2048,256], index: 0, kind: input, shape index: {}]   ;;  %s4306_s1 = inlined_call_operand.vmem [shape: bf16[256,128], index: 1, kind: input, shape index: {}]   ;;  %s4307_s2 = inlined_call_operand.vmem [shape: f32[1,128], index: 2, kind: input, shape index: {}]   ;;  %s4308_s3 = inlined_call_operand.vmem [shape: bf16[2048,128], index: 3, kind: output, shape index: {0}]   ;;  %s4309_s4 = inlined_call_operand.vmem [shape: f32[32,128], index: 4, kind: output, shape index: {1}]   ;;  %s4310_s5 = inlined_call_operand.vmem [shape: f32[32,128], index: 5, kind: output, shape index: {2}]  }
   0x1 LB: > { %s2994_s19 = sadd.s32 4294967295, %s2954_s18   ;;  %p2316_p0 = scmp.ge.s32.totalorder %s2954_s18, 1  ;;  %s2954_s18 = sphi %s2988_s18, %s16_s18  }
   0x2   : > { %p194_p1 = scmp.lt.s32.totalorder %s2954_s18, 5 }
   0x4   : > { %p195_p2 = pnand %p2316_p0, %p194_p1 }
   0x6   : > { %198 = sbr.rel (%p195_p2) target bundleno = 788 (0x314), region = 32 }
   0xd   : > { %p244_p3 = scmp.lt.s32.totalorder %s2994_s19, 3  ;;  %v2956_v0 = vmov 0   ;;  %v2836_v1 = vld [vmem:[%s4306_s1] sm:$0xff]   ;;  %s2317_s22 = sshll.u32 %s2994_s19, 6  ;;  %v2837_v2 = vld [vmem:[%s4306_s1 + $0x8] sm:$0xff]   ;;  %v2838_v3 = vld [vmem:[%s4306_s1 + $0x10] sm:$0xff]  }
   0xe   : > { %772 = vmatprep.subr.bf16.mxu0 %v2956_v0  ;;  %2794 = vmatprep.subr.bf16.mxu1 %v2956_v0  ;;  %p232_p4 = scmp.lt.s32.totalorder %s2317_s22, 255  ;;  %v2839_v4 = vld [vmem:[%s4306_s1 + $0x18] sm:$0xff]   ;;  %v2840_v5 = vld [vmem:[%s4306_s1 + $0x20] sm:$0xff]   ;;  %v2841_v8 = vld [vmem:[%s4306_s1 + $0x28] sm:$0xff]   ;;  %p2405_p5 = scmp.eq.s32.totalorder %s2994_s19, 3 }
   0xf   : > { %s245_s23 = scalar_select %p244_p3, %s2994_s19, 3  ;;  %773 = vmatpush1.bf16.msra.mxu0 %v2836_v1  ;;  %2810 = vmatpush1.bf16.msra.mxu1 %v2836_v1  ;;  %v2842_v9 = vld [vmem:[%s4306_s1 + $0x30] sm:$0xff]   ;;  %v2843_v10 = vld [vmem:[%s4306_s1 + $0x38] sm:$0xff]   ;;  %v2844_v11 = vld [vmem:[%s4306_s1 + $0x40] sm:$0xff]  }
  0x10   : > { %774 = vmatprep.subr.bf16.mxu0 %v2956_v0  ;;  %2795 = vmatprep.subr.bf16.mxu1 %v2956_v0  ;;  %s4605_s22 = smov (!%p232_p4, %s2317_s22), 255  ;;  %v2845_v12 = vld [vmem:[%s4306_s1 + $0x48] sm:$0xff]   ;;  %v2846_v13 = vld [vmem:[%s4306_s1 + $0x50] sm:$0xff]   ;;  %v2847_v14 = vld [vmem:[%s4306_s1 + $0x58] sm:$0xff]  }
  0x11   : > { %s2322_s26 = sshll.u32 %s245_s23, 3  ;;  %s2321_s10 = sshll.u32 %s4605_s22, 2  ;;  %v2848_v15 = vld [vmem:[%s4306_s1 + $0x60] sm:$0xff]   ;;  %v2849_v16 = vld [vmem:[%s4306_s1 + $0x68] sm:$0xff]   ;;  %v2850_v17 = vld [vmem:[%s4306_s1 + $0x70] sm:$0xff]  }
  0x12   : > { %s3014_s29 = scalar_lea.vmem %s4309_s4, %s2322_s26  ;;  %s3019_s7 = scalar_lea.vmem %s4310_s5, %s2322_s26  ;;  %v2851_v18 = vld [vmem:[%s4306_s1 + $0x78] sm:$0xff]  }
  0x13   : > { %775 = vmatpush1.bf16.msra.mxu0 %v2837_v2  ;;  %2811 = vmatpush1.bf16.msra.mxu1 %v2837_v2  ;;  %s3029_s13 = scalar_lea.vmem %s4308_s3, %s2321_s10  ;;  %s2538_s16 = sshll.u32 %s4605_s22, 3 }
  0x14   : > { %776 = vmatprep.subr.bf16.mxu0 %v2956_v0  ;;  %2796 = vmatprep.subr.bf16.mxu1 %v2956_v0  ;;  %s3039_s21 = scalar_lea.vmem %s4305_s0, %s2538_s16 }
  0x15   : > { %v2854_v6 = vld [vmem:[%s3039_s21 + $0x4] ss:$8 sps:$4 sm:$0xff]   ;;  %v2852_v19 = vld [vmem:[%s3039_s21] ss:$8 sps:$4 sm:$0xff]   ;;  %v2858_v21 = vld [vmem:[%s3039_s21 + $0x14] ss:$8 sps:$4 sm:$0xff]  }
  0x16   : > { %v2857_v7 = vld [vmem:[%s3039_s21 + $0x104] ss:$8 sps:$4 sm:$0xff]   ;;  %804 = vmatprep.mubr.bf16.mxu0 %v2854_v6  ;;  %v2855_v20 = vld [vmem:[%s3039_s21 + $0x100] ss:$8 sps:$4 sm:$0xff]   ;;  %v2860_v22 = vld [vmem:[%s3039_s21 + $0x114] ss:$8 sps:$4 sm:$0xff]  }
  0x17   : > { %777 = vmatpush1.bf16.msra.mxu0 %v2838_v3  ;;  %2812 = vmatpush1.bf16.msra.mxu1 %v2838_v3  ;;  %v2862_v23 = vld [vmem:[%s3039_s21 + $0x10] ss:$8 sps:$4 sm:$0xff]   ;;  %v2864_v25 = vld [vmem:[%s3039_s21 + $0x24] ss:$8 sps:$4 sm:$0xff]   ;;  %v2868_v27 = vld [vmem:[%s3039_s21 + $0x20] ss:$8 sps:$4 sm:$0xff]  }
  0x18   : > { %778 = vmatprep.subr.bf16.mxu0 %v2956_v0  ;;  %2797 = vmatprep.subr.bf16.mxu1 %v2956_v0  ;;  %v2863_v24 = vld [vmem:[%s3039_s21 + $0x110] ss:$8 sps:$4 sm:$0xff]   ;;  %v2866_v26 = vld [vmem:[%s3039_s21 + $0x124] ss:$8 sps:$4 sm:$0xff]   ;;  %v2869_v28 = vld [vmem:[%s3039_s21 + $0x120] ss:$8 sps:$4 sm:$0xff]  }
  0x19   : > { %932 = vmatprep.mubr.bf16.mxu1 %v2857_v7  ;;  %v2870_v29 = vld [vmem:[%s3039_s21 + $0x34] ss:$8 sps:$4 sm:$0xff]   ;;  %v2874_v31 = vld [vmem:[%s3039_s21 + $0x30] ss:$8 sps:$4 sm:$0xff]   ;;  %v2876_v33 = vld [vmem:[%s3039_s21 + $0x44] ss:$8 sps:$4 sm:$0xff]  }
  0x1a   : > { %v2872_v30 = vld [vmem:[%s3039_s21 + $0x134] ss:$8 sps:$4 sm:$0xff]   ;;  %v2875_v32 = vld [vmem:[%s3039_s21 + $0x130] ss:$8 sps:$4 sm:$0xff]   ;;  %v2878_v34 = vld [vmem:[%s3039_s21 + $0x144] ss:$8 sps:$4 sm:$0xff]  }
  0x1b   : > { %779 = vmatpush1.bf16.msra.mxu0 %v2839_v4  ;;  %2813 = vmatpush1.bf16.msra.mxu1 %v2839_v4  ;;  %v2880_v35 = vld [vmem:[%s3039_s21 + $0x40] ss:$8 sps:$4 sm:$0xff]   ;;  %v2882_v37 = vld [vmem:[%s3039_s21 + $0x54] ss:$8 sps:$4 sm:$0xff]   ;;  %v2886_v39 = vld [vmem:[%s3039_s21 + $0x50] ss:$8 sps:$4 sm:$0xff]  }
  0x1c   : > { %780 = vmatprep.subr.bf16.mxu0 %v2956_v0  ;;  %2798 = vmatprep.subr.bf16.mxu1 %v2956_v0  ;;  %v2881_v36 = vld [vmem:[%s3039_s21 + $0x140] ss:$8 sps:$4 sm:$0xff]   ;;  %v2884_v38 = vld [vmem:[%s3039_s21 + $0x154] ss:$8 sps:$4 sm:$0xff]   ;;  %v2887_v40 = vld [vmem:[%s3039_s21 + $0x150] ss:$8 sps:$4 sm:$0xff]  }
  0x1d   : > { %v2888_v41 = vld [vmem:[%s3039_s21 + $0x64] ss:$8 sps:$4 sm:$0xff]   ;;  %v2892_v43 = vld [vmem:[%s3039_s21 + $0x60] ss:$8 sps:$4 sm:$0xff]   ;;  %v2894_v45 = vld [vmem:[%s3039_s21 + $0x74] ss:$8 sps:$4 sm:$0xff]  }
  0x1e   : > { %v2890_v42 = vld [vmem:[%s3039_s21 + $0x164] ss:$8 sps:$4 sm:$0xff]   ;;  %v2893_v44 = vld [vmem:[%s3039_s21 + $0x160] ss:$8 sps:$4 sm:$0xff]   ;;  %v2896_v46 = vld [vmem:[%s3039_s21 + $0x174] ss:$8 sps:$4 sm:$0xff]  }
  0x1f   : > { %781 = vmatpush1.bf16.msra.mxu0 %v2840_v5  ;;  %2814 = vmatpush1.bf16.msra.mxu1 %v2840_v5  ;;  %v2898_v47 = vld [vmem:[%s3039_s21 + $0x70] ss:$8 sps:$4 sm:$0xff]   ;;  %v2900_v49 = vld [vmem:[%s3039_s21 + $0x84] ss:$8 sps:$4 sm:$0xff]   ;;  %v2904_v51 = vld [vmem:[%s3039_s21 + $0x80] ss:$8 sps:$4 sm:$0xff]  }
  0x20   : > { %782 = vmatprep.subr.bf16.mxu0 %v2956_v0  ;;  %2799 = vmatprep.subr.bf16.mxu1 %v2956_v0  ;;  %v2899_v48 = vld [vmem:[%s3039_s21 + $0x170] ss:$8 sps:$4 sm:$0xff]   ;;  %v2902_v50 = vld [vmem:[%s3039_s21 + $0x184] ss:$8 sps:$4 sm:$0xff]   ;;  %v2905_v52 = vld [vmem:[%s3039_s21 + $0x180] ss:$8 sps:$4 sm:$0xff]  }
  0x21   : > { %v2906_v53 = vld [vmem:[%s3039_s21 + $0x94] ss:$8 sps:$4 sm:$0xff]   ;;  %v2910_v55 = vld [vmem:[%s3039_s21 + $0x90] ss:$8 sps:$4 sm:$0xff]   ;;  %v2912_v57 = vld [vmem:[%s3039_s21 + $0xa4] ss:$8 sps:$4 sm:$0xff]  }
  0x22   : > { %v2908_v54 = vld [vmem:[%s3039_s21 + $0x194] ss:$8 sps:$4 sm:$0xff]   ;;  %v2911_v56 = vld [vmem:[%s3039_s21 + $0x190] ss:$8 sps:$4 sm:$0xff]   ;;  %v2914_v58 = vld [vmem:[%s3039_s21 + $0x1a4] ss:$8 sps:$4 sm:$0xff]  }
  0x23   : > { %783 = vmatpush1.bf16.msra.mxu0 %v2841_v8  ;;  %2815 = vmatpush1.bf16.msra.mxu1 %v2841_v8  ;;  %v2916_v59 = vld [vmem:[%s3039_s21 + $0xa0] ss:$8 sps:$4 sm:$0xff]   ;;  %v2918_v61 = vld [vmem:[%s3039_s21 + $0xb4] ss:$8 sps:$4 sm:$0xff]   ;;  %v2922_v63 = vld [vmem:[%s3039_s21 + $0xb0] ss:$8 sps:$4 sm:$0xff]  }
  0x24   : > { %784 = vmatprep.subr.bf16.mxu0 %v2956_v0  ;;  %2800 = vmatprep.subr.bf16.mxu1 %v2956_v0  ;;  %v2917_v60 = vld [vmem:[%s3039_s21 + $0x1a0] ss:$8 sps:$4 sm:$0xff]   ;;  %v2920_v62 = vld [vmem:[%s3039_s21 + $0x1b4] ss:$8 sps:$4 sm:$0xff]   ;;  %v2924_v1 = vld [vmem:[%s3039_s21 + $0xc4] ss:$8 sps:$4 sm:$0xff]  }
  0x25   : > { %v2926_v2 = vld [vmem:[%s3039_s21 + $0x1c4] ss:$8 sps:$4 sm:$0xff]   ;;  %v2928_v3 = vld [vmem:[%s3039_s21 + $0xc0] ss:$8 sps:$4 sm:$0xff]   ;;  %v2930_v5 = vld [vmem:[%s3039_s21 + $0xd4] ss:$8 sps:$4 sm:$0xff]  }
  0x26   : > { %v2929_v4 = vld [vmem:[%s3039_s21 + $0x1c0] ss:$8 sps:$4 sm:$0xff]   ;;  %v2932_v6 = vld [vmem:[%s3039_s21 + $0x1d4] ss:$8 sps:$4 sm:$0xff]   ;;  %v2934_v7 = vld [vmem:[%s3039_s21 + $0xd0] ss:$8 sps:$4 sm:$0xff]  }
  0x27   : > { %785 = vmatpush1.bf16.msra.mxu0 %v2842_v9  ;;  %2816 = vmatpush1.bf16.msra.mxu1 %v2842_v9  ;;  %v2935_v8 = vld [vmem:[%s3039_s21 + $0x1d0] ss:$8 sps:$4 sm:$0xff]   ;;  %v2936_v9 = vld [vmem:[%s3039_s21 + $0xe4] ss:$8 sps:$4 sm:$0xff]  }
  0x28   : > { %786 = vmatprep.subr.bf16.mxu0 %v2956_v0  ;;  %2801 = vmatprep.subr.bf16.mxu1 %v2956_v0 }
  0x2b   : > { %787 = vmatpush1.bf16.msra.mxu0 %v2843_v10  ;;  %2817 = vmatpush1.bf16.msra.mxu1 %v2843_v10  ;;  %v2938_v10 = vld [vmem:[%s3039_s21 + $0x1e4] ss:$8 sps:$4 sm:$0xff]  }
  0x2c   : > { %788 = vmatprep.subr.bf16.mxu0 %v2956_v0  ;;  %2802 = vmatprep.subr.bf16.mxu1 %v2956_v0 }
  0x2f   : > { %789 = vmatpush1.bf16.msra.mxu0 %v2844_v11  ;;  %2818 = vmatpush1.bf16.msra.mxu1 %v2844_v11  ;;  %v2940_v11 = vld [vmem:[%s3039_s21 + $0xe0] ss:$8 sps:$4 sm:$0xff]  }
  0x30   : > { %790 = vmatprep.subr.bf16.mxu0 %v2956_v0  ;;  %2803 = vmatprep.subr.bf16.mxu1 %v2956_v0 }
  0x33   : > { %791 = vmatpush1.bf16.msra.mxu0 %v2845_v12  ;;  %2819 = vmatpush1.bf16.msra.mxu1 %v2845_v12  ;;  %v2941_v12 = vld [vmem:[%s3039_s21 + $0x1e0] ss:$8 sps:$4 sm:$0xff]  }
  0x34   : > { %792 = vmatprep.subr.bf16.mxu0 %v2956_v0  ;;  %2804 = vmatprep.subr.bf16.mxu1 %v2956_v0 }
  0x37   : > { %793 = vmatpush1.bf16.msra.mxu0 %v2846_v13  ;;  %2820 = vmatpush1.bf16.msra.mxu1 %v2846_v13  ;;  %v2942_v13 = vld [vmem:[%s3039_s21 + $0xf4] ss:$8 sps:$4 sm:$0xff]  }
  0x38   : > { %794 = vmatprep.subr.bf16.mxu0 %v2956_v0  ;;  %2805 = vmatprep.subr.bf16.mxu1 %v2956_v0 }
  0x3b   : > { %795 = vmatpush1.bf16.msra.mxu0 %v2847_v14  ;;  %2821 = vmatpush1.bf16.msra.mxu1 %v2847_v14  ;;  %v2944_v14 = vld [vmem:[%s3039_s21 + $0x1f4] ss:$8 sps:$4 sm:$0xff]  }
  0x3c   : > { %796 = vmatprep.subr.bf16.mxu0 %v2956_v0  ;;  %2806 = vmatprep.subr.bf16.mxu1 %v2956_v0 }
  0x3f   : > { %797 = vmatpush1.bf16.msra.mxu0 %v2848_v15  ;;  %2822 = vmatpush1.bf16.msra.mxu1 %v2848_v15  ;;  %v2946_v15 = vld [vmem:[%s3039_s21 + $0xf0] ss:$8 sps:$4 sm:$0xff]  }
  0x40   : > { %798 = vmatprep.subr.bf16.mxu0 %v2956_v0  ;;  %2807 = vmatprep.subr.bf16.mxu1 %v2956_v0 }
  0x43   : > { %799 = vmatpush1.bf16.msra.mxu0 %v2849_v16  ;;  %2823 = vmatpush1.bf16.msra.mxu1 %v2849_v16  ;;  %v2947_v16 = vld [vmem:[%s3039_s21 + $0x1f0] ss:$8 sps:$4 sm:$0xff]  }
  0x44   : > { %800 = vmatprep.subr.bf16.mxu0 %v2956_v0  ;;  %2808 = vmatprep.subr.bf16.mxu1 %v2956_v0 }
  0x47   : > { %801 = vmatpush1.bf16.msra.mxu0 %v2850_v17  ;;  %2824 = vmatpush1.bf16.msra.mxu1 %v2850_v17  ;;  %v1061_v17 = vlaneseq }
  0x48   : > { %802 = vmatprep.subr.bf16.mxu0 %v2956_v0  ;;  %2809 = vmatprep.subr.bf16.mxu1 %v2956_v0  ;;  %v2923_v0 = vld [vmem:[%s3039_s21 + $0x1b0] ss:$8 sps:$4 sm:$0xff]  }
  0x4b   : > { %803 = vmatpush1.bf16.msra.mxu0 %v2851_v18  ;;  %2825 = vmatpush1.bf16.msra.mxu1 %v2851_v18  ;;  %v3165_v18 = vshrl.u32 %v1061_v17, 7 }
  0x4d   : > { %4399 = vst [vmem:[#allocation2_spill] sm:$0xff] %v3165_v18 }
  0x4e   : > { %805 = vmatmul.mubr.bf16.vlgmr.msra.gmra.mrb[0].mxu0 %v2852_v19  ;;  %933 = vmatmul.mubr.bf16.vlgmr.msra.gmra.mrb[0].mxu1 %v2855_v20  ;;  %v3170_v19 = vld [vmem:[%s4307_s2] ss:$0 sm:$0xff] }
  0x4f   : > { %812 = vmatprep.mubr.bf16.mxu0 %v2858_v21  ;;  %940 = vmatprep.mubr.bf16.mxu1 %v2860_v22 }
  0x56   : > { %813 = vmatmul.mubr.bf16.gmra.mrb[4].mxu0 %v2862_v23  ;;  %941 = vmatmul.mubr.bf16.gmra.mrb[4].mxu1 %v2863_v24 }
  0x57   : > { %820 = vmatprep.mubr.bf16.mxu0 %v2864_v25  ;;  %948 = vmatprep.mubr.bf16.mxu1 %v2866_v26 }
  0x5e   : > { %821 = vmatmul.mubr.bf16.gmra.mrb[8].mxu0 %v2868_v27  ;;  %949 = vmatmul.mubr.bf16.gmra.mrb[8].mxu1 %v2869_v28 }
  0x5f   : > { %828 = vmatprep.mubr.bf16.mxu0 %v2870_v29  ;;  %956 = vmatprep.mubr.bf16.mxu1 %v2872_v30 }
  0x66   : > { %829 = vmatmul.mubr.bf16.gmra.mrb[12].mxu0 %v2874_v31  ;;  %957 = vmatmul.mubr.bf16.gmra.mrb[12].mxu1 %v2875_v32 }
  0x67   : > { %836 = vmatprep.mubr.bf16.mxu0 %v2876_v33  ;;  %964 = vmatprep.mubr.bf16.mxu1 %v2878_v34 }
  0x6e   : > { %837 = vmatmul.mubr.bf16.gmra.mrb[16].mxu0 %v2880_v35  ;;  %965 = vmatmul.mubr.bf16.gmra.mrb[16].mxu1 %v2881_v36 }
  0x6f   : > { %844 = vmatprep.mubr.bf16.mxu0 %v2882_v37  ;;  %972 = vmatprep.mubr.bf16.mxu1 %v2884_v38 }
  0x76   : > { %845 = vmatmul.mubr.bf16.gmra.mrb[20].mxu0 %v2886_v39  ;;  %973 = vmatmul.mubr.bf16.gmra.mrb[20].mxu1 %v2887_v40 }
  0x77   : > { %852 = vmatprep.mubr.bf16.mxu0 %v2888_v41  ;;  %980 = vmatprep.mubr.bf16.mxu1 %v2890_v42 }
  0x7e   : > { %853 = vmatmul.mubr.bf16.gmra.mrb[24].mxu0 %v2892_v43  ;;  %981 = vmatmul.mubr.bf16.gmra.mrb[24].mxu1 %v2893_v44 }
  0x7f   : > { %860 = vmatprep.mubr.bf16.mxu0 %v2894_v45  ;;  %988 = vmatprep.mubr.bf16.mxu1 %v2896_v46 }
  0x86   : > { %861 = vmatmul.mubr.bf16.gmra.mrb[28].mxu0 %v2898_v47  ;;  %989 = vmatmul.mubr.bf16.gmra.mrb[28].mxu1 %v2899_v48 }
  0x87   : > { %868 = vmatprep.mubr.bf16.mxu0 %v2900_v49  ;;  %996 = vmatprep.mubr.bf16.mxu1 %v2902_v50 }
  0x8e   : > { %869 = vmatmul.mubr.bf16.gmra.mrb[32].mxu0 %v2904_v51  ;;  %997 = vmatmul.mubr.bf16.gmra.mrb[32].mxu1 %v2905_v52 }
  0x8f   : > { %876 = vmatprep.mubr.bf16.mxu0 %v2906_v53  ;;  %1004 = vmatprep.mubr.bf16.mxu1 %v2908_v54 }
  0x96   : > { %877 = vmatmul.mubr.bf16.gmra.mrb[36].mxu0 %v2910_v55  ;;  %1005 = vmatmul.mubr.bf16.gmra.mrb[36].mxu1 %v2911_v56 }
  0x97   : > { %884 = vmatprep.mubr.bf16.mxu0 %v2912_v57  ;;  %1012 = vmatprep.mubr.bf16.mxu1 %v2914_v58 }
  0x9e   : > { %885 = vmatmul.mubr.bf16.gmra.mrb[40].mxu0 %v2916_v59  ;;  %1013 = vmatmul.mubr.bf16.gmra.mrb[40].mxu1 %v2917_v60 }
  0x9f   : > { %892 = vmatprep.mubr.bf16.mxu0 %v2918_v61  ;;  %1020 = vmatprep.mubr.bf16.mxu1 %v2920_v62 }
  0xa6   : > { %893 = vmatmul.mubr.bf16.gmra.mrb[44].mxu0 %v2922_v63  ;;  %1021 = vmatmul.mubr.bf16.gmra.mrb[44].mxu1 %v2923_v0 }
  0xa7   : > { %900 = vmatprep.mubr.bf16.mxu0 %v2924_v1  ;;  %1028 = vmatprep.mubr.bf16.mxu1 %v2926_v2 }
  0xae   : > { %901 = vmatmul.mubr.bf16.gmra.mrb[48].mxu0 %v2928_v3  ;;  %1029 = vmatmul.mubr.bf16.gmra.mrb[48].mxu1 %v2929_v4 }
  0xaf   : > { %908 = vmatprep.mubr.bf16.mxu0 %v2930_v5  ;;  %1036 = vmatprep.mubr.bf16.mxu1 %v2932_v6 }
  0xb6   : > { %909 = vmatmul.mubr.bf16.gmra.mrb[52].mxu0 %v2934_v7  ;;  %1037 = vmatmul.mubr.bf16.gmra.mrb[52].mxu1 %v2935_v8 }
  0xb7   : > { %916 = vmatprep.mubr.bf16.mxu0 %v2936_v9  ;;  %1044 = vmatprep.mubr.bf16.mxu1 %v2938_v10 }
  0xbe   : > { %917 = vmatmul.mubr.bf16.gmra.mrb[56].mxu0 %v2940_v11  ;;  %1045 = vmatmul.mubr.bf16.gmra.mrb[56].mxu1 %v2941_v12 }
  0xbf   : > { %924 = vmatprep.mubr.bf16.mxu0 %v2942_v13  ;;  %1052 = vmatprep.mubr.bf16.mxu1 %v2944_v14 }
  0xc6   : > { %925 = vmatmul.mubr.bf16.gmra.mrb[60].mxu0 %v2946_v15  ;;  %1053 = vmatmul.mubr.bf16.gmra.mrb[60].mxu1 %v2947_v16 }
 0x121   : > { %v806_v20 = vpop.f32.mrb[0].mxu0  ;;  %v934_v21 = vpop.f32.mrb[0].mxu1 }
 0x122   : > { %v3173_v22 = vadd.f32 %v3170_v19, %v806_v20  ;;  %v3176_v23 = vadd.f32 %v3170_v19, %v934_v21  ;;  %v808_v24 = vpop.f32.mrb[1].mxu0  ;;  %v936_v25 = vpop.f32.mrb[1].mxu1 }
 0x123   : > { %v809_v26 = vpop.f32.mrb[2].mxu0  ;;  %v937_v27 = vpop.f32.mrb[2].mxu1 }
 0x124   : > { %4400 = vst [vmem:[#allocation3_spill] sm:$0xff] %v3173_v22  ;;  %4401 = vst [vmem:[#allocation4_spill] sm:$0xff] %v3176_v23  ;;  %v3179_v28 = vadd.f32 %v3170_v19, %v809_v26  ;;  %v3182_v29 = vadd.f32 %v3170_v19, %v937_v27  ;;  %v811_v30 = vpop.f32.mrb[3].mxu0  ;;  %v939_v31 = vpop.f32.mrb[3].mxu1 }
 0x126   : > { %4402 = vst [vmem:[#allocation5_spill] sm:$0xff] %v3179_v28  ;;  %4403 = vst [vmem:[#allocation6_spill] sm:$0xff] %v3182_v29 }
 0x129   : > { %v814_v32 = vpop.f32.mrb[4].mxu0  ;;  %v942_v33 = vpop.f32.mrb[4].mxu1 }
 0x12a   : > { %v3185_v34 = vadd.f32 %v3170_v19, %v814_v32  ;;  %v3188_v35 = vadd.f32 %v3170_v19, %v942_v33  ;;  %v816_v36 = vpop.f32.mrb[5].mxu0  ;;  %v944_v37 = vpop.f32.mrb[5].mxu1 }
 0x12b   : > { %v817_v38 = vpop.f32.mrb[6].mxu0  ;;  %v945_v39 = vpop.f32.mrb[6].mxu1 }
 0x12c   : > { %4404 = vst [vmem:[#allocation7_spill] sm:$0xff] %v3185_v34  ;;  %4405 = vst [vmem:[#allocation8_spill] sm:$0xff] %v3188_v35  ;;  %v3191_v40 = vadd.f32 %v3170_v19, %v817_v38  ;;  %v3194_v41 = vadd.f32 %v3170_v19, %v945_v39  ;;  %v819_v42 = vpop.f32.mrb[7].mxu0  ;;  %v947_v43 = vpop.f32.mrb[7].mxu1 }
 0x12e   : > { %4406 = vst [vmem:[#allocation9_spill] sm:$0xff] %v3191_v40  ;;  %4407 = vst [vmem:[#allocation10_spill] sm:$0xff] %v3194_v41 }
 0x131   : > { %v822_v44 = vpop.f32.mrb[8].mxu0  ;;  %v950_v45 = vpop.f32.mrb[8].mxu1 }
 0x132   : > { %v3197_v46 = vadd.f32 %v3170_v19, %v822_v44  ;;  %v3200_v47 = vadd.f32 %v3170_v19, %v950_v45  ;;  %v824_v48 = vpop.f32.mrb[9].mxu0  ;;  %v952_v49 = vpop.f32.mrb[9].mxu1 }
 0x133   : > { %v825_v50 = vpop.f32.mrb[10].mxu0  ;;  %v953_v51 = vpop.f32.mrb[10].mxu1 }
 0x134   : > { %4408 = vst [vmem:[#allocation11_spill] sm:$0xff] %v3200_v47  ;;  %v3203_v52 = vadd.f32 %v3170_v19, %v825_v50  ;;  %v3206_v53 = vadd.f32 %v3170_v19, %v953_v51  ;;  %v827_v54 = vpop.f32.mrb[11].mxu0  ;;  %v955_v55 = vpop.f32.mrb[11].mxu1 }
 0x136   : > { %4409 = vst [vmem:[#allocation12_spill] sm:$0xff] %v3206_v53 }
 0x139   : > { %v830_v56 = vpop.f32.mrb[12].mxu0  ;;  %v958_v57 = vpop.f32.mrb[12].mxu1 }
 0x13a   : > { %v3209_v58 = vadd.f32 %v3170_v19, %v830_v56  ;;  %v3212_v59 = vadd.f32 %v3170_v19, %v958_v57  ;;  %v832_v60 = vpop.f32.mrb[13].mxu0  ;;  %v960_v61 = vpop.f32.mrb[13].mxu1 }
 0x13b   : > { %v833_v62 = vpop.f32.mrb[14].mxu0  ;;  %v961_v63 = vpop.f32.mrb[14].mxu1 }
 0x13c   : > { %4410 = vst [vmem:[#allocation13_spill] sm:$0xff] %v3212_v59  ;;  %v3215_v0 = vadd.f32 %v3170_v19, %v833_v62  ;;  %v3218_v1 = vadd.f32 %v3170_v19, %v961_v63  ;;  %v835_v2 = vpop.f32.mrb[15].mxu0  ;;  %v963_v3 = vpop.f32.mrb[15].mxu1 }
 0x13e   : > { %4411 = vst [vmem:[#allocation14_spill] sm:$0xff] %v3218_v1 }
 0x141   : > { %v838_v4 = vpop.f32.mrb[16].mxu0  ;;  %v966_v5 = vpop.f32.mrb[16].mxu1 }
 0x142   : > { %v3221_v6 = vadd.f32 %v3170_v19, %v838_v4  ;;  %v3224_v7 = vadd.f32 %v3170_v19, %v966_v5  ;;  %v840_v8 = vpop.f32.mrb[17].mxu0  ;;  %v968_v9 = vpop.f32.mrb[17].mxu1 }
 0x143   : > { %v841_v10 = vpop.f32.mrb[18].mxu0  ;;  %v969_v11 = vpop.f32.mrb[18].mxu1 }
 0x144   : > { %4412 = vst [vmem:[#allocation15_spill] sm:$0xff] %v3224_v7  ;;  %v3227_v12 = vadd.f32 %v3170_v19, %v841_v10  ;;  %v3230_v13 = vadd.f32 %v3170_v19, %v969_v11  ;;  %v843_v14 = vpop.f32.mrb[19].mxu0  ;;  %v971_v15 = vpop.f32.mrb[19].mxu1 }
 0x146   : > { %4413 = vst [vmem:[#allocation16_spill] sm:$0xff] %v3230_v13 }
 0x149   : > { %v846_v16 = vpop.f32.mrb[20].mxu0  ;;  %v974_v17 = vpop.f32.mrb[20].mxu1 }
 0x14a   : > { %v3233_v20 = vadd.f32 %v3170_v19, %v846_v16  ;;  %v3236_v21 = vadd.f32 %v3170_v19, %v974_v17  ;;  %v848_v24 = vpop.f32.mrb[21].mxu0  ;;  %v976_v25 = vpop.f32.mrb[21].mxu1 }
 0x14b   : > { %v849_v26 = vpop.f32.mrb[22].mxu0  ;;  %v977_v27 = vpop.f32.mrb[22].mxu1 }
 0x14c   : > { %4414 = vst [vmem:[#allocation17_spill] sm:$0xff] %v3236_v21  ;;  %v3239_v30 = vadd.f32 %v3170_v19, %v849_v26  ;;  %v3242_v31 = vadd.f32 %v3170_v19, %v977_v27  ;;  %v851_v32 = vpop.f32.mrb[23].mxu0  ;;  %v979_v33 = vpop.f32.mrb[23].mxu1 }
 0x14e   : > { %4415 = vst [vmem:[#allocation18_spill] sm:$0xff] %v3242_v31 }
 0x151   : > { %v854_v36 = vpop.f32.mrb[24].mxu0  ;;  %v982_v37 = vpop.f32.mrb[24].mxu1 }
 0x152   : > { %v3245_v38 = vadd.f32 %v3170_v19, %v854_v36  ;;  %v3248_v39 = vadd.f32 %v3170_v19, %v982_v37  ;;  %v856_v42 = vpop.f32.mrb[25].mxu0  ;;  %v984_v43 = vpop.f32.mrb[25].mxu1 }
 0x153   : > { %v857_v44 = vpop.f32.mrb[26].mxu0  ;;  %v985_v45 = vpop.f32.mrb[26].mxu1 }
 0x154   : > { %4416 = vst [vmem:[#allocation19_spill] sm:$0xff] %v3248_v39  ;;  %v3251_v48 = vadd.f32 %v3170_v19, %v857_v44  ;;  %v3254_v49 = vadd.f32 %v3170_v19, %v985_v45  ;;  %v859_v50 = vpop.f32.mrb[27].mxu0  ;;  %v987_v51 = vpop.f32.mrb[27].mxu1 }
 0x156   : > { %4417 = vst [vmem:[#allocation20_spill] sm:$0xff] %v3254_v49 }
 0x159   : > { %v862_v54 = vpop.f32.mrb[28].mxu0  ;;  %v990_v55 = vpop.f32.mrb[28].mxu1 }
 0x15a   : > { %v3257_v56 = vadd.f32 %v3170_v19, %v862_v54  ;;  %v3260_v57 = vadd.f32 %v3170_v19, %v990_v55  ;;  %v864_v60 = vpop.f32.mrb[29].mxu0  ;;  %v992_v61 = vpop.f32.mrb[29].mxu1 }
 0x15b   : > { %v865_v62 = vpop.f32.mrb[30].mxu0  ;;  %v993_v63 = vpop.f32.mrb[30].mxu1 }
 0x15c   : > { %4418 = vst [vmem:[#allocation21_spill] sm:$0xff] %v3260_v57  ;;  %v3263_v2 = vadd.f32 %v3170_v19, %v865_v62  ;;  %v3266_v3 = vadd.f32 %v3170_v19, %v993_v63  ;;  %v867_v4 = vpop.f32.mrb[31].mxu0  ;;  %v995_v5 = vpop.f32.mrb[31].mxu1 }
 0x15e   : > { %4419 = vst [vmem:[#allocation22_spill] sm:$0xff] %v3266_v3 }
 0x161   : > { %v870_v8 = vpop.f32.mrb[32].mxu0  ;;  %v998_v9 = vpop.f32.mrb[32].mxu1 }
 0x162   : > { %v3269_v10 = vadd.f32 %v3170_v19, %v870_v8  ;;  %v3272_v11 = vadd.f32 %v3170_v19, %v998_v9  ;;  %v872_v14 = vpop.f32.mrb[33].mxu0  ;;  %v1000_v15 = vpop.f32.mrb[33].mxu1 }
 0x163   : > { %v873_v16 = vpop.f32.mrb[34].mxu0  ;;  %v1001_v17 = vpop.f32.mrb[34].mxu1 }
 0x164   : > { %4420 = vst [vmem:[#allocation23_spill] sm:$0xff] %v3272_v11  ;;  %v3275_v24 = vadd.f32 %v3170_v19, %v873_v16  ;;  %v3278_v25 = vadd.f32 %v3170_v19, %v1001_v17  ;;  %v875_v26 = vpop.f32.mrb[35].mxu0  ;;  %v1003_v27 = vpop.f32.mrb[35].mxu1 }
 0x166   : > { %4421 = vst [vmem:[#allocation24_spill] sm:$0xff] %v3278_v25 }
 0x169   : > { %v878_v32 = vpop.f32.mrb[36].mxu0  ;;  %v1006_v33 = vpop.f32.mrb[36].mxu1 }
 0x16a   : > { %v3281_v36 = vadd.f32 %v3170_v19, %v878_v32  ;;  %v3284_v37 = vadd.f32 %v3170_v19, %v1006_v33  ;;  %v880_v42 = vpop.f32.mrb[37].mxu0  ;;  %v1008_v43 = vpop.f32.mrb[37].mxu1 }
 0x16b   : > { %v881_v44 = vpop.f32.mrb[38].mxu0  ;;  %v1009_v45 = vpop.f32.mrb[38].mxu1 }
 0x16c   : > { %4422 = vst [vmem:[#allocation25_spill] sm:$0xff] %v3284_v37  ;;  %v3287_v50 = vadd.f32 %v3170_v19, %v881_v44  ;;  %v3290_v51 = vadd.f32 %v3170_v19, %v1009_v45  ;;  %v883_v54 = vpop.f32.mrb[39].mxu0  ;;  %v1011_v55 = vpop.f32.mrb[39].mxu1 }
 0x16e   : > { %4423 = vst [vmem:[#allocation26_spill] sm:$0xff] %v3287_v50  ;;  %4424 = vst [vmem:[#allocation27_spill] sm:$0xff] %v3290_v51 }
 0x171   : > { %v886_v60 = vpop.f32.mrb[40].mxu0  ;;  %v1014_v61 = vpop.f32.mrb[40].mxu1 }
 0x172   : > { %v3293_v62 = vadd.f32 %v3170_v19, %v886_v60  ;;  %v3296_v63 = vadd.f32 %v3170_v19, %v1014_v61  ;;  %v888_v4 = vpop.f32.mrb[41].mxu0  ;;  %v1016_v5 = vpop.f32.mrb[41].mxu1 }
 0x173   : > { %v889_v8 = vpop.f32.mrb[42].mxu0  ;;  %v1017_v9 = vpop.f32.mrb[42].mxu1 }
 0x174   : > { %4425 = vst [vmem:[#allocation28_spill] sm:$0xff] %v3293_v62  ;;  %4426 = vst [vmem:[#allocation29_spill] sm:$0xff] %v3296_v63  ;;  %v3299_v14 = vadd.f32 %v3170_v19, %v889_v8  ;;  %v3302_v15 = vadd.f32 %v3170_v19, %v1017_v9  ;;  %v891_v16 = vpop.f32.mrb[43].mxu0  ;;  %v1019_v17 = vpop.f32.mrb[43].mxu1 }
 0x176   : > { %4427 = vst [vmem:[#allocation30_spill] sm:$0xff] %v3299_v14  ;;  %4428 = vst [vmem:[#allocation31_spill] sm:$0xff] %v3302_v15 }
 0x179   : > { %v894_v26 = vpop.f32.mrb[44].mxu0  ;;  %v1022_v27 = vpop.f32.mrb[44].mxu1 }
 0x17a   : > { %v3305_v32 = vadd.f32 %v3170_v19, %v894_v26  ;;  %v3308_v33 = vadd.f32 %v3170_v19, %v1022_v27  ;;  %v896_v42 = vpop.f32.mrb[45].mxu0  ;;  %v1024_v43 = vpop.f32.mrb[45].mxu1 }
 0x17b   : > { %v897_v44 = vpop.f32.mrb[46].mxu0  ;;  %v1025_v45 = vpop.f32.mrb[46].mxu1 }
 0x17c   : > { %4429 = vst [vmem:[#allocation32_spill] sm:$0xff] %v3308_v33  ;;  %v3311_v54 = vadd.f32 %v3170_v19, %v897_v44  ;;  %v3314_v55 = vadd.f32 %v3170_v19, %v1025_v45  ;;  %v899_v60 = vpop.f32.mrb[47].mxu0  ;;  %v1027_v61 = vpop.f32.mrb[47].mxu1 }
 0x17e   : > { %4430 = vst [vmem:[#allocation33_spill] sm:$0xff] %v3314_v55 }
 0x181   : > { %v902_v4 = vpop.f32.mrb[48].mxu0  ;;  %v1030_v5 = vpop.f32.mrb[48].mxu1 }
 0x182   : > { %v3317_v8 = vadd.f32 %v3170_v19, %v902_v4  ;;  %v3320_v9 = vadd.f32 %v3170_v19, %v1030_v5  ;;  %v904_v16 = vpop.f32.mrb[49].mxu0  ;;  %v1032_v17 = vpop.f32.mrb[49].mxu1 }
 0x183   : > { %v905_v26 = vpop.f32.mrb[50].mxu0  ;;  %v1033_v27 = vpop.f32.mrb[50].mxu1 }
 0x184   : > { %4431 = vst [vmem:[#allocation34_spill] sm:$0xff] %v3320_v9  ;;  %v3323_v42 = vadd.f32 %v3170_v19, %v905_v26  ;;  %v3326_v43 = vadd.f32 %v3170_v19, %v1033_v27  ;;  %v907_v44 = vpop.f32.mrb[51].mxu0  ;;  %v1035_v45 = vpop.f32.mrb[51].mxu1 }
 0x186   : > { %4432 = vst [vmem:[#allocation35_spill] sm:$0xff] %v3326_v43 }
 0x189   : > { %v910_v60 = vpop.f32.mrb[52].mxu0  ;;  %v1038_v61 = vpop.f32.mrb[52].mxu1 }
 0x18a   : > { %v3329_v4 = vadd.f32 %v3170_v19, %v910_v60  ;;  %v3332_v5 = vadd.f32 %v3170_v19, %v1038_v61  ;;  %v912_v16 = vpop.f32.mrb[53].mxu0  ;;  %v1040_v17 = vpop.f32.mrb[53].mxu1 }
 0x18b   : > { %v913_v18 = vpop.f32.mrb[54].mxu0  ;;  %v1041_v9 = vpop.f32.mrb[54].mxu1 }
 0x18c   : > { %4433 = vst [vmem:[#allocation36_spill] sm:$0xff] %v3332_v5  ;;  %v3335_v26 = vadd.f32 %v3170_v19, %v913_v18  ;;  %v3338_v27 = vadd.f32 %v3170_v19, %v1041_v9  ;;  %v915_v44 = vpop.f32.mrb[55].mxu0  ;;  %v1043_v45 = vpop.f32.mrb[55].mxu1 }
 0x18e   : > { %4434 = vst [vmem:[#allocation37_spill] sm:$0xff] %v3335_v26  ;;  %4435 = vst [vmem:[#allocation38_spill] sm:$0xff] %v3338_v27 }
 0x191   : > { %v918_v43 = vpop.f32.mrb[56].mxu0  ;;  %v1046_v55 = vpop.f32.mrb[56].mxu1 }
 0x192   : > { %v3341_v60 = vadd.f32 %v3170_v19, %v918_v43  ;;  %v3344_v61 = vadd.f32 %v3170_v19, %v1046_v55  ;;  %v920_v16 = vpop.f32.mrb[57].mxu0  ;;  %v1048_v17 = vpop.f32.mrb[57].mxu1 }
 0x193   : > { %v921_v5 = vpop.f32.mrb[58].mxu0  ;;  %v1049_v33 = vpop.f32.mrb[58].mxu1 }
 0x194   : > { %4436 = vst [vmem:[#allocation39_spill] sm:$0xff] %v3341_v60  ;;  %4437 = vst [vmem:[#allocation40_spill] sm:$0xff] %v3344_v61  ;;  %v3347_v18 = vadd.f32 %v3170_v19, %v921_v5  ;;  %v3350_v9 = vadd.f32 %v3170_v19, %v1049_v33  ;;  %v923_v44 = vpop.f32.mrb[59].mxu0  ;;  %v1051_v45 = vpop.f32.mrb[59].mxu1 }
 0x196   : > { %4438 = vst [vmem:[#allocation41_spill] sm:$0xff] %v3347_v18  ;;  %4439 = vst [vmem:[#allocation42_spill] sm:$0xff] %v3350_v9 }
 0x198   : > { %1066 = sbr.rel (%p2405_p5) target bundleno = 562 (0x232), region = 36 }
 0x199   : > { %v926_v27 = vpop.f32.mrb[60].mxu0  ;;  %v1054_v15 = vpop.f32.mrb[60].mxu1 }
 0x19a   : > { %v3353_v43 = vadd.f32 %v3170_v19, %v926_v27  ;;  %v3356_v55 = vadd.f32 %v3170_v19, %v1054_v15  ;;  %v928_v16 = vpop.f32.mrb[61].mxu0  ;;  %v1056_v17 = vpop.f32.mrb[61].mxu1  ;;  %v1067_v27 = vadd.f32 (!%p2405_p5), %v3179_v28, %v3173_v22 }
 0x19b   : > { %v929_v61 = vpop.f32.mrb[62].mxu0  ;;  %v1057_v63 = vpop.f32.mrb[62].mxu1 }
 0x19c   : > { %4440 = vst [vmem:[#allocation43_spill] sm:$0xff] %v3353_v43  ;;  %4441 = vst [vmem:[#allocation44_spill] sm:$0xff] %v3356_v55  ;;  %v3359_v5 = vadd.f32 %v3170_v19, %v929_v61  ;;  %v3362_v33 = vadd.f32 %v3170_v19, %v1057_v63  ;;  %v931_v44 = vpop.f32.mrb[63].mxu0  ;;  %v1059_v45 = vpop.f32.mrb[63].mxu1  ;;  %v1068_v15 = vadd.f32 (!%p2405_p5), %v1067_v27, %v3185_v34 }
 0x19d   : > { %v1136_v44 = vmul.f32 (!%p2405_p5), %v3173_v22, %v3173_v22  ;;  %v1137_v45 = vmul.f32 (!%p2405_p5), %v3179_v28, %v3179_v28 }
 0x19e   : > { %4442 = vst [vmem:[#allocation45_spill] sm:$0xff] %v3359_v5  ;;  %4443 = vst [vmem:[#allocation46_spill] sm:$0xff] %v3362_v33  ;;  %v1069_v16 = vadd.f32 (!%p2405_p5), %v1068_v15, %v3191_v40  ;;  %v1138_v15 = vmul.f32 (!%p2405_p5), %v3185_v34, %v3185_v34 }
 0x1a0   : > { %v1070_v17 = vadd.f32 %v1069_v16, %v3197_v46 }
 0x1a2   : > { %v1071_v61 = vadd.f32 %v1070_v17, %v3203_v52  ;;  %v1139_v17 = vmul.f32 %v3191_v40, %v3191_v40 }
 0x1a4   : > { %v1072_v55 = vadd.f32 %v1071_v61, %v3209_v58  ;;  %v1200_v61 = vadd.f32 %v1137_v45, %v1136_v44  ;;  %v1143_v45 = vmul.f32 %v3215_v0, %v3215_v0 }
 0x1a6   : > { %v1073_v19 = vadd.f32 %v1072_v55, %v3215_v0  ;;  %v1201_v22 = vadd.f32 %v1200_v61, %v1138_v15  ;;  %v1144_v61 = vmul.f32 %v3221_v6, %v3221_v6 }
 0x1a8   : > { %v1074_v63 = vadd.f32 %v1073_v19, %v3221_v6  ;;  %v1140_v19 = vmul.f32 %v3197_v46, %v3197_v46  ;;  %v1202_v28 = vadd.f32 %v1201_v22, %v1139_v17 }
 0x1aa   : > { %v1075_v27 = vadd.f32 %v1074_v63, %v3227_v12  ;;  %v1141_v63 = vmul.f32 %v3203_v52, %v3203_v52  ;;  %v1203_v9 = vadd.f32 %v1202_v28, %v1140_v19 }
 0x1ac   : > { %v1076_v16 = vadd.f32 %v1075_v27, %v3233_v20  ;;  %v1142_v27 = vmul.f32 %v3209_v58, %v3209_v58 }
 0x1ae   : > { %v1077_v55 = vadd.f32 %v1076_v16, %v3239_v30  ;;  %v1204_v16 = vadd.f32 %v1203_v9, %v1141_v63  ;;  %v1147_v63 = vmul.f32 %v3239_v30, %v3239_v30 }
 0x1b0   : > { %v1078_v33 = vadd.f32 %v1077_v55, %v3245_v38  ;;  %v1205_v55 = vadd.f32 %v1204_v16, %v1142_v27  ;;  %v1148_v16 = vmul.f32 %v3245_v38, %v3245_v38 }
 0x1b2   : > { %v1079_v34 = vadd.f32 %v1078_v33, %v3251_v48  ;;  %v1145_v33 = vmul.f32 %v3227_v12, %v3227_v12  ;;  %v1206_v17 = vadd.f32 %v1205_v55, %v1143_v45  ;;  %v1149_v55 = vmul.f32 %v3251_v48, %v3251_v48 }
 0x1b4   : > { %v1080_v44 = vadd.f32 %v1079_v34, %v3257_v56  ;;  %v1146_v34 = vmul.f32 %v3233_v20, %v3233_v20  ;;  %v1207_v19 = vadd.f32 %v1206_v17, %v1144_v61  ;;  %v1150_v17 = vmul.f32 %v3257_v56, %v3257_v56 }
 0x1b6   : > { %v1081_v15 = vadd.f32 %v1080_v44, %v3263_v2  ;;  %v1208_v44 = vadd.f32 %v1207_v19, %v1145_v33  ;;  %v1151_v19 = vmul.f32 %v3263_v2, %v3263_v2 }
 0x1b8   : > { %v1082_v22 = vadd.f32 %v1081_v15, %v3269_v10  ;;  %v1209_v15 = vadd.f32 %v1208_v44, %v1146_v34  ;;  %v1152_v44 = vmul.f32 %v3269_v10, %v3269_v10 }
 0x1ba   : > { %v1083_v28 = vadd.f32 %v1082_v22, %v3275_v24  ;;  %v1210_v22 = vadd.f32 %v1209_v15, %v1147_v63  ;;  %v1153_v15 = vmul.f32 %v3275_v24, %v3275_v24 }
 0x1bc   : > { %v1084_v9 = vadd.f32 %v1083_v28, %v3281_v36  ;;  %v1211_v28 = vadd.f32 %v1210_v22, %v1148_v16  ;;  %v1154_v22 = vmul.f32 %v3281_v36, %v3281_v36 }
 0x1be   : > { %v1085_v27 = vadd.f32 %v1084_v9, %v3287_v50  ;;  %v1212_v9 = vadd.f32 %v1211_v28, %v1149_v55  ;;  %v1155_v28 = vmul.f32 %v3287_v50, %v3287_v50 }
 0x1c0   : > { %v1086_v45 = vadd.f32 %v1085_v27, %v3293_v62  ;;  %v1213_v27 = vadd.f32 %v1212_v9, %v1150_v17  ;;  %v1156_v9 = vmul.f32 %v3293_v62, %v3293_v62 }
 0x1c2   : > { %v1087_v61 = vadd.f32 %v1086_v45, %v3299_v14  ;;  %v1214_v45 = vadd.f32 %v1213_v27, %v1151_v19  ;;  %v1157_v27 = vmul.f32 %v3299_v14, %v3299_v14 }
 0x1c4   : > { %v1088_v33 = vadd.f32 %v1087_v61, %v3305_v32  ;;  %v1215_v61 = vadd.f32 %v1214_v45, %v1152_v44  ;;  %v1158_v45 = vmul.f32 %v3305_v32, %v3305_v32 }
 0x1c6   : > { %v1089_v34 = vadd.f32 %v1088_v33, %v3311_v54  ;;  %v1216_v33 = vadd.f32 %v1215_v61, %v1153_v15  ;;  %v1159_v61 = vmul.f32 %v3311_v54, %v3311_v54 }
 0x1c8   : > { %v1090_v63 = vadd.f32 %v1089_v34, %v3317_v8  ;;  %v1217_v34 = vadd.f32 %v1216_v33, %v1154_v22  ;;  %v1160_v33 = vmul.f32 %v3317_v8, %v3317_v8 }
 0x1ca   : > { %v1091_v16 = vadd.f32 %v1090_v63, %v3323_v42  ;;  %v1218_v63 = vadd.f32 %v1217_v34, %v1155_v28  ;;  %v1161_v34 = vmul.f32 %v3323_v42, %v3323_v42 }
 0x1cc   : > { %v1092_v55 = vadd.f32 %v1091_v16, %v3329_v4  ;;  %v1219_v16 = vadd.f32 %v1218_v63, %v1156_v9  ;;  %v1162_v63 = vmul.f32 %v3329_v4, %v3329_v4 }
 0x1ce   : > { %v1093_v17 = vadd.f32 %v1092_v55, %v3335_v26  ;;  %v1220_v55 = vadd.f32 %v1219_v16, %v1157_v27  ;;  %v1163_v16 = vmul.f32 %v3335_v26, %v3335_v26 }
 0x1d0   : > { %v1094_v19 = vadd.f32 %v1093_v17, %v3341_v60  ;;  %v1221_v17 = vadd.f32 %v1220_v55, %v1158_v45  ;;  %v1164_v55 = vmul.f32 %v3341_v60, %v3341_v60 }
 0x1d2   : > { %v1095_v44 = vadd.f32 %v1094_v19, %v3347_v18  ;;  %v1222_v19 = vadd.f32 %v1221_v17, %v1159_v61  ;;  %v1165_v17 = vmul.f32 %v3347_v18, %v3347_v18 }
 0x1d4   : > { %v1096_v15 = vadd.f32 %v1095_v44, %v3353_v43  ;;  %v1223_v44 = vadd.f32 %v1222_v19, %v1160_v33  ;;  %v1166_v19 = vmul.f32 %v3353_v43, %v3353_v43 }
 0x1d6   : > { %v1097_v22 = vadd.f32 %v1096_v15, %v3359_v5  ;;  %v1224_v15 = vadd.f32 %v1223_v44, %v1161_v34  ;;  %v1167_v44 = vmul.f32 %v3359_v5, %v3359_v5 }
 0x1d8   : > { %v1098_v28 = vadd.f32 %v1097_v22, %v3176_v23  ;;  %v1225_v22 = vadd.f32 %v1224_v15, %v1162_v63  ;;  %v1168_v15 = vmul.f32 %v3176_v23, %v3176_v23 }
 0x1da   : > { %v1099_v9 = vadd.f32 %v1098_v28, %v3182_v29  ;;  %v1226_v28 = vadd.f32 %v1225_v22, %v1163_v16  ;;  %v1169_v22 = vmul.f32 %v3182_v29, %v3182_v29 }
 0x1dc   : > { %v1100_v27 = vadd.f32 %v1099_v9, %v3188_v35  ;;  %v1227_v9 = vadd.f32 %v1226_v28, %v1164_v55  ;;  %v1170_v28 = vmul.f32 %v3188_v35, %v3188_v35 }
 0x1de   : > { %v1101_v45 = vadd.f32 %v1100_v27, %v3194_v41  ;;  %v1228_v27 = vadd.f32 %v1227_v9, %v1165_v17  ;;  %v1171_v9 = vmul.f32 %v3194_v41, %v3194_v41 }
 0x1e0   : > { %v1102_v61 = vadd.f32 %v1101_v45, %v3200_v47  ;;  %v1229_v45 = vadd.f32 %v1228_v27, %v1166_v19  ;;  %v1172_v27 = vmul.f32 %v3200_v47, %v3200_v47 }
 0x1e2   : > { %v1103_v33 = vadd.f32 %v1102_v61, %v3206_v53  ;;  %v1230_v61 = vadd.f32 %v1229_v45, %v1167_v44  ;;  %v1173_v45 = vmul.f32 %v3206_v53, %v3206_v53 }
 0x1e4   : > { %v1104_v34 = vadd.f32 %v1103_v33, %v3212_v59  ;;  %v1231_v33 = vadd.f32 %v1230_v61, %v1168_v15  ;;  %v1174_v61 = vmul.f32 %v3212_v59, %v3212_v59 }
 0x1e6   : > { %v1105_v63 = vadd.f32 %v1104_v34, %v3218_v1  ;;  %v1232_v34 = vadd.f32 %v1231_v33, %v1169_v22  ;;  %v1175_v33 = vmul.f32 %v3218_v1, %v3218_v1 }
 0x1e8   : > { %v1106_v16 = vadd.f32 %v1105_v63, %v3224_v7  ;;  %v1233_v63 = vadd.f32 %v1232_v34, %v1170_v28  ;;  %v1176_v34 = vmul.f32 %v3224_v7, %v3224_v7 }
 0x1ea   : > { %v1107_v55 = vadd.f32 %v1106_v16, %v3230_v13  ;;  %v1234_v16 = vadd.f32 %v1233_v63, %v1171_v9  ;;  %v1177_v63 = vmul.f32 %v3230_v13, %v3230_v13  ;;  %v4444_v13 = vld [vmem:[#allocation29_spill] sm:$0xff] }
 0x1ec   : > { %v1108_v17 = vadd.f32 %v1107_v55, %v3236_v21  ;;  %v1235_v55 = vadd.f32 %v1234_v16, %v1172_v27  ;;  %v1178_v16 = vmul.f32 %v3236_v21, %v3236_v21  ;;  %v4445_v21 = vld [vmem:[#allocation31_spill] sm:$0xff] }
 0x1ee   : > { %v1109_v19 = vadd.f32 %v1108_v17, %v3242_v31  ;;  %v1236_v17 = vadd.f32 %v1235_v55, %v1173_v45  ;;  %v1179_v55 = vmul.f32 %v3242_v31, %v3242_v31  ;;  %v4446_v31 = vld [vmem:[#allocation32_spill] sm:$0xff] }
 0x1f0   : > { %v1110_v44 = vadd.f32 %v1109_v19, %v3248_v39  ;;  %v1237_v19 = vadd.f32 %v1236_v17, %v1174_v61  ;;  %v1180_v17 = vmul.f32 %v3248_v39, %v3248_v39  ;;  %v4447_v39 = vld [vmem:[#allocation33_spill] sm:$0xff] }
 0x1f2   : > { %v1111_v15 = vadd.f32 %v1110_v44, %v3254_v49  ;;  %v1238_v44 = vadd.f32 %v1237_v19, %v1175_v33  ;;  %v1181_v19 = vmul.f32 %v3254_v49, %v3254_v49  ;;  %v4448_v49 = vld [vmem:[#allocation34_spill] sm:$0xff] }
 0x1f4   : > { %v1112_v22 = vadd.f32 %v1111_v15, %v3260_v57  ;;  %v1239_v15 = vadd.f32 %v1238_v44, %v1176_v34  ;;  %v1182_v44 = vmul.f32 %v3260_v57, %v3260_v57  ;;  %v4449_v57 = vld [vmem:[#allocation35_spill] sm:$0xff] }
 0x1f6   : > { %v1113_v28 = vadd.f32 %v1112_v22, %v3266_v3  ;;  %v1240_v22 = vadd.f32 %v1239_v15, %v1177_v63  ;;  %v1183_v15 = vmul.f32 %v3266_v3, %v3266_v3  ;;  %v4450_v3 = vld [vmem:[#allocation36_spill] sm:$0xff] }
 0x1f8   : > { %v1114_v9 = vadd.f32 %v1113_v28, %v3272_v11  ;;  %v1241_v28 = vadd.f32 %v1240_v22, %v1178_v16  ;;  %v1184_v22 = vmul.f32 %v3272_v11, %v3272_v11  ;;  %v4451_v11 = vld [vmem:[#allocation38_spill] sm:$0xff] }
 0x1fa   : > { %v1115_v27 = vadd.f32 %v1114_v9, %v3278_v25  ;;  %v1242_v9 = vadd.f32 %v1241_v28, %v1179_v55  ;;  %v1185_v28 = vmul.f32 %v3278_v25, %v3278_v25  ;;  %v4452_v25 = vld [vmem:[#allocation40_spill] sm:$0xff] }
 0x1fc   : > { %v1116_v45 = vadd.f32 %v1115_v27, %v3284_v37  ;;  %v1243_v27 = vadd.f32 %v1242_v9, %v1180_v17  ;;  %v1186_v9 = vmul.f32 %v3284_v37, %v3284_v37  ;;  %v4453_v37 = vld [vmem:[#allocation42_spill] sm:$0xff] }
 0x1fe   : > { %v1117_v61 = vadd.f32 %v1116_v45, %v3290_v51  ;;  %v1244_v45 = vadd.f32 %v1243_v27, %v1181_v19  ;;  %v1187_v27 = vmul.f32 %v3290_v51, %v3290_v51  ;;  %v4454_v51 = vld [vmem:[#allocation44_spill] sm:$0xff] }
 0x200   : > { %v1118_v33 = vadd.f32 %v1117_v61, %v4444_v13  ;;  %v1245_v61 = vadd.f32 %v1244_v45, %v1182_v44  ;;  %v1188_v45 = vmul.f32 %v4444_v13, %v4444_v13  ;;  %v4455_v13 = vld [vmem:[#allocation46_spill] sm:$0xff] }
 0x202   : > { %v1119_v34 = vadd.f32 %v1118_v33, %v4445_v21  ;;  %v1246_v33 = vadd.f32 %v1245_v61, %v1183_v15  ;;  %v1189_v61 = vmul.f32 %v4445_v21, %v4445_v21 }
 0x204   : > { %v1120_v63 = vadd.f32 %v1119_v34, %v4446_v31  ;;  %v1247_v34 = vadd.f32 %v1246_v33, %v1184_v22  ;;  %v1190_v33 = vmul.f32 %v4446_v31, %v4446_v31  ;;  %v1194_v31 = vmul.f32 %v4450_v3, %v4450_v3 }
 0x206   : > { %v1121_v16 = vadd.f32 %v1120_v63, %v4447_v39  ;;  %v1248_v63 = vadd.f32 %v1247_v34, %v1185_v28  ;;  %v1191_v34 = vmul.f32 %v4447_v39, %v4447_v39  ;;  %v1195_v39 = vmul.f32 %v4451_v11, %v4451_v11 }
 0x208   : > { %v1122_v55 = vadd.f32 %v1121_v16, %v4448_v49  ;;  %v1249_v16 = vadd.f32 %v1248_v63, %v1186_v9  ;;  %v1192_v63 = vmul.f32 %v4448_v49, %v4448_v49  ;;  %v1196_v49 = vmul.f32 %v4452_v25, %v4452_v25 }
 0x20a   : > { %v1123_v17 = vadd.f32 %v1122_v55, %v4449_v57  ;;  %v1250_v55 = vadd.f32 %v1249_v16, %v1187_v27  ;;  %v1193_v27 = vmul.f32 %v4449_v57, %v4449_v57  ;;  %v1197_v57 = vmul.f32 %v4453_v37, %v4453_v37 }
 0x20c   : > { %v1124_v19 = vadd.f32 %v1123_v17, %v4450_v3  ;;  %v1251_v17 = vadd.f32 %v1250_v55, %v1188_v45 }
 0x20e   : > { %v1125_v44 = vadd.f32 %v1124_v19, %v4451_v11  ;;  %v1252_v19 = vadd.f32 %v1251_v17, %v1189_v61  ;;  %v1199_v11 = vmul.f32 %v4455_v13, %v4455_v13 }
 0x210   : > { %v1126_v15 = vadd.f32 %v1125_v44, %v4452_v25  ;;  %v1253_v44 = vadd.f32 %v1252_v19, %v1190_v33  ;;  %v1198_v19 = vmul.f32 %v4454_v51, %v4454_v51 }
 0x212   : > { %v1127_v22 = vadd.f32 %v1126_v15, %v4453_v37  ;;  %v1254_v16 = vadd.f32 %v1253_v44, %v1191_v34  ;;  %v4456_v34 = vld [vmem:[#allocation2_spill] sm:$0xff] }
 0x213   : > { %vm1269_vm0 = vcmp.eq.s32.totalorder %v4456_v34, 0 }
 0x214   : > { %v1128_v28 = vadd.f32 %v1127_v22, %v4454_v51  ;;  %v1255_v45 = vadd.f32 %v1254_v16, %v1192_v63 }
 0x216   : > { %v1129_v9 = vadd.f32 %v1128_v28, %v4455_v13  ;;  %v1256_v61 = vadd.f32 %v1255_v45, %v1193_v27 }
 0x218   : > { %v1130_v21 = vrot.slane %v1129_v9, 4  ;;  %v1257_v33 = vadd.f32 %v1256_v61, %v1194_v31 }
 0x21a   : > { %v1131_v15 = vadd.f32 %v1130_v21, %v1129_v9  ;;  %v1258_v28 = vadd.f32 %v1257_v33, %v1195_v39 }
 0x21c   : > { %v1132_v55 = vrot.slane %v1131_v15, 2  ;;  %v1259_v9 = vadd.f32 %v1258_v28, %v1196_v49 }
 0x21e   : > { %v1133_v22 = vadd.f32 %v1132_v55, %v1131_v15  ;;  %v1260_v63 = vadd.f32 %v1259_v9, %v1197_v57 }
 0x220   : > { %v1134_v17 = vrot.slane %v1133_v22, 1  ;;  %v1261_v44 = vadd.f32 %v1260_v63, %v1198_v19 }
 0x222   : > { %v1135_v3 = vadd.f32 %v1134_v17, %v1133_v22  ;;  %v1262_v21 = vadd.f32 %v1261_v44, %v1199_v11 }
 0x224   : > { %v1272_v25 = vsel %vm1269_vm0, %v1135_v3, 0.0  ;;  %v1263_v37 = vrot.slane %v1262_v21, 4 }
 0x225   : > { %1273 = vst [vmem:[%s3014_s29] sm:$0xff] %v1272_v25 }
 0x226   : > { %v1264_v27 = vadd.f32 %v1263_v37, %v1262_v21 }
 0x228   : > { %v1265_v16 = vrot.slane %v1264_v27, 2 }
 0x22a   : > { %v1266_v15 = vadd.f32 %v1265_v16, %v1264_v27 }
 0x22c   : > { %v1267_v31 = vrot.slane %v1266_v15, 1 }
 0x22e   : > { %v1268_v45 = vadd.f32 %v1267_v31, %v1266_v15 }
 0x230   : > { %v1274_v51 = vsel %vm1269_vm0, %v1268_v45, 0.0 }
 0x231   : > { %1275 = vst [vmem:[%s3019_s7] sm:$0xff] %v1274_v51 }
 0x232 PF: > { %p2406_p6 = scmp.ne.s32.totalorder %s2994_s19, 3 }
 0x234   : > { %1279 = sbr.rel (%p2406_p6) target bundleno = 766 (0x2fe), region = 40 }
 0x23b   : > { %v4457_v13 = vld [vmem:[#allocation2_spill] sm:$0xff]  ;;  %s2407_s21 = sshll.u32 %s2994_s19, 9 }
 0x23c   : > { %v1313_v55 = vadd.s32 264, %v4457_v13  ;;  %v1314_v39 = vadd.s32 272, %v4457_v13  ;;  %v1315_v61 = vadd.s32 280, %v4457_v13  ;;  %v1316_v22 = vadd.s32 288, %v4457_v13 }
 0x23d   : > { %v1317_v49 = vadd.s32 296, %v4457_v13  ;;  %v1318_v33 = vadd.s32 304, %v4457_v13  ;;  %v1319_v17 = vadd.s32 312, %v4457_v13  ;;  %v1320_v57 = vadd.s32 320, %v4457_v13 }
 0x23e   : > { %v1321_v28 = vadd.s32 328, %v4457_v13  ;;  %v1322_v34 = vadd.s32 336, %v4457_v13  ;;  %v1323_v3 = vadd.s32 344, %v4457_v13  ;;  %v1324_v19 = vadd.s32 352, %v4457_v13 }
 0x23f   : > { %v1325_v9 = vadd.s32 360, %v4457_v13  ;;  %v1326_v11 = vadd.s32 368, %v4457_v13  ;;  %v1327_v63 = vadd.s32 376, %v4457_v13  ;;  %v1328_v25 = vadd.s32 384, %v4457_v13 }
 0x240   : > { %v1329_v44 = vadd.s32 392, %v4457_v13  ;;  %v1330_v21 = vadd.s32 400, %v4457_v13  ;;  %v1331_v37 = vadd.s32 408, %v4457_v13  ;;  %v1332_v27 = vadd.s32 416, %v4457_v13 }
 0x241   : > { %v1333_v16 = vadd.s32 424, %v4457_v13  ;;  %v1334_v15 = vadd.s32 432, %v4457_v13  ;;  %v1335_v31 = vadd.s32 440, %v4457_v13  ;;  %v1336_v45 = vadd.s32 448, %v4457_v13 }
 0x242   : > { %v1337_v51 = vadd.s32 456, %v4457_v13  ;;  %v1338_v7 = vadd.s32 464, %v4457_v13  ;;  %v1339_v1 = vadd.s32 472, %v4457_v13  ;;  %v1340_v59 = vadd.s32 480, %v4457_v13 }
 0x243   : > { %v1341_v53 = vadd.s32 488, %v4457_v13  ;;  %v3595_v47 = vstv %s2407_s21  ;;  %v1342_v41 = vadd.s32 496, %v4457_v13  ;;  %v1343_v35 = vadd.s32 504, %v4457_v13 }
 0x244   : > { %v3600_v29 = vadd.s32 %v3595_v47, %v1313_v55  ;;  %v3603_v23 = vadd.s32 %v3595_v47, %v1314_v39  ;;  %v3606_v5 = vadd.s32 %v3595_v47, %v1315_v61  ;;  %v3609_v43 = vadd.s32 %v3595_v47, %v1316_v22 }
 0x245   : > { %v3612_v18 = vadd.s32 %v3595_v47, %v1317_v49  ;;  %v3615_v60 = vadd.s32 %v3595_v47, %v1318_v33  ;;  %v3618_v26 = vadd.s32 %v3595_v47, %v1319_v17  ;;  %v3621_v55 = vadd.s32 %v3595_v47, %v1320_v57 }
 0x246   : > { %v3624_v39 = vadd.s32 %v3595_v47, %v1321_v28  ;;  %v3627_v61 = vadd.s32 %v3595_v47, %v1322_v34  ;;  %v3630_v22 = vadd.s32 %v3595_v47, %v1323_v3  ;;  %v3633_v49 = vadd.s32 %v3595_v47, %v1324_v19 }
 0x247   : > { %v3636_v33 = vadd.s32 %v3595_v47, %v1325_v9  ;;  %v3639_v17 = vadd.s32 %v3595_v47, %v1326_v11  ;;  %v3642_v57 = vadd.s32 %v3595_v47, %v1327_v63  ;;  %v3645_v28 = vadd.s32 %v3595_v47, %v1328_v25 }
 0x248   : > { %v3648_v34 = vadd.s32 %v3595_v47, %v1329_v44  ;;  %v3651_v3 = vadd.s32 %v3595_v47, %v1330_v21  ;;  %v3654_v19 = vadd.s32 %v3595_v47, %v1331_v37  ;;  %v3657_v9 = vadd.s32 %v3595_v47, %v1332_v27 }
 0x249   : > { %v3660_v11 = vadd.s32 %v3595_v47, %v1333_v16  ;;  %v3663_v63 = vadd.s32 %v3595_v47, %v1334_v15  ;;  %v3666_v25 = vadd.s32 %v3595_v47, %v1335_v31  ;;  %v3669_v44 = vadd.s32 %v3595_v47, %v1336_v45 }
 0x24a   : > { %v3672_v21 = vadd.s32 %v3595_v47, %v1337_v51  ;;  %v3675_v37 = vadd.s32 %v3595_v47, %v1338_v7  ;;  %v3678_v27 = vadd.s32 %v3595_v47, %v1339_v1  ;;  %v3681_v16 = vadd.s32 %v3595_v47, %v1340_v59 }
 0x24b   : > { %v3684_v15 = vadd.s32 %v3595_v47, %v1341_v53  ;;  %v3687_v31 = vadd.s32 %v3595_v47, %v1342_v41  ;;  %v3690_v45 = vadd.s32 %v3595_v47, %v1343_v35  ;;  %vm1442_vm1 = vcmp.lt.s32.totalorder %v3600_v29, 1922 }
 0x24c   : > { %vm1443_vm2 = vcmp.lt.s32.totalorder %v3603_v23, 1922  ;;  %vm1444_vm3 = vcmp.lt.s32.totalorder %v3606_v5, 1922  ;;  %vm1445_vm4 = vcmp.lt.s32.totalorder %v3609_v43, 1922  ;;  %vm1446_vm5 = vcmp.lt.s32.totalorder %v3612_v18, 1922 }
 0x24d   : > { %vm1447_vm6 = vcmp.lt.s32.totalorder %v3615_v60, 1922  ;;  %vm1463_vm12 = vcmp.lt.s32.totalorder %v3663_v63, 1922  ;;  %vm1464_vm13 = vcmp.lt.s32.totalorder %v3666_v25, 1922  ;;  %vm1465_vm14 = vcmp.lt.s32.totalorder %v3669_v44, 1922 }
 0x24e   : > { %vm1466_vm15 = vcmp.lt.s32.totalorder %v3672_v21, 1922  ;;  %vm1467_vm0 = vcmp.lt.s32.totalorder %v3675_v37, 1922  ;;  %vm1468_vm7 = vcmp.lt.s32.totalorder %v3678_v27, 1922  ;;  %vm1469_vm8 = vcmp.lt.s32.totalorder %v3681_v16, 1922 }
 0x24f   : > { %vm1470_vm9 = vcmp.lt.s32.totalorder %v3684_v15, 1922  ;;  %vm1471_vm10 = vcmp.lt.s32.totalorder %v3687_v31, 1922  ;;  %vm1472_vm11 = vcmp.lt.s32.totalorder %v3690_v45, 1922  ;;  %v4393_v35 = vmov 0.0  }
 0x250   : > { %v3726_v41 = vsel %vm1442_vm1, 1.0, %v4393_v35  ;;  %v3731_v53 = vsel %vm1443_vm2, 1.0, %v4393_v35  ;;  %v3736_v59 = vsel %vm1444_vm3, 1.0, %v4393_v35  ;;  %v3741_v1 = vsel %vm1445_vm4, 1.0, %v4393_v35 }
 0x251   : > { %v3746_v29 = vsel %vm1446_vm5, 1.0, %v4393_v35  ;;  %v3751_v23 = vsel %vm1447_vm6, 1.0, %v4393_v35  ;;  %vm4458_vm1 = vcmp.lt.s32.totalorder %v3618_v26, 1922  ;;  %vm4459_vm2 = vcmp.lt.s32.totalorder %v3621_v55, 1922 }
 0x252   : > { %v3756_v7 = vsel %vm4458_vm1, 1.0, %v4393_v35  ;;  %v3761_v43 = vsel %vm4459_vm2, 1.0, %v4393_v35  ;;  %vm4460_vm3 = vcmp.lt.s32.totalorder %v3624_v39, 1922  ;;  %vm4462_vm4 = vcmp.lt.s32.totalorder %v3627_v61, 1922 }
 0x253   : > { %v3766_v18 = vsel %vm4460_vm3, 1.0, %v4393_v35  ;;  %v3771_v60 = vsel %vm4462_vm4, 1.0, %v4393_v35  ;;  %vm4464_vm5 = vcmp.lt.s32.totalorder %v3630_v22, 1922  ;;  %vm4466_vm6 = vcmp.lt.s32.totalorder %v3633_v49, 1922 }
 0x254   : > { %4461 = vst [vmem:[#allocation47_spill] sm:$0xff] %v3766_v18  ;;  %4463 = vst [vmem:[#allocation48_spill] sm:$0xff] %v3771_v60  ;;  %v3776_v26 = vsel %vm4464_vm5, 1.0, %v4393_v35  ;;  %v3781_v5 = vsel %vm4466_vm6, 1.0, %v4393_v35  ;;  %vm4468_vm1 = vcmp.lt.s32.totalorder %v3636_v33, 1922  ;;  %vm4470_vm2 = vcmp.lt.s32.totalorder %v3639_v17, 1922 }
 0x255   : > { %4465 = vst [vmem:[#allocation49_spill] sm:$0xff] %v3776_v26  ;;  %4467 = vst [vmem:[#allocation50_spill] sm:$0xff] %v3781_v5  ;;  %v3786_v51 = vsel %vm4468_vm1, 1.0, %v4393_v35  ;;  %v3791_v55 = vsel %vm4470_vm2, 1.0, %v4393_v35  ;;  %vm4472_vm3 = vcmp.lt.s32.totalorder %v3642_v57, 1922  ;;  %vm4474_vm4 = vcmp.lt.s32.totalorder %v3645_v28, 1922 }
 0x256   : > { %4469 = vst [vmem:[#allocation51_spill] sm:$0xff] %v3786_v51  ;;  %4471 = vst [vmem:[#allocation52_spill] sm:$0xff] %v3791_v55  ;;  %v3796_v39 = vsel %vm4472_vm3, 1.0, %v4393_v35  ;;  %v3801_v61 = vsel %vm4474_vm4, 1.0, %v4393_v35  ;;  %vm4476_vm5 = vcmp.lt.s32.totalorder %v3648_v34, 1922  ;;  %vm4478_vm6 = vcmp.lt.s32.totalorder %v3651_v3, 1922 }
 0x257   : > { %4473 = vst [vmem:[#allocation53_spill] sm:$0xff] %v3796_v39  ;;  %4475 = vst [vmem:[#allocation54_spill] sm:$0xff] %v3801_v61  ;;  %v3806_v22 = vsel %vm4476_vm5, 1.0, %v4393_v35  ;;  %v3811_v49 = vsel %vm4478_vm6, 1.0, %v4393_v35  ;;  %vm4480_vm1 = vcmp.lt.s32.totalorder %v3654_v19, 1922  ;;  %vm4482_vm2 = vcmp.lt.s32.totalorder %v3657_v9, 1922 }
 0x258   : > { %4477 = vst [vmem:[#allocation55_spill] sm:$0xff] %v3806_v22  ;;  %4479 = vst [vmem:[#allocation56_spill] sm:$0xff] %v3811_v49  ;;  %v3816_v33 = vsel %vm4480_vm1, 1.0, %v4393_v35  ;;  %v3821_v17 = vsel %vm4482_vm2, 1.0, %v4393_v35  ;;  %vm4484_vm3 = vcmp.lt.s32.totalorder %v3660_v11, 1922  ;;  %v3831_v28 = vsel %vm1463_vm12, 1.0, %v4393_v35 }
 0x259   : > { %4481 = vst [vmem:[#allocation57_spill] sm:$0xff] %v3816_v33  ;;  %4483 = vst [vmem:[#allocation58_spill] sm:$0xff] %v3821_v17  ;;  %v3826_v57 = vsel %vm4484_vm3, 1.0, %v4393_v35  ;;  %v3836_v34 = vsel %vm1464_vm13, 1.0, %v4393_v35  ;;  %v3841_v3 = vsel %vm1465_vm14, 1.0, %v4393_v35  ;;  %v3846_v19 = vsel %vm1466_vm15, 1.0, %v4393_v35 }
 0x25a   : > { %4485 = vst [vmem:[#allocation59_spill] sm:$0xff] %v3826_v57  ;;  %4486 = vst [vmem:[#allocation60_spill] sm:$0xff] %v3831_v28  ;;  %v3851_v9 = vsel %vm1467_vm0, 1.0, %v4393_v35  ;;  %v3856_v11 = vsel %vm1468_vm7, 1.0, %v4393_v35  ;;  %v3861_v63 = vsel %vm1469_vm8, 1.0, %v4393_v35  ;;  %v3866_v25 = vsel %vm1470_vm9, 1.0, %v4393_v35 }
 0x25b   : > { %4487 = vst [vmem:[#allocation61_spill] sm:$0xff] %v3836_v34  ;;  %4488 = vst [vmem:[#allocation62_spill] sm:$0xff] %v3841_v3  ;;  %v3871_v44 = vsel %vm1471_vm10, 1.0, %v4393_v35  ;;  %v3876_v21 = vsel %vm1472_vm11, 1.0, %v4393_v35  ;;  %v1281_v37 = vadd.s32 8, %v4457_v13  ;;  %v1282_v27 = vadd.s32 16, %v4457_v13 }
 0x25c   : > { %4489 = vst [vmem:[#allocation63_spill] sm:$0xff] %v3846_v19  ;;  %4490 = vst [vmem:[#allocation64_spill] sm:$0xff] %v3851_v9  ;;  %v1283_v16 = vadd.s32 24, %v4457_v13  ;;  %v1345_v15 = vadd.s32 %v3595_v47, %v4457_v13  ;;  %v1284_v31 = vadd.s32 32, %v4457_v13  ;;  %v1286_v35 = vadd.s32 48, %v4457_v13 }
 0x25d   : > { %4491 = vst [vmem:[#allocation65_spill] sm:$0xff] %v3856_v11  ;;  %4492 = vst [vmem:[#allocation66_spill] sm:$0xff] %v3861_v63  ;;  %v1285_v63 = vadd.s32 40, %v4457_v13  ;;  %v4496_v11 = vmov 0.0   ;;  %v1289_v28 = vadd.s32 72, %v4457_v13  ;;  %v1290_v49 = vadd.s32 80, %v4457_v13 }
 0x25e   : > { %4493 = vst [vmem:[#allocation67_spill] sm:$0xff] %v3866_v25  ;;  %4494 = vst [vmem:[#allocation68_spill] sm:$0xff] %v3871_v44  ;;  %v1346_v25 = vadd.s32 %v3595_v47, %v1281_v37  ;;  %v1347_v44 = vadd.s32 %v3595_v47, %v1282_v27  ;;  %v1348_v45 = vadd.s32 %v3595_v47, %v1283_v16  ;;  %vm1409_vm7 = vcmp.lt.s32.totalorder %v1345_v15, 1922  ;;  %v4497_v15 = vld [vmem:[#allocation3_spill] sm:$0xff] }
 0x25f   : > { %4495 = vst [vmem:[#allocation69_spill] sm:$0xff] %v3876_v21  ;;  %v1349_v21 = vadd.s32 %v3595_v47, %v1284_v31  ;;  %v2408_v9 = vsel %vm1409_vm7, 1.0, %v4496_v11  ;;  %v1287_v37 = vadd.s32 56, %v4457_v13  ;;  %v1350_v3 = vadd.s32 %v3595_v47, %v1285_v63  ;;  %v4498_v31 = vld [vmem:[#allocation5_spill] sm:$0xff]  ;;  %v4499_v63 = vld [vmem:[#allocation7_spill] sm:$0xff] }
 0x260   : > { %vm1410_vm8 = vcmp.lt.s32.totalorder %v1346_v25, 1922  ;;  %vm1411_vm9 = vcmp.lt.s32.totalorder %v1347_v44, 1922  ;;  %vm1412_vm10 = vcmp.lt.s32.totalorder %v1348_v45, 1922  ;;  %v1288_v27 = vadd.s32 64, %v4457_v13 }
 0x261   : > { %v2409_v19 = vsel %vm1410_vm8, 1.0, %v4496_v11  ;;  %v2410_v16 = vsel %vm1411_vm9, 1.0, %v4496_v11  ;;  %v1351_v25 = vadd.s32 %v3595_v47, %v1286_v35  ;;  %vm1413_vm11 = vcmp.lt.s32.totalorder %v1349_v21, 1922 }
 0x262   : > { %v1601_v34 = vmul.f32 %v2408_v9, %v4497_v15  ;;  %v1602_v44 = vmul.f32 %v2409_v19, %v4498_v31  ;;  %v2411_v57 = vsel %vm1412_vm10, 1.0, %v4496_v11  ;;  %v1352_v17 = vadd.s32 %v3595_v47, %v1287_v37 }
 0x263   : > { %vm1414_vm12 = vcmp.lt.s32.totalorder %v1350_v3, 1922  ;;  %v1603_v45 = vmul.f32 %v2410_v16, %v4499_v63  ;;  %v2412_v22 = vsel %vm1413_vm11, 1.0, %v4496_v11  ;;  %v1353_v35 = vadd.s32 %v3595_v47, %v1288_v27 }
 0x264   : > { %v1665_v33 = vadd.f32 %v1602_v44, %v1601_v34  ;;  %vm1415_vm13 = vcmp.lt.s32.totalorder %v1351_v25, 1922  ;;  %v1604_v9 = vmul.f32 %v2411_v57, %v3191_v40  ;;  %v1291_v21 = vadd.s32 88, %v4457_v13 }
 0x265   : > { %v2413_v61 = vsel %vm1414_vm12, 1.0, %v4496_v11  ;;  %v1354_v37 = vadd.s32 %v3595_v47, %v1289_v28  ;;  %vm1416_vm14 = vcmp.lt.s32.totalorder %v1352_v17, 1922  ;;  %v1605_v3 = vmul.f32 %v2412_v22, %v3197_v46 }
 0x266   : > { %v1666_v19 = vadd.f32 %v1665_v33, %v1603_v45  ;;  %v1292_v39 = vadd.s32 96, %v4457_v13  ;;  %v2414_v55 = vsel %vm1415_vm13, 1.0, %v4496_v11  ;;  %v1355_v27 = vadd.s32 %v3595_v47, %v1290_v49 }
 0x267   : > { %vm1417_vm15 = vcmp.lt.s32.totalorder %v1353_v35, 1922  ;;  %v1606_v57 = vmul.f32 %v2413_v61, %v3203_v52  ;;  %v1293_v25 = vadd.s32 104, %v4457_v13  ;;  %v2415_v51 = vsel %vm1416_vm14, 1.0, %v4496_v11 }
 0x268   : > { %v1667_v16 = vadd.f32 %v1666_v19, %v1604_v9  ;;  %v1356_v28 = vadd.s32 %v3595_v47, %v1291_v21  ;;  %vm1418_vm0 = vcmp.lt.s32.totalorder %v1354_v37, 1922  ;;  %v1607_v22 = vmul.f32 %v2414_v55, %v3209_v58 }
 0x269   : > { %v1294_v19 = vadd.s32 112, %v4457_v13  ;;  %v1357_v5 = vadd.s32 %v3595_v47, %v1292_v39  ;;  %v2416_v49 = vsel %vm1417_vm15, 1.0, %v4496_v11  ;;  %vm1419_vm4 = vcmp.lt.s32.totalorder %v1355_v27, 1922 }
 0x26a   : > { %v1668_v33 = vadd.f32 %v1667_v16, %v1605_v3  ;;  %v1608_v61 = vmul.f32 %v2415_v51, %v3215_v0  ;;  %v1295_v16 = vadd.s32 120, %v4457_v13  ;;  %v2417_v26 = vsel %vm1418_vm0, 1.0, %v4496_v11 }
 0x26b   : > { %v1358_v21 = vadd.s32 %v3595_v47, %v1293_v25  ;;  %vm1420_vm5 = vcmp.lt.s32.totalorder %v1356_v28, 1922  ;;  %v3927_v55 = vmul.f32 %v2416_v49, %v3221_v6  ;;  %v1359_v39 = vadd.s32 %v3595_v47, %v1294_v19 }
 0x26c   : > { %v1669_v17 = vadd.f32 %v1668_v33, %v1606_v57  ;;  %v1296_v33 = vadd.s32 128, %v4457_v13  ;;  %vm1421_vm6 = vcmp.lt.s32.totalorder %v1357_v5, 1922  ;;  %v2418_v27 = vsel %vm1419_vm4, 1.0, %v4496_v11 }
 0x26d   : > { %v3933_v51 = vmul.f32 %v2417_v26, %v3227_v12  ;;  %v1734_v60 = vmul.f32 %v1601_v34, %v4497_v15  ;;  %v1735_v25 = vmul.f32 %v1602_v44, %v4498_v31  ;;  %v1297_v28 = vadd.s32 136, %v4457_v13 }
 0x26e   : > { %v1670_v35 = vadd.f32 %v1669_v17, %v1607_v22  ;;  %v1360_v49 = vadd.s32 %v3595_v47, %v1295_v16  ;;  %vm1422_vm1 = vcmp.lt.s32.totalorder %v1358_v21, 1922  ;;  %v3942_v19 = vmul.f32 %v2418_v27, %v3233_v20 }
 0x26f   : > { %v1736_v26 = vmul.f32 %v1603_v45, %v4499_v63  ;;  %v1361_v34 = vadd.s32 %v3595_v47, %v1296_v33  ;;  %vm1423_vm2 = vcmp.lt.s32.totalorder %v1359_v39, 1922  ;;  %v2420_v15 = vsel %vm1421_vm6, 1.0, %v4496_v11 }
 0x270   : > { %v1671_v37 = vadd.f32 %v1670_v35, %v1608_v61  ;;  %v2419_v35 = vsel %vm1420_vm5, 1.0, %v4496_v11  ;;  %v1737_v16 = vmul.f32 %v1604_v9, %v3191_v40  ;;  %v1798_v21 = vadd.f32 %v1735_v25, %v1734_v60 }
 0x271   : > { %v3951_v31 = vmul.f32 %v2419_v35, %v3239_v30  ;;  %v1299_v27 = vadd.s32 152, %v4457_v13  ;;  %v1362_v63 = vadd.s32 %v3595_v47, %v1297_v28  ;;  %vm1424_vm3 = vcmp.lt.s32.totalorder %v1360_v49, 1922 }
 0x272   : > { %v1672_v17 = vadd.f32 %v1671_v37, %v3927_v55  ;;  %v1298_v37 = vadd.s32 144, %v4457_v13  ;;  %v2421_v45 = vsel %vm1422_vm1, 1.0, %v4496_v11  ;;  %v3959_v33 = vmul.f32 %v2420_v15, %v3245_v38 }
 0x273   : > { %v1799_v35 = vadd.f32 %v1798_v21, %v1736_v26  ;;  %vm1425_vm7 = vcmp.lt.s32.totalorder %v1361_v34, 1922  ;;  %v2422_v60 = vsel %vm1423_vm2, 1.0, %v4496_v11  ;;  %v3968_v25 = vmul.f32 %v2421_v45, %v3251_v48 }
 0x274   : > { %v1673_v18 = vadd.f32 %v1672_v17, %v3933_v51  ;;  %v1738_v17 = vmul.f32 %v1605_v3, %v3197_v46  ;;  %v1363_v9 = vadd.s32 %v3595_v47, %v1298_v37  ;;  %v1739_v15 = vmul.f32 %v1606_v57, %v3203_v52 }
 0x275   : > { %v1800_v40 = vadd.f32 %v1799_v35, %v1737_v16  ;;  %v1364_v3 = vadd.s32 %v3595_v47, %v1299_v27  ;;  %vm1426_vm8 = vcmp.lt.s32.totalorder %v1362_v63, 1922  ;;  %v2423_v26 = vsel %vm1424_vm3, 1.0, %v4496_v11 }
 0x276   : > { %v1674_v44 = vadd.f32 %v1673_v18, %v3942_v19  ;;  %v1300_v18 = vadd.s32 160, %v4457_v13  ;;  %v3977_v37 = vmul.f32 %v2422_v60, %v3257_v56  ;;  %v1740_v21 = vmul.f32 %v1607_v22, %v3209_v58 }
 0x277   : > { %v1801_v45 = vadd.f32 %v1800_v40, %v1738_v17  ;;  %vm1427_vm9 = vcmp.lt.s32.totalorder %v1363_v9, 1922  ;;  %v2424_v16 = vsel %vm1425_vm7, 1.0, %v4496_v11  ;;  %v3986_v27 = vmul.f32 %v2423_v26, %v3263_v2 }
 0x278   : > { %v1675_v5 = vadd.f32 %v1674_v44, %v3951_v31  ;;  %v1301_v44 = vadd.s32 168, %v4457_v13  ;;  %v1365_v57 = vadd.s32 %v3595_v47, %v1300_v18  ;;  %v1741_v35 = vmul.f32 %v1608_v61, %v3215_v0 }
 0x279   : > { %v1802_v60 = vadd.f32 %v1801_v45, %v1739_v15  ;;  %vm1428_vm10 = vcmp.lt.s32.totalorder %v1364_v3, 1922  ;;  %v2425_v22 = vsel %vm1426_vm8, 1.0, %v4496_v11  ;;  %v3995_v17 = vmul.f32 %v2424_v16, %v3269_v10 }
 0x27a   : > { %v1676_v28 = vadd.f32 %v1675_v5, %v3959_v33  ;;  %v1302_v5 = vadd.s32 176, %v4457_v13  ;;  %v1366_v40 = vadd.s32 %v3595_v47, %v1301_v44  ;;  %v1742_v18 = vmul.f32 %v3927_v55, %v3221_v6 }
 0x27b   : > { %v1803_v26 = vadd.f32 %v1802_v60, %v1740_v21  ;;  %v1304_v61 = vadd.s32 192, %v4457_v13  ;;  %vm1429_vm11 = vcmp.lt.s32.totalorder %v1365_v57, 1922  ;;  %v2426_v44 = vsel %vm1427_vm9, 1.0, %v4496_v11 }
 0x27c   : > { %v1677_v39 = vadd.f32 %v1676_v28, %v3968_v25  ;;  %v1303_v28 = vadd.s32 184, %v4457_v13  ;;  %v1367_v15 = vadd.s32 %v3595_v47, %v1302_v5  ;;  %v4005_v63 = vmul.f32 %v2425_v22, %v3275_v24 }
 0x27d   : > { %v1743_v45 = vmul.f32 %v3933_v51, %v3227_v12  ;;  %v1804_v16 = vadd.f32 %v1803_v26, %v1741_v35  ;;  %v1305_v55 = vadd.s32 200, %v4457_v13  ;;  %vm1430_vm12 = vcmp.lt.s32.totalorder %v1366_v40, 1922 }
 0x27e   : > { %v1678_v49 = vadd.f32 %v1677_v39, %v3977_v37  ;;  %v1368_v21 = vadd.s32 %v3595_v47, %v1303_v28  ;;  %v2427_v5 = vsel %vm1428_vm10, 1.0, %v4496_v11  ;;  %v4015_v9 = vmul.f32 %v2426_v44, %v3281_v36 }
 0x27f   : > { %v1744_v60 = vmul.f32 %v3942_v19, %v3233_v20  ;;  %v1805_v22 = vadd.f32 %v1804_v16, %v1742_v18  ;;  %v1306_v51 = vadd.s32 208, %v4457_v13  ;;  %v1369_v35 = vadd.s32 %v3595_v47, %v1304_v61 }
 0x280   : > { %v1679_v34 = vadd.f32 %v1678_v49, %v3986_v27  ;;  %vm1431_vm13 = vcmp.lt.s32.totalorder %v1367_v15, 1922  ;;  %v2428_v28 = vsel %vm1429_vm11, 1.0, %v4496_v11  ;;  %v4025_v3 = vmul.f32 %v2427_v5, %v3287_v50 }
 0x281   : > { %v1745_v26 = vmul.f32 %v3951_v31, %v3239_v30  ;;  %v1806_v44 = vadd.f32 %v1805_v22, %v1743_v45  ;;  %v1307_v19 = vadd.s32 216, %v4457_v13  ;;  %v1370_v18 = vadd.s32 %v3595_v47, %v1305_v55 }
 0x282   : > { %v1680_v39 = vadd.f32 %v1679_v34, %v3995_v17  ;;  %vm1432_vm14 = vcmp.lt.s32.totalorder %v1368_v21, 1922  ;;  %v2429_v61 = vsel %vm1430_vm12, 1.0, %v4496_v11  ;;  %v1621_v57 = vmul.f32 %v2428_v28, %v3293_v62 }
 0x283   : > { %v1746_v16 = vmul.f32 %v3959_v33, %v3245_v38  ;;  %v1807_v5 = vadd.f32 %v1806_v44, %v1744_v60  ;;  %v1371_v31 = vadd.s32 %v3595_v47, %v1306_v51  ;;  %vm1433_vm15 = vcmp.lt.s32.totalorder %v1369_v35, 1922 }
 0x284   : > { %v1681_v49 = vadd.f32 %v1680_v39, %v4005_v63  ;;  %v2430_v45 = vsel %vm1431_vm13, 1.0, %v4496_v11  ;;  %v1622_v55 = vmul.f32 %v2429_v61, %v3299_v14  ;;  %v1747_v22 = vmul.f32 %v3968_v25, %v3251_v48 }
 0x285   : > { %v1808_v28 = vadd.f32 %v1807_v5, %v1745_v26  ;;  %v1372_v33 = vadd.s32 %v3595_v47, %v1307_v19  ;;  %vm1434_vm0 = vcmp.lt.s32.totalorder %v1370_v18, 1922  ;;  %v2431_v60 = vsel %vm1432_vm14, 1.0, %v4496_v11 }
 0x286   : > { %v1682_v34 = vadd.f32 %v1681_v49, %v4015_v9  ;;  %v1308_v49 = vadd.s32 224, %v4457_v13  ;;  %v1623_v51 = vmul.f32 %v2430_v45, %v3305_v32  ;;  %v1748_v15 = vmul.f32 %v3977_v37, %v3257_v56 }
 0x287   : > { %v1809_v61 = vadd.f32 %v1808_v28, %v1746_v16  ;;  %vm1435_vm4 = vcmp.lt.s32.totalorder %v1371_v31, 1922  ;;  %v2432_v26 = vsel %vm1433_vm15, 1.0, %v4496_v11  ;;  %v1624_v19 = vmul.f32 %v2431_v60, %v3311_v54 }
 0x288   : > { %v1683_v39 = vadd.f32 %v1682_v34, %v4025_v3  ;;  %v1309_v34 = vadd.s32 232, %v4457_v13  ;;  %v1373_v25 = vadd.s32 %v3595_v47, %v1308_v49  ;;  %v1749_v21 = vmul.f32 %v3986_v27, %v3263_v2 }
 0x289   : > { %v1810_v45 = vadd.f32 %v1809_v61, %v1747_v22  ;;  %vm1436_vm5 = vcmp.lt.s32.totalorder %v1372_v33, 1922  ;;  %v2433_v16 = vsel %vm1434_vm0, 1.0, %v4496_v11  ;;  %v1625_v49 = vmul.f32 %v2432_v26, %v3317_v8 }
 0x28a   : > { %v1684_v40 = vadd.f32 %v1683_v39, %v1621_v57  ;;  %v1310_v39 = vadd.s32 240, %v4457_v13  ;;  %v1374_v37 = vadd.s32 %v3595_v47, %v1309_v34  ;;  %v1750_v35 = vmul.f32 %v3995_v17, %v3269_v10 }
 0x28b   : > { %v1811_v60 = vadd.f32 %v1810_v45, %v1748_v15  ;;  %vm1437_vm6 = vcmp.lt.s32.totalorder %v1373_v25, 1922  ;;  %v2434_v22 = vsel %vm1435_vm4, 1.0, %v4496_v11  ;;  %v1626_v34 = vmul.f32 %v2433_v16, %v3323_v42 }
 0x28c   : > { %v1685_v44 = vadd.f32 %v1684_v40, %v1622_v55  ;;  %v1311_v40 = vadd.s32 248, %v4457_v13  ;;  %v1375_v27 = vadd.s32 %v3595_v47, %v1310_v39  ;;  %v1751_v18 = vmul.f32 %v4005_v63, %v3275_v24  ;;  %v4500_v63 = vld [vmem:[#allocation37_spill] sm:$0xff] }
 0x28d   : > { %v1812_v26 = vadd.f32 %v1811_v60, %v1749_v21  ;;  %vm1438_vm1 = vcmp.lt.s32.totalorder %v1374_v37, 1922  ;;  %v2435_v17 = vsel %vm1436_vm5, 1.0, %v4496_v11  ;;  %v1627_v15 = vmul.f32 %v2434_v22, %v3329_v4  ;;  %v4501_v60 = vld [vmem:[#allocation39_spill] sm:$0xff] }
 0x28e   : > { %v1686_v5 = vadd.f32 %v1685_v44, %v1623_v51  ;;  %v1312_v44 = vadd.s32 256, %v4457_v13  ;;  %v1752_v31 = vmul.f32 %v4015_v9, %v3281_v36  ;;  %vm1439_vm2 = vcmp.lt.s32.totalorder %v1375_v27, 1922 }
 0x28f   : > { %v1813_v25 = vadd.f32 %v1812_v26, %v1750_v35  ;;  %v2436_v16 = vsel %vm1437_vm6, 1.0, %v4496_v11  ;;  %v1628_v21 = vmul.f32 %v2435_v17, %v4500_v63  ;;  %v2437_v37 = vsel %vm1438_vm1, 1.0, %v4496_v11 }
 0x290   : > { %v1687_v28 = vadd.f32 %v1686_v5, %v1624_v19  ;;  %v1376_v5 = vadd.s32 %v3595_v47, %v1311_v40  ;;  %v1377_v45 = vadd.s32 %v3595_v47, %v1312_v44  ;;  %v1753_v40 = vmul.f32 %v4025_v3, %v3287_v50  ;;  %v4502_v44 = vld [vmem:[#allocation41_spill] sm:$0xff] }
 0x291   : > { %v1814_v33 = vadd.f32 %v1813_v25, %v1751_v18  ;;  %v1629_v22 = vmul.f32 %v2436_v16, %v4501_v60  ;;  %v1754_v9 = vmul.f32 %v1621_v57, %v3293_v62  ;;  %v2438_v47 = vsel %vm1439_vm2, 1.0, %v4496_v11  ;;  %v4503_v18 = vld [vmem:[#allocation43_spill] sm:$0xff] }
 0x292   : > { %v1688_v61 = vadd.f32 %v1687_v28, %v1625_v49  ;;  %vm1440_vm3 = vcmp.lt.s32.totalorder %v1376_v5, 1922  ;;  %vm1441_vm7 = vcmp.lt.s32.totalorder %v1377_v45, 1922  ;;  %v1630_v27 = vmul.f32 %v2437_v37, %v4502_v44 }
 0x293   : > { %v1815_v35 = vadd.f32 %v1814_v33, %v1752_v31  ;;  %v1755_v17 = vmul.f32 %v1622_v55, %v3299_v14  ;;  %v2439_v3 = vsel %vm1440_vm3, 1.0, %v4496_v11  ;;  %v1631_v5 = vmul.f32 %v2438_v47, %v4503_v18  ;;  %v4504_v31 = vld [vmem:[#allocation45_spill] sm:$0xff]  ;;  %v4506_v14 = vld [vmem:[#allocation6_spill] sm:$0xff] }
 0x294   : > { %v1689_v39 = vadd.f32 %v1688_v61, %v1626_v34  ;;  %v1756_v16 = vmul.f32 %v1623_v51, %v3305_v32  ;;  %v2440_v57 = vsel %vm1441_vm7, 1.0, %v4496_v11  ;;  %v1632_v45 = vmul.f32 %v2439_v3, %v4504_v31  ;;  %v4507_v11 = vld [vmem:[#allocation8_spill] sm:$0xff] }
 0x295   : > { %v1757_v62 = vmul.f32 %v1624_v19, %v3311_v54  ;;  %v1634_v47 = vmul.f32 %v3726_v41, %v4506_v14  ;;  %v1759_v51 = vmul.f32 %v1626_v34, %v3323_v42  ;;  %v1760_v19 = vmul.f32 %v1627_v15, %v3329_v4 }
 0x296   : > { %v1690_v28 = vadd.f32 %v1689_v39, %v1627_v15  ;;  %v1816_v39 = vadd.f32 %v1815_v35, %v1753_v40  ;;  %v1758_v40 = vmul.f32 %v1625_v49, %v3317_v8  ;;  %v1761_v49 = vmul.f32 %v1628_v21, %v4500_v63 }
 0x297   : > { %v1763_v15 = vmul.f32 %v1630_v27, %v4502_v44  ;;  %v1764_v63 = vmul.f32 %v1631_v5, %v4503_v18  ;;  %v1767_v18 = vmul.f32 %v1634_v47, %v4506_v14  ;;  %vm1867_vm8 = vcmp.eq.s32.totalorder %v4457_v13, 0 }
 0x298   : > { %v1691_v61 = vadd.f32 %v1690_v28, %v1628_v21  ;;  %v1817_v28 = vadd.f32 %v1816_v39, %v1754_v9  ;;  %v1635_v39 = vmul.f32 %v3731_v53, %v4507_v11 }
 0x29a   : > { %v1692_v26 = vadd.f32 %v1691_v61, %v1629_v22  ;;  %v1818_v37 = vadd.f32 %v1817_v28, %v1755_v17  ;;  %v4505_v61 = vld [vmem:[#allocation4_spill] sm:$0xff] }
 0x29b   : > { %v1633_v50 = vmul.f32 %v2440_v57, %v4505_v61 }
 0x29c   : > { %v1693_v25 = vadd.f32 %v1692_v26, %v1630_v27  ;;  %v1819_v35 = vadd.f32 %v1818_v37, %v1756_v16 }
 0x29d   : > { %v1766_v44 = vmul.f32 %v1633_v50, %v4505_v61 }
 0x29e   : > { %v1694_v33 = vadd.f32 %v1693_v25, %v1631_v5  ;;  %v1820_v9 = vadd.f32 %v1819_v35, %v1757_v62  ;;  %v4508_v25 = vld [vmem:[#allocation10_spill] sm:$0xff]  ;;  %v1762_v62 = vmul.f32 %v1629_v22, %v4501_v60  ;;  %v1765_v60 = vmul.f32 %v1632_v45, %v4504_v31 }
 0x29f   : > { %v1636_v28 = vmul.f32 %v3736_v59, %v4508_v25  ;;  %v1768_v31 = vmul.f32 %v1635_v39, %v4507_v11 }
 0x2a0   : > { %v1695_v55 = vadd.f32 %v1694_v33, %v1632_v45  ;;  %v1821_v17 = vadd.f32 %v1820_v9, %v1758_v40  ;;  %v4509_v33 = vld [vmem:[#allocation11_spill] sm:$0xff] }
 0x2a1   : > { %v1637_v41 = vmul.f32 %v3741_v1, %v4509_v33 }
 0x2a2   : > { %v1696_v26 = vadd.f32 %v1695_v55, %v1633_v50  ;;  %v1822_v16 = vadd.f32 %v1821_v17, %v1759_v51  ;;  %v4510_v55 = vld [vmem:[#allocation12_spill] sm:$0xff]  ;;  %v4512_v51 = vld [vmem:[#allocation14_spill] sm:$0xff]  ;;  %v1769_v50 = vmul.f32 %v1636_v28, %v4508_v25 }
 0x2a3   : > { %v1638_v53 = vmul.f32 %v3746_v29, %v4510_v55  ;;  %v1640_v1 = vmul.f32 %v3756_v7, %v4512_v51  ;;  %v4517_v7 = vld [vmem:[#allocation48_spill] sm:$0xff]  ;;  %v1770_v14 = vmul.f32 %v1637_v41, %v4509_v33 }
 0x2a4   : > { %v1697_v3 = vadd.f32 %v1696_v26, %v1634_v47  ;;  %v1823_v34 = vadd.f32 %v1822_v16, %v1760_v19  ;;  %v4511_v26 = vld [vmem:[#allocation13_spill] sm:$0xff]  ;;  %v4513_v19 = vld [vmem:[#allocation15_spill] sm:$0xff] }
 0x2a5   : > { %v1639_v59 = vmul.f32 %v3751_v23, %v4511_v26  ;;  %v1641_v29 = vmul.f32 %v3761_v43, %v4513_v19  ;;  %v4515_v23 = vld [vmem:[#allocation47_spill] sm:$0xff]  ;;  %v4519_v43 = vld [vmem:[#allocation49_spill] sm:$0xff]  ;;  %v1771_v11 = vmul.f32 %v1638_v53, %v4510_v55  ;;  %v1773_v33 = vmul.f32 %v1640_v1, %v4512_v51 }
 0x2a6   : > { %v1698_v57 = vadd.f32 %v1697_v3, %v1635_v39  ;;  %v1824_v40 = vadd.f32 %v1823_v34, %v1761_v49 }
 0x2a7   : > { %v1772_v25 = vmul.f32 %v1639_v59, %v4511_v26  ;;  %v1774_v55 = vmul.f32 %v1641_v29, %v4513_v19 }
 0x2a8   : > { %v1699_v37 = vadd.f32 %v1698_v57, %v1636_v28  ;;  %v1825_v21 = vadd.f32 %v1824_v40, %v1762_v62  ;;  %v4514_v57 = vld [vmem:[#allocation16_spill] sm:$0xff] }
 0x2a9   : > { %v1642_v49 = vmul.f32 %v4515_v23, %v4514_v57  ;;  %v4525_v23 = vld [vmem:[#allocation52_spill] sm:$0xff] }
 0x2aa   : > { %v1700_v35 = vadd.f32 %v1699_v37, %v1637_v41  ;;  %v1826_v22 = vadd.f32 %v1825_v21, %v1763_v15  ;;  %v4516_v37 = vld [vmem:[#allocation17_spill] sm:$0xff] }
 0x2ab   : > { %v1643_v62 = vmul.f32 %v4517_v7, %v4516_v37  ;;  %v4527_v7 = vld [vmem:[#allocation53_spill] sm:$0xff]  ;;  %v1775_v26 = vmul.f32 %v1642_v49, %v4514_v57 }
 0x2ac   : > { %v1701_v9 = vadd.f32 %v1700_v35, %v1638_v53  ;;  %v1827_v27 = vadd.f32 %v1826_v22, %v1764_v63  ;;  %v4518_v35 = vld [vmem:[#allocation18_spill] sm:$0xff]  ;;  %v4523_v22 = vld [vmem:[#allocation51_spill] sm:$0xff] }
 0x2ad   : > { %v1644_v15 = vmul.f32 %v4519_v43, %v4518_v35  ;;  %v4521_v63 = vld [vmem:[#allocation50_spill] sm:$0xff]  ;;  %v1776_v51 = vmul.f32 %v1643_v62, %v4516_v37 }
 0x2ae   : > { %v1702_v3 = vadd.f32 %v1701_v9, %v1639_v59  ;;  %v1828_v5 = vadd.f32 %v1827_v27, %v1765_v60  ;;  %v4520_v9 = vld [vmem:[#allocation19_spill] sm:$0xff]  ;;  %v4522_v60 = vld [vmem:[#allocation20_spill] sm:$0xff]  ;;  %v4529_v43 = vld [vmem:[#allocation54_spill] sm:$0xff] }
 0x2af   : > { %v1645_v21 = vmul.f32 %v4521_v63, %v4520_v9  ;;  %v4531_v63 = vld [vmem:[#allocation55_spill] sm:$0xff]  ;;  %v1777_v19 = vmul.f32 %v1644_v15, %v4518_v35 }
 0x2b0   : > { %v1703_v17 = vadd.f32 %v1702_v3, %v1640_v1  ;;  %v1829_v45 = vadd.f32 %v1828_v5, %v1766_v44  ;;  %v4524_v44 = vld [vmem:[#allocation21_spill] sm:$0xff] }
 0x2b1   : > { %v1778_v57 = vmul.f32 %v1645_v21, %v4520_v9 }
 0x2b2   : > { %v1704_v16 = vadd.f32 %v1703_v17, %v1641_v29  ;;  %v1830_v61 = vadd.f32 %v1829_v45, %v1767_v18  ;;  %v1646_v17 = vmul.f32 %v4523_v22, %v4522_v60  ;;  %v4526_v18 = vld [vmem:[#allocation22_spill] sm:$0xff]  ;;  %v4533_v22 = vld [vmem:[#allocation56_spill] sm:$0xff] }
 0x2b4   : > { %v1705_v34 = vadd.f32 %v1704_v16, %v1642_v49  ;;  %v1831_v47 = vadd.f32 %v1830_v61, %v1768_v31  ;;  %v1647_v16 = vmul.f32 %v4525_v23, %v4524_v44  ;;  %v4528_v31 = vld [vmem:[#allocation23_spill] sm:$0xff]  ;;  %v4535_v23 = vld [vmem:[#allocation57_spill] sm:$0xff]  ;;  %v1779_v37 = vmul.f32 %v1646_v17, %v4522_v60 }
 0x2b6   : > { %v1706_v40 = vadd.f32 %v1705_v34, %v1643_v62  ;;  %v1832_v39 = vadd.f32 %v1831_v47, %v1769_v50  ;;  %v1648_v34 = vmul.f32 %v4527_v7, %v4526_v18  ;;  %v4530_v50 = vld [vmem:[#allocation24_spill] sm:$0xff]  ;;  %v4537_v7 = vld [vmem:[#allocation58_spill] sm:$0xff]  ;;  %v1780_v35 = vmul.f32 %v1647_v16, %v4524_v44 }
 0x2b8   : > { %v1707_v3 = vadd.f32 %v1706_v40, %v1644_v15  ;;  %v1833_v28 = vadd.f32 %v1832_v39, %v1770_v14  ;;  %v1649_v40 = vmul.f32 %v4529_v43, %v4528_v31  ;;  %v4532_v14 = vld [vmem:[#allocation25_spill] sm:$0xff]  ;;  %v4539_v43 = vld [vmem:[#allocation59_spill] sm:$0xff]  ;;  %v1781_v9 = vmul.f32 %v1648_v34, %v4526_v18 }
 0x2ba   : > { %v1708_v27 = vadd.f32 %v1707_v3, %v1645_v21  ;;  %v1834_v41 = vadd.f32 %v1833_v28, %v1771_v11  ;;  %v1650_v3 = vmul.f32 %v4531_v63, %v4530_v50  ;;  %v4534_v11 = vld [vmem:[#allocation27_spill] sm:$0xff]  ;;  %v4541_v63 = vld [vmem:[#allocation60_spill] sm:$0xff]  ;;  %v1782_v60 = vmul.f32 %v1649_v40, %v4528_v31 }
 0x2bc   : > { %v1709_v5 = vadd.f32 %v1708_v27, %v1646_v17  ;;  %v1835_v53 = vadd.f32 %v1834_v41, %v1772_v25  ;;  %v1651_v27 = vmul.f32 %v4533_v22, %v4532_v14  ;;  %v4536_v25 = vld [vmem:[#allocation29_spill] sm:$0xff]  ;;  %v1783_v44 = vmul.f32 %v1650_v3, %v4530_v50 }
 0x2bd   : > { %v4543_v22 = vld [vmem:[#allocation61_spill] sm:$0xff] }
 0x2be   : > { %v1710_v45 = vadd.f32 %v1709_v5, %v1647_v16  ;;  %v1836_v59 = vadd.f32 %v1835_v53, %v1773_v33  ;;  %v1652_v5 = vmul.f32 %v4535_v23, %v4534_v11  ;;  %v4538_v33 = vld [vmem:[#allocation31_spill] sm:$0xff]  ;;  %v4545_v23 = vld [vmem:[#allocation62_spill] sm:$0xff]  ;;  %v1784_v18 = vmul.f32 %v1651_v27, %v4532_v14 }
 0x2c0   : > { %v1711_v61 = vadd.f32 %v1710_v45, %v1648_v34  ;;  %v1837_v1 = vadd.f32 %v1836_v59, %v1774_v55  ;;  %v1653_v45 = vmul.f32 %v4537_v7, %v4536_v25  ;;  %v4540_v55 = vld [vmem:[#allocation32_spill] sm:$0xff]  ;;  %v4547_v7 = vld [vmem:[#allocation63_spill] sm:$0xff]  ;;  %v1785_v31 = vmul.f32 %v1652_v5, %v4534_v11 }
 0x2c2   : > { %v1712_v47 = vadd.f32 %v1711_v61, %v1649_v40  ;;  %v1838_v29 = vadd.f32 %v1837_v1, %v1775_v26  ;;  %v1654_v61 = vmul.f32 %v4539_v43, %v4538_v33  ;;  %v4542_v26 = vld [vmem:[#allocation33_spill] sm:$0xff]  ;;  %v4549_v43 = vld [vmem:[#allocation64_spill] sm:$0xff]  ;;  %v1786_v50 = vmul.f32 %v1653_v45, %v4536_v25 }
 0x2c4   : > { %v1713_v39 = vadd.f32 %v1712_v47, %v1650_v3  ;;  %v1839_v49 = vadd.f32 %v1838_v29, %v1776_v51  ;;  %v1655_v47 = vmul.f32 %v4541_v63, %v4540_v55  ;;  %v4544_v51 = vld [vmem:[#allocation34_spill] sm:$0xff]  ;;  %v4551_v63 = vld [vmem:[#allocation65_spill] sm:$0xff]  ;;  %v1787_v14 = vmul.f32 %v1654_v61, %v4538_v33 }
 0x2c6   : > { %v1714_v28 = vadd.f32 %v1713_v39, %v1651_v27  ;;  %v1840_v62 = vadd.f32 %v1839_v49, %v1777_v19  ;;  %v1656_v39 = vmul.f32 %v4543_v22, %v4542_v26  ;;  %v4546_v19 = vld [vmem:[#allocation35_spill] sm:$0xff]  ;;  %v4553_v22 = vld [vmem:[#allocation66_spill] sm:$0xff]  ;;  %v1788_v11 = vmul.f32 %v1655_v47, %v4540_v55 }
 0x2c8   : > { %v1715_v41 = vadd.f32 %v1714_v28, %v1652_v5  ;;  %v1841_v15 = vadd.f32 %v1840_v62, %v1778_v57  ;;  %v1657_v28 = vmul.f32 %v4545_v23, %v4544_v51  ;;  %v4548_v57 = vld [vmem:[#allocation36_spill] sm:$0xff]  ;;  %v4555_v23 = vld [vmem:[#allocation67_spill] sm:$0xff]  ;;  %v1789_v25 = vmul.f32 %v1656_v39, %v4542_v26 }
 0x2ca   : > { %v1716_v53 = vadd.f32 %v1715_v41, %v1653_v45  ;;  %v1842_v21 = vadd.f32 %v1841_v15, %v1779_v37  ;;  %v1658_v41 = vmul.f32 %v4547_v7, %v4546_v19  ;;  %v4550_v37 = vld [vmem:[#allocation38_spill] sm:$0xff]  ;;  %v4557_v7 = vld [vmem:[#allocation68_spill] sm:$0xff] }
 0x2cc   : > { %v1717_v59 = vadd.f32 %v1716_v53, %v1654_v61  ;;  %v1843_v17 = vadd.f32 %v1842_v21, %v1780_v35  ;;  %v1659_v53 = vmul.f32 %v4549_v43, %v4548_v57  ;;  %v4552_v35 = vld [vmem:[#allocation40_spill] sm:$0xff]  ;;  %v4559_v43 = vld [vmem:[#allocation69_spill] sm:$0xff]  ;;  %v1791_v61 = vmul.f32 %v1658_v41, %v4546_v19 }
 0x2ce   : > { %v1718_v1 = vadd.f32 %v1717_v59, %v1655_v47  ;;  %v1844_v16 = vadd.f32 %v1843_v17, %v1781_v9  ;;  %v1660_v59 = vmul.f32 %v4551_v63, %v4550_v37  ;;  %v4554_v9 = vld [vmem:[#allocation42_spill] sm:$0xff]  ;;  %v1790_v63 = vmul.f32 %v1657_v28, %v4544_v51 }
 0x2d0   : > { %v1719_v29 = vadd.f32 %v1718_v1, %v1656_v39  ;;  %v1845_v34 = vadd.f32 %v1844_v16, %v1782_v60  ;;  %v1661_v1 = vmul.f32 %v4553_v22, %v4552_v35  ;;  %v4556_v60 = vld [vmem:[#allocation44_spill] sm:$0xff]  ;;  %v1792_v22 = vmul.f32 %v1659_v53, %v4548_v57 }
 0x2d2   : > { %v1720_v49 = vadd.f32 %v1719_v29, %v1657_v28  ;;  %v1846_v40 = vadd.f32 %v1845_v34, %v1783_v44  ;;  %v1662_v29 = vmul.f32 %v4555_v23, %v4554_v9  ;;  %v4558_v44 = vld [vmem:[#allocation46_spill] sm:$0xff]  ;;  %v1794_v26 = vmul.f32 %v1661_v1, %v4552_v35 }
 0x2d4   : > { %v1721_v62 = vadd.f32 %v1720_v49, %v1658_v41  ;;  %v1847_v3 = vadd.f32 %v1846_v40, %v1784_v18  ;;  %v1663_v49 = vmul.f32 %v4557_v7, %v4556_v60  ;;  %v1795_v51 = vmul.f32 %v1662_v29, %v4554_v9 }
 0x2d6   : > { %v1722_v15 = vadd.f32 %v1721_v62, %v1659_v53  ;;  %v1848_v27 = vadd.f32 %v1847_v3, %v1785_v31  ;;  %v1664_v62 = vmul.f32 %v4559_v43, %v4558_v44  ;;  %v1796_v41 = vmul.f32 %v1663_v49, %v4556_v60 }
 0x2d8   : > { %v1723_v21 = vadd.f32 %v1722_v15, %v1660_v59  ;;  %v1849_v5 = vadd.f32 %v1848_v27, %v1786_v50  ;;  %v1797_v53 = vmul.f32 %v1664_v62, %v4558_v44 }
 0x2da   : > { %v1724_v17 = vadd.f32 %v1723_v21, %v1661_v1  ;;  %v1850_v45 = vadd.f32 %v1849_v5, %v1787_v14  ;;  %v1793_v21 = vmul.f32 %v1660_v59, %v4550_v37 }
 0x2dc   : > { %v1725_v16 = vadd.f32 %v1724_v17, %v1662_v29  ;;  %v1851_v15 = vadd.f32 %v1850_v45, %v1788_v11 }
 0x2de   : > { %v1726_v34 = vadd.f32 %v1725_v16, %v1663_v49  ;;  %v1852_v31 = vadd.f32 %v1851_v15, %v1789_v25 }
 0x2e0   : > { %v1727_v18 = vadd.f32 %v1726_v34, %v1664_v62  ;;  %v1853_v55 = vadd.f32 %v1852_v31, %v1790_v63 }
 0x2e2   : > { %v1728_v33 = vrot.slane %v1727_v18, 4  ;;  %v1854_v50 = vadd.f32 %v1853_v55, %v1791_v61 }
 0x2e4   : > { %v1729_v40 = vadd.f32 %v1728_v33, %v1727_v18  ;;  %v1855_v39 = vadd.f32 %v1854_v50, %v1792_v22 }
 0x2e6   : > { %v1730_v47 = vrot.slane %v1729_v40, 2  ;;  %v1856_v28 = vadd.f32 %v1855_v39, %v1793_v21 }
 0x2e8   : > { %v1731_v3 = vadd.f32 %v1730_v47, %v1729_v40  ;;  %v1857_v57 = vadd.f32 %v1856_v28, %v1794_v26 }
 0x2ea   : > { %v1732_v23 = vrot.slane %v1731_v3, 1  ;;  %v1858_v17 = vadd.f32 %v1857_v57, %v1795_v51 }
 0x2ec   : > { %v1733_v19 = vadd.f32 %v1732_v23, %v1731_v3  ;;  %v1859_v59 = vadd.f32 %v1858_v17, %v1796_v41 }
 0x2ee   : > { %v1870_v37 = vsel %vm1867_vm8, %v1733_v19, 0.0  ;;  %v1860_v35 = vadd.f32 %v1859_v59, %v1797_v53 }
 0x2ef   : > { %1871 = vst [vmem:[%s3014_s29] sm:$0xff] %v1870_v37 }
 0x2f0   : > { %v1861_v1 = vrot.slane %v1860_v35, 4 }
 0x2f2   : > { %v1862_v14 = vadd.f32 %v1861_v1, %v1860_v35 }
 0x2f4   : > { %v1863_v9 = vrot.slane %v1862_v14, 2 }
 0x2f6   : > { %v1864_v29 = vadd.f32 %v1863_v9, %v1862_v14 }
 0x2f8   : > { %v1865_v27 = vrot.slane %v1864_v29, 1 }
 0x2fa   : > { %v1866_v7 = vadd.f32 %v1865_v27, %v1864_v29 }
 0x2fc   : > { %v1872_v16 = vsel %vm1867_vm8, %v1866_v7, 0.0 }
 0x2fd   : > { %1873 = vst [vmem:[%s3019_s7] sm:$0xff] %v1872_v16 }
 0x2fe PF: > { %v4560_v60 = vld [vmem:[#allocation3_spill] sm:$0xff]  ;;  %v4561_v49 = vld [vmem:[#allocation5_spill] sm:$0xff]  ;;  %v2616_v62 = vpack.c.bf16 %v3203_v52, %v3197_v46  ;;  %v2621_v13 = vpack.c.bf16 %v3215_v0, %v3209_v58  ;;  %v2626_v34 = vpack.c.bf16 %v3227_v12, %v3221_v6  ;;  %v2631_v25 = vpack.c.bf16 %v3239_v30, %v3233_v20  ;;  %v4564_v52 = vld [vmem:[#allocation26_spill] sm:$0xff] }
 0x2ff   : > { %v2606_v11 = vpack.c.bf16 %v4561_v49, %v4560_v60  ;;  %v4562_v5 = vld [vmem:[#allocation7_spill] sm:$0xff]  ;;  %v4563_v44 = vld [vmem:[#allocation9_spill] sm:$0xff]  ;;  %v2636_v45 = vpack.c.bf16 %v3251_v48, %v3245_v38  ;;  %v2641_v18 = vpack.c.bf16 %v3263_v2, %v3257_v56  ;;  %v2646_v46 = vpack.c.bf16 %v3275_v24, %v3269_v10  ;;  %v4565_v0 = vld [vmem:[#allocation28_spill] sm:$0xff] }
 0x300   : > { %v2611_v43 = vpack.c.bf16 %v4563_v44, %v4562_v5  ;;  %2764 = vst [vmem:[%s3029_s13 + $0x10] sm:$0xff] %v2616_v62   ;;  %2765 = vst [vmem:[%s3029_s13 + $0x18] sm:$0xff] %v2621_v13   ;;  %v2651_v58 = vpack.c.bf16 %v4564_v52, %v3281_v36  ;;  %v4566_v6 = vld [vmem:[#allocation30_spill] sm:$0xff]  ;;  %v2661_v20 = vpack.c.bf16 %v3311_v54, %v3305_v32  ;;  %v4567_v38 = vld [vmem:[#allocation37_spill] sm:$0xff] }
 0x301   : > { %2607 = vst [vmem:[%s3029_s13] sm:$0xff] %v2606_v11   ;;  %v2656_v12 = vpack.c.bf16 %v4566_v6, %v4565_v0  ;;  %2766 = vst [vmem:[%s3029_s13 + $0x20] sm:$0xff] %v2626_v34   ;;  %v2666_v30 = vpack.c.bf16 %v3323_v42, %v3317_v8  ;;  %v2671_v48 = vpack.c.bf16 %v4567_v38, %v3329_v4  ;;  %v4568_v56 = vld [vmem:[#allocation39_spill] sm:$0xff]  ;;  %v4569_v2 = vld [vmem:[#allocation41_spill] sm:$0xff] }
 0x302   : > { %2763 = vst [vmem:[%s3029_s13 + $0x8] sm:$0xff] %v2611_v43   ;;  %2767 = vst [vmem:[%s3029_s13 + $0x28] sm:$0xff] %v2631_v25   ;;  %v2676_v10 = vpack.c.bf16 %v4569_v2, %v4568_v56  ;;  %v4570_v24 = vld [vmem:[#allocation43_spill] sm:$0xff]  ;;  %v4571_v36 = vld [vmem:[#allocation45_spill] sm:$0xff] }
 0x303   : > { %2768 = vst [vmem:[%s3029_s13 + $0x30] sm:$0xff] %v2636_v45   ;;  %2769 = vst [vmem:[%s3029_s13 + $0x38] sm:$0xff] %v2641_v18   ;;  %v2681_v32 = vpack.c.bf16 %v4571_v36, %v4570_v24  ;;  %v4572_v54 = vld [vmem:[#allocation4_spill] sm:$0xff]  ;;  %v4573_v63 = vld [vmem:[#allocation6_spill] sm:$0xff] }
 0x304   : > { %2770 = vst [vmem:[%s3029_s13 + $0x40] sm:$0xff] %v2646_v46   ;;  %2771 = vst [vmem:[%s3029_s13 + $0x48] sm:$0xff] %v2651_v58   ;;  %v2686_v8 = vpack.c.bf16 %v4573_v63, %v4572_v54  ;;  %v4574_v42 = vld [vmem:[#allocation8_spill] sm:$0xff]  ;;  %v4575_v15 = vld [vmem:[#allocation10_spill] sm:$0xff] }
 0x305   : > { %2772 = vst [vmem:[%s3029_s13 + $0x50] sm:$0xff] %v2656_v12   ;;  %2773 = vst [vmem:[%s3029_s13 + $0x58] sm:$0xff] %v2661_v20   ;;  %v2691_v4 = vpack.c.bf16 %v4575_v15, %v4574_v42  ;;  %v4576_v33 = vld [vmem:[#allocation11_spill] sm:$0xff]  ;;  %v4577_v61 = vld [vmem:[#allocation12_spill] sm:$0xff] }
 0x306   : > { %v2696_v31 = vpack.c.bf16 %v4577_v61, %v4576_v33  ;;  %v4578_v40 = vld [vmem:[#allocation13_spill] sm:$0xff]  ;;  %v4579_v22 = vld [vmem:[#allocation14_spill] sm:$0xff]  ;;  %2774 = vst [vmem:[%s3029_s13 + $0x60] sm:$0xff] %v2666_v30   ;;  %2775 = vst [vmem:[%s3029_s13 + $0x68] sm:$0xff] %v2671_v48  }
 0x307   : > { %v2701_v55 = vpack.c.bf16 %v4579_v22, %v4578_v40  ;;  %2776 = vst [vmem:[%s3029_s13 + $0x70] sm:$0xff] %v2676_v10   ;;  %2777 = vst [vmem:[%s3029_s13 + $0x78] sm:$0xff] %v2681_v32   ;;  %v4580_v47 = vld [vmem:[#allocation15_spill] sm:$0xff]  ;;  %v4581_v21 = vld [vmem:[#allocation16_spill] sm:$0xff] }
 0x308   : > { %v2706_v50 = vpack.c.bf16 %v4581_v21, %v4580_v47  ;;  %v4582_v3 = vld [vmem:[#allocation17_spill] sm:$0xff]  ;;  %v4583_v26 = vld [vmem:[#allocation18_spill] sm:$0xff]  ;;  %v4584_v23 = vld [vmem:[#allocation19_spill] sm:$0xff]  ;;  %2778 = vst [vmem:[%s3029_s13 + $0x80] sm:$0xff] %v2686_v8  }
 0x309   : > { %v2711_v39 = vpack.c.bf16 %v4583_v26, %v4582_v3  ;;  %v4585_v51 = vld [vmem:[#allocation20_spill] sm:$0xff]  ;;  %v4586_v19 = vld [vmem:[#allocation21_spill] sm:$0xff]  ;;  %v4587_v41 = vld [vmem:[#allocation22_spill] sm:$0xff]  ;;  %2779 = vst [vmem:[%s3029_s13 + $0x88] sm:$0xff] %v2691_v4  }
 0x30a   : > { %v2716_v28 = vpack.c.bf16 %v4585_v51, %v4584_v23  ;;  %v2721_v57 = vpack.c.bf16 %v4587_v41, %v4586_v19  ;;  %2780 = vst [vmem:[%s3029_s13 + $0x90] sm:$0xff] %v2696_v31   ;;  %2781 = vst [vmem:[%s3029_s13 + $0x98] sm:$0xff] %v2701_v55   ;;  %v4588_v53 = vld [vmem:[#allocation23_spill] sm:$0xff]  ;;  %v4589_v17 = vld [vmem:[#allocation24_spill] sm:$0xff] }
 0x30b   : > { %v2726_v37 = vpack.c.bf16 %v4589_v17, %v4588_v53  ;;  %v4590_v59 = vld [vmem:[#allocation25_spill] sm:$0xff]  ;;  %v4591_v35 = vld [vmem:[#allocation27_spill] sm:$0xff]  ;;  %v4594_v27 = vld [vmem:[#allocation32_spill] sm:$0xff]  ;;  %2782 = vst [vmem:[%s3029_s13 + $0xa0] sm:$0xff] %v2706_v50  }
 0x30c   : > { %v2731_v1 = vpack.c.bf16 %v4591_v35, %v4590_v59  ;;  %v4592_v14 = vld [vmem:[#allocation29_spill] sm:$0xff]  ;;  %v4593_v9 = vld [vmem:[#allocation31_spill] sm:$0xff]  ;;  %2783 = vst [vmem:[%s3029_s13 + $0xa8] sm:$0xff] %v2711_v39   ;;  %2784 = vst [vmem:[%s3029_s13 + $0xb0] sm:$0xff] %v2716_v28  }
 0x30d   : > { %v2736_v29 = vpack.c.bf16 %v4593_v9, %v4592_v14  ;;  %v4595_v7 = vld [vmem:[#allocation33_spill] sm:$0xff]  ;;  %2785 = vst [vmem:[%s3029_s13 + $0xb8] sm:$0xff] %v2721_v57   ;;  %v4596_v60 = vld [vmem:[#allocation34_spill] sm:$0xff]  ;;  %v4597_v49 = vld [vmem:[#allocation35_spill] sm:$0xff] }
 0x30e   : > { %v2741_v16 = vpack.c.bf16 %v4595_v7, %v4594_v27  ;;  %v2746_v11 = vpack.c.bf16 %v4597_v49, %v4596_v60  ;;  %v4598_v5 = vld [vmem:[#allocation36_spill] sm:$0xff]  ;;  %v4599_v44 = vld [vmem:[#allocation38_spill] sm:$0xff]  ;;  %2786 = vst [vmem:[%s3029_s13 + $0xc0] sm:$0xff] %v2726_v37   ;;  %2787 = vst [vmem:[%s3029_s13 + $0xc8] sm:$0xff] %v2731_v1  }
 0x30f   : > { %v2751_v43 = vpack.c.bf16 %v4599_v44, %v4598_v5  ;;  %v4600_v62 = vld [vmem:[#allocation40_spill] sm:$0xff]  ;;  %v4601_v13 = vld [vmem:[#allocation42_spill] sm:$0xff]  ;;  %2788 = vst [vmem:[%s3029_s13 + $0xd0] sm:$0xff] %v2736_v29  }
 0x310   : > { %v2756_v34 = vpack.c.bf16 %v4601_v13, %v4600_v62  ;;  %v4602_v25 = vld [vmem:[#allocation44_spill] sm:$0xff]  ;;  %v4603_v45 = vld [vmem:[#allocation46_spill] sm:$0xff]  ;;  %2789 = vst [vmem:[%s3029_s13 + $0xd8] sm:$0xff] %v2741_v16   ;;  %2790 = vst [vmem:[%s3029_s13 + $0xe0] sm:$0xff] %v2746_v11  }
 0x311   : > { %v2761_v18 = vpack.c.bf16 %v4603_v45, %v4602_v25  ;;  %2791 = vst [vmem:[%s3029_s13 + $0xe8] sm:$0xff] %v2751_v43  }
 0x312   : > { %2792 = vst [vmem:[%s3029_s13 + $0xf0] sm:$0xff] %v2756_v34  }
 0x313   : > { %2793 = vst [vmem:[%s3029_s13 + $0xf8] sm:$0xff] %v2761_v18  }
 0x314 PF: > { %s16_s18 = sadd.s32 1, %s2954_s18  }
 0x315   : > { %p13_p7 = scmp.ge.s32.totalorder %s16_s18, 6  }
 0x317   :  { %15 = sbr.rel (!%p13_p7) target bundleno = 1 (0x1), region = 94 }

// kernel: discriminator_forward.5
= control target key start
LH: loop header
LB: loop body
LE: loop exit
PB: predicated region body
PF: predicated region fallthrough
CT: control target
= control target key end

     0   :  { %v2338_v0 = vmov 0   ;;  %v176_v3 = vlaneseq  ;;  %s3319_s3 = inlined_call_operand.vmem [shape: bf16[256,128], index: 3, kind: input, shape index: {}]   ;;  %s3320_s0 = inlined_call_operand.vmem [shape: bf16[400,256], index: 0, kind: input, shape index: {}]   ;;  %s3321_s1 = inlined_call_operand.vmem [shape: f32[1,256], index: 1, kind: input, shape index: {}]   ;;  %s3322_s2 = inlined_call_operand.vmem [shape: f32[1,256], index: 2, kind: input, shape index: {}]   ;;  %s3323_s4 = inlined_call_operand.vmem [shape: f32[1,128], index: 4, kind: input, shape index: {}]   ;;  %s3324_s5 = inlined_call_operand.vmem [shape: bf16[400,128], index: 5, kind: output, shape index: {0}]   ;;  %s3325_s6 = inlined_call_operand.vmem [shape: f32[8,128], index: 6, kind: output, shape index: {1}]   ;;  %s3326_s7 = inlined_call_operand.vmem [shape: f32[8,128], index: 7, kind: output, shape index: {2}]  }
   0x1   :  { %883 = vmatprep.subr.bf16.mxu0 %v2338_v0  ;;  %v2322_v1 = vld [vmem:[%s3319_s3] sm:$0xff]   ;;  %2289 = vmatprep.subr.bf16.mxu1 %v2338_v0  ;;  %v2323_v2 = vld [vmem:[%s3319_s3 + $0x8] sm:$0xff]   ;;  %v2324_v4 = vld [vmem:[%s3319_s3 + $0x10] sm:$0xff]  }
   0x2   :  { %884 = vmatpush1.bf16.msra.mxu0 %v2322_v1  ;;  %2305 = vmatpush1.bf16.msra.mxu1 %v2322_v1  ;;  %v2394_v5 = vshrl.u32 %v176_v3, 7  ;;  %v2325_v6 = vld [vmem:[%s3319_s3 + $0x18] sm:$0xff]   ;;  %v2326_v8 = vld [vmem:[%s3319_s3 + $0x20] sm:$0xff]   ;;  %v25_v11 = vld [vmem:[%s3320_s0 + $0x8] sm:$0xff] }
   0x3   :  { %885 = vmatprep.subr.bf16.mxu0 %v2338_v0  ;;  %2290 = vmatprep.subr.bf16.mxu1 %v2338_v0  ;;  %v24_v10 = vld [vmem:[%s3320_s0] sm:$0xff]  ;;  %v76_v15 = vunpack.c.l.bf16 %v25_v11  ;;  %v77_v16 = vunpack.c.h.bf16 %v25_v11  ;;  %v26_v18 = vld [vmem:[%s3320_s0 + $0x10] sm:$0xff]  ;;  %v27_v19 = vld [vmem:[%s3320_s0 + $0x18] sm:$0xff] }
   0x4   :  { %v178_v7 = vsub.s32 0, %v2394_v5  ;;  %v182_v9 = vsub.s32 1, %v2394_v5  ;;  %v174_v12 = vld [vmem:[%s3321_s1] sm:$0x3]  ;;  %v74_v13 = vunpack.c.l.bf16 %v24_v10  ;;  %v75_v14 = vunpack.c.h.bf16 %v24_v10  ;;  %v2327_v20 = vld [vmem:[%s3319_s3 + $0x28] sm:$0xff]   ;;  %v2328_v38 = vld [vmem:[%s3319_s3 + $0x30] sm:$0xff]  }
   0x5   :  { %v286_v17 = vld [vmem:[%s3322_s2] sm:$0x3]  ;;  %v79_v25 = vunpack.c.h.bf16 %v26_v18  ;;  %v81_v26 = vunpack.c.h.bf16 %v27_v19  ;;  %v78_v27 = vunpack.c.l.bf16 %v26_v18  ;;  %v80_v28 = vunpack.c.l.bf16 %v27_v19  ;;  %v2329_v51 = vld [vmem:[%s3319_s3 + $0x38] sm:$0xff]   ;;  %v29_v54 = vld [vmem:[%s3320_s0 + $0x28] sm:$0xff] }
   0x6   :  { %886 = vmatpush1.bf16.msra.mxu0 %v2323_v2  ;;  %2306 = vmatpush1.bf16.msra.mxu1 %v2323_v2  ;;  %v2429_v21 = vrot.slane %v174_v12, %v178_v7  ;;  %v2431_v22 = vrot.slane %v174_v12, %v182_v9  ;;  %v2433_v23 = vrot.slane %v286_v17, %v178_v7  ;;  %v2446_v33 = vld [vmem:[%s3320_s0 + $0x20] sm:$0xff]  ;;  %v85_v1 = vunpack.c.h.bf16 %v29_v54  ;;  %v2486_v3 = vld [vmem:[%s3320_s0 + $0x30] sm:$0xff] }
   0x7   :  { %887 = vmatprep.subr.bf16.mxu0 %v2338_v0  ;;  %2291 = vmatprep.subr.bf16.mxu1 %v2338_v0  ;;  %v2435_v24 = vrot.slane %v286_v17, %v182_v9  ;;  %v83_v46 = vunpack.c.h.bf16 %v2446_v33  ;;  %v2498_v9 = vld [vmem:[%s3320_s0 + $0x38] sm:$0xff]  ;;  %v87_v17 = vunpack.c.h.bf16 %v2486_v3 }
   0x8   :  { %v187_v29 = vmul.f32 %v2431_v22, %v75_v14  ;;  %v189_v30 = vmul.f32 %v2431_v22, %v77_v16  ;;  %v186_v31 = vmul.f32 %v2429_v21, %v74_v13  ;;  %v188_v32 = vmul.f32 %v2429_v21, %v76_v15 }
   0x9   :  { %v191_v34 = vmul.f32 %v2431_v22, %v79_v25  ;;  %v193_v35 = vmul.f32 %v2431_v22, %v81_v26  ;;  %v190_v36 = vmul.f32 %v2429_v21, %v78_v27  ;;  %v192_v37 = vmul.f32 %v2429_v21, %v80_v28  ;;  %v2331_v26 = vld [vmem:[%s3319_s3 + $0x48] sm:$0xff]  }
   0xa   :  { %888 = vmatpush1.bf16.msra.mxu0 %v2324_v4  ;;  %2307 = vmatpush1.bf16.msra.mxu1 %v2324_v4  ;;  %v299_v39 = vadd.f32 %v2435_v24, %v187_v29  ;;  %v301_v40 = vadd.f32 %v2435_v24, %v189_v30  ;;  %v298_v41 = vadd.f32 %v2433_v23, %v186_v31  ;;  %v2330_v4 = vld [vmem:[%s3319_s3 + $0x40] sm:$0xff]   ;;  %v84_v13 = vunpack.c.l.bf16 %v29_v54 }
   0xb   :  { %889 = vmatprep.subr.bf16.mxu0 %v2338_v0  ;;  %2292 = vmatprep.subr.bf16.mxu1 %v2338_v0  ;;  %v300_v42 = vadd.f32 %v2433_v23, %v188_v32  ;;  %v303_v43 = vadd.f32 %v2435_v24, %v191_v34  ;;  %v305_v44 = vadd.f32 %v2435_v24, %v193_v35  ;;  %v89_v25 = vunpack.c.h.bf16 %v2498_v9 }
   0xc   :  { %v302_v45 = vadd.f32 %v2433_v23, %v190_v36  ;;  %vm399_vm0 = vcmp.gt.f32.partialorder %v299_v39, 0.0  ;;  %vm401_vm1 = vcmp.gt.f32.partialorder %v301_v40, 0.0  ;;  %v499_v47 = vmul.f32 0.2, %v299_v39 }
   0xd   :  { %v501_v48 = vmul.f32 0.2, %v301_v40  ;;  %vm398_vm2 = vcmp.gt.f32.partialorder %v298_v41, 0.0  ;;  %vm400_vm3 = vcmp.gt.f32.partialorder %v300_v42, 0.0  ;;  %v498_v49 = vmul.f32 0.2, %v298_v41 }
   0xe   :  { %890 = vmatpush1.bf16.msra.mxu0 %v2325_v6  ;;  %2308 = vmatpush1.bf16.msra.mxu1 %v2325_v6  ;;  %v500_v50 = vmul.f32 0.2, %v300_v42  ;;  %v599_v52 = vsel %vm399_vm0, %v299_v39, %v499_v47  ;;  %vm403_vm4 = vcmp.gt.f32.partialorder %v303_v43, 0.0  ;;  %vm405_vm5 = vcmp.gt.f32.partialorder %v305_v44, 0.0  ;;  %v32_v39 = vld [vmem:[%s3320_s0 + $0x40] sm:$0xff] }
   0xf   :  { %891 = vmatprep.subr.bf16.mxu0 %v2338_v0  ;;  %2293 = vmatprep.subr.bf16.mxu1 %v2338_v0  ;;  %v601_v53 = vsel %vm401_vm1, %v301_v40, %v501_v48  ;;  %v2472_v56 = vsel %vm398_vm2, %v298_v41, %v498_v49  ;;  %v503_v58 = vmul.f32 0.2, %v303_v43  ;;  %v505_v60 = vmul.f32 0.2, %v305_v44  ;;  %v2332_v40 = vld [vmem:[%s3319_s3 + $0x50] sm:$0xff]  }
  0x10   :  { %v699_v55 = vpack.c.bf16 %v601_v53, %v599_v52  ;;  %v2474_v57 = vsel %vm400_vm3, %v300_v42, %v500_v50  ;;  %v304_v61 = vadd.f32 %v2433_v23, %v192_v37  ;;  %vm402_vm6 = vcmp.gt.f32.partialorder %v302_v45, 0.0  ;;  %v2559_v52 = vld [vmem:[%s3320_s0 + $0x50] sm:$0xff] }
  0x11   :  { %v698_v59 = vpack.c.bf16 %v2474_v57, %v2472_v56  ;;  %v2480_v62 = vsel %vm403_vm4, %v303_v43, %v503_v58  ;;  %v502_v63 = vmul.f32 0.2, %v302_v45  ;;  %v195_v2 = vmul.f32 %v2431_v22, %v83_v46 }
  0x12   :  { %892 = vmatpush1.bf16.msra.mxu0 %v2326_v8  ;;  %2309 = vmatpush1.bf16.msra.mxu1 %v2326_v8  ;;  %v2492_v6 = vsel %vm405_vm5, %v305_v44, %v505_v60  ;;  %vm404_vm7 = vcmp.gt.f32.partialorder %v304_v61, 0.0  ;;  %v504_v7 = vmul.f32 0.2, %v304_v61  ;;  %v82_v8 = vunpack.c.l.bf16 %v2446_v33  ;;  %v33_v44 = vld [vmem:[%s3320_s0 + $0x48] sm:$0xff]  ;;  %v2567_v60 = vld [vmem:[%s3320_s0 + $0x58] sm:$0xff] }
  0x13   :  { %893 = vmatprep.subr.bf16.mxu0 %v2338_v0  ;;  %2294 = vmatprep.subr.bf16.mxu1 %v2338_v0  ;;  %v701_v10 = vpack.c.bf16 %v2492_v6, %v2480_v62  ;;  %v2504_v11 = vsel %vm402_vm6, %v302_v45, %v502_v63  ;;  %v197_v12 = vmul.f32 %v2431_v22, %v85_v1  ;;  %v86_v47 = vunpack.c.l.bf16 %v2486_v3 }
  0x14   :  { %915 = vmatprep.mubr.bf16.mxu0 %v699_v55  ;;  %v2507_v14 = vsel %vm404_vm7, %v304_v61, %v504_v7  ;;  %v307_v15 = vadd.f32 %v2435_v24, %v195_v2  ;;  %v194_v16 = vmul.f32 %v2429_v21, %v82_v8  ;;  %v199_v29 = vmul.f32 %v2431_v22, %v87_v17  ;;  %v2333_v61 = vld [vmem:[%s3319_s3 + $0x58] sm:$0xff]   ;;  %v2334_v17 = vld [vmem:[%s3319_s3 + $0x60] sm:$0xff]  }
  0x15   :  { %v700_v18 = vpack.c.bf16 %v2507_v14, %v2504_v11  ;;  %v309_v19 = vadd.f32 %v2435_v24, %v197_v12  ;;  %v201_v32 = vmul.f32 %v2431_v22, %v89_v25  ;;  %v88_v50 = vunpack.c.l.bf16 %v2498_v9 }
  0x16   :  { %894 = vmatpush1.bf16.msra.mxu0 %v2327_v20  ;;  %2310 = vmatpush1.bf16.msra.mxu1 %v2327_v20  ;;  %v196_v20 = vmul.f32 %v2429_v21, %v84_v13  ;;  %vm407_vm8 = vcmp.gt.f32.partialorder %v307_v15, 0.0  ;;  %v507_v27 = vmul.f32 0.2, %v307_v15  ;;  %v306_v28 = vadd.f32 %v2433_v23, %v194_v16 }
  0x17   :  { %895 = vmatprep.subr.bf16.mxu0 %v2338_v0  ;;  %2295 = vmatprep.subr.bf16.mxu1 %v2338_v0  ;;  %vm409_vm9 = vcmp.gt.f32.partialorder %v309_v19, 0.0  ;;  %v509_v30 = vmul.f32 0.2, %v309_v19  ;;  %v311_v35 = vadd.f32 %v2435_v24, %v199_v29  ;;  %v198_v54 = vmul.f32 %v2429_v21, %v86_v47 }
  0x18   :  { %v308_v31 = vadd.f32 %v2433_v23, %v196_v20  ;;  %v2526_v33 = vsel %vm407_vm8, %v307_v15, %v507_v27  ;;  %vm406_vm10 = vcmp.gt.f32.partialorder %v306_v28, 0.0  ;;  %v506_v34 = vmul.f32 0.2, %v306_v28 }
  0x19   :  { %v2530_v36 = vsel %vm409_vm9, %v309_v19, %v509_v30  ;;  %vm411_vm12 = vcmp.gt.f32.partialorder %v311_v35, 0.0  ;;  %v511_v43 = vmul.f32 0.2, %v311_v35  ;;  %v93_v55 = vunpack.c.h.bf16 %v33_v44 }
  0x1a   :  { %896 = vmatpush1.bf16.msra.mxu0 %v2328_v38  ;;  %2311 = vmatpush1.bf16.msra.mxu1 %v2328_v38  ;;  %vm408_vm11 = vcmp.gt.f32.partialorder %v308_v31, 0.0  ;;  %v508_v37 = vmul.f32 0.2, %v308_v31  ;;  %v313_v38 = vadd.f32 %v2435_v24, %v201_v32  ;;  %v703_v41 = vpack.c.bf16 %v2530_v36, %v2526_v33 }
  0x1b   :  { %897 = vmatprep.subr.bf16.mxu0 %v2338_v0  ;;  %2296 = vmatprep.subr.bf16.mxu1 %v2338_v0  ;;  %v2541_v42 = vsel %vm406_vm10, %v306_v28, %v506_v34  ;;  %v2552_v49 = vsel %vm411_vm12, %v311_v35, %v511_v43  ;;  %v90_v58 = vunpack.c.l.bf16 %v32_v39  ;;  %v200_v1 = vmul.f32 %v2429_v21, %v88_v50  ;;  %v36_v35 = vld [vmem:[%s3320_s0 + $0x60] sm:$0xff]  ;;  %v2335_v43 = vld [vmem:[%s3319_s3 + $0x68] sm:$0xff]  }
  0x1c   :  { %v2547_v45 = vsel %vm408_vm11, %v308_v31, %v508_v37  ;;  %vm413_vm13 = vcmp.gt.f32.partialorder %v313_v38, 0.0  ;;  %v513_v46 = vmul.f32 0.2, %v313_v38  ;;  %v92_v3 = vunpack.c.l.bf16 %v33_v44 }
  0x1d   :  { %v702_v48 = vpack.c.bf16 %v2547_v45, %v2541_v42  ;;  %v205_v7 = vmul.f32 %v2431_v22, %v93_v55  ;;  %v202_v8 = vmul.f32 %v2429_v21, %v90_v58  ;;  %v95_v9 = vunpack.c.h.bf16 %v2559_v52 }
  0x1e   :  { %898 = vmatpush1.bf16.msra.mxu0 %v2329_v51  ;;  %2312 = vmatpush1.bf16.msra.mxu1 %v2329_v51  ;;  %v91_v51 = vunpack.c.h.bf16 %v32_v39  ;;  %v2561_v53 = vsel %vm413_vm13, %v313_v38, %v513_v46  ;;  %v312_v12 = vadd.f32 %v2433_v23, %v200_v1  ;;  %v204_v15 = vmul.f32 %v2429_v21, %v92_v3 }
  0x1f   :  { %899 = vmatprep.subr.bf16.mxu0 %v2338_v0  ;;  %2297 = vmatprep.subr.bf16.mxu1 %v2338_v0  ;;  %v705_v63 = vpack.c.bf16 %v2561_v53, %v2552_v49  ;;  %v97_v16 = vunpack.c.h.bf16 %v2567_v60  ;;  %v317_v20 = vadd.f32 %v2435_v24, %v205_v7  ;;  %v314_v25 = vadd.f32 %v2433_v23, %v202_v8 }
  0x20   :  { %v203_v2 = vmul.f32 %v2431_v22, %v91_v51  ;;  %vm412_vm15 = vcmp.gt.f32.partialorder %v312_v12, 0.0  ;;  %v316_v30 = vadd.f32 %v2433_v23, %v204_v15  ;;  %v207_v47 = vmul.f32 %v2431_v22, %v95_v9 }
  0x21   :  { %vm417_vm1 = vcmp.gt.f32.partialorder %v317_v20, 0.0  ;;  %v517_v29 = vmul.f32 0.2, %v317_v20  ;;  %vm414_vm2 = vcmp.gt.f32.partialorder %v314_v25, 0.0  ;;  %v514_v34 = vmul.f32 0.2, %v314_v25 }
  0x22   :  { %900 = vmatpush1.bf16.msra.mxu0 %v2330_v4  ;;  %2313 = vmatpush1.bf16.msra.mxu1 %v2330_v4  ;;  %v310_v4 = vadd.f32 %v2433_v23, %v198_v54  ;;  %v315_v13 = vadd.f32 %v2435_v24, %v203_v2  ;;  %vm416_vm3 = vcmp.gt.f32.partialorder %v316_v30, 0.0  ;;  %v516_v39 = vmul.f32 0.2, %v316_v30 }
  0x23   :  { %901 = vmatprep.subr.bf16.mxu0 %v2338_v0  ;;  %2298 = vmatprep.subr.bf16.mxu1 %v2338_v0  ;;  %v2605_v38 = vsel %vm417_vm1, %v317_v20, %v517_v29  ;;  %v2615_v46 = vsel %vm414_vm2, %v314_v25, %v514_v34  ;;  %v209_v50 = vmul.f32 %v2431_v22, %v97_v16  ;;  %v94_v54 = vunpack.c.l.bf16 %v2559_v52  ;;  %v2337_v34 = vld [vmem:[%s3319_s3 + $0x78] sm:$0xff]  }
  0x24   :  { %vm410_vm14 = vcmp.gt.f32.partialorder %v310_v4, 0.0  ;;  %v510_v19 = vmul.f32 0.2, %v310_v4  ;;  %vm415_vm0 = vcmp.gt.f32.partialorder %v315_v13, 0.0  ;;  %v515_v27 = vmul.f32 0.2, %v315_v13 }
  0x25   :  { %v2620_v51 = vsel %vm416_vm3, %v316_v30, %v516_v39  ;;  %v96_v55 = vunpack.c.l.bf16 %v2567_v60  ;;  %v99_v58 = vunpack.c.h.bf16 %v36_v35  ;;  %v319_v1 = vadd.f32 %v2435_v24, %v207_v47 }
  0x26   :  { %902 = vmatpush1.bf16.msra.mxu0 %v2331_v26  ;;  %2314 = vmatpush1.bf16.msra.mxu1 %v2331_v26  ;;  %v512_v26 = vmul.f32 0.2, %v312_v12  ;;  %v2592_v28 = vsel %vm410_vm14, %v310_v4, %v510_v19  ;;  %v2597_v32 = vsel %vm415_vm0, %v315_v13, %v515_v27  ;;  %v321_v2 = vadd.f32 %v2435_v24, %v209_v50  ;;  %v2336_v4 = vld [vmem:[%s3319_s3 + $0x70] sm:$0xff]  }
  0x27   :  { %903 = vmatprep.subr.bf16.mxu0 %v2338_v0  ;;  %2299 = vmatprep.subr.bf16.mxu1 %v2338_v0  ;;  %v707_v44 = vpack.c.bf16 %v2605_v38, %v2597_v32  ;;  %v206_v7 = vmul.f32 %v2429_v21, %v94_v54  ;;  %v208_v52 = vmul.f32 %v2429_v21, %v96_v55  ;;  %v98_v8 = vunpack.c.l.bf16 %v36_v35  ;;  %v50_v27 = vld [vmem:[%s3320_s0 + $0xd0] sm:$0xff]  ;;  %v51_v54 = vld [vmem:[%s3320_s0 + $0xd8] sm:$0xff] }
  0x28   :  { %v2595_v31 = vsel %vm412_vm15, %v312_v12, %v512_v26  ;;  %v211_v60 = vmul.f32 %v2431_v22, %v99_v58  ;;  %vm419_vm4 = vcmp.gt.f32.partialorder %v319_v1, 0.0  ;;  %vm421_vm5 = vcmp.gt.f32.partialorder %v321_v2, 0.0 }
  0x29   :  { %v704_v37 = vpack.c.bf16 %v2595_v31, %v2592_v28  ;;  %v519_v9 = vmul.f32 0.2, %v319_v1  ;;  %v521_v12 = vmul.f32 0.2, %v321_v2  ;;  %v318_v13 = vadd.f32 %v2433_v23, %v206_v7 }
  0x2a   :  { %904 = vmatpush1.bf16.msra.mxu0 %v2332_v40  ;;  %2315 = vmatpush1.bf16.msra.mxu1 %v2332_v40  ;;  %v37_v40 = vld [vmem:[%s3320_s0 + $0x68] sm:$0xff]  ;;  %v320_v15 = vadd.f32 %v2433_v23, %v208_v52  ;;  %v323_v25 = vadd.f32 %v2435_v24, %v211_v60  ;;  %v210_v26 = vmul.f32 %v2429_v21, %v98_v8  ;;  %v126_v55 = vunpack.c.l.bf16 %v50_v27 }
  0x2b   :  { %905 = vmatprep.subr.bf16.mxu0 %v2338_v0  ;;  %2300 = vmatprep.subr.bf16.mxu1 %v2338_v0  ;;  %v101_v3 = vunpack.c.h.bf16 %v37_v40  ;;  %v2639_v19 = vsel %vm419_vm4, %v319_v1, %v519_v9  ;;  %v2641_v20 = vsel %vm421_vm5, %v321_v2, %v521_v12  ;;  %vm418_vm6 = vcmp.gt.f32.partialorder %v318_v13, 0.0  ;;  %v39_v12 = vld [vmem:[%s3320_s0 + $0x78] sm:$0xff] }
  0x2c   :  { %v709_v29 = vpack.c.bf16 %v2641_v20, %v2639_v19  ;;  %vm420_vm7 = vcmp.gt.f32.partialorder %v320_v15, 0.0  ;;  %v518_v30 = vmul.f32 0.2, %v318_v13  ;;  %v520_v35 = vmul.f32 0.2, %v320_v15  ;;  %v44_v19 = vld [vmem:[%s3320_s0 + $0xa0] sm:$0xff] }
  0x2d   :  { %v213_v16 = vmul.f32 %v2431_v22, %v101_v3  ;;  %vm423_vm8 = vcmp.gt.f32.partialorder %v323_v25, 0.0  ;;  %v322_v50 = vadd.f32 %v2433_v23, %v210_v26  ;;  %v127_v60 = vunpack.c.h.bf16 %v50_v27  ;;  %v45_v20 = vld [vmem:[%s3320_s0 + $0xa8] sm:$0xff] }
  0x2e   :  { %906 = vmatpush1.bf16.msra.mxu0 %v2333_v61  ;;  %2316 = vmatpush1.bf16.msra.mxu1 %v2333_v61  ;;  %v706_v61 = vpack.c.bf16 %v2620_v51, %v2615_v46  ;;  %v2663_v58 = vsel %vm420_vm7, %v320_v15, %v520_v35  ;;  %v128_v8 = vunpack.c.l.bf16 %v51_v54  ;;  %v129_v9 = vunpack.c.h.bf16 %v51_v54 }
  0x2f   :  { %907 = vmatprep.subr.bf16.mxu0 %v2338_v0  ;;  %2301 = vmatprep.subr.bf16.mxu1 %v2338_v0  ;;  %v325_v39 = vadd.f32 %v2435_v24, %v213_v16  ;;  %vm422_vm10 = vcmp.gt.f32.partialorder %v322_v50, 0.0  ;;  %v522_v7 = vmul.f32 0.2, %v322_v50  ;;  %v238_v26 = vmul.f32 %v2429_v21, %v126_v55 }
  0x30   :  { %v240_v27 = vmul.f32 %v2429_v21, %v128_v8  ;;  %v105_v35 = vunpack.c.h.bf16 %v39_v12  ;;  %v104_v55 = vunpack.c.l.bf16 %v39_v12 }
  0x31   :  { %vm425_vm9 = vcmp.gt.f32.partialorder %v325_v39, 0.0  ;;  %v525_v1 = vmul.f32 0.2, %v325_v39  ;;  %v2681_v16 = vsel %vm422_vm10, %v322_v50, %v522_v7  ;;  %v350_v54 = vadd.f32 %v2433_v23, %v238_v26 }
  0x32   :  { %908 = vmatpush1.bf16.msra.mxu0 %v2334_v17  ;;  %2317 = vmatpush1.bf16.msra.mxu1 %v2334_v17  ;;  %v100_v17 = vunpack.c.l.bf16 %v37_v40  ;;  %v523_v40 = vmul.f32 0.2, %v323_v25  ;;  %v352_v56 = vadd.f32 %v2433_v23, %v240_v27 }
  0x33   :  { %909 = vmatprep.subr.bf16.mxu0 %v2338_v0  ;;  %2302 = vmatprep.subr.bf16.mxu1 %v2338_v0  ;;  %v2671_v52 = vsel %vm425_vm9, %v325_v39, %v525_v1  ;;  %vm450_vm14 = vcmp.gt.f32.partialorder %v350_v54, 0.0 }
  0x34   :  { %v212_v47 = vmul.f32 %v2429_v21, %v100_v17  ;;  %v2666_v2 = vsel %vm423_vm8, %v323_v25, %v523_v40  ;;  %v239_v17 = vmul.f32 %v2431_v22, %v127_v60  ;;  %v241_v25 = vmul.f32 %v2431_v22, %v129_v9  ;;  %v52_v9 = vld [vmem:[%s3320_s0 + $0xe0] sm:$0xff] }
  0x35   :  { %vm452_vm15 = vcmp.gt.f32.partialorder %v352_v56, 0.0  ;;  %v552_v1 = vmul.f32 0.2, %v352_v56 }
  0x36   :  { %910 = vmatpush1.bf16.msra.mxu0 %v2335_v43  ;;  %2318 = vmatpush1.bf16.msra.mxu1 %v2335_v43  ;;  %v2656_v43 = vsel %vm418_vm6, %v318_v13, %v518_v30  ;;  %v711_v13 = vpack.c.bf16 %v2671_v52, %v2666_v2  ;;  %v353_v50 = vadd.f32 %v2435_v24, %v241_v25  ;;  %v53_v25 = vld [vmem:[%s3320_s0 + $0xe8] sm:$0xff]  ;;  %v58_v52 = vld [vmem:[%s3320_s0 + $0x110] sm:$0xff] }
  0x37   :  { %911 = vmatprep.subr.bf16.mxu0 %v2338_v0  ;;  %2303 = vmatprep.subr.bf16.mxu1 %v2338_v0  ;;  %v708_v3 = vpack.c.bf16 %v2663_v58, %v2656_v43 }
  0x38   :  { %vm453_vm13 = vcmp.gt.f32.partialorder %v353_v50, 0.0  ;;  %v553_v6 = vmul.f32 0.2, %v353_v50 }
  0x3a   :  { %912 = vmatpush1.bf16.msra.mxu0 %v2336_v4  ;;  %2319 = vmatpush1.bf16.msra.mxu1 %v2336_v4  ;;  %v324_v4 = vadd.f32 %v2433_v23, %v212_v47  ;;  %v351_v47 = vadd.f32 %v2435_v24, %v239_v17  ;;  %v653_v7 = vsel %vm453_vm13, %v353_v50, %v553_v6  ;;  %v131_v50 = vunpack.c.h.bf16 %v52_v9 }
  0x3b   :  { %913 = vmatprep.subr.bf16.mxu0 %v2338_v0  ;;  %2304 = vmatprep.subr.bf16.mxu1 %v2338_v0  ;;  %v38_v0 = vld [vmem:[%s3320_s0 + $0x70] sm:$0xff] }
  0x3c   :  { %vm424_vm11 = vcmp.gt.f32.partialorder %v324_v4, 0.0  ;;  %v524_v15 = vmul.f32 0.2, %v324_v4  ;;  %v102_v39 = vunpack.c.l.bf16 %v38_v0  ;;  %vm451_vm12 = vcmp.gt.f32.partialorder %v351_v47, 0.0 }
  0x3d   :  { %v551_v62 = vmul.f32 0.2, %v351_v47  ;;  %v243_v36 = vmul.f32 %v2431_v22, %v131_v50 }
  0x3e   :  { %914 = vmatpush1.bf16.msra.mxu0 %v2337_v34  ;;  %2320 = vmatpush1.bf16.msra.mxu1 %v2337_v34  ;;  %v2690_v30 = vsel %vm424_vm11, %v324_v4, %v524_v15  ;;  %v103_v34 = vunpack.c.h.bf16 %v38_v0  ;;  %v652_v15 = vsel %vm452_vm15, %v352_v56, %v552_v1  ;;  %v214_v17 = vmul.f32 %v2429_v21, %v102_v39 }
  0x3f   :  { %v710_v40 = vpack.c.bf16 %v2690_v30, %v2681_v16  ;;  %v651_v4 = vsel %vm451_vm12, %v351_v47, %v551_v62  ;;  %v130_v56 = vunpack.c.l.bf16 %v52_v9  ;;  %v41_v62 = vld [vmem:[%s3320_s0 + $0x88] sm:$0xff]  ;;  %v142_v16 = vunpack.c.l.bf16 %v58_v52  ;;  %v46_v30 = vld [vmem:[%s3320_s0 + $0xb0] sm:$0xff] }
  0x40   :  { %v215_v57 = vmul.f32 %v2431_v22, %v103_v34  ;;  %v725_v0 = vpack.c.bf16 %v653_v7, %v651_v4  ;;  %v326_v47 = vadd.f32 %v2433_v23, %v214_v17  ;;  %v355_v4 = vadd.f32 %v2435_v24, %v243_v36 }
  0x41   :  { %916 = vmatmul.mubr.bf16.vlgmr.msra.gmra.mrb[0].mxu0 %v698_v59  ;;  %v217_v59 = vmul.f32 %v2431_v22, %v105_v35  ;;  %v216_v35 = vmul.f32 %v2429_v21, %v104_v55  ;;  %v242_v55 = vmul.f32 %v2429_v21, %v130_v56 }
  0x42   :  { %923 = vmatprep.mubr.bf16.mxu0 %v701_v10  ;;  %v550_v10 = vmul.f32 0.2, %v350_v54  ;;  %v327_v60 = vadd.f32 %v2435_v24, %v215_v57  ;;  %1019 = vmatprep.mubr.bf16.mxu1 %v725_v0  ;;  %v132_v57 = vunpack.c.l.bf16 %v53_v25  ;;  %vm426_vm2 = vcmp.gt.f32.partialorder %v326_v47, 0.0 }
  0x43   :  { %v329_v8 = vadd.f32 %v2435_v24, %v217_v59  ;;  %v328_v11 = vadd.f32 %v2433_v23, %v216_v35  ;;  %v526_v14 = vmul.f32 0.2, %v326_v47  ;;  %vm455_vm4 = vcmp.gt.f32.partialorder %v355_v4, 0.0 }
  0x44   :  { %v650_v12 = vsel %vm450_vm14, %v350_v54, %v550_v10  ;;  %vm427_vm0 = vcmp.gt.f32.partialorder %v327_v60, 0.0  ;;  %v527_v27 = vmul.f32 0.2, %v327_v60  ;;  %v133_v54 = vunpack.c.h.bf16 %v53_v25 }
  0x45   :  { %v724_v26 = vpack.c.bf16 %v652_v15, %v650_v12  ;;  %vm429_vm1 = vcmp.gt.f32.partialorder %v329_v8, 0.0  ;;  %v529_v34 = vmul.f32 0.2, %v329_v8  ;;  %vm428_vm3 = vcmp.gt.f32.partialorder %v328_v11, 0.0 }
  0x46   :  { %v2720_v39 = vsel %vm427_vm0, %v327_v60, %v527_v27  ;;  %v528_v6 = vmul.f32 0.2, %v328_v11  ;;  %v2736_v10 = vsel %vm426_vm2, %v326_v47, %v526_v14  ;;  %v244_v1 = vmul.f32 %v2429_v21, %v132_v57 }
  0x47   :  { %1020 = vmatmul.mubr.bf16.vlgmr.msra.gmra.mrb[0].mxu1 %v724_v26  ;;  %v2722_v59 = vsel %vm429_vm1, %v329_v8, %v529_v34  ;;  %v354_v60 = vadd.f32 %v2433_v23, %v242_v55  ;;  %v109_v12 = vunpack.c.h.bf16 %v41_v62  ;;  %v555_v25 = vmul.f32 0.2, %v355_v4 }
  0x48   :  { %v713_v33 = vpack.c.bf16 %v2722_v59, %v2720_v39  ;;  %v2742_v9 = vsel %vm428_vm3, %v328_v11, %v528_v6  ;;  %v356_v0 = vadd.f32 %v2433_v23, %v244_v1 }
  0x49   :  { %924 = vmatmul.mubr.bf16.gmra.mrb[4].mxu0 %v700_v18  ;;  %v40_v18 = vld [vmem:[%s3320_s0 + $0x80] sm:$0xff]  ;;  %v712_v17 = vpack.c.bf16 %v2742_v9, %v2736_v10  ;;  %vm454_vm6 = vcmp.gt.f32.partialorder %v354_v60, 0.0  ;;  %v554_v27 = vmul.f32 0.2, %v354_v60  ;;  %v655_v34 = vsel %vm455_vm4, %v355_v4, %v555_v25 }
  0x4a   :  { %931 = vmatprep.mubr.bf16.mxu0 %v703_v41  ;;  %v245_v41 = vmul.f32 %v2431_v22, %v133_v54  ;;  %v107_v8 = vunpack.c.h.bf16 %v40_v18  ;;  %v106_v15 = vunpack.c.l.bf16 %v40_v18  ;;  %vm456_vm7 = vcmp.gt.f32.partialorder %v356_v0, 0.0  ;;  %v54_v54 = vld [vmem:[%s3320_s0 + $0xf0] sm:$0xff]  ;;  %v60_v10 = vld [vmem:[%s3320_s0 + $0x120] sm:$0xff] }
  0x4b   :  { %v556_v35 = vmul.f32 0.2, %v356_v0  ;;  %v221_v50 = vmul.f32 %v2431_v22, %v109_v12  ;;  %v654_v45 = vsel %vm454_vm6, %v354_v60, %v554_v27  ;;  %v42_v12 = vld [vmem:[%s3320_s0 + $0x90] sm:$0xff] }
  0x4c   :  { %v357_v7 = vadd.f32 %v2435_v24, %v245_v41  ;;  %v219_v47 = vmul.f32 %v2431_v22, %v107_v8  ;;  %v218_v56 = vmul.f32 %v2429_v21, %v106_v15  ;;  %v135_v41 = vunpack.c.h.bf16 %v54_v54  ;;  %v43_v15 = vld [vmem:[%s3320_s0 + $0x98] sm:$0xff] }
  0x4d   :  { %v656_v11 = vsel %vm456_vm7, %v356_v0, %v556_v35  ;;  %v333_v53 = vadd.f32 %v2435_v24, %v221_v50  ;;  %v134_v0 = vunpack.c.l.bf16 %v54_v54  ;;  %v111_v31 = vunpack.c.h.bf16 %v42_v12 }
  0x4e   :  { %vm457_vm5 = vcmp.gt.f32.partialorder %v357_v7, 0.0  ;;  %v557_v26 = vmul.f32 0.2, %v357_v7  ;;  %v331_v49 = vadd.f32 %v2435_v24, %v219_v47  ;;  %v726_v14 = vpack.c.bf16 %v656_v11, %v654_v45 }
  0x4f   :  { %v330_v36 = vadd.f32 %v2433_v23, %v218_v56  ;;  %vm433_vm9 = vcmp.gt.f32.partialorder %v333_v53, 0.0  ;;  %v247_v8 = vmul.f32 %v2431_v22, %v135_v41  ;;  %v246_v50 = vmul.f32 %v2429_v21, %v134_v0 }
  0x50   :  { %v657_v42 = vsel %vm457_vm5, %v357_v7, %v557_v26  ;;  %vm431_vm8 = vcmp.gt.f32.partialorder %v331_v49, 0.0  ;;  %v531_v55 = vmul.f32 0.2, %v331_v49  ;;  %v110_v54 = vunpack.c.l.bf16 %v42_v12 }
  0x51   :  { %932 = vmatmul.mubr.bf16.gmra.mrb[8].mxu0 %v702_v48  ;;  %v108_v48 = vunpack.c.l.bf16 %v41_v62  ;;  %v727_v57 = vpack.c.bf16 %v657_v42, %v655_v34  ;;  %v533_v62 = vmul.f32 0.2, %v333_v53  ;;  %vm430_vm10 = vcmp.gt.f32.partialorder %v330_v36, 0.0 }
  0x52   :  { %939 = vmatprep.mubr.bf16.mxu0 %v705_v63  ;;  %v55_v63 = vld [vmem:[%s3320_s0 + $0xf8] sm:$0xff]  ;;  %v530_v1 = vmul.f32 0.2, %v330_v36  ;;  %v2767_v7 = vsel %vm431_vm8, %v331_v49, %v531_v55  ;;  %v359_v35 = vadd.f32 %v2435_v24, %v247_v8  ;;  %v112_v49 = vunpack.c.l.bf16 %v43_v15  ;;  %v57_v8 = vld [vmem:[%s3320_s0 + $0x108] sm:$0xff] }
  0x53   :  { %v220_v18 = vmul.f32 %v2429_v21, %v108_v48  ;;  %1027 = vmatprep.mubr.bf16.mxu1 %v727_v57  ;;  %v137_v4 = vunpack.c.h.bf16 %v55_v63  ;;  %v2769_v60 = vsel %vm433_vm9, %v333_v53, %v533_v62  ;;  %v136_v47 = vunpack.c.l.bf16 %v55_v63  ;;  %v56_v62 = vld [vmem:[%s3320_s0 + $0x100] sm:$0xff] }
  0x54   :  { %1028 = vmatmul.mubr.bf16.gmra.mrb[4].mxu1 %v726_v14  ;;  %v715_v25 = vpack.c.bf16 %v2769_v60, %v2767_v7  ;;  %v2783_v27 = vsel %vm430_vm10, %v330_v36, %v530_v1  ;;  %vm459_vm12 = vcmp.gt.f32.partialorder %v359_v35, 0.0  ;;  %v559_v32 = vmul.f32 0.2, %v359_v35  ;;  %v61_v7 = vld [vmem:[%s3320_s0 + $0x128] sm:$0xff] }
  0x55   :  { %v332_v6 = vadd.f32 %v2433_v23, %v220_v18  ;;  %v249_v34 = vmul.f32 %v2431_v22, %v137_v4  ;;  %v248_v38 = vmul.f32 %v2429_v21, %v136_v47  ;;  %v223_v48 = vmul.f32 %v2431_v22, %v111_v31 }
  0x56   :  { %v659_v11 = vsel %vm459_vm12, %v359_v35, %v559_v32  ;;  %v222_v41 = vmul.f32 %v2429_v21, %v110_v54  ;;  %v224_v55 = vmul.f32 %v2429_v21, %v112_v49  ;;  %v141_v47 = vunpack.c.h.bf16 %v57_v8 }
  0x57   :  { %vm432_vm11 = vcmp.gt.f32.partialorder %v332_v6, 0.0  ;;  %v532_v26 = vmul.f32 0.2, %v332_v6  ;;  %v361_v45 = vadd.f32 %v2435_v24, %v249_v34  ;;  %v360_v53 = vadd.f32 %v2433_v23, %v248_v38 }
  0x58   :  { %v335_v14 = vadd.f32 %v2435_v24, %v223_v48  ;;  %v334_v46 = vadd.f32 %v2433_v23, %v222_v41  ;;  %v336_v51 = vadd.f32 %v2433_v23, %v224_v55  ;;  %v253_v54 = vmul.f32 %v2431_v22, %v141_v47 }
  0x59   :  { %940 = vmatmul.mubr.bf16.gmra.mrb[12].mxu0 %v704_v37  ;;  %v2791_v28 = vsel %vm432_vm11, %v332_v6, %v532_v26  ;;  %v113_v37 = vunpack.c.h.bf16 %v43_v15  ;;  %vm461_vm13 = vcmp.gt.f32.partialorder %v361_v45, 0.0  ;;  %v561_v57 = vmul.f32 0.2, %v361_v45 }
  0x5a   :  { %947 = vmatprep.mubr.bf16.mxu0 %v707_v44  ;;  %v714_v42 = vpack.c.bf16 %v2791_v28, %v2783_v27  ;;  %v358_v44 = vadd.f32 %v2433_v23, %v246_v50  ;;  %vm460_vm15 = vcmp.gt.f32.partialorder %v360_v53, 0.0  ;;  %v560_v1 = vmul.f32 0.2, %v360_v53 }
  0x5b   :  { %v225_v56 = vmul.f32 %v2431_v22, %v113_v37  ;;  %v661_v18 = vsel %vm461_vm13, %v361_v45, %v561_v57  ;;  %vm435_vm0 = vcmp.gt.f32.partialorder %v335_v14, 0.0  ;;  %v535_v0 = vmul.f32 0.2, %v335_v14 }
  0x5c   :  { %vm458_vm14 = vcmp.gt.f32.partialorder %v358_v44, 0.0  ;;  %v558_v63 = vmul.f32 0.2, %v358_v44  ;;  %v729_v6 = vpack.c.bf16 %v661_v18, %v659_v11  ;;  %v660_v15 = vsel %vm460_vm15, %v360_v53, %v560_v1 }
  0x5d   :  { %v337_v36 = vadd.f32 %v2435_v24, %v225_v56  ;;  %v2819_v34 = vsel %vm435_vm0, %v335_v14, %v535_v0  ;;  %vm434_vm2 = vcmp.gt.f32.partialorder %v334_v46, 0.0  ;;  %vm436_vm3 = vcmp.gt.f32.partialorder %v336_v51, 0.0 }
  0x5e   :  { %v658_v4 = vsel %vm458_vm14, %v358_v44, %v558_v63  ;;  %1035 = vmatprep.mubr.bf16.mxu1 %v729_v6  ;;  %v534_v50 = vmul.f32 0.2, %v334_v46  ;;  %v536_v31 = vmul.f32 0.2, %v336_v51  ;;  %v138_v45 = vunpack.c.l.bf16 %v56_v62 }
  0x5f   :  { %vm437_vm1 = vcmp.gt.f32.partialorder %v337_v36, 0.0  ;;  %v537_v12 = vmul.f32 0.2, %v337_v36  ;;  %v728_v26 = vpack.c.bf16 %v660_v15, %v658_v4  ;;  %v140_v38 = vunpack.c.l.bf16 %v57_v8 }
  0x60   :  { %v2833_v32 = vsel %vm434_vm2, %v334_v46, %v534_v50  ;;  %v115_v44 = vunpack.c.h.bf16 %v44_v19  ;;  %v117_v48 = vunpack.c.h.bf16 %v45_v20  ;;  %v2835_v56 = vsel %vm436_vm3, %v336_v51, %v536_v31 }
  0x61   :  { %948 = vmatmul.mubr.bf16.gmra.mrb[16].mxu0 %v706_v61  ;;  %v139_v61 = vunpack.c.h.bf16 %v56_v62  ;;  %v2821_v35 = vsel %vm437_vm1, %v337_v36, %v537_v12  ;;  %1036 = vmatmul.mubr.bf16.gmra.mrb[8].mxu1 %v728_v26  ;;  %v365_v11 = vadd.f32 %v2435_v24, %v253_v54  ;;  %v250_v49 = vmul.f32 %v2429_v21, %v138_v45 }
  0x62   :  { %955 = vmatprep.mubr.bf16.mxu0 %v709_v29  ;;  %v717_v29 = vpack.c.bf16 %v2821_v35, %v2819_v34  ;;  %v716_v53 = vpack.c.bf16 %v2835_v56, %v2833_v32  ;;  %v252_v63 = vmul.f32 %v2429_v21, %v140_v38  ;;  %v227_v14 = vmul.f32 %v2431_v22, %v115_v44 }
  0x63   :  { %v251_v37 = vmul.f32 %v2431_v22, %v139_v61  ;;  %v229_v18 = vmul.f32 %v2431_v22, %v117_v48  ;;  %vm465_vm5 = vcmp.gt.f32.partialorder %v365_v11, 0.0  ;;  %v565_v41 = vmul.f32 0.2, %v365_v11 }
  0x64   :  { %v362_v43 = vadd.f32 %v2433_v23, %v250_v49  ;;  %v364_v58 = vadd.f32 %v2433_v23, %v252_v63  ;;  %v114_v1 = vunpack.c.l.bf16 %v44_v19  ;;  %v116_v4 = vunpack.c.l.bf16 %v45_v20 }
  0x65   :  { %v363_v57 = vadd.f32 %v2435_v24, %v251_v37  ;;  %v341_v55 = vadd.f32 %v2435_v24, %v229_v18  ;;  %v665_v6 = vsel %vm465_vm5, %v365_v11, %v565_v41  ;;  %v143_v19 = vunpack.c.h.bf16 %v58_v52 }
  0x66   :  { %vm462_vm6 = vcmp.gt.f32.partialorder %v362_v43, 0.0  ;;  %vm464_vm7 = vcmp.gt.f32.partialorder %v364_v58, 0.0  ;;  %v562_v2 = vmul.f32 0.2, %v362_v43  ;;  %v564_v0 = vmul.f32 0.2, %v364_v58 }
  0x67   :  { %vm463_vm4 = vcmp.gt.f32.partialorder %v363_v57, 0.0  ;;  %v563_v36 = vmul.f32 0.2, %v363_v57  ;;  %vm441_vm9 = vcmp.gt.f32.partialorder %v341_v55, 0.0  ;;  %v541_v46 = vmul.f32 0.2, %v341_v55 }
  0x68   :  { %v662_v15 = vsel %vm462_vm6, %v362_v43, %v562_v2  ;;  %v226_v51 = vmul.f32 %v2429_v21, %v114_v1  ;;  %v228_v61 = vmul.f32 %v2429_v21, %v116_v4  ;;  %v664_v26 = vsel %vm464_vm7, %v364_v58, %v564_v0 }
  0x69   :  { %956 = vmatmul.mubr.bf16.gmra.mrb[20].mxu0 %v708_v3  ;;  %v339_v3 = vadd.f32 %v2435_v24, %v227_v14  ;;  %v663_v62 = vsel %vm463_vm4, %v363_v57, %v563_v36  ;;  %v730_v50 = vpack.c.bf16 %v664_v26, %v662_v15  ;;  %v2868_v31 = vsel %vm441_vm9, %v341_v55, %v541_v46 }
  0x6a   :  { %963 = vmatprep.mubr.bf16.mxu0 %v711_v13  ;;  %v731_v8 = vpack.c.bf16 %v665_v6, %v663_v62  ;;  %v59_v13 = vld [vmem:[%s3320_s0 + $0x118] sm:$0xff]  ;;  %v338_v37 = vadd.f32 %v2433_v23, %v226_v51  ;;  %v340_v54 = vadd.f32 %v2433_v23, %v228_v61  ;;  %v255_v38 = vmul.f32 %v2431_v22, %v143_v19 }
  0x6b   :  { %vm439_vm8 = vcmp.gt.f32.partialorder %v339_v3, 0.0  ;;  %v539_v12 = vmul.f32 0.2, %v339_v3  ;;  %v145_v20 = vunpack.c.h.bf16 %v59_v13  ;;  %v144_v57 = vunpack.c.l.bf16 %v59_v13 }
  0x6c   :  { %1043 = vmatprep.mubr.bf16.mxu1 %v731_v8  ;;  %vm438_vm10 = vcmp.gt.f32.partialorder %v338_v37, 0.0  ;;  %vm440_vm11 = vcmp.gt.f32.partialorder %v340_v54, 0.0  ;;  %v538_v39 = vmul.f32 0.2, %v338_v37  ;;  %v540_v59 = vmul.f32 0.2, %v340_v54 }
  0x6d   :  { %v2863_v47 = vsel %vm439_vm8, %v339_v3, %v539_v12  ;;  %v257_v44 = vmul.f32 %v2431_v22, %v145_v20  ;;  %1044 = vmatmul.mubr.bf16.gmra.mrb[12].mxu1 %v730_v50  ;;  %v254_v11 = vmul.f32 %v2429_v21, %v142_v16  ;;  %v119_v14 = vunpack.c.h.bf16 %v46_v30 }
  0x6e   :  { %v719_v45 = vpack.c.bf16 %v2868_v31, %v2863_v47  ;;  %v2888_v49 = vsel %vm438_vm10, %v338_v37, %v538_v39  ;;  %v2890_v63 = vsel %vm440_vm11, %v340_v54, %v540_v59  ;;  %v256_v58 = vmul.f32 %v2429_v21, %v144_v57 }
  0x6f   :  { %v369_v48 = vadd.f32 %v2435_v24, %v257_v44  ;;  %v718_v36 = vpack.c.bf16 %v2890_v63, %v2888_v49  ;;  %v366_v3 = vadd.f32 %v2433_v23, %v254_v11  ;;  %v231_v55 = vmul.f32 %v2431_v22, %v119_v14  ;;  %v49_v44 = vld [vmem:[%s3320_s0 + $0xc8] sm:$0xff] }
  0x70   :  { %v118_v1 = vunpack.c.l.bf16 %v46_v30  ;;  %v368_v2 = vadd.f32 %v2433_v23, %v256_v58  ;;  %v147_v19 = vunpack.c.h.bf16 %v60_v10  ;;  %v149_v54 = vunpack.c.h.bf16 %v61_v7 }
  0x71   :  { %964 = vmatmul.mubr.bf16.gmra.mrb[24].mxu0 %v710_v40  ;;  %v47_v40 = vld [vmem:[%s3320_s0 + $0xb8] sm:$0xff]  ;;  %vm469_vm13 = vcmp.gt.f32.partialorder %v369_v48, 0.0  ;;  %v569_v43 = vmul.f32 0.2, %v369_v48  ;;  %vm466_vm14 = vcmp.gt.f32.partialorder %v366_v3, 0.0  ;;  %v343_v0 = vadd.f32 %v2435_v24, %v231_v55 }
  0x72   :  { %971 = vmatprep.mubr.bf16.mxu0 %v713_v33  ;;  %v367_v33 = vadd.f32 %v2435_v24, %v255_v38  ;;  %v121_v18 = vunpack.c.h.bf16 %v47_v40  ;;  %v120_v4 = vunpack.c.l.bf16 %v47_v40  ;;  %v566_v52 = vmul.f32 0.2, %v366_v3  ;;  %v48_v38 = vld [vmem:[%s3320_s0 + $0xc0] sm:$0xff] }
  0x73   :  { %v669_v8 = vsel %vm469_vm13, %v369_v48, %v569_v43  ;;  %v230_v15 = vmul.f32 %v2429_v21, %v118_v1  ;;  %vm468_vm15 = vcmp.gt.f32.partialorder %v368_v2, 0.0  ;;  %v568_v9 = vmul.f32 0.2, %v368_v2 }
  0x74   :  { %vm467_vm12 = vcmp.gt.f32.partialorder %v367_v33, 0.0  ;;  %v567_v41 = vmul.f32 0.2, %v367_v33  ;;  %v233_v6 = vmul.f32 %v2431_v22, %v121_v18  ;;  %v232_v46 = vmul.f32 %v2429_v21, %v120_v4 }
  0x75   :  { %vm443_vm0 = vcmp.gt.f32.partialorder %v343_v0, 0.0  ;;  %v543_v60 = vmul.f32 0.2, %v343_v0  ;;  %v668_v51 = vsel %vm468_vm15, %v368_v2, %v568_v9  ;;  %v342_v61 = vadd.f32 %v2433_v23, %v230_v15 }
  0x76   :  { %v667_v62 = vsel %vm467_vm12, %v367_v33, %v567_v41  ;;  %v345_v12 = vadd.f32 %v2435_v24, %v233_v6  ;;  %v344_v26 = vadd.f32 %v2433_v23, %v232_v46  ;;  %v259_v39 = vmul.f32 %v2431_v22, %v147_v19 }
  0x77   :  { %v733_v13 = vpack.c.bf16 %v669_v8, %v667_v62  ;;  %v2917_v50 = vsel %vm443_vm0, %v343_v0, %v543_v60  ;;  %vm442_vm2 = vcmp.gt.f32.partialorder %v342_v61, 0.0  ;;  %v542_v30 = vmul.f32 0.2, %v342_v61  ;;  %v62_v0 = vld [vmem:[%s3320_s0 + $0x130] sm:$0xff] }
  0x78   :  { %vm445_vm1 = vcmp.gt.f32.partialorder %v345_v12, 0.0  ;;  %vm444_vm3 = vcmp.gt.f32.partialorder %v344_v26, 0.0  ;;  %v544_v40 = vmul.f32 0.2, %v344_v26  ;;  %v261_v59 = vmul.f32 %v2431_v22, %v149_v54  ;;  %v65_v54 = vld [vmem:[%s3320_s0 + $0x148] sm:$0xff] }
  0x79   :  { %972 = vmatmul.mubr.bf16.gmra.mrb[28].mxu0 %v712_v17  ;;  %v666_v17 = vsel %vm466_vm14, %v366_v3, %v566_v52  ;;  %1051 = vmatprep.mubr.bf16.mxu1 %v733_v13  ;;  %v146_v33 = vunpack.c.l.bf16 %v60_v10  ;;  %v2934_v48 = vsel %vm442_vm2, %v342_v61, %v542_v30  ;;  %v148_v57 = vunpack.c.l.bf16 %v61_v7 }
  0x7a   :  { %979 = vmatprep.mubr.bf16.mxu0 %v715_v25  ;;  %v545_v25 = vmul.f32 0.2, %v345_v12  ;;  %v732_v20 = vpack.c.bf16 %v668_v51, %v666_v17  ;;  %v123_v11 = vunpack.c.h.bf16 %v48_v38  ;;  %v125_v14 = vunpack.c.h.bf16 %v49_v44 }
  0x7b   :  { %v2939_v18 = vsel %vm444_vm3, %v344_v26, %v544_v40  ;;  %v371_v41 = vadd.f32 %v2435_v24, %v259_v39  ;;  %v373_v43 = vadd.f32 %v2435_v24, %v261_v59  ;;  %v258_v58 = vmul.f32 %v2429_v21, %v146_v33 }
  0x7c   :  { %v2919_v37 = vsel %vm445_vm1, %v345_v12, %v545_v25  ;;  %1052 = vmatmul.mubr.bf16.gmra.mrb[16].mxu1 %v732_v20  ;;  %v720_v27 = vpack.c.bf16 %v2939_v18, %v2934_v48  ;;  %v260_v28 = vmul.f32 %v2429_v21, %v148_v57  ;;  %v237_v3 = vmul.f32 %v2431_v22, %v125_v14  ;;  %v63_v12 = vld [vmem:[%s3320_s0 + $0x138] sm:$0xff] }
  0x7d   :  { %v721_v16 = vpack.c.bf16 %v2919_v37, %v2917_v50  ;;  %vm471_vm4 = vcmp.gt.f32.partialorder %v371_v41, 0.0  ;;  %vm473_vm5 = vcmp.gt.f32.partialorder %v373_v43, 0.0  ;;  %v571_v34 = vmul.f32 0.2, %v371_v41  ;;  %v66_v50 = vld [vmem:[%s3320_s0 + $0x150] sm:$0xff] }
  0x7e   :  { %v573_v35 = vmul.f32 0.2, %v373_v43  ;;  %v372_v55 = vadd.f32 %v2433_v23, %v260_v28  ;;  %v349_v6 = vadd.f32 %v2435_v24, %v237_v3  ;;  %v122_v8 = vunpack.c.l.bf16 %v48_v38 }
  0x7f   :  { %v671_v1 = vsel %vm471_vm4, %v371_v41, %v571_v34  ;;  %v124_v2 = vunpack.c.l.bf16 %v49_v44  ;;  %v151_v51 = vunpack.c.h.bf16 %v62_v0  ;;  %v153_v61 = vunpack.c.h.bf16 %v63_v12 }
  0x80   :  { %v673_v4 = vsel %vm473_vm5, %v373_v43, %v573_v35  ;;  %vm472_vm7 = vcmp.gt.f32.partialorder %v372_v55, 0.0  ;;  %v572_v15 = vmul.f32 0.2, %v372_v55  ;;  %vm449_vm9 = vcmp.gt.f32.partialorder %v349_v6, 0.0 }
  0x81   :  { %980 = vmatmul.mubr.bf16.gmra.mrb[32].mxu0 %v714_v42  ;;  %v235_v42 = vmul.f32 %v2431_v22, %v123_v11  ;;  %v735_v52 = vpack.c.bf16 %v673_v4, %v671_v1  ;;  %v549_v17 = vmul.f32 0.2, %v349_v6  ;;  %v234_v46 = vmul.f32 %v2429_v21, %v122_v8 }
  0x82   :  { %987 = vmatprep.mubr.bf16.mxu0 %v717_v29  ;;  %v370_v29 = vadd.f32 %v2433_v23, %v258_v58  ;;  %v236_v7 = vmul.f32 %v2429_v21, %v124_v2  ;;  %v672_v60 = vsel %vm472_vm7, %v372_v55, %v572_v15  ;;  %v263_v20 = vmul.f32 %v2431_v22, %v151_v51  ;;  %v67_v2 = vld [vmem:[%s3320_s0 + $0x158] sm:$0xff]  ;;  %v69_v51 = vld [vmem:[%s3320_s0 + $0x168] sm:$0xff] }
  0x83   :  { %v347_v62 = vadd.f32 %v2435_v24, %v235_v42  ;;  %1059 = vmatprep.mubr.bf16.mxu1 %v735_v52  ;;  %v2969_v19 = vsel %vm449_vm9, %v349_v6, %v549_v17  ;;  %v346_v32 = vadd.f32 %v2433_v23, %v234_v46  ;;  %v265_v47 = vmul.f32 %v2431_v22, %v153_v61 }
  0x84   :  { %vm470_vm6 = vcmp.gt.f32.partialorder %v370_v29, 0.0  ;;  %v570_v13 = vmul.f32 0.2, %v370_v29  ;;  %v348_v56 = vadd.f32 %v2433_v23, %v236_v7  ;;  %v150_v31 = vunpack.c.l.bf16 %v62_v0 }
  0x85   :  { %vm447_vm8 = vcmp.gt.f32.partialorder %v347_v62, 0.0  ;;  %v547_v10 = vmul.f32 0.2, %v347_v62  ;;  %vm446_vm10 = vcmp.gt.f32.partialorder %v346_v32, 0.0  ;;  %v546_v38 = vmul.f32 0.2, %v346_v32 }
  0x86   :  { %v670_v9 = vsel %vm470_vm6, %v370_v29, %v570_v13  ;;  %vm448_vm11 = vcmp.gt.f32.partialorder %v348_v56, 0.0  ;;  %v548_v44 = vmul.f32 0.2, %v348_v56  ;;  %v375_v30 = vadd.f32 %v2435_v24, %v263_v20 }
  0x87   :  { %v2967_v25 = vsel %vm447_vm8, %v347_v62, %v547_v10  ;;  %v734_v26 = vpack.c.bf16 %v672_v60, %v670_v9  ;;  %v377_v40 = vadd.f32 %v2435_v24, %v265_v47  ;;  %v152_v39 = vunpack.c.l.bf16 %v63_v12  ;;  %v68_v60 = vld [vmem:[%s3320_s0 + $0x160] sm:$0xff] }
  0x88   :  { %v262_v59 = vmul.f32 %v2429_v21, %v150_v31  ;;  %v2986_v33 = vsel %vm446_vm10, %v346_v32, %v546_v38  ;;  %v2988_v57 = vsel %vm448_vm11, %v348_v56, %v548_v44  ;;  %v157_v14 = vunpack.c.h.bf16 %v65_v54 }
  0x89   :  { %988 = vmatmul.mubr.bf16.gmra.mrb[36].mxu0 %v716_v53  ;;  %v723_v53 = vpack.c.bf16 %v2969_v19, %v2967_v25  ;;  %1060 = vmatmul.mubr.bf16.gmra.mrb[20].mxu1 %v734_v26  ;;  %v722_v41 = vpack.c.bf16 %v2988_v57, %v2986_v33  ;;  %vm475_vm12 = vcmp.gt.f32.partialorder %v375_v30, 0.0  ;;  %vm477_vm13 = vcmp.gt.f32.partialorder %v377_v40, 0.0 }
  0x8a   :  { %995 = vmatprep.mubr.bf16.mxu0 %v719_v45  ;;  %v64_v45 = vld [vmem:[%s3320_s0 + $0x140] sm:$0xff]  ;;  %v575_v43 = vmul.f32 0.2, %v375_v30  ;;  %v577_v58 = vmul.f32 0.2, %v377_v40  ;;  %v264_v28 = vmul.f32 %v2429_v21, %v152_v39  ;;  %v374_v42 = vadd.f32 %v2433_v23, %v262_v59 }
  0x8b   :  { %v155_v11 = vunpack.c.h.bf16 %v64_v45  ;;  %v269_v35 = vmul.f32 %v2431_v22, %v157_v14  ;;  %v154_v29 = vunpack.c.l.bf16 %v64_v45  ;;  %v156_v55 = vunpack.c.l.bf16 %v65_v54 }
  0x8c   :  { %v675_v34 = vsel %vm475_vm12, %v375_v30, %v575_v43  ;;  %v677_v62 = vsel %vm477_vm13, %v377_v40, %v577_v58  ;;  %v376_v49 = vadd.f32 %v2433_v23, %v264_v28  ;;  %vm474_vm14 = vcmp.gt.f32.partialorder %v374_v42, 0.0 }
  0x8d   :  { %v267_v3 = vmul.f32 %v2431_v22, %v155_v11  ;;  %v574_v63 = vmul.f32 0.2, %v374_v42  ;;  %v381_v1 = vadd.f32 %v2435_v24, %v269_v35  ;;  %v266_v4 = vmul.f32 %v2429_v21, %v154_v29  ;;  %v70_v29 = vld [vmem:[%s3320_s0 + $0x170] sm:$0xff] }
  0x8e   :  { %vm476_vm15 = vcmp.gt.f32.partialorder %v376_v49, 0.0  ;;  %v576_v37 = vmul.f32 0.2, %v376_v49  ;;  %v268_v8 = vmul.f32 %v2429_v21, %v156_v55  ;;  %v159_v10 = vunpack.c.h.bf16 %v66_v50  ;;  %v71_v55 = vld [vmem:[%s3320_s0 + $0x178] sm:$0xff] }
  0x8f   :  { %v379_v6 = vadd.f32 %v2435_v24, %v267_v3  ;;  %vm481_vm1 = vcmp.gt.f32.partialorder %v381_v1, 0.0  ;;  %v581_v13 = vmul.f32 0.2, %v381_v1  ;;  %v378_v12 = vadd.f32 %v2433_v23, %v266_v4 }
  0x90   :  { %v676_v0 = vsel %vm476_vm15, %v376_v49, %v576_v37  ;;  %v380_v15 = vadd.f32 %v2433_v23, %v268_v8  ;;  %v161_v7 = vunpack.c.h.bf16 %v67_v2  ;;  %v271_v56 = vmul.f32 %v2431_v22, %v159_v10 }
  0x91   :  { %996 = vmatmul.mubr.bf16.gmra.mrb[40].mxu0 %v718_v36  ;;  %v737_v36 = vpack.c.bf16 %v677_v62, %v675_v34  ;;  %vm479_vm0 = vcmp.gt.f32.partialorder %v379_v6, 0.0  ;;  %v579_v52 = vmul.f32 0.2, %v379_v6  ;;  %v681_v46 = vsel %vm481_vm1, %v381_v1, %v581_v13 }
  0x92   :  { %1003 = vmatprep.mubr.bf16.mxu0 %v721_v16  ;;  %v674_v16 = vsel %vm474_vm14, %v374_v42, %v574_v63  ;;  %vm478_vm2 = vcmp.gt.f32.partialorder %v378_v12, 0.0  ;;  %vm480_vm3 = vcmp.gt.f32.partialorder %v380_v15, 0.0  ;;  %v578_v26 = vmul.f32 0.2, %v378_v12 }
  0x93   :  { %1067 = vmatprep.mubr.bf16.mxu1 %v737_v36  ;;  %v736_v9 = vpack.c.bf16 %v676_v0, %v674_v16  ;;  %v679_v17 = vsel %vm479_vm0, %v379_v6, %v579_v52  ;;  %v580_v32 = vmul.f32 0.2, %v380_v15  ;;  %v273_v20 = vmul.f32 %v2431_v22, %v161_v7 }
  0x94   :  { %v739_v61 = vpack.c.bf16 %v681_v46, %v679_v17  ;;  %v158_v47 = vunpack.c.l.bf16 %v66_v50  ;;  %v678_v31 = vsel %vm478_vm2, %v378_v12, %v578_v26  ;;  %v160_v45 = vunpack.c.l.bf16 %v67_v2  ;;  %v72_v12 = vld [vmem:[%s3320_s0 + $0x180] sm:$0xff] }
  0x95   :  { %1068 = vmatmul.mubr.bf16.gmra.mrb[24].mxu1 %v736_v9  ;;  %v163_v48 = vunpack.c.h.bf16 %v68_v60  ;;  %v165_v18 = vunpack.c.h.bf16 %v69_v51  ;;  %v383_v54 = vadd.f32 %v2435_v24, %v271_v56  ;;  %v385_v38 = vadd.f32 %v2435_v24, %v273_v20 }
  0x96   :  { %1075 = vmatprep.mubr.bf16.mxu1 %v739_v61  ;;  %v270_v25 = vmul.f32 %v2429_v21, %v158_v47  ;;  %v162_v42 = vunpack.c.l.bf16 %v68_v60  ;;  %v164_v3 = vunpack.c.l.bf16 %v69_v51  ;;  %v167_v1 = vunpack.c.h.bf16 %v70_v29 }
  0x97   :  { %v275_v44 = vmul.f32 %v2431_v22, %v163_v48  ;;  %v277_v30 = vmul.f32 %v2431_v22, %v165_v18  ;;  %vm483_vm4 = vcmp.gt.f32.partialorder %v383_v54, 0.0  ;;  %vm485_vm5 = vcmp.gt.f32.partialorder %v385_v38, 0.0 }
  0x98   :  { %v583_v40 = vmul.f32 0.2, %v383_v54  ;;  %v585_v39 = vmul.f32 0.2, %v385_v38  ;;  %v382_v59 = vadd.f32 %v2433_v23, %v270_v25  ;;  %v276_v63 = vmul.f32 %v2429_v21, %v164_v3 }
  0x99   :  { %1004 = vmatmul.mubr.bf16.gmra.mrb[44].mxu0 %v720_v27  ;;  %v680_v27 = vsel %vm480_vm3, %v380_v15, %v580_v32  ;;  %v387_v14 = vadd.f32 %v2435_v24, %v275_v44  ;;  %v389_v43 = vadd.f32 %v2435_v24, %v277_v30  ;;  %v169_v4 = vunpack.c.h.bf16 %v71_v55  ;;  %v73_v15 = vld [vmem:[%s3320_s0 + $0x188] sm:$0xff] }
  0x9a   :  { %1011 = vmatprep.mubr.bf16.mxu0 %v723_v53  ;;  %v738_v19 = vpack.c.bf16 %v680_v27, %v678_v31  ;;  %v272_v53 = vmul.f32 %v2429_v21, %v160_v45  ;;  %v683_v58 = vsel %vm483_vm4, %v383_v54, %v583_v40  ;;  %v685_v28 = vsel %vm485_vm5, %v385_v38, %v585_v39 }
  0x9b   :  { %v741_v34 = vpack.c.bf16 %v685_v28, %v683_v58  ;;  %vm482_vm6 = vcmp.gt.f32.partialorder %v382_v59, 0.0  ;;  %v582_v35 = vmul.f32 0.2, %v382_v59  ;;  %vm487_vm8 = vcmp.gt.f32.partialorder %v387_v14, 0.0 }
  0x9c   :  { %v384_v11 = vadd.f32 %v2433_v23, %v272_v53  ;;  %vm489_vm9 = vcmp.gt.f32.partialorder %v389_v43, 0.0  ;;  %v587_v49 = vmul.f32 0.2, %v387_v14  ;;  %v589_v57 = vmul.f32 0.2, %v389_v43 }
  0x9d   :  { %1076 = vmatmul.mubr.bf16.gmra.mrb[28].mxu1 %v738_v19  ;;  %v682_v33 = vsel %vm482_vm6, %v382_v59, %v582_v35  ;;  %v388_v8 = vadd.f32 %v2433_v23, %v276_v63  ;;  %v279_v52 = vmul.f32 %v2431_v22, %v167_v1  ;;  %v281_v13 = vmul.f32 %v2431_v22, %v169_v4 }
  0x9e   :  { %vm484_vm7 = vcmp.gt.f32.partialorder %v384_v11, 0.0  ;;  %v584_v62 = vmul.f32 0.2, %v384_v11  ;;  %1083 = vmatprep.mubr.bf16.mxu1 %v741_v34  ;;  %v687_v6 = vsel %vm487_vm8, %v387_v14, %v587_v49  ;;  %v689_v37 = vsel %vm489_vm9, %v389_v43, %v589_v57 }
  0x9f   :  { %v743_v2 = vpack.c.bf16 %v689_v37, %v687_v6  ;;  %v166_v0 = vunpack.c.l.bf16 %v70_v29  ;;  %vm488_vm11 = vcmp.gt.f32.partialorder %v388_v8, 0.0  ;;  %v588_v9 = vmul.f32 0.2, %v388_v8 }
  0xa0   :  { %v684_v36 = vsel %vm484_vm7, %v384_v11, %v584_v62  ;;  %v391_v17 = vadd.f32 %v2435_v24, %v279_v52  ;;  %v393_v46 = vadd.f32 %v2435_v24, %v281_v13  ;;  %v168_v7 = vunpack.c.l.bf16 %v71_v55 }
  0xa1   :  { %1012 = vmatmul.mubr.bf16.gmra.mrb[48].mxu0 %v722_v41  ;;  %v274_v41 = vmul.f32 %v2429_v21, %v162_v42  ;;  %v740_v50 = vpack.c.bf16 %v684_v36, %v682_v33  ;;  %v278_v60 = vmul.f32 %v2429_v21, %v166_v0  ;;  %v171_v61 = vunpack.c.h.bf16 %v72_v12  ;;  %v3077_v33 = vld [vmem:[%s3323_s4] ss:$0 sm:$0xff] }
  0xa2   :  { %v173_v26 = vunpack.c.h.bf16 %v73_v15  ;;  %v688_v32 = vsel %vm488_vm11, %v388_v8, %v588_v9  ;;  %vm491_vm12 = vcmp.gt.f32.partialorder %v391_v17, 0.0  ;;  %vm493_vm13 = vcmp.gt.f32.partialorder %v393_v46, 0.0 }
  0xa3   :  { %v386_v16 = vadd.f32 %v2433_v23, %v274_v41  ;;  %v591_v56 = vmul.f32 0.2, %v391_v17  ;;  %v593_v20 = vmul.f32 0.2, %v393_v46  ;;  %v280_v47 = vmul.f32 %v2429_v21, %v168_v7 }
  0xa4   :  { %v390_v31 = vadd.f32 %v2433_v23, %v278_v60  ;;  %v283_v45 = vmul.f32 %v2431_v22, %v171_v61  ;;  %v285_v18 = vmul.f32 %v2431_v22, %v173_v26  ;;  %v170_v27 = vunpack.c.l.bf16 %v72_v12 }
  0xa5   :  { %vm486_vm10 = vcmp.gt.f32.partialorder %v386_v16, 0.0  ;;  %v586_v10 = vmul.f32 0.2, %v386_v16  ;;  %1084 = vmatmul.mubr.bf16.gmra.mrb[32].mxu1 %v740_v50  ;;  %v691_v48 = vsel %vm491_vm12, %v391_v17, %v591_v56  ;;  %v172_v54 = vunpack.c.l.bf16 %v73_v15 }
  0xa6   :  { %1091 = vmatprep.mubr.bf16.mxu1 %v743_v2  ;;  %v693_v38 = vsel %vm493_vm13, %v393_v46, %v593_v20  ;;  %v392_v25 = vadd.f32 %v2433_v23, %v280_v47  ;;  %v590_v53 = vmul.f32 0.2, %v390_v31  ;;  %v395_v44 = vadd.f32 %v2435_v24, %v283_v45 }
  0xa7   :  { %v686_v51 = vsel %vm486_vm10, %v386_v16, %v586_v10  ;;  %v397_v30 = vadd.f32 %v2435_v24, %v285_v18  ;;  %v745_v40 = vpack.c.bf16 %v693_v38, %v691_v48  ;;  %v282_v59 = vmul.f32 %v2429_v21, %v170_v27 }
  0xa8   :  { %v742_v19 = vpack.c.bf16 %v688_v32, %v686_v51  ;;  %v592_v39 = vmul.f32 0.2, %v392_v25  ;;  %v284_v11 = vmul.f32 %v2429_v21, %v172_v54  ;;  %vm490_vm14 = vcmp.gt.f32.partialorder %v390_v31, 0.0 }
  0xa9   :  { %vm492_vm15 = vcmp.gt.f32.partialorder %v392_v25, 0.0  ;;  %v595_v22 = vmul.f32 0.2, %v395_v44  ;;  %v597_v14 = vmul.f32 0.2, %v397_v30  ;;  %vm495_vm0 = vcmp.gt.f32.partialorder %v395_v44, 0.0 }
  0xaa   :  { %vm497_vm1 = vcmp.gt.f32.partialorder %v397_v30, 0.0  ;;  %v690_v43 = vsel %vm490_vm14, %v390_v31, %v590_v53  ;;  %v692_v58 = vsel %vm492_vm15, %v392_v25, %v592_v39  ;;  %v394_v28 = vadd.f32 %v2433_v23, %v282_v59 }
  0xab   :  { %v396_v24 = vadd.f32 %v2433_v23, %v284_v11  ;;  %v695_v42 = vsel %vm495_vm0, %v395_v44, %v595_v22  ;;  %v697_v3 = vsel %vm497_vm1, %v397_v30, %v597_v14  ;;  %v744_v34 = vpack.c.bf16 %v692_v58, %v690_v43 }
  0xac   :  { %v747_v35 = vpack.c.bf16 %v697_v3, %v695_v42  ;;  %v594_v29 = vmul.f32 0.2, %v394_v28  ;;  %vm494_vm2 = vcmp.gt.f32.partialorder %v394_v28, 0.0  ;;  %vm1754_vm4 = vcmp.eq.s32.totalorder %v2394_v5, 0 }
  0xad   :  { %1092 = vmatmul.mubr.bf16.gmra.mrb[36].mxu1 %v742_v19  ;;  %v596_v21 = vmul.f32 0.2, %v396_v24  ;;  %vm496_vm3 = vcmp.gt.f32.partialorder %v396_v24, 0.0 }
  0xae   :  { %1099 = vmatprep.mubr.bf16.mxu1 %v745_v40  ;;  %v694_v55 = vsel %vm494_vm2, %v394_v28, %v594_v29 }
  0xaf   :  { %v696_v62 = vsel %vm496_vm3, %v396_v24, %v596_v21 }
  0xb0   :  { %v746_v49 = vpack.c.bf16 %v696_v62, %v694_v55 }
  0xb5   :  { %1100 = vmatmul.mubr.bf16.gmra.mrb[40].mxu1 %v744_v34 }
  0xb6   :  { %1107 = vmatprep.mubr.bf16.mxu1 %v747_v35 }
  0xbd   :  { %1108 = vmatmul.mubr.bf16.gmra.mrb[44].mxu1 %v746_v49 }
 0x114   :  { %v917_v23 = vpop.f32.mrb[0].mxu0 }
 0x115   :  { %v918_v57 = vadd.f32 %v3077_v33, %v917_v23  ;;  %v919_v41 = vpop.f32.mrb[1].mxu0 }
 0x116   :  { %v920_v63 = vpop.f32.mrb[2].mxu0 }
 0x117   :  { %v921_v36 = vadd.f32 %v3077_v33, %v920_v63  ;;  %v922_v6 = vpop.f32.mrb[3].mxu0  ;;  %v1649_v1 = vmul.f32 %v918_v57, %v918_v57 }
 0x119   :  { %v1594_v4 = vadd.f32 %v921_v36, %v918_v57  ;;  %v1650_v50 = vmul.f32 %v921_v36, %v921_v36  ;;  %v2143_v37 = vpack.c.bf16 %v921_v36, %v918_v57 }
 0x11a   :  { %v1021_v13 = vpop.f32.mrb[0].mxu1 }
 0x11b   :  { %v1699_v16 = vadd.f32 %v1650_v50, %v1649_v1  ;;  %2144 = vst [vmem:[%s3324_s5] sm:$0xff] %v2143_v37   ;;  %v3086_v12 = vadd.f32 %v3077_v33, %v1021_v13  ;;  %v1023_v15 = vpop.f32.mrb[1].mxu1 }
 0x11c   :  { %v925_v8 = vpop.f32.mrb[4].mxu0  ;;  %v1024_v7 = vpop.f32.mrb[2].mxu1 }
 0x11d   :  { %v926_v2 = vadd.f32 %v3077_v33, %v925_v8  ;;  %v927_v52 = vpop.f32.mrb[5].mxu0  ;;  %v3090_v60 = vadd.f32 %v3077_v33, %v1024_v7  ;;  %v1026_v51 = vpop.f32.mrb[3].mxu1 }
 0x11e   :  { %v928_v0 = vpop.f32.mrb[6].mxu0 }
 0x11f   :  { %v1595_v10 = vadd.f32 %v1594_v4, %v926_v2  ;;  %v1651_v9 = vmul.f32 %v926_v2, %v926_v2  ;;  %v929_v17 = vadd.f32 %v3077_v33, %v928_v0  ;;  %v930_v46 = vpop.f32.mrb[7].mxu0  ;;  %v2208_v20 = vpack.c.bf16 %v3090_v60, %v3086_v12 }
 0x121   :  { %v1700_v61 = vadd.f32 %v1699_v16, %v1651_v9  ;;  %v1596_v26 = vadd.f32 %v1595_v10, %v929_v17  ;;  %v1652_v32 = vmul.f32 %v929_v17, %v929_v17  ;;  %v2148_v56 = vpack.c.bf16 %v929_v17, %v926_v2  ;;  %2277 = vst [vmem:[%s3324_s5 + $0x68] sm:$0xff] %v2208_v20  }
 0x123   :  { %v1701_v47 = vadd.f32 %v1700_v61, %v1652_v32  ;;  %2265 = vst [vmem:[%s3324_s5 + $0x8] sm:$0xff] %v2148_v56  }
 0x124   :  { %v933_v31 = vpop.f32.mrb[8].mxu0 }
 0x125   :  { %v934_v45 = vadd.f32 %v3077_v33, %v933_v31  ;;  %v935_v48 = vpop.f32.mrb[9].mxu0 }
 0x126   :  { %v936_v18 = vpop.f32.mrb[10].mxu0 }
 0x127   :  { %v1597_v27 = vadd.f32 %v1596_v26, %v934_v45  ;;  %v1653_v54 = vmul.f32 %v934_v45, %v934_v45  ;;  %v937_v38 = vadd.f32 %v3077_v33, %v936_v18  ;;  %v938_v25 = vpop.f32.mrb[11].mxu0  ;;  %v1029_v40 = vpop.f32.mrb[4].mxu1 }
 0x128   :  { %v1031_v59 = vpop.f32.mrb[5].mxu1  ;;  %v3106_v22 = vadd.f32 %v3077_v33, %v1029_v40 }
 0x129   :  { %v1702_v19 = vadd.f32 %v1701_v47, %v1653_v54  ;;  %v1598_v53 = vadd.f32 %v1597_v27, %v937_v38  ;;  %v1654_v44 = vmul.f32 %v937_v38, %v937_v38  ;;  %v2153_v30 = vpack.c.bf16 %v937_v38, %v934_v45  ;;  %v1032_v14 = vpop.f32.mrb[6].mxu1 }
 0x12a   :  { %v3110_v28 = vadd.f32 %v3077_v33, %v1032_v14  ;;  %v1034_v24 = vpop.f32.mrb[7].mxu1 }
 0x12b   :  { %v1703_v39 = vadd.f32 %v1702_v19, %v1654_v44  ;;  %2266 = vst [vmem:[%s3324_s5 + $0x10] sm:$0xff] %v2153_v30  }
 0x12c   :  { %v941_v11 = vpop.f32.mrb[12].mxu0  ;;  %v2213_v21 = vpack.c.bf16 %v3110_v28, %v3106_v22 }
 0x12d   :  { %v942_v43 = vadd.f32 %v3077_v33, %v941_v11  ;;  %v943_v58 = vpop.f32.mrb[13].mxu0 }
 0x12e   :  { %v944_v42 = vpop.f32.mrb[14].mxu0  ;;  %2278 = vst [vmem:[%s3324_s5 + $0x70] sm:$0xff] %v2213_v21  }
 0x12f   :  { %v1599_v3 = vadd.f32 %v1598_v53, %v942_v43  ;;  %v1655_v34 = vmul.f32 %v942_v43, %v942_v43  ;;  %v945_v35 = vadd.f32 %v3077_v33, %v944_v42  ;;  %v946_v29 = vpop.f32.mrb[15].mxu0 }
 0x131   :  { %v1704_v55 = vadd.f32 %v1703_v39, %v1655_v34  ;;  %v1600_v62 = vadd.f32 %v1599_v3, %v945_v35  ;;  %v1656_v49 = vmul.f32 %v945_v35, %v945_v35  ;;  %v2158_v23 = vpack.c.bf16 %v945_v35, %v942_v43 }
 0x133   :  { %v1705_v57 = vadd.f32 %v1704_v55, %v1656_v49  ;;  %2267 = vst [vmem:[%s3324_s5 + $0x18] sm:$0xff] %v2158_v23  }
 0x134   :  { %v949_v41 = vpop.f32.mrb[16].mxu0  ;;  %v1037_v13 = vpop.f32.mrb[8].mxu1 }
 0x135   :  { %v950_v63 = vadd.f32 %v3077_v33, %v949_v41  ;;  %v951_v36 = vpop.f32.mrb[17].mxu0  ;;  %v3124_v0 = vadd.f32 %v3077_v33, %v1037_v13  ;;  %v1039_v15 = vpop.f32.mrb[9].mxu1 }
 0x136   :  { %v952_v6 = vpop.f32.mrb[18].mxu0  ;;  %v1040_v9 = vpop.f32.mrb[10].mxu1 }
 0x137   :  { %v1601_v1 = vadd.f32 %v1600_v62, %v950_v63  ;;  %v1657_v4 = vmul.f32 %v950_v63, %v950_v63  ;;  %v953_v50 = vadd.f32 %v3077_v33, %v952_v6  ;;  %v954_v37 = vpop.f32.mrb[19].mxu0  ;;  %v3130_v46 = vadd.f32 %v3077_v33, %v1040_v9  ;;  %v1042_v7 = vpop.f32.mrb[11].mxu1 }
 0x139   :  { %v1706_v16 = vadd.f32 %v1705_v57, %v1657_v4  ;;  %v1602_v8 = vadd.f32 %v1601_v1, %v953_v50  ;;  %v1658_v2 = vmul.f32 %v953_v50, %v953_v50  ;;  %v2163_v52 = vpack.c.bf16 %v953_v50, %v950_v63 }
 0x13a   :  { %v2218_v32 = vpack.c.bf16 %v3130_v46, %v3124_v0 }
 0x13b   :  { %v1707_v10 = vadd.f32 %v1706_v16, %v1658_v2  ;;  %2268 = vst [vmem:[%s3324_s5 + $0x20] sm:$0xff] %v2163_v52  }
 0x13c   :  { %v957_v17 = vpop.f32.mrb[20].mxu0  ;;  %2279 = vst [vmem:[%s3324_s5 + $0x78] sm:$0xff] %v2218_v32  }
 0x13d   :  { %v958_v51 = vadd.f32 %v3077_v33, %v957_v17  ;;  %v959_v61 = vpop.f32.mrb[21].mxu0 }
 0x13e   :  { %v960_v26 = vpop.f32.mrb[22].mxu0 }
 0x13f   :  { %v1603_v56 = vadd.f32 %v1602_v8, %v958_v51  ;;  %v1659_v20 = vmul.f32 %v958_v51, %v958_v51  ;;  %v961_v47 = vadd.f32 %v3077_v33, %v960_v26  ;;  %v962_v31 = vpop.f32.mrb[23].mxu0 }
 0x140   :  { %v1045_v44 = vpop.f32.mrb[12].mxu1 }
 0x141   :  { %v1708_v45 = vadd.f32 %v1707_v10, %v1659_v20  ;;  %v1604_v48 = vadd.f32 %v1603_v56, %v961_v47  ;;  %v1660_v18 = vmul.f32 %v961_v47, %v961_v47  ;;  %v2168_v27 = vpack.c.bf16 %v961_v47, %v958_v51  ;;  %v1047_v11 = vpop.f32.mrb[13].mxu1 }
 0x142   :  { %v3145_v14 = vadd.f32 %v3077_v33, %v1045_v44  ;;  %v1048_v43 = vpop.f32.mrb[14].mxu1 }
 0x143   :  { %v1709_v54 = vadd.f32 %v1708_v45, %v1660_v18  ;;  %2269 = vst [vmem:[%s3324_s5 + $0x28] sm:$0xff] %v2168_v27   ;;  %v1050_v34 = vpop.f32.mrb[15].mxu1  ;;  %v3148_v35 = vadd.f32 %v3077_v33, %v1048_v43 }
 0x144   :  { %v965_v38 = vpop.f32.mrb[24].mxu0 }
 0x145   :  { %v966_v25 = vadd.f32 %v3077_v33, %v965_v38  ;;  %v967_v19 = vpop.f32.mrb[25].mxu0  ;;  %v2223_v55 = vpack.c.bf16 %v3148_v35, %v3145_v14 }
 0x146   :  { %v968_v53 = vpop.f32.mrb[26].mxu0 }
 0x147   :  { %v1605_v30 = vadd.f32 %v1604_v48, %v966_v25  ;;  %v1661_v40 = vmul.f32 %v966_v25, %v966_v25  ;;  %v969_v39 = vadd.f32 %v3077_v33, %v968_v53  ;;  %v970_v59 = vpop.f32.mrb[27].mxu0  ;;  %2280 = vst [vmem:[%s3324_s5 + $0x80] sm:$0xff] %v2223_v55  }
 0x149   :  { %v1710_v58 = vadd.f32 %v1709_v54, %v1661_v40  ;;  %v1606_v24 = vadd.f32 %v1605_v30, %v969_v39  ;;  %v1662_v42 = vmul.f32 %v969_v39, %v969_v39  ;;  %v2173_v3 = vpack.c.bf16 %v969_v39, %v966_v25 }
 0x14b   :  { %v1711_v29 = vadd.f32 %v1710_v58, %v1662_v42  ;;  %2270 = vst [vmem:[%s3324_s5 + $0x30] sm:$0xff] %v2173_v3  }
 0x14c   :  { %v973_v21 = vpop.f32.mrb[28].mxu0 }
 0x14d   :  { %v974_v62 = vadd.f32 %v3077_v33, %v973_v21  ;;  %v975_v49 = vpop.f32.mrb[29].mxu0 }
 0x14e   :  { %v976_v23 = vpop.f32.mrb[30].mxu0 }
 0x14f   :  { %v1607_v57 = vadd.f32 %v1606_v24, %v974_v62  ;;  %v1663_v41 = vmul.f32 %v974_v62, %v974_v62  ;;  %v977_v63 = vadd.f32 %v3077_v33, %v976_v23  ;;  %v978_v36 = vpop.f32.mrb[31].mxu0  ;;  %v1053_v16 = vpop.f32.mrb[16].mxu1 }
 0x150   :  { %v3164_v2 = vadd.f32 %v3077_v33, %v1053_v16  ;;  %v1055_v52 = vpop.f32.mrb[17].mxu1 }
 0x151   :  { %v1712_v6 = vadd.f32 %v1711_v29, %v1663_v41  ;;  %v1608_v1 = vadd.f32 %v1607_v57, %v977_v63  ;;  %v1664_v4 = vmul.f32 %v977_v63, %v977_v63  ;;  %v2178_v50 = vpack.c.bf16 %v977_v63, %v974_v62  ;;  %v1056_v10 = vpop.f32.mrb[18].mxu1 }
 0x152   :  { %v3168_v17 = vadd.f32 %v3077_v33, %v1056_v10  ;;  %v1058_v7 = vpop.f32.mrb[19].mxu1 }
 0x153   :  { %v1713_v37 = vadd.f32 %v1712_v6, %v1664_v4  ;;  %2271 = vst [vmem:[%s3324_s5 + $0x38] sm:$0xff] %v2178_v50  }
 0x154   :  { %v981_v8 = vpop.f32.mrb[32].mxu0  ;;  %v2228_v56 = vpack.c.bf16 %v3168_v17, %v3164_v2 }
 0x155   :  { %v982_v13 = vadd.f32 %v3077_v33, %v981_v8  ;;  %v983_v15 = vpop.f32.mrb[33].mxu0 }
 0x156   :  { %v984_v9 = vpop.f32.mrb[34].mxu0  ;;  %2281 = vst [vmem:[%s3324_s5 + $0x88] sm:$0xff] %v2228_v56  }
 0x157   :  { %v1609_v51 = vadd.f32 %v1608_v1, %v982_v13  ;;  %v1665_v61 = vmul.f32 %v982_v13, %v982_v13  ;;  %v985_v26 = vadd.f32 %v3077_v33, %v984_v9  ;;  %v986_v32 = vpop.f32.mrb[35].mxu0 }
 0x159   :  { %v1714_v20 = vadd.f32 %v1713_v37, %v1665_v61  ;;  %v1610_v47 = vadd.f32 %v1609_v51, %v985_v26  ;;  %v1666_v31 = vmul.f32 %v985_v26, %v985_v26  ;;  %v2183_v45 = vpack.c.bf16 %v985_v26, %v982_v13 }
 0x15b   :  { %v1715_v48 = vadd.f32 %v1714_v20, %v1666_v31  ;;  %2272 = vst [vmem:[%s3324_s5 + $0x40] sm:$0xff] %v2183_v45  }
 0x15c   :  { %v989_v18 = vpop.f32.mrb[36].mxu0  ;;  %v1061_v30 = vpop.f32.mrb[20].mxu1 }
 0x15d   :  { %v990_v27 = vadd.f32 %v3077_v33, %v989_v18  ;;  %v991_v54 = vpop.f32.mrb[37].mxu0  ;;  %v1063_v43 = vpop.f32.mrb[21].mxu1  ;;  %v3182_v58 = vadd.f32 %v3077_v33, %v1061_v30 }
 0x15e   :  { %v992_v38 = vpop.f32.mrb[38].mxu0  ;;  %v1064_v24 = vpop.f32.mrb[22].mxu1 }
 0x15f   :  { %v1611_v25 = vadd.f32 %v1610_v47, %v990_v27  ;;  %v1667_v19 = vmul.f32 %v990_v27, %v990_v27  ;;  %v993_v53 = vadd.f32 %v3077_v33, %v992_v38  ;;  %v994_v44 = vpop.f32.mrb[39].mxu0  ;;  %v3188_v3 = vadd.f32 %v3077_v33, %v1064_v24  ;;  %v1066_v34 = vpop.f32.mrb[23].mxu1 }
 0x161   :  { %v1716_v40 = vadd.f32 %v1715_v48, %v1667_v19  ;;  %v1612_v39 = vadd.f32 %v1611_v25, %v993_v53  ;;  %v1668_v59 = vmul.f32 %v993_v53, %v993_v53  ;;  %v2188_v11 = vpack.c.bf16 %v993_v53, %v990_v27 }
 0x162   :  { %v2233_v62 = vpack.c.bf16 %v3188_v3, %v3182_v58 }
 0x163   :  { %v1717_v42 = vadd.f32 %v1716_v40, %v1668_v59  ;;  %2273 = vst [vmem:[%s3324_s5 + $0x48] sm:$0xff] %v2188_v11  }
 0x164   :  { %v997_v29 = vpop.f32.mrb[40].mxu0  ;;  %2282 = vst [vmem:[%s3324_s5 + $0x90] sm:$0xff] %v2233_v62   ;;  %v1675_v62 = vmul.f32 %v3086_v12, %v3086_v12 }
 0x165   :  { %v998_v21 = vadd.f32 %v3077_v33, %v997_v29  ;;  %v999_v55 = vpop.f32.mrb[41].mxu0 }
 0x166   :  { %v1000_v49 = vpop.f32.mrb[42].mxu0 }
 0x167   :  { %v1613_v23 = vadd.f32 %v1612_v39, %v998_v21  ;;  %v1669_v57 = vmul.f32 %v998_v21, %v998_v21  ;;  %v1001_v41 = vadd.f32 %v3077_v33, %v1000_v49  ;;  %v1002_v63 = vpop.f32.mrb[43].mxu0 }
 0x168   :  { %v1069_v52 = vpop.f32.mrb[24].mxu1 }
 0x169   :  { %v1718_v36 = vadd.f32 %v1717_v42, %v1669_v57  ;;  %v1614_v6 = vadd.f32 %v1613_v23, %v1001_v41  ;;  %v1670_v1 = vmul.f32 %v1001_v41, %v1001_v41  ;;  %v2193_v4 = vpack.c.bf16 %v1001_v41, %v998_v21  ;;  %v1071_v10 = vpop.f32.mrb[25].mxu1 }
 0x16a   :  { %v3202_v15 = vadd.f32 %v3077_v33, %v1069_v52  ;;  %v1072_v26 = vpop.f32.mrb[26].mxu1  ;;  %v1676_v57 = vmul.f32 %v3090_v60, %v3090_v60 }
 0x16b   :  { %v1719_v50 = vadd.f32 %v1718_v36, %v1670_v1  ;;  %2274 = vst [vmem:[%s3324_s5 + $0x50] sm:$0xff] %v2193_v4   ;;  %v3206_v32 = vadd.f32 %v3077_v33, %v1072_v26  ;;  %v1074_v56 = vpop.f32.mrb[27].mxu1  ;;  %v1677_v1 = vmul.f32 %v3106_v22, %v3106_v22 }
 0x16c   :  { %v1005_v37 = vpop.f32.mrb[44].mxu0 }
 0x16d   :  { %v1006_v16 = vadd.f32 %v3077_v33, %v1005_v37  ;;  %v1007_v8 = vpop.f32.mrb[45].mxu0  ;;  %v2238_v48 = vpack.c.bf16 %v3206_v32, %v3202_v15 }
 0x16e   :  { %v1008_v13 = vpop.f32.mrb[46].mxu0 }
 0x16f   :  { %v1615_v9 = vadd.f32 %v1614_v6, %v1006_v16  ;;  %v1671_v7 = vmul.f32 %v1006_v16, %v1006_v16  ;;  %v1009_v51 = vadd.f32 %v3077_v33, %v1008_v13  ;;  %v1010_v61 = vpop.f32.mrb[47].mxu0  ;;  %2283 = vst [vmem:[%s3324_s5 + $0x98] sm:$0xff] %v2238_v48  }
 0x170   :  { %v1077_v25 = vpop.f32.mrb[28].mxu1 }
 0x171   :  { %v1720_v20 = vadd.f32 %v1719_v50, %v1671_v7  ;;  %v1616_v47 = vadd.f32 %v1615_v9, %v1009_v51  ;;  %v1672_v31 = vmul.f32 %v1009_v51, %v1009_v51  ;;  %v2198_v45 = vpack.c.bf16 %v1009_v51, %v1006_v16  ;;  %v1079_v44 = vpop.f32.mrb[29].mxu1 }
 0x172   :  { %v3218_v53 = vadd.f32 %v3077_v33, %v1077_v25  ;;  %v1080_v11 = vpop.f32.mrb[30].mxu1  ;;  %v1679_v9 = vmul.f32 %v3124_v0, %v3124_v0  ;;  %v1680_v51 = vmul.f32 %v3130_v46, %v3130_v46  ;;  %v1683_v25 = vmul.f32 %v3164_v2, %v3164_v2 }
 0x173   :  { %v1721_v18 = vadd.f32 %v1720_v20, %v1672_v31  ;;  %2275 = vst [vmem:[%s3324_s5 + $0x58] sm:$0xff] %v2198_v45   ;;  %v3222_v43 = vadd.f32 %v3077_v33, %v1080_v11  ;;  %v1082_v24 = vpop.f32.mrb[31].mxu1  ;;  %v1685_v11 = vmul.f32 %v3182_v58, %v3182_v58 }
 0x174   :  { %v1013_v27 = vpop.f32.mrb[48].mxu0 }
 0x175   :  { %v1014_v54 = vadd.f32 %v3077_v33, %v1013_v27  ;;  %v1015_v38 = vpop.f32.mrb[49].mxu0  ;;  %v2243_v55 = vpack.c.bf16 %v3222_v43, %v3218_v53  ;;  %v1682_v27 = vmul.f32 %v3148_v35, %v3148_v35 }
 0x176   :  { %v1016_v19 = vpop.f32.mrb[50].mxu0 }
 0x177   :  { %v1617_v30 = vadd.f32 %v1616_v47, %v1014_v54  ;;  %v1673_v40 = vmul.f32 %v1014_v54, %v1014_v54  ;;  %v1017_v39 = vadd.f32 %v3077_v33, %v1016_v19  ;;  %v1018_v59 = vpop.f32.mrb[51].mxu0  ;;  %2284 = vst [vmem:[%s3324_s5 + $0xa0] sm:$0xff] %v2243_v55   ;;  %v1681_v47 = vmul.f32 %v3145_v14, %v3145_v14 }
 0x178   :  { %v1085_v36 = vpop.f32.mrb[32].mxu1 }
 0x179   :  { %v1722_v42 = vadd.f32 %v1721_v18, %v1673_v40  ;;  %v1618_v34 = vadd.f32 %v1617_v30, %v1017_v39  ;;  %v1674_v29 = vmul.f32 %v1017_v39, %v1017_v39  ;;  %v2203_v21 = vpack.c.bf16 %v1017_v39, %v1014_v54 }
 0x17a   :  { %v3239_v6 = vadd.f32 %v3077_v33, %v1085_v36 }
 0x17b   :  { %v1619_v49 = vadd.f32 %v1618_v34, %v3086_v12  ;;  %v1723_v23 = vadd.f32 %v1722_v42, %v1674_v29  ;;  %2276 = vst [vmem:[%s3324_s5 + $0x60] sm:$0xff] %v2203_v21   ;;  %v1087_v12 = vpop.f32.mrb[33].mxu1  ;;  %v1686_v21 = vmul.f32 %v3188_v3, %v3188_v3 }
 0x17c   :  { %v1088_v37 = vpop.f32.mrb[34].mxu1 }
 0x17d   :  { %v1620_v41 = vadd.f32 %v1619_v49, %v3090_v60  ;;  %v1724_v63 = vadd.f32 %v1723_v23, %v1675_v62  ;;  %v3245_v16 = vadd.f32 %v3077_v33, %v1088_v37  ;;  %v1090_v8 = vpop.f32.mrb[35].mxu1  ;;  %v1678_v60 = vmul.f32 %v3110_v28, %v3110_v28 }
 0x17e   :  { %v1687_v23 = vmul.f32 %v3202_v15, %v3202_v15 }
 0x17f   :  { %v1621_v4 = vadd.f32 %v1620_v41, %v3106_v22  ;;  %v1725_v50 = vadd.f32 %v1724_v63, %v1676_v57  ;;  %v2248_v10 = vpack.c.bf16 %v3245_v16, %v3239_v6  ;;  %v1688_v63 = vmul.f32 %v3206_v32, %v3206_v32 }
 0x180   :  { %v1093_v26 = vpop.f32.mrb[36].mxu1 }
 0x181   :  { %v1622_v52 = vadd.f32 %v1621_v4, %v3110_v28  ;;  %v1726_v13 = vadd.f32 %v1725_v50, %v1677_v1  ;;  %2285 = vst [vmem:[%s3324_s5 + $0xa8] sm:$0xff] %v2248_v10   ;;  %v1094_v56 = vadd.f32 %v3077_v33, %v1093_v26  ;;  %v1095_v20 = vpop.f32.mrb[37].mxu1 }
 0x182   :  { %v1096_v45 = vpop.f32.mrb[38].mxu1 }
 0x183   :  { %v1623_v22 = vadd.f32 %v1622_v52, %v3124_v0  ;;  %v1727_v7 = vadd.f32 %v1726_v13, %v1678_v60  ;;  %v1097_v48 = vadd.f32 %v3077_v33, %v1096_v45  ;;  %v1098_v18 = vpop.f32.mrb[39].mxu1 }
 0x185   :  { %v1624_v61 = vadd.f32 %v1623_v22, %v3130_v46  ;;  %v1728_v28 = vadd.f32 %v1727_v7, %v1679_v9  ;;  %v2253_v38 = vpack.c.bf16 %v1097_v48, %v1094_v56  ;;  %v1691_v22 = vmul.f32 %v3239_v6, %v3239_v6 }
 0x186   :  { %v1692_v7 = vmul.f32 %v3245_v16, %v3245_v16  ;;  %v1694_v20 = vmul.f32 %v1097_v48, %v1097_v48 }
 0x187   :  { %v1729_v31 = vadd.f32 %v1728_v28, %v1680_v51  ;;  %v1625_v0 = vadd.f32 %v1624_v61, %v3145_v14  ;;  %2286 = vst [vmem:[%s3324_s5 + $0xb0] sm:$0xff] %v2253_v38   ;;  %v1684_v14 = vmul.f32 %v3168_v17, %v3168_v17 }
 0x188   :  { %v1101_v39 = vpop.f32.mrb[40].mxu1 }
 0x189   :  { %v1626_v46 = vadd.f32 %v1625_v0, %v3148_v35  ;;  %v1730_v54 = vadd.f32 %v1729_v31, %v1681_v47  ;;  %v1102_v35 = vadd.f32 %v3077_v33, %v1101_v39  ;;  %v1103_v59 = vpop.f32.mrb[41].mxu1 }
 0x18a   :  { %v1104_v42 = vpop.f32.mrb[42].mxu1 }
 0x18b   :  { %v1627_v19 = vadd.f32 %v1626_v46, %v3164_v2  ;;  %v1731_v44 = vadd.f32 %v1730_v54, %v1682_v27  ;;  %v1105_v34 = vadd.f32 %v3077_v33, %v1104_v42  ;;  %v1106_v29 = vpop.f32.mrb[43].mxu1  ;;  %v1695_v0 = vmul.f32 %v1102_v35, %v1102_v35 }
 0x18d   :  { %v1628_v30 = vadd.f32 %v1627_v19, %v3168_v17  ;;  %v1732_v40 = vadd.f32 %v1731_v44, %v1683_v25  ;;  %v2258_v62 = vpack.c.bf16 %v1105_v34, %v1102_v35  ;;  %v1696_v18 = vmul.f32 %v1105_v34, %v1105_v34 }
 0x18f   :  { %v1629_v2 = vadd.f32 %v1628_v30, %v3182_v58  ;;  %v1733_v24 = vadd.f32 %v1732_v40, %v1684_v14  ;;  %2287 = vst [vmem:[%s3324_s5 + $0xb8] sm:$0xff] %v2258_v62  }
 0x190   :  { %v1109_v36 = vpop.f32.mrb[44].mxu1 }
 0x191   :  { %v1630_v17 = vadd.f32 %v1629_v2, %v3188_v3  ;;  %v1734_v55 = vadd.f32 %v1733_v24, %v1685_v11  ;;  %v1110_v3 = vadd.f32 %v3077_v33, %v1109_v36  ;;  %v1111_v12 = vpop.f32.mrb[45].mxu1 }
 0x192   :  { %v1112_v50 = vpop.f32.mrb[46].mxu1 }
 0x193   :  { %v1631_v49 = vadd.f32 %v1630_v17, %v3202_v15  ;;  %v1735_v57 = vadd.f32 %v1734_v55, %v1686_v21  ;;  %v1689_v15 = vmul.f32 %v3218_v53, %v3218_v53  ;;  %v1113_v37 = vadd.f32 %v3077_v33, %v1112_v50  ;;  %v1114_v8 = vpop.f32.mrb[47].mxu1 }
 0x194   :  { %v1697_v38 = vmul.f32 %v1110_v3, %v1110_v3 }
 0x195   :  { %v1736_v58 = vadd.f32 %v1735_v57, %v1687_v23  ;;  %v1632_v41 = vadd.f32 %v1631_v49, %v3206_v32  ;;  %v1690_v32 = vmul.f32 %v3222_v43, %v3222_v43  ;;  %v2263_v13 = vpack.c.bf16 %v1113_v37, %v1110_v3 }
 0x196   :  { %v1593_v27 = vmul.f32 0.0, %v1113_v37 }
 0x197   :  { %v1737_v1 = vadd.f32 %v1736_v58, %v1688_v63  ;;  %v1633_v4 = vadd.f32 %v1632_v41, %v3218_v53  ;;  %2288 = vst [vmem:[%s3324_s5 + $0xc0] sm:$0xff] %v2263_v13  }
 0x198   :  { %v1698_v44 = vmul.f32 %v1593_v27, %v1113_v37 }
 0x199   :  { %v1738_v60 = vadd.f32 %v1737_v1, %v1689_v15  ;;  %v1634_v52 = vadd.f32 %v1633_v4, %v3222_v43  ;;  %v1693_v43 = vmul.f32 %v1094_v56, %v1094_v56 }
 0x19b   :  { %v1739_v10 = vadd.f32 %v1738_v60, %v1690_v32  ;;  %v1635_v9 = vadd.f32 %v1634_v52, %v3239_v6 }
 0x19d   :  { %v1740_v53 = vadd.f32 %v1739_v10, %v1691_v22  ;;  %v1636_v33 = vadd.f32 %v1635_v9, %v3245_v16 }
 0x19f   :  { %v1741_v51 = vadd.f32 %v1740_v53, %v1692_v7  ;;  %v1637_v61 = vadd.f32 %v1636_v33, %v1094_v56 }
 0x1a1   :  { %v1742_v28 = vadd.f32 %v1741_v51, %v1693_v43  ;;  %v1638_v26 = vadd.f32 %v1637_v61, %v1097_v48 }
 0x1a3   :  { %v1743_v47 = vadd.f32 %v1742_v28, %v1694_v20  ;;  %v1639_v31 = vadd.f32 %v1638_v26, %v1102_v35 }
 0x1a5   :  { %v1744_v6 = vadd.f32 %v1743_v47, %v1695_v0  ;;  %v1640_v45 = vadd.f32 %v1639_v31, %v1105_v34 }
 0x1a7   :  { %v1745_v46 = vadd.f32 %v1744_v6, %v1696_v18  ;;  %v1641_v54 = vadd.f32 %v1640_v45, %v1110_v3 }
 0x1a9   :  { %v1746_v25 = vadd.f32 %v1745_v46, %v1697_v38  ;;  %v1642_v19 = vadd.f32 %v1641_v54, %v1593_v27 }
 0x1ab   :  { %v1643_v16 = vrot.slane %v1642_v19, 4  ;;  %v1747_v14 = vadd.f32 %v1746_v25, %v1698_v44 }
 0x1ad   :  { %v1644_v30 = vadd.f32 %v1643_v16, %v1642_v19  ;;  %v1748_v56 = vrot.slane %v1747_v14, 4 }
 0x1af   :  { %v1645_v40 = vrot.slane %v1644_v30, 2  ;;  %v1749_v39 = vadd.f32 %v1748_v56, %v1747_v14 }
 0x1b1   :  { %v1646_v48 = vadd.f32 %v1645_v40, %v1644_v30  ;;  %v1750_v59 = vrot.slane %v1749_v39, 2 }
 0x1b3   :  { %v1647_v11 = vrot.slane %v1646_v48, 1  ;;  %v1751_v35 = vadd.f32 %v1750_v59, %v1749_v39 }
 0x1b5   :  { %v1648_v2 = vadd.f32 %v1647_v11, %v1646_v48  ;;  %v1752_v24 = vrot.slane %v1751_v35, 1 }
 0x1b7   :  { %v1753_v42 = vadd.f32 %v1752_v24, %v1751_v35  ;;  %v1757_v34 = vsel %vm1754_vm4, %v1648_v2, 0.0 }
 0x1b8   :  { %1758 = vst [vmem:[%s3325_s6] sm:$0xff] %v1757_v34 }
 0x1b9   :  { %v1759_v29 = vsel %vm1754_vm4, %v1753_v42, 0.0 }
 0x1ba   :  { %1760 = vst [vmem:[%s3326_s7] sm:$0xff] %v1759_v29 }

// kernel: discriminator_forward.6
= control target key start
LH: loop header
LB: loop body
LE: loop exit
PB: predicated region body
PF: predicated region fallthrough
CT: control target
= control target key end

     0   :  { %v218_v23 = vlaneseq  ;;  %s3334_s3 = inlined_call_operand.vmem [shape: bf16[512,128], index: 3, kind: input, shape index: {}]   ;;  %s3335_s0 = inlined_call_operand.vmem [shape: bf16[256,512], index: 0, kind: input, shape index: {}]   ;;  %s3336_s1 = inlined_call_operand.vmem [shape: f32[1,512], index: 1, kind: input, shape index: {}]   ;;  %s3337_s2 = inlined_call_operand.vmem [shape: f32[1,512], index: 2, kind: input, shape index: {}]   ;;  %s3338_s4 = inlined_call_operand.vmem [shape: f32[1,128], index: 4, kind: input, shape index: {}]   ;;  %s3339_s5 = inlined_call_operand.vmem [shape: bf16[256,128], index: 5, kind: output, shape index: {0}]   ;;  %s3340_s6 = inlined_call_operand.vmem [shape: f32[8,128], index: 6, kind: output, shape index: {1}]   ;;  %s3341_s7 = inlined_call_operand.vmem [shape: f32[8,128], index: 7, kind: output, shape index: {2}]  }
   0x1   :  { %v2568_v0 = vld [vmem:[%s3334_s3 + $0x40] sm:$0xff]   ;;  %v2572_v4 = vld [vmem:[%s3334_s3 + $0x48] sm:$0xff]   ;;  %v2576_v8 = vld [vmem:[%s3334_s3 + $0x50] sm:$0xff]  }
   0x2   :  { %v2569_v1 = vld [vmem:[%s3334_s3 + $0xc0] sm:$0xff]   ;;  %2343 = vmatprep.subr.bf16.mxu0 %v2568_v0  ;;  %v2573_v5 = vld [vmem:[%s3334_s3 + $0xc8] sm:$0xff]   ;;  %v2577_v9 = vld [vmem:[%s3334_s3 + $0xd0] sm:$0xff]   ;;  %v2722_v28 = vshrl.u32 %v218_v23, 7 }
   0x3   :  { %v2570_v2 = vld [vmem:[%s3334_s3] sm:$0xff]   ;;  %2455 = vmatprep.subr.bf16.mxu1 %v2569_v1  ;;  %v2574_v6 = vld [vmem:[%s3334_s3 + $0x8] sm:$0xff]   ;;  %v2578_v10 = vld [vmem:[%s3334_s3 + $0x10] sm:$0xff]  }
   0x4   :  { %v2571_v3 = vld [vmem:[%s3334_s3 + $0x80] sm:$0xff]   ;;  %2344 = vmatpush3.bf16.msra.mxu0 %v2570_v2  ;;  %v2575_v7 = vld [vmem:[%s3334_s3 + $0x88] sm:$0xff]   ;;  %v2579_v11 = vld [vmem:[%s3334_s3 + $0x90] sm:$0xff]   ;;  %v224_v33 = vsub.s32 1, %v2722_v28  ;;  %v232_v35 = vsub.s32 3, %v2722_v28  ;;  %v220_v39 = vsub.s32 0, %v2722_v28 }
   0x5   :  { %2456 = vmatpush3.bf16.msra.mxu1 %v2571_v3  ;;  %2345 = vmatprep.subr.bf16.mxu0 %v2572_v4  ;;  %v2580_v12 = vld [vmem:[%s3334_s3 + $0x58] sm:$0xff]   ;;  %v2584_v16 = vld [vmem:[%s3334_s3 + $0x60] sm:$0xff]   ;;  %v2588_v20 = vld [vmem:[%s3334_s3 + $0x68] sm:$0xff]   ;;  %v228_v40 = vsub.s32 2, %v2722_v28 }
   0x6   :  { %2457 = vmatprep.subr.bf16.mxu1 %v2573_v5  ;;  %v2581_v13 = vld [vmem:[%s3334_s3 + $0xd8] sm:$0xff]   ;;  %v2585_v17 = vld [vmem:[%s3334_s3 + $0xe0] sm:$0xff]   ;;  %v2589_v21 = vld [vmem:[%s3334_s3 + $0xe8] sm:$0xff]  }
   0x7   :  { %v2582_v14 = vld [vmem:[%s3334_s3 + $0x18] sm:$0xff]   ;;  %v2586_v18 = vld [vmem:[%s3334_s3 + $0x20] sm:$0xff]   ;;  %v2590_v22 = vld [vmem:[%s3334_s3 + $0x28] sm:$0xff]  }
   0x8   :  { %2346 = vmatpush3.bf16.msra.mxu0 %v2574_v6  ;;  %v2583_v15 = vld [vmem:[%s3334_s3 + $0x98] sm:$0xff]   ;;  %v2587_v19 = vld [vmem:[%s3334_s3 + $0xa0] sm:$0xff]   ;;  %v2591_v24 = vld [vmem:[%s3334_s3 + $0xa8] sm:$0xff]  }
   0x9   :  { %2458 = vmatpush3.bf16.msra.mxu1 %v2575_v7  ;;  %2347 = vmatprep.subr.bf16.mxu0 %v2576_v8  ;;  %v2592_v25 = vld [vmem:[%s3334_s3 + $0x70] sm:$0xff]   ;;  %v2596_v30 = vld [vmem:[%s3334_s3 + $0x78] sm:$0xff]   ;;  %v24_v36 = vld [vmem:[%s3335_s0] sm:$0xff] }
   0xa   :  { %2459 = vmatprep.subr.bf16.mxu1 %v2577_v9  ;;  %v2593_v26 = vld [vmem:[%s3334_s3 + $0xf0] sm:$0xff]   ;;  %v2597_v31 = vld [vmem:[%s3334_s3 + $0xf8] sm:$0xff]   ;;  %v216_v38 = vld [vmem:[%s3336_s1] sm:$0xf]  ;;  %v88_v41 = vunpack.c.l.bf16 %v24_v36  ;;  %v89_v42 = vunpack.c.h.bf16 %v24_v36 }
   0xb   :  { %v2594_v27 = vld [vmem:[%s3334_s3 + $0x30] sm:$0xff]   ;;  %v2598_v32 = vld [vmem:[%s3334_s3 + $0x38] sm:$0xff]   ;;  %v366_v45 = vld [vmem:[%s3337_s2] sm:$0xf]  ;;  %v2761_v48 = vrot.slane %v216_v38, %v224_v33  ;;  %v2765_v54 = vrot.slane %v216_v38, %v232_v35  ;;  %v2771_v58 = vrot.slane %v216_v38, %v220_v39  ;;  %v2777_v62 = vrot.slane %v216_v38, %v228_v40 }
   0xc   :  { %2348 = vmatpush3.bf16.msra.mxu0 %v2578_v10  ;;  %v2595_v29 = vld [vmem:[%s3334_s3 + $0xb0] sm:$0xff]   ;;  %v2599_v34 = vld [vmem:[%s3334_s3 + $0xb8] sm:$0xff]   ;;  %v25_v46 = vld [vmem:[%s3335_s0 + $0x8] sm:$0xff]  ;;  %v2763_v49 = vrot.slane %v366_v45, %v224_v33  ;;  %v2767_v55 = vrot.slane %v366_v45, %v232_v35  ;;  %v2773_v59 = vrot.slane %v366_v45, %v220_v39  ;;  %v2779_v63 = vrot.slane %v366_v45, %v228_v40 }
   0xd   :  { %2460 = vmatpush3.bf16.msra.mxu1 %v2579_v11  ;;  %2349 = vmatprep.subr.bf16.mxu0 %v2580_v12  ;;  %v26_v37 = vld [vmem:[%s3335_s0 + $0x10] sm:$0xff]  ;;  %v27_v47 = vld [vmem:[%s3335_s0 + $0x18] sm:$0xff]  ;;  %v90_v50 = vunpack.c.l.bf16 %v25_v46  ;;  %v91_v51 = vunpack.c.h.bf16 %v25_v46  ;;  %v239_v56 = vmul.f32 %v2761_v48, %v89_v42  ;;  %v238_v2 = vmul.f32 %v2771_v58, %v88_v41 }
   0xe   :  { %2461 = vmatprep.subr.bf16.mxu1 %v2581_v13  ;;  %v92_v43 = vunpack.c.l.bf16 %v26_v37  ;;  %v93_v44 = vunpack.c.h.bf16 %v26_v37  ;;  %v94_v52 = vunpack.c.l.bf16 %v27_v47  ;;  %v95_v53 = vunpack.c.h.bf16 %v27_v47 }
   0xf   :  { %v241_v60 = vmul.f32 %v2765_v54, %v91_v51  ;;  %v389_v0 = vadd.f32 %v2763_v49, %v239_v56  ;;  %v240_v6 = vmul.f32 %v2777_v62, %v90_v50 }
  0x10   :  { %2350 = vmatpush3.bf16.msra.mxu0 %v2582_v14  ;;  %v243_v57 = vmul.f32 %v2761_v48, %v93_v44  ;;  %v245_v61 = vmul.f32 %v2765_v54, %v95_v53  ;;  %v242_v3 = vmul.f32 %v2771_v58, %v92_v43  ;;  %v244_v7 = vmul.f32 %v2777_v62, %v94_v52 }
  0x11   :  { %2462 = vmatpush3.bf16.msra.mxu1 %v2583_v15  ;;  %2351 = vmatprep.subr.bf16.mxu0 %v2584_v16  ;;  %v391_v4 = vadd.f32 %v2767_v55, %v241_v60  ;;  %vm517_vm0 = vcmp.gt.f32.partialorder %v389_v0, 0.0  ;;  %v645_v8 = vmul.f32 0.2, %v389_v0  ;;  %v388_v14 = vadd.f32 %v2773_v59, %v238_v2 }
  0x12   :  { %2463 = vmatprep.subr.bf16.mxu1 %v2585_v17  ;;  %v393_v1 = vadd.f32 %v2763_v49, %v243_v57  ;;  %v395_v5 = vadd.f32 %v2767_v55, %v245_v61  ;;  %v392_v15 = vadd.f32 %v2773_v59, %v242_v3 }
  0x13   :  { %vm519_vm2 = vcmp.gt.f32.partialorder %v391_v4, 0.0  ;;  %v647_v10 = vmul.f32 0.2, %v391_v4  ;;  %v773_v12 = vsel %vm517_vm0, %v389_v0, %v645_v8  ;;  %vm516_vm4 = vcmp.gt.f32.partialorder %v388_v14, 0.0 }
  0x14   :  { %2352 = vmatpush3.bf16.msra.mxu0 %v2586_v18  ;;  %vm521_vm1 = vcmp.gt.f32.partialorder %v393_v1, 0.0  ;;  %v649_v9 = vmul.f32 0.2, %v393_v1  ;;  %vm523_vm3 = vcmp.gt.f32.partialorder %v395_v5, 0.0  ;;  %v651_v11 = vmul.f32 0.2, %v395_v5 }
  0x15   :  { %2464 = vmatpush3.bf16.msra.mxu1 %v2587_v19  ;;  %2353 = vmatprep.subr.bf16.mxu0 %v2588_v20  ;;  %v775_v17 = vsel %vm519_vm2, %v391_v4, %v647_v10  ;;  %v390_v19 = vadd.f32 %v2779_v63, %v240_v6  ;;  %v28_v20 = vld [vmem:[%s3335_s0 + $0x20] sm:$0xff]  ;;  %vm520_vm5 = vcmp.gt.f32.partialorder %v392_v15, 0.0  ;;  %v34_v10 = vld [vmem:[%s3335_s0 + $0x50] sm:$0xff] }
  0x16   :  { %2465 = vmatprep.subr.bf16.mxu1 %v2589_v21  ;;  %v777_v13 = vsel %vm521_vm1, %v393_v1, %v649_v9  ;;  %v779_v18 = vsel %vm523_vm3, %v395_v5, %v651_v11  ;;  %v30_v21 = vld [vmem:[%s3335_s0 + $0x30] sm:$0xff]  ;;  %v96_v43 = vunpack.c.l.bf16 %v28_v20  ;;  %v32_v6 = vld [vmem:[%s3335_s0 + $0x40] sm:$0xff] }
  0x17   :  { %v901_v16 = vpack.c.bf16 %v777_v13, %v773_v12  ;;  %v903_v23 = vpack.c.bf16 %v779_v18, %v775_v17  ;;  %vm518_vm6 = vcmp.gt.f32.partialorder %v390_v19, 0.0  ;;  %v100_v44 = vunpack.c.l.bf16 %v30_v21  ;;  %v33_v17 = vld [vmem:[%s3335_s0 + $0x48] sm:$0xff]  ;;  %v35_v18 = vld [vmem:[%s3335_s0 + $0x58] sm:$0xff] }
  0x18   :  { %2354 = vmatpush3.bf16.msra.mxu0 %v2590_v22  ;;  %v2801_v22 = vld [vmem:[%s3335_s0 + $0x28] sm:$0xff]  ;;  %v246_v52 = vmul.f32 %v2771_v58, %v96_v43 }
  0x19   :  { %2466 = vmatpush3.bf16.msra.mxu1 %v2591_v24  ;;  %2355 = vmatprep.subr.bf16.mxu0 %v2592_v25  ;;  %v644_v24 = vmul.f32 0.2, %v388_v14  ;;  %v648_v25 = vmul.f32 0.2, %v392_v15  ;;  %v99_v33 = vunpack.c.h.bf16 %v2801_v22  ;;  %v250_v53 = vmul.f32 %v2771_v58, %v100_v44 }
  0x1a   :  { %2467 = vmatprep.subr.bf16.mxu1 %v2593_v26  ;;  %1259 = vmatprep.mubr.bf16.mxu0 %v901_v16  ;;  %v394_v26 = vadd.f32 %v2779_v63, %v244_v7  ;;  %v98_v56 = vunpack.c.l.bf16 %v2801_v22  ;;  %v396_v1 = vadd.f32 %v2773_v59, %v246_v52  ;;  %v105_v16 = vunpack.c.h.bf16 %v32_v6 }
  0x1b   :  { %1420 = vmatprep.mubr.bf16.mxu1 %v903_v23  ;;  %v249_v42 = vmul.f32 %v2765_v54, %v99_v33  ;;  %v400_v4 = vadd.f32 %v2773_v59, %v250_v53  ;;  %v109_v22 = vunpack.c.h.bf16 %v34_v10  ;;  %v106_v52 = vunpack.c.l.bf16 %v33_v17 }
  0x1c   :  { %2356 = vmatpush3.bf16.msra.mxu0 %v2594_v27  ;;  %v646_v27 = vmul.f32 0.2, %v390_v19  ;;  %vm522_vm7 = vcmp.gt.f32.partialorder %v394_v26, 0.0  ;;  %v650_v35 = vmul.f32 0.2, %v394_v26  ;;  %vm524_vm12 = vcmp.gt.f32.partialorder %v396_v1, 0.0 }
  0x1d   :  { %2468 = vmatpush3.bf16.msra.mxu1 %v2595_v29  ;;  %2357 = vmatprep.subr.bf16.mxu0 %v2596_v30  ;;  %v31_v29 = vld [vmem:[%s3335_s0 + $0x38] sm:$0xff]  ;;  %v772_v30 = vsel %vm516_vm4, %v388_v14, %v644_v24  ;;  %v399_v51 = vadd.f32 %v2767_v55, %v249_v42  ;;  %vm528_vm13 = vcmp.gt.f32.partialorder %v400_v4, 0.0  ;;  %v652_v11 = vmul.f32 0.2, %v396_v1 }
  0x1e   :  { %2469 = vmatprep.subr.bf16.mxu1 %v2597_v31  ;;  %v97_v31 = vunpack.c.h.bf16 %v28_v20  ;;  %v774_v36 = vsel %vm518_vm6, %v390_v19, %v646_v27  ;;  %v103_v40 = vunpack.c.h.bf16 %v31_v29  ;;  %v778_v41 = vsel %vm522_vm7, %v394_v26, %v650_v35 }
  0x1f   :  { %v902_v45 = vpack.c.bf16 %v778_v41, %v774_v36  ;;  %vm527_vm10 = vcmp.gt.f32.partialorder %v399_v51, 0.0  ;;  %v655_v0 = vmul.f32 0.2, %v399_v51  ;;  %v102_v5 = vunpack.c.l.bf16 %v31_v29 }
  0x20   :  { %2358 = vmatpush3.bf16.msra.mxu0 %v2598_v32  ;;  %v101_v32 = vunpack.c.h.bf16 %v30_v21  ;;  %v247_v38 = vmul.f32 %v2761_v48, %v97_v31  ;;  %v253_v50 = vmul.f32 %v2765_v54, %v103_v40  ;;  %v656_v12 = vmul.f32 0.2, %v400_v4 }
  0x21   :  { %2470 = vmatpush3.bf16.msra.mxu1 %v2599_v34  ;;  %v776_v34 = vsel %vm520_vm5, %v392_v15, %v648_v25  ;;  %v783_v9 = vsel %vm527_vm10, %v399_v51, %v655_v0  ;;  %v248_v14 = vmul.f32 %v2777_v62, %v98_v56  ;;  %v252_v15 = vmul.f32 %v2777_v62, %v102_v5 }
  0x22   :  { %v900_v37 = vpack.c.bf16 %v776_v34, %v772_v30  ;;  %v251_v39 = vmul.f32 %v2761_v48, %v101_v32  ;;  %v397_v46 = vadd.f32 %v2763_v49, %v247_v38  ;;  %v403_v61 = vadd.f32 %v2767_v55, %v253_v50 }
  0x23   :  { %v780_v20 = vsel %vm524_vm12, %v396_v1, %v652_v11  ;;  %v784_v21 = vsel %vm528_vm13, %v400_v4, %v656_v12  ;;  %v398_v24 = vadd.f32 %v2779_v63, %v248_v14  ;;  %v402_v25 = vadd.f32 %v2779_v63, %v252_v15  ;;  %v39_v15 = vld [vmem:[%s3335_s0 + $0x78] sm:$0xff] }
  0x24   :  { %1260 = vmatmul.mubr.bf16.vlgmr.msra.gmra.mrb[0].mxu0 %v900_v37  ;;  %v401_v47 = vadd.f32 %v2763_v49, %v251_v39  ;;  %1421 = vmatmul.mubr.bf16.vlgmr.msra.gmra.mrb[0].mxu1 %v902_v45  ;;  %vm525_vm8 = vcmp.gt.f32.partialorder %v397_v46, 0.0  ;;  %v653_v57 = vmul.f32 0.2, %v397_v46  ;;  %vm531_vm11 = vcmp.gt.f32.partialorder %v403_v61, 0.0 }
  0x25   :  { %v659_v8 = vmul.f32 0.2, %v403_v61  ;;  %v904_v23 = vpack.c.bf16 %v784_v21, %v780_v20  ;;  %v255_v26 = vmul.f32 %v2761_v48, %v105_v16  ;;  %v259_v27 = vmul.f32 %v2761_v48, %v109_v22 }
  0x26   :  { %vm529_vm9 = vcmp.gt.f32.partialorder %v401_v47, 0.0  ;;  %v657_v60 = vmul.f32 0.2, %v401_v47  ;;  %v781_v2 = vsel %vm525_vm8, %v397_v46, %v653_v57  ;;  %v107_v29 = vunpack.c.h.bf16 %v33_v17 }
  0x27   :  { %v787_v13 = vsel %vm531_vm11, %v403_v61, %v659_v8  ;;  %v111_v30 = vunpack.c.h.bf16 %v35_v18  ;;  %v104_v31 = vunpack.c.l.bf16 %v32_v6  ;;  %vm526_vm14 = vcmp.gt.f32.partialorder %v398_v24, 0.0  ;;  %v38_v6 = vld [vmem:[%s3335_s0 + $0x70] sm:$0xff] }
  0x28   :  { %v785_v3 = vsel %vm529_vm9, %v401_v47, %v657_v60  ;;  %v907_v19 = vpack.c.bf16 %v787_v13, %v783_v9  ;;  %vm530_vm15 = vcmp.gt.f32.partialorder %v402_v25, 0.0  ;;  %v654_v32 = vmul.f32 0.2, %v398_v24  ;;  %v36_v60 = vld [vmem:[%s3335_s0 + $0x60] sm:$0xff] }
  0x29   :  { %v905_v7 = vpack.c.bf16 %v785_v3, %v781_v2  ;;  %v658_v33 = vmul.f32 0.2, %v402_v25  ;;  %v405_v34 = vadd.f32 %v2763_v49, %v255_v26  ;;  %v409_v35 = vadd.f32 %v2763_v49, %v259_v27 }
  0x2a   :  { %1428 = vmatprep.mubr.bf16.mxu1 %v907_v19  ;;  %v257_v36 = vmul.f32 %v2765_v54, %v107_v29  ;;  %v261_v37 = vmul.f32 %v2765_v54, %v111_v30  ;;  %v782_v38 = vsel %vm526_vm14, %v398_v24, %v654_v32  ;;  %v108_v40 = vunpack.c.l.bf16 %v34_v10 }
  0x2b   :  { %1267 = vmatprep.mubr.bf16.mxu0 %v905_v7  ;;  %v786_v39 = vsel %vm530_vm15, %v402_v25, %v658_v33  ;;  %v254_v41 = vmul.f32 %v2771_v58, %v104_v31  ;;  %vm533_vm0 = vcmp.gt.f32.partialorder %v405_v34, 0.0  ;;  %vm537_vm1 = vcmp.gt.f32.partialorder %v409_v35, 0.0  ;;  %v2860_v7 = vld [vmem:[%s3335_s0 + $0x68] sm:$0xff] }
  0x2c   :  { %1268 = vmatmul.mubr.bf16.gmra.mrb[4].mxu0 %v904_v23  ;;  %v906_v42 = vpack.c.bf16 %v786_v39, %v782_v38  ;;  %v661_v43 = vmul.f32 0.2, %v405_v34  ;;  %v665_v44 = vmul.f32 0.2, %v409_v35  ;;  %v407_v45 = vadd.f32 %v2767_v55, %v257_v36 }
  0x2d   :  { %v411_v46 = vadd.f32 %v2767_v55, %v261_v37  ;;  %v258_v47 = vmul.f32 %v2771_v58, %v108_v40  ;;  %v404_v51 = vadd.f32 %v2773_v59, %v254_v41  ;;  %v110_v53 = vunpack.c.l.bf16 %v35_v18 }
  0x2e   :  { %1429 = vmatmul.mubr.bf16.gmra.mrb[4].mxu1 %v906_v42  ;;  %v789_v50 = vsel %vm533_vm0, %v405_v34, %v661_v43  ;;  %v793_v56 = vsel %vm537_vm1, %v409_v35, %v665_v44  ;;  %vm535_vm2 = vcmp.gt.f32.partialorder %v407_v45, 0.0  ;;  %v663_v57 = vmul.f32 0.2, %v407_v45 }
  0x2f   :  { %vm539_vm3 = vcmp.gt.f32.partialorder %v411_v46, 0.0  ;;  %v909_v61 = vpack.c.bf16 %v793_v56, %v789_v50  ;;  %v667_v0 = vmul.f32 0.2, %v411_v46  ;;  %v408_v1 = vadd.f32 %v2773_v59, %v258_v47  ;;  %v40_v50 = vld [vmem:[%s3335_s0 + $0x80] sm:$0xff]  ;;  %v42_v56 = vld [vmem:[%s3335_s0 + $0x90] sm:$0xff] }
  0x30   :  { %vm532_vm4 = vcmp.gt.f32.partialorder %v404_v51, 0.0  ;;  %v791_v2 = vsel %vm535_vm2, %v407_v45, %v663_v57  ;;  %v660_v3 = vmul.f32 0.2, %v404_v51  ;;  %v256_v4 = vmul.f32 %v2777_v62, %v106_v52 }
  0x31   :  { %v260_v5 = vmul.f32 %v2777_v62, %v110_v53  ;;  %1275 = vmatprep.mubr.bf16.mxu0 %v909_v61  ;;  %v795_v8 = vsel %vm539_vm3, %v411_v46, %v667_v0  ;;  %vm536_vm5 = vcmp.gt.f32.partialorder %v408_v1, 0.0  ;;  %v664_v9 = vmul.f32 0.2, %v408_v1 }
  0x32   :  { %v113_v10 = vunpack.c.h.bf16 %v36_v60  ;;  %v911_v11 = vpack.c.bf16 %v795_v8, %v791_v2  ;;  %v788_v12 = vsel %vm532_vm4, %v404_v51, %v660_v3  ;;  %v406_v13 = vadd.f32 %v2779_v63, %v256_v4  ;;  %v41_v3 = vld [vmem:[%s3335_s0 + $0x88] sm:$0xff]  ;;  %v43_v4 = vld [vmem:[%s3335_s0 + $0x98] sm:$0xff] }
  0x33   :  { %v410_v14 = vadd.f32 %v2779_v63, %v260_v5  ;;  %v792_v16 = vsel %vm536_vm5, %v408_v1, %v664_v9  ;;  %v117_v17 = vunpack.c.h.bf16 %v38_v6  ;;  %v115_v19 = vunpack.c.h.bf16 %v2860_v7 }
  0x34   :  { %v263_v18 = vmul.f32 %v2761_v48, %v113_v10  ;;  %1436 = vmatprep.mubr.bf16.mxu1 %v911_v11  ;;  %v908_v20 = vpack.c.bf16 %v792_v16, %v788_v12  ;;  %vm534_vm6 = vcmp.gt.f32.partialorder %v406_v13, 0.0  ;;  %v662_v21 = vmul.f32 0.2, %v406_v13 }
  0x35   :  { %vm538_vm7 = vcmp.gt.f32.partialorder %v410_v14, 0.0  ;;  %v666_v22 = vmul.f32 0.2, %v410_v14  ;;  %v267_v23 = vmul.f32 %v2761_v48, %v117_v17  ;;  %v119_v25 = vunpack.c.h.bf16 %v39_v15 }
  0x36   :  { %v413_v24 = vadd.f32 %v2763_v49, %v263_v18  ;;  %1276 = vmatmul.mubr.bf16.gmra.mrb[8].mxu0 %v908_v20  ;;  %v790_v26 = vsel %vm534_vm6, %v406_v13, %v662_v21  ;;  %v265_v27 = vmul.f32 %v2765_v54, %v115_v19  ;;  %v112_v29 = vunpack.c.l.bf16 %v36_v60 }
  0x37   :  { %v116_v30 = vunpack.c.l.bf16 %v38_v6  ;;  %v794_v31 = vsel %vm538_vm7, %v410_v14, %v666_v22  ;;  %v417_v32 = vadd.f32 %v2763_v49, %v267_v23  ;;  %v269_v35 = vmul.f32 %v2765_v54, %v119_v25 }
  0x38   :  { %vm541_vm8 = vcmp.gt.f32.partialorder %v413_v24, 0.0  ;;  %v669_v33 = vmul.f32 0.2, %v413_v24  ;;  %v910_v34 = vpack.c.bf16 %v794_v31, %v790_v26  ;;  %v415_v36 = vadd.f32 %v2767_v55, %v265_v27 }
  0x39   :  { %v262_v37 = vmul.f32 %v2771_v58, %v112_v29  ;;  %vm545_vm9 = vcmp.gt.f32.partialorder %v417_v32, 0.0  ;;  %v673_v38 = vmul.f32 0.2, %v417_v32  ;;  %v266_v40 = vmul.f32 %v2771_v58, %v116_v30 }
  0x3a   :  { %v797_v39 = vsel %vm541_vm8, %v413_v24, %v669_v33  ;;  %1437 = vmatmul.mubr.bf16.gmra.mrb[8].mxu1 %v910_v34  ;;  %v419_v41 = vadd.f32 %v2767_v55, %v269_v35  ;;  %vm543_vm10 = vcmp.gt.f32.partialorder %v415_v36, 0.0  ;;  %v671_v42 = vmul.f32 0.2, %v415_v36 }
  0x3b   :  { %v412_v43 = vadd.f32 %v2773_v59, %v262_v37  ;;  %v801_v44 = vsel %vm545_vm9, %v417_v32, %v673_v38  ;;  %v416_v45 = vadd.f32 %v2773_v59, %v266_v40  ;;  %v114_v46 = vunpack.c.l.bf16 %v2860_v7  ;;  %v44_v40 = vld [vmem:[%s3335_s0 + $0xa0] sm:$0xff] }
  0x3c   :  { %v118_v47 = vunpack.c.l.bf16 %v39_v15  ;;  %v913_v51 = vpack.c.bf16 %v801_v44, %v797_v39  ;;  %vm547_vm11 = vcmp.gt.f32.partialorder %v419_v41, 0.0  ;;  %v675_v52 = vmul.f32 0.2, %v419_v41 }
  0x3d   :  { %v799_v53 = vsel %vm543_vm10, %v415_v36, %v671_v42  ;;  %vm540_vm12 = vcmp.gt.f32.partialorder %v412_v43, 0.0  ;;  %vm544_vm13 = vcmp.gt.f32.partialorder %v416_v45, 0.0  ;;  %v668_v57 = vmul.f32 0.2, %v412_v43 }
  0x3e   :  { %v672_v60 = vmul.f32 0.2, %v416_v45  ;;  %1283 = vmatprep.mubr.bf16.mxu0 %v913_v51  ;;  %v803_v61 = vsel %vm547_vm11, %v419_v41, %v675_v52  ;;  %v264_v0 = vmul.f32 %v2777_v62, %v114_v46  ;;  %v268_v1 = vmul.f32 %v2777_v62, %v118_v47  ;;  %v2920_v51 = vld [vmem:[%s3335_s0 + $0xa8] sm:$0xff] }
  0x3f   :  { %v121_v2 = vunpack.c.h.bf16 %v40_v50  ;;  %v915_v5 = vpack.c.bf16 %v803_v61, %v799_v53  ;;  %v796_v6 = vsel %vm540_vm12, %v412_v43, %v668_v57  ;;  %v125_v8 = vunpack.c.h.bf16 %v42_v56 }
  0x40   :  { %v800_v7 = vsel %vm544_vm13, %v416_v45, %v672_v60  ;;  %v414_v10 = vadd.f32 %v2779_v63, %v264_v0  ;;  %v418_v11 = vadd.f32 %v2779_v63, %v268_v1  ;;  %v123_v14 = vunpack.c.h.bf16 %v41_v3  ;;  %v47_v1 = vld [vmem:[%s3335_s0 + $0xb8] sm:$0xff] }
  0x41   :  { %v912_v9 = vpack.c.bf16 %v800_v7, %v796_v6  ;;  %v271_v12 = vmul.f32 %v2761_v48, %v121_v2  ;;  %1444 = vmatprep.mubr.bf16.mxu1 %v915_v5  ;;  %v275_v13 = vmul.f32 %v2761_v48, %v125_v8  ;;  %v127_v15 = vunpack.c.h.bf16 %v43_v4 }
  0x42   :  { %v120_v16 = vunpack.c.l.bf16 %v40_v50  ;;  %vm542_vm14 = vcmp.gt.f32.partialorder %v414_v10, 0.0  ;;  %vm546_vm15 = vcmp.gt.f32.partialorder %v418_v11, 0.0  ;;  %v670_v17 = vmul.f32 0.2, %v414_v10  ;;  %v46_v50 = vld [vmem:[%s3335_s0 + $0xb0] sm:$0xff] }
  0x43   :  { %1284 = vmatmul.mubr.bf16.gmra.mrb[12].mxu0 %v912_v9  ;;  %v674_v18 = vmul.f32 0.2, %v418_v11  ;;  %v421_v19 = vadd.f32 %v2763_v49, %v271_v12  ;;  %v425_v20 = vadd.f32 %v2763_v49, %v275_v13  ;;  %v273_v21 = vmul.f32 %v2765_v54, %v123_v14 }
  0x44   :  { %v277_v22 = vmul.f32 %v2765_v54, %v127_v15  ;;  %v798_v23 = vsel %vm542_vm14, %v414_v10, %v670_v17  ;;  %v124_v25 = vunpack.c.l.bf16 %v42_v56  ;;  %v270_v26 = vmul.f32 %v2771_v58, %v120_v16 }
  0x45   :  { %v802_v24 = vsel %vm546_vm15, %v418_v11, %v674_v18  ;;  %vm549_vm0 = vcmp.gt.f32.partialorder %v421_v19, 0.0  ;;  %vm553_vm1 = vcmp.gt.f32.partialorder %v425_v20, 0.0  ;;  %v677_v29 = vmul.f32 0.2, %v421_v19 }
  0x46   :  { %v914_v27 = vpack.c.bf16 %v802_v24, %v798_v23  ;;  %v681_v30 = vmul.f32 0.2, %v425_v20  ;;  %v423_v31 = vadd.f32 %v2767_v55, %v273_v21  ;;  %v427_v32 = vadd.f32 %v2767_v55, %v277_v22 }
  0x47   :  { %v274_v33 = vmul.f32 %v2771_v58, %v124_v25  ;;  %v805_v34 = vsel %vm549_vm0, %v421_v19, %v677_v29  ;;  %v420_v35 = vadd.f32 %v2773_v59, %v270_v26  ;;  %v122_v36 = vunpack.c.l.bf16 %v41_v3 }
  0x48   :  { %1445 = vmatmul.mubr.bf16.gmra.mrb[12].mxu1 %v914_v27  ;;  %v126_v37 = vunpack.c.l.bf16 %v43_v4  ;;  %v809_v38 = vsel %vm553_vm1, %v425_v20, %v681_v30  ;;  %vm551_vm2 = vcmp.gt.f32.partialorder %v423_v31, 0.0  ;;  %vm555_vm3 = vcmp.gt.f32.partialorder %v427_v32, 0.0 }
  0x49   :  { %v679_v39 = vmul.f32 0.2, %v423_v31  ;;  %v917_v41 = vpack.c.bf16 %v809_v38, %v805_v34  ;;  %v683_v42 = vmul.f32 0.2, %v427_v32  ;;  %v424_v43 = vadd.f32 %v2773_v59, %v274_v33  ;;  %v48_v34 = vld [vmem:[%s3335_s0 + $0xc0] sm:$0xff]  ;;  %v50_v38 = vld [vmem:[%s3335_s0 + $0xd0] sm:$0xff] }
  0x4a   :  { %vm548_vm4 = vcmp.gt.f32.partialorder %v420_v35, 0.0  ;;  %v676_v45 = vmul.f32 0.2, %v420_v35  ;;  %v272_v46 = vmul.f32 %v2777_v62, %v122_v36  ;;  %v276_v47 = vmul.f32 %v2777_v62, %v126_v37 }
  0x4b   :  { %v807_v44 = vsel %vm551_vm2, %v423_v31, %v679_v39  ;;  %1291 = vmatprep.mubr.bf16.mxu0 %v917_v41  ;;  %v811_v52 = vsel %vm555_vm3, %v427_v32, %v683_v42  ;;  %vm552_vm5 = vcmp.gt.f32.partialorder %v424_v43, 0.0  ;;  %v680_v53 = vmul.f32 0.2, %v424_v43 }
  0x4c   :  { %v129_v56 = vunpack.c.h.bf16 %v44_v40  ;;  %v919_v57 = vpack.c.bf16 %v811_v52, %v807_v44  ;;  %v804_v60 = vsel %vm548_vm4, %v420_v35, %v676_v45  ;;  %v422_v61 = vadd.f32 %v2779_v63, %v272_v46  ;;  %v49_v45 = vld [vmem:[%s3335_s0 + $0xc8] sm:$0xff]  ;;  %v51_v46 = vld [vmem:[%s3335_s0 + $0xd8] sm:$0xff] }
  0x4d   :  { %v426_v0 = vadd.f32 %v2779_v63, %v276_v47  ;;  %v808_v2 = vsel %vm552_vm5, %v424_v43, %v680_v53  ;;  %v133_v3 = vunpack.c.h.bf16 %v46_v50  ;;  %v131_v5 = vunpack.c.h.bf16 %v2920_v51 }
  0x4e   :  { %v279_v4 = vmul.f32 %v2761_v48, %v129_v56  ;;  %1452 = vmatprep.mubr.bf16.mxu1 %v919_v57  ;;  %v916_v6 = vpack.c.bf16 %v808_v2, %v804_v60  ;;  %vm550_vm6 = vcmp.gt.f32.partialorder %v422_v61, 0.0  ;;  %v678_v7 = vmul.f32 0.2, %v422_v61 }
  0x4f   :  { %vm554_vm7 = vcmp.gt.f32.partialorder %v426_v0, 0.0  ;;  %v682_v8 = vmul.f32 0.2, %v426_v0  ;;  %v283_v9 = vmul.f32 %v2761_v48, %v133_v3  ;;  %v135_v11 = vunpack.c.h.bf16 %v47_v1 }
  0x50   :  { %v429_v10 = vadd.f32 %v2763_v49, %v279_v4  ;;  %1292 = vmatmul.mubr.bf16.gmra.mrb[16].mxu0 %v916_v6  ;;  %v806_v12 = vsel %vm550_vm6, %v422_v61, %v678_v7  ;;  %v281_v13 = vmul.f32 %v2765_v54, %v131_v5  ;;  %v128_v14 = vunpack.c.l.bf16 %v44_v40 }
  0x51   :  { %v132_v15 = vunpack.c.l.bf16 %v46_v50  ;;  %v810_v16 = vsel %vm554_vm7, %v426_v0, %v682_v8  ;;  %v433_v17 = vadd.f32 %v2763_v49, %v283_v9  ;;  %v285_v20 = vmul.f32 %v2765_v54, %v135_v11 }
  0x52   :  { %vm557_vm8 = vcmp.gt.f32.partialorder %v429_v10, 0.0  ;;  %v685_v18 = vmul.f32 0.2, %v429_v10  ;;  %v918_v19 = vpack.c.bf16 %v810_v16, %v806_v12  ;;  %v431_v21 = vadd.f32 %v2767_v55, %v281_v13 }
  0x53   :  { %v278_v22 = vmul.f32 %v2771_v58, %v128_v14  ;;  %vm561_vm9 = vcmp.gt.f32.partialorder %v433_v17, 0.0  ;;  %v689_v23 = vmul.f32 0.2, %v433_v17  ;;  %v282_v25 = vmul.f32 %v2771_v58, %v132_v15 }
  0x54   :  { %v813_v24 = vsel %vm557_vm8, %v429_v10, %v685_v18  ;;  %1453 = vmatmul.mubr.bf16.gmra.mrb[16].mxu1 %v918_v19  ;;  %v435_v26 = vadd.f32 %v2767_v55, %v285_v20  ;;  %vm559_vm10 = vcmp.gt.f32.partialorder %v431_v21, 0.0  ;;  %v687_v27 = vmul.f32 0.2, %v431_v21 }
  0x55   :  { %v428_v29 = vadd.f32 %v2773_v59, %v278_v22  ;;  %v817_v30 = vsel %vm561_vm9, %v433_v17, %v689_v23  ;;  %v432_v31 = vadd.f32 %v2773_v59, %v282_v25  ;;  %v130_v32 = vunpack.c.l.bf16 %v2920_v51  ;;  %v52_v25 = vld [vmem:[%s3335_s0 + $0xe0] sm:$0xff] }
  0x56   :  { %v134_v33 = vunpack.c.l.bf16 %v47_v1  ;;  %v921_v35 = vpack.c.bf16 %v817_v30, %v813_v24  ;;  %vm563_vm11 = vcmp.gt.f32.partialorder %v435_v26, 0.0  ;;  %v691_v36 = vmul.f32 0.2, %v435_v26 }
  0x57   :  { %v815_v37 = vsel %vm559_vm10, %v431_v21, %v687_v27  ;;  %vm556_vm12 = vcmp.gt.f32.partialorder %v428_v29, 0.0  ;;  %vm560_vm13 = vcmp.gt.f32.partialorder %v432_v31, 0.0  ;;  %v684_v39 = vmul.f32 0.2, %v428_v29 }
  0x58   :  { %v688_v40 = vmul.f32 0.2, %v432_v31  ;;  %1299 = vmatprep.mubr.bf16.mxu0 %v921_v35  ;;  %v819_v41 = vsel %vm563_vm11, %v435_v26, %v691_v36  ;;  %v280_v42 = vmul.f32 %v2777_v62, %v130_v32  ;;  %v284_v43 = vmul.f32 %v2777_v62, %v134_v33  ;;  %v2980_v35 = vld [vmem:[%s3335_s0 + $0xe8] sm:$0xff] }
  0x59   :  { %v137_v44 = vunpack.c.h.bf16 %v48_v34  ;;  %v923_v47 = vpack.c.bf16 %v819_v41, %v815_v37  ;;  %v812_v50 = vsel %vm556_vm12, %v428_v29, %v684_v39  ;;  %v141_v52 = vunpack.c.h.bf16 %v50_v38 }
  0x5a   :  { %v816_v51 = vsel %vm560_vm13, %v432_v31, %v688_v40  ;;  %v430_v56 = vadd.f32 %v2779_v63, %v280_v42  ;;  %v434_v57 = vadd.f32 %v2779_v63, %v284_v43  ;;  %v139_v0 = vunpack.c.h.bf16 %v49_v45  ;;  %v55_v43 = vld [vmem:[%s3335_s0 + $0xf8] sm:$0xff] }
  0x5b   :  { %v920_v53 = vpack.c.bf16 %v816_v51, %v812_v50  ;;  %v287_v60 = vmul.f32 %v2761_v48, %v137_v44  ;;  %1460 = vmatprep.mubr.bf16.mxu1 %v923_v47  ;;  %v291_v61 = vmul.f32 %v2761_v48, %v141_v52  ;;  %v143_v1 = vunpack.c.h.bf16 %v51_v46 }
  0x5c   :  { %v136_v2 = vunpack.c.l.bf16 %v48_v34  ;;  %vm558_vm14 = vcmp.gt.f32.partialorder %v430_v56, 0.0  ;;  %vm562_vm15 = vcmp.gt.f32.partialorder %v434_v57, 0.0  ;;  %v686_v3 = vmul.f32 0.2, %v430_v56  ;;  %v54_v34 = vld [vmem:[%s3335_s0 + $0xf0] sm:$0xff] }
  0x5d   :  { %1300 = vmatmul.mubr.bf16.gmra.mrb[20].mxu0 %v920_v53  ;;  %v690_v4 = vmul.f32 0.2, %v434_v57  ;;  %v437_v5 = vadd.f32 %v2763_v49, %v287_v60  ;;  %v441_v6 = vadd.f32 %v2763_v49, %v291_v61  ;;  %v289_v7 = vmul.f32 %v2765_v54, %v139_v0 }
  0x5e   :  { %v293_v8 = vmul.f32 %v2765_v54, %v143_v1  ;;  %v814_v9 = vsel %vm558_vm14, %v430_v56, %v686_v3  ;;  %v140_v11 = vunpack.c.l.bf16 %v50_v38  ;;  %v286_v12 = vmul.f32 %v2771_v58, %v136_v2 }
  0x5f   :  { %v818_v10 = vsel %vm562_vm15, %v434_v57, %v690_v4  ;;  %vm565_vm0 = vcmp.gt.f32.partialorder %v437_v5, 0.0  ;;  %vm569_vm1 = vcmp.gt.f32.partialorder %v441_v6, 0.0  ;;  %v693_v14 = vmul.f32 0.2, %v437_v5 }
  0x60   :  { %v922_v13 = vpack.c.bf16 %v818_v10, %v814_v9  ;;  %v697_v15 = vmul.f32 0.2, %v441_v6  ;;  %v439_v16 = vadd.f32 %v2767_v55, %v289_v7  ;;  %v443_v17 = vadd.f32 %v2767_v55, %v293_v8 }
  0x61   :  { %v290_v18 = vmul.f32 %v2771_v58, %v140_v11  ;;  %v821_v19 = vsel %vm565_vm0, %v437_v5, %v693_v14  ;;  %v436_v20 = vadd.f32 %v2773_v59, %v286_v12  ;;  %v138_v21 = vunpack.c.l.bf16 %v49_v45 }
  0x62   :  { %1461 = vmatmul.mubr.bf16.gmra.mrb[20].mxu1 %v922_v13  ;;  %v142_v22 = vunpack.c.l.bf16 %v51_v46  ;;  %v825_v23 = vsel %vm569_vm1, %v441_v6, %v697_v15  ;;  %vm567_vm2 = vcmp.gt.f32.partialorder %v439_v16, 0.0  ;;  %vm571_vm3 = vcmp.gt.f32.partialorder %v443_v17, 0.0 }
  0x63   :  { %v695_v24 = vmul.f32 0.2, %v439_v16  ;;  %v925_v26 = vpack.c.bf16 %v825_v23, %v821_v19  ;;  %v699_v27 = vmul.f32 0.2, %v443_v17  ;;  %v440_v29 = vadd.f32 %v2773_v59, %v290_v18  ;;  %v56_v19 = vld [vmem:[%s3335_s0 + $0x100] sm:$0xff]  ;;  %v58_v23 = vld [vmem:[%s3335_s0 + $0x110] sm:$0xff] }
  0x64   :  { %vm564_vm4 = vcmp.gt.f32.partialorder %v436_v20, 0.0  ;;  %v692_v31 = vmul.f32 0.2, %v436_v20  ;;  %v288_v32 = vmul.f32 %v2777_v62, %v138_v21  ;;  %v292_v33 = vmul.f32 %v2777_v62, %v142_v22 }
  0x65   :  { %v823_v30 = vsel %vm567_vm2, %v439_v16, %v695_v24  ;;  %1307 = vmatprep.mubr.bf16.mxu0 %v925_v26  ;;  %v827_v36 = vsel %vm571_vm3, %v443_v17, %v699_v27  ;;  %vm568_vm5 = vcmp.gt.f32.partialorder %v440_v29, 0.0  ;;  %v696_v37 = vmul.f32 0.2, %v440_v29 }
  0x66   :  { %v145_v38 = vunpack.c.h.bf16 %v52_v25  ;;  %v927_v39 = vpack.c.bf16 %v827_v36, %v823_v30  ;;  %v820_v40 = vsel %vm564_vm4, %v436_v20, %v692_v31  ;;  %v438_v41 = vadd.f32 %v2779_v63, %v288_v32  ;;  %v57_v31 = vld [vmem:[%s3335_s0 + $0x108] sm:$0xff]  ;;  %v59_v32 = vld [vmem:[%s3335_s0 + $0x118] sm:$0xff] }
  0x67   :  { %v442_v42 = vadd.f32 %v2779_v63, %v292_v33  ;;  %v824_v44 = vsel %vm568_vm5, %v440_v29, %v696_v37  ;;  %v149_v45 = vunpack.c.h.bf16 %v54_v34  ;;  %v147_v47 = vunpack.c.h.bf16 %v2980_v35 }
  0x68   :  { %v295_v46 = vmul.f32 %v2761_v48, %v145_v38  ;;  %1468 = vmatprep.mubr.bf16.mxu1 %v927_v39  ;;  %v924_v50 = vpack.c.bf16 %v824_v44, %v820_v40  ;;  %vm566_vm6 = vcmp.gt.f32.partialorder %v438_v41, 0.0  ;;  %v694_v51 = vmul.f32 0.2, %v438_v41 }
  0x69   :  { %vm570_vm7 = vcmp.gt.f32.partialorder %v442_v42, 0.0  ;;  %v698_v52 = vmul.f32 0.2, %v442_v42  ;;  %v299_v53 = vmul.f32 %v2761_v48, %v149_v45  ;;  %v151_v57 = vunpack.c.h.bf16 %v55_v43 }
  0x6a   :  { %v445_v56 = vadd.f32 %v2763_v49, %v295_v46  ;;  %1308 = vmatmul.mubr.bf16.gmra.mrb[24].mxu0 %v924_v50  ;;  %v822_v60 = vsel %vm566_vm6, %v438_v41, %v694_v51  ;;  %v297_v61 = vmul.f32 %v2765_v54, %v147_v47  ;;  %v144_v0 = vunpack.c.l.bf16 %v52_v25 }
  0x6b   :  { %v148_v1 = vunpack.c.l.bf16 %v54_v34  ;;  %v826_v2 = vsel %vm570_vm7, %v442_v42, %v698_v52  ;;  %v449_v3 = vadd.f32 %v2763_v49, %v299_v53  ;;  %v301_v6 = vmul.f32 %v2765_v54, %v151_v57 }
  0x6c   :  { %vm573_vm8 = vcmp.gt.f32.partialorder %v445_v56, 0.0  ;;  %v701_v4 = vmul.f32 0.2, %v445_v56  ;;  %v926_v5 = vpack.c.bf16 %v826_v2, %v822_v60  ;;  %v447_v7 = vadd.f32 %v2767_v55, %v297_v61 }
  0x6d   :  { %v294_v8 = vmul.f32 %v2771_v58, %v144_v0  ;;  %vm577_vm9 = vcmp.gt.f32.partialorder %v449_v3, 0.0  ;;  %v705_v9 = vmul.f32 0.2, %v449_v3  ;;  %v298_v11 = vmul.f32 %v2771_v58, %v148_v1 }
  0x6e   :  { %v829_v10 = vsel %vm573_vm8, %v445_v56, %v701_v4  ;;  %1469 = vmatmul.mubr.bf16.gmra.mrb[24].mxu1 %v926_v5  ;;  %v451_v12 = vadd.f32 %v2767_v55, %v301_v6  ;;  %vm575_vm10 = vcmp.gt.f32.partialorder %v447_v7, 0.0  ;;  %v703_v13 = vmul.f32 0.2, %v447_v7 }
  0x6f   :  { %v444_v14 = vadd.f32 %v2773_v59, %v294_v8  ;;  %v833_v15 = vsel %vm577_vm9, %v449_v3, %v705_v9  ;;  %v448_v16 = vadd.f32 %v2773_v59, %v298_v11  ;;  %v146_v17 = vunpack.c.l.bf16 %v2980_v35  ;;  %v60_v11 = vld [vmem:[%s3335_s0 + $0x120] sm:$0xff] }
  0x70   :  { %v150_v18 = vunpack.c.l.bf16 %v55_v43  ;;  %v929_v20 = vpack.c.bf16 %v833_v15, %v829_v10  ;;  %vm579_vm11 = vcmp.gt.f32.partialorder %v451_v12, 0.0  ;;  %v707_v21 = vmul.f32 0.2, %v451_v12 }
  0x71   :  { %v831_v22 = vsel %vm575_vm10, %v447_v7, %v703_v13  ;;  %vm572_vm12 = vcmp.gt.f32.partialorder %v444_v14, 0.0  ;;  %vm576_vm13 = vcmp.gt.f32.partialorder %v448_v16, 0.0  ;;  %v700_v24 = vmul.f32 0.2, %v444_v14 }
  0x72   :  { %v704_v25 = vmul.f32 0.2, %v448_v16  ;;  %1315 = vmatprep.mubr.bf16.mxu0 %v929_v20  ;;  %v835_v26 = vsel %vm579_vm11, %v451_v12, %v707_v21  ;;  %v296_v27 = vmul.f32 %v2777_v62, %v146_v17  ;;  %v300_v29 = vmul.f32 %v2777_v62, %v150_v18  ;;  %v3040_v20 = vld [vmem:[%s3335_s0 + $0x128] sm:$0xff] }
  0x73   :  { %v153_v30 = vunpack.c.h.bf16 %v56_v19  ;;  %v931_v33 = vpack.c.bf16 %v835_v26, %v831_v22  ;;  %v828_v34 = vsel %vm572_vm12, %v444_v14, %v700_v24  ;;  %v157_v36 = vunpack.c.h.bf16 %v58_v23 }
  0x74   :  { %v832_v35 = vsel %vm576_vm13, %v448_v16, %v704_v25  ;;  %v446_v38 = vadd.f32 %v2779_v63, %v296_v27  ;;  %v450_v39 = vadd.f32 %v2779_v63, %v300_v29  ;;  %v155_v42 = vunpack.c.h.bf16 %v57_v31  ;;  %v63_v29 = vld [vmem:[%s3335_s0 + $0x138] sm:$0xff] }
  0x75   :  { %v928_v37 = vpack.c.bf16 %v832_v35, %v828_v34  ;;  %v303_v40 = vmul.f32 %v2761_v48, %v153_v30  ;;  %1476 = vmatprep.mubr.bf16.mxu1 %v931_v33  ;;  %v307_v41 = vmul.f32 %v2761_v48, %v157_v36  ;;  %v159_v43 = vunpack.c.h.bf16 %v59_v32 }
  0x76   :  { %v152_v44 = vunpack.c.l.bf16 %v56_v19  ;;  %vm574_vm14 = vcmp.gt.f32.partialorder %v446_v38, 0.0  ;;  %vm578_vm15 = vcmp.gt.f32.partialorder %v450_v39, 0.0  ;;  %v702_v45 = vmul.f32 0.2, %v446_v38  ;;  %v62_v19 = vld [vmem:[%s3335_s0 + $0x130] sm:$0xff] }
  0x77   :  { %1316 = vmatmul.mubr.bf16.gmra.mrb[28].mxu0 %v928_v37  ;;  %v706_v46 = vmul.f32 0.2, %v450_v39  ;;  %v453_v47 = vadd.f32 %v2763_v49, %v303_v40  ;;  %v457_v50 = vadd.f32 %v2763_v49, %v307_v41  ;;  %v305_v51 = vmul.f32 %v2765_v54, %v155_v42 }
  0x78   :  { %v309_v52 = vmul.f32 %v2765_v54, %v159_v43  ;;  %v830_v53 = vsel %vm574_vm14, %v446_v38, %v702_v45  ;;  %v156_v57 = vunpack.c.l.bf16 %v58_v23  ;;  %v302_v60 = vmul.f32 %v2771_v58, %v152_v44 }
  0x79   :  { %v834_v56 = vsel %vm578_vm15, %v450_v39, %v706_v46  ;;  %vm581_vm0 = vcmp.gt.f32.partialorder %v453_v47, 0.0  ;;  %vm585_vm1 = vcmp.gt.f32.partialorder %v457_v50, 0.0  ;;  %v709_v0 = vmul.f32 0.2, %v453_v47 }
  0x7a   :  { %v930_v61 = vpack.c.bf16 %v834_v56, %v830_v53  ;;  %v713_v1 = vmul.f32 0.2, %v457_v50  ;;  %v455_v2 = vadd.f32 %v2767_v55, %v305_v51  ;;  %v459_v3 = vadd.f32 %v2767_v55, %v309_v52 }
  0x7b   :  { %v306_v4 = vmul.f32 %v2771_v58, %v156_v57  ;;  %v837_v5 = vsel %vm581_vm0, %v453_v47, %v709_v0  ;;  %v452_v6 = vadd.f32 %v2773_v59, %v302_v60  ;;  %v154_v7 = vunpack.c.l.bf16 %v57_v31 }
  0x7c   :  { %1477 = vmatmul.mubr.bf16.gmra.mrb[28].mxu1 %v930_v61  ;;  %v158_v8 = vunpack.c.l.bf16 %v59_v32  ;;  %v841_v9 = vsel %vm585_vm1, %v457_v50, %v713_v1  ;;  %vm583_vm2 = vcmp.gt.f32.partialorder %v455_v2, 0.0  ;;  %vm587_vm3 = vcmp.gt.f32.partialorder %v459_v3, 0.0 }
  0x7d   :  { %v711_v10 = vmul.f32 0.2, %v455_v2  ;;  %v933_v12 = vpack.c.bf16 %v841_v9, %v837_v5  ;;  %v715_v13 = vmul.f32 0.2, %v459_v3  ;;  %v456_v14 = vadd.f32 %v2773_v59, %v306_v4  ;;  %v64_v5 = vld [vmem:[%s3335_s0 + $0x140] sm:$0xff]  ;;  %v66_v9 = vld [vmem:[%s3335_s0 + $0x150] sm:$0xff] }
  0x7e   :  { %vm580_vm4 = vcmp.gt.f32.partialorder %v452_v6, 0.0  ;;  %v708_v16 = vmul.f32 0.2, %v452_v6  ;;  %v304_v17 = vmul.f32 %v2777_v62, %v154_v7  ;;  %v308_v18 = vmul.f32 %v2777_v62, %v158_v8 }
  0x7f   :  { %v839_v15 = vsel %vm583_vm2, %v455_v2, %v711_v10  ;;  %1323 = vmatprep.mubr.bf16.mxu0 %v933_v12  ;;  %v843_v21 = vsel %vm587_vm3, %v459_v3, %v715_v13  ;;  %vm584_vm5 = vcmp.gt.f32.partialorder %v456_v14, 0.0  ;;  %v712_v22 = vmul.f32 0.2, %v456_v14 }
  0x80   :  { %v161_v23 = vunpack.c.h.bf16 %v60_v11  ;;  %v935_v24 = vpack.c.bf16 %v843_v21, %v839_v15  ;;  %v836_v25 = vsel %vm580_vm4, %v452_v6, %v708_v16  ;;  %v454_v26 = vadd.f32 %v2779_v63, %v304_v17  ;;  %v65_v16 = vld [vmem:[%s3335_s0 + $0x148] sm:$0xff]  ;;  %v67_v17 = vld [vmem:[%s3335_s0 + $0x158] sm:$0xff] }
  0x81   :  { %v458_v27 = vadd.f32 %v2779_v63, %v308_v18  ;;  %v840_v30 = vsel %vm584_vm5, %v456_v14, %v712_v22  ;;  %v165_v31 = vunpack.c.h.bf16 %v62_v19  ;;  %v163_v33 = vunpack.c.h.bf16 %v3040_v20 }
  0x82   :  { %v311_v32 = vmul.f32 %v2761_v48, %v161_v23  ;;  %1484 = vmatprep.mubr.bf16.mxu1 %v935_v24  ;;  %v932_v34 = vpack.c.bf16 %v840_v30, %v836_v25  ;;  %vm582_vm6 = vcmp.gt.f32.partialorder %v454_v26, 0.0  ;;  %v710_v35 = vmul.f32 0.2, %v454_v26 }
  0x83   :  { %vm586_vm7 = vcmp.gt.f32.partialorder %v458_v27, 0.0  ;;  %v714_v36 = vmul.f32 0.2, %v458_v27  ;;  %v315_v37 = vmul.f32 %v2761_v48, %v165_v31  ;;  %v167_v39 = vunpack.c.h.bf16 %v63_v29 }
  0x84   :  { %v461_v38 = vadd.f32 %v2763_v49, %v311_v32  ;;  %1324 = vmatmul.mubr.bf16.gmra.mrb[32].mxu0 %v932_v34  ;;  %v838_v40 = vsel %vm582_vm6, %v454_v26, %v710_v35  ;;  %v313_v41 = vmul.f32 %v2765_v54, %v163_v33  ;;  %v160_v42 = vunpack.c.l.bf16 %v60_v11 }
  0x85   :  { %v164_v43 = vunpack.c.l.bf16 %v62_v19  ;;  %v842_v44 = vsel %vm586_vm7, %v458_v27, %v714_v36  ;;  %v465_v45 = vadd.f32 %v2763_v49, %v315_v37  ;;  %v317_v50 = vmul.f32 %v2765_v54, %v167_v39 }
  0x86   :  { %vm589_vm8 = vcmp.gt.f32.partialorder %v461_v38, 0.0  ;;  %v717_v46 = vmul.f32 0.2, %v461_v38  ;;  %v934_v47 = vpack.c.bf16 %v842_v44, %v838_v40  ;;  %v463_v51 = vadd.f32 %v2767_v55, %v313_v41 }
  0x87   :  { %v310_v52 = vmul.f32 %v2771_v58, %v160_v42  ;;  %vm593_vm9 = vcmp.gt.f32.partialorder %v465_v45, 0.0  ;;  %v721_v53 = vmul.f32 0.2, %v465_v45  ;;  %v314_v57 = vmul.f32 %v2771_v58, %v164_v43 }
  0x88   :  { %v845_v56 = vsel %vm589_vm8, %v461_v38, %v717_v46  ;;  %1485 = vmatmul.mubr.bf16.gmra.mrb[32].mxu1 %v934_v47  ;;  %v467_v60 = vadd.f32 %v2767_v55, %v317_v50  ;;  %vm591_vm10 = vcmp.gt.f32.partialorder %v463_v51, 0.0  ;;  %v719_v61 = vmul.f32 0.2, %v463_v51 }
  0x89   :  { %v460_v0 = vadd.f32 %v2773_v59, %v310_v52  ;;  %v849_v1 = vsel %vm593_vm9, %v465_v45, %v721_v53  ;;  %v464_v2 = vadd.f32 %v2773_v59, %v314_v57  ;;  %v162_v3 = vunpack.c.l.bf16 %v3040_v20  ;;  %v68_v57 = vld [vmem:[%s3335_s0 + $0x160] sm:$0xff] }
  0x8a   :  { %v166_v4 = vunpack.c.l.bf16 %v63_v29  ;;  %v937_v6 = vpack.c.bf16 %v849_v1, %v845_v56  ;;  %vm595_vm11 = vcmp.gt.f32.partialorder %v467_v60, 0.0  ;;  %v723_v7 = vmul.f32 0.2, %v467_v60 }
  0x8b   :  { %v847_v8 = vsel %vm591_vm10, %v463_v51, %v719_v61  ;;  %vm588_vm12 = vcmp.gt.f32.partialorder %v460_v0, 0.0  ;;  %vm592_vm13 = vcmp.gt.f32.partialorder %v464_v2, 0.0  ;;  %v716_v10 = vmul.f32 0.2, %v460_v0 }
  0x8c   :  { %v720_v11 = vmul.f32 0.2, %v464_v2  ;;  %1331 = vmatprep.mubr.bf16.mxu0 %v937_v6  ;;  %v851_v12 = vsel %vm595_vm11, %v467_v60, %v723_v7  ;;  %v312_v13 = vmul.f32 %v2777_v62, %v162_v3  ;;  %v316_v14 = vmul.f32 %v2777_v62, %v166_v4  ;;  %v3100_v6 = vld [vmem:[%s3335_s0 + $0x168] sm:$0xff] }
  0x8d   :  { %v169_v15 = vunpack.c.h.bf16 %v64_v5  ;;  %v939_v18 = vpack.c.bf16 %v851_v12, %v847_v8  ;;  %v844_v19 = vsel %vm588_vm12, %v460_v0, %v716_v10  ;;  %v173_v21 = vunpack.c.h.bf16 %v66_v9 }
  0x8e   :  { %v848_v20 = vsel %vm592_vm13, %v464_v2, %v720_v11  ;;  %v462_v23 = vadd.f32 %v2779_v63, %v312_v13  ;;  %v466_v24 = vadd.f32 %v2779_v63, %v316_v14  ;;  %v171_v27 = vunpack.c.h.bf16 %v65_v16  ;;  %v71_v14 = vld [vmem:[%s3335_s0 + $0x178] sm:$0xff] }
  0x8f   :  { %v936_v22 = vpack.c.bf16 %v848_v20, %v844_v19  ;;  %v319_v25 = vmul.f32 %v2761_v48, %v169_v15  ;;  %1492 = vmatprep.mubr.bf16.mxu1 %v939_v18  ;;  %v323_v26 = vmul.f32 %v2761_v48, %v173_v21  ;;  %v175_v29 = vunpack.c.h.bf16 %v67_v17 }
  0x90   :  { %v168_v30 = vunpack.c.l.bf16 %v64_v5  ;;  %vm590_vm14 = vcmp.gt.f32.partialorder %v462_v23, 0.0  ;;  %vm594_vm15 = vcmp.gt.f32.partialorder %v466_v24, 0.0  ;;  %v718_v31 = vmul.f32 0.2, %v462_v23  ;;  %v70_v5 = vld [vmem:[%s3335_s0 + $0x170] sm:$0xff] }
  0x91   :  { %1332 = vmatmul.mubr.bf16.gmra.mrb[36].mxu0 %v936_v22  ;;  %v722_v32 = vmul.f32 0.2, %v466_v24  ;;  %v469_v33 = vadd.f32 %v2763_v49, %v319_v25  ;;  %v473_v34 = vadd.f32 %v2763_v49, %v323_v26  ;;  %v321_v35 = vmul.f32 %v2765_v54, %v171_v27 }
  0x92   :  { %v325_v36 = vmul.f32 %v2765_v54, %v175_v29  ;;  %v846_v37 = vsel %vm590_vm14, %v462_v23, %v718_v31  ;;  %v172_v39 = vunpack.c.l.bf16 %v66_v9  ;;  %v318_v40 = vmul.f32 %v2771_v58, %v168_v30 }
  0x93   :  { %v850_v38 = vsel %vm594_vm15, %v466_v24, %v722_v32  ;;  %vm597_vm0 = vcmp.gt.f32.partialorder %v469_v33, 0.0  ;;  %vm601_vm1 = vcmp.gt.f32.partialorder %v473_v34, 0.0  ;;  %v725_v42 = vmul.f32 0.2, %v469_v33 }
  0x94   :  { %v938_v41 = vpack.c.bf16 %v850_v38, %v846_v37  ;;  %v729_v43 = vmul.f32 0.2, %v473_v34  ;;  %v471_v44 = vadd.f32 %v2767_v55, %v321_v35  ;;  %v475_v45 = vadd.f32 %v2767_v55, %v325_v36 }
  0x95   :  { %v322_v46 = vmul.f32 %v2771_v58, %v172_v39  ;;  %v853_v47 = vsel %vm597_vm0, %v469_v33, %v725_v42  ;;  %v468_v50 = vadd.f32 %v2773_v59, %v318_v40  ;;  %v170_v51 = vunpack.c.l.bf16 %v65_v16 }
  0x96   :  { %1493 = vmatmul.mubr.bf16.gmra.mrb[36].mxu1 %v938_v41  ;;  %v174_v52 = vunpack.c.l.bf16 %v67_v17  ;;  %v857_v53 = vsel %vm601_vm1, %v473_v34, %v729_v43  ;;  %vm599_vm2 = vcmp.gt.f32.partialorder %v471_v44, 0.0  ;;  %vm603_vm3 = vcmp.gt.f32.partialorder %v475_v45, 0.0 }
  0x97   :  { %v727_v56 = vmul.f32 0.2, %v471_v44  ;;  %v941_v60 = vpack.c.bf16 %v857_v53, %v853_v47  ;;  %v731_v61 = vmul.f32 0.2, %v475_v45  ;;  %v472_v0 = vadd.f32 %v2773_v59, %v322_v46  ;;  %v72_v47 = vld [vmem:[%s3335_s0 + $0x180] sm:$0xff]  ;;  %v74_v53 = vld [vmem:[%s3335_s0 + $0x190] sm:$0xff] }
  0x98   :  { %vm596_vm4 = vcmp.gt.f32.partialorder %v468_v50, 0.0  ;;  %v724_v2 = vmul.f32 0.2, %v468_v50  ;;  %v320_v3 = vmul.f32 %v2777_v62, %v170_v51  ;;  %v324_v4 = vmul.f32 %v2777_v62, %v174_v52 }
  0x99   :  { %v855_v1 = vsel %vm599_vm2, %v471_v44, %v727_v56  ;;  %1339 = vmatprep.mubr.bf16.mxu0 %v941_v60  ;;  %v859_v7 = vsel %vm603_vm3, %v475_v45, %v731_v61  ;;  %vm600_vm5 = vcmp.gt.f32.partialorder %v472_v0, 0.0  ;;  %v728_v8 = vmul.f32 0.2, %v472_v0 }
  0x9a   :  { %v177_v9 = vunpack.c.h.bf16 %v68_v57  ;;  %v943_v10 = vpack.c.bf16 %v859_v7, %v855_v1  ;;  %v852_v11 = vsel %vm596_vm4, %v468_v50, %v724_v2  ;;  %v470_v12 = vadd.f32 %v2779_v63, %v320_v3  ;;  %v73_v2 = vld [vmem:[%s3335_s0 + $0x188] sm:$0xff]  ;;  %v75_v3 = vld [vmem:[%s3335_s0 + $0x198] sm:$0xff] }
  0x9b   :  { %v474_v13 = vadd.f32 %v2779_v63, %v324_v4  ;;  %v856_v15 = vsel %vm600_vm5, %v472_v0, %v728_v8  ;;  %v181_v16 = vunpack.c.h.bf16 %v70_v5  ;;  %v179_v18 = vunpack.c.h.bf16 %v3100_v6 }
  0x9c   :  { %v327_v17 = vmul.f32 %v2761_v48, %v177_v9  ;;  %1500 = vmatprep.mubr.bf16.mxu1 %v943_v10  ;;  %v940_v19 = vpack.c.bf16 %v856_v15, %v852_v11  ;;  %vm598_vm6 = vcmp.gt.f32.partialorder %v470_v12, 0.0  ;;  %v726_v20 = vmul.f32 0.2, %v470_v12 }
  0x9d   :  { %vm602_vm7 = vcmp.gt.f32.partialorder %v474_v13, 0.0  ;;  %v730_v21 = vmul.f32 0.2, %v474_v13  ;;  %v331_v22 = vmul.f32 %v2761_v48, %v181_v16  ;;  %v183_v24 = vunpack.c.h.bf16 %v71_v14 }
  0x9e   :  { %v477_v23 = vadd.f32 %v2763_v49, %v327_v17  ;;  %1340 = vmatmul.mubr.bf16.gmra.mrb[40].mxu0 %v940_v19  ;;  %v854_v25 = vsel %vm598_vm6, %v470_v12, %v726_v20  ;;  %v329_v26 = vmul.f32 %v2765_v54, %v179_v18  ;;  %v176_v27 = vunpack.c.l.bf16 %v68_v57 }
  0x9f   :  { %v180_v29 = vunpack.c.l.bf16 %v70_v5  ;;  %v858_v30 = vsel %vm602_vm7, %v474_v13, %v730_v21  ;;  %v481_v31 = vadd.f32 %v2763_v49, %v331_v22  ;;  %v333_v34 = vmul.f32 %v2765_v54, %v183_v24 }
  0xa0   :  { %vm605_vm8 = vcmp.gt.f32.partialorder %v477_v23, 0.0  ;;  %v733_v32 = vmul.f32 0.2, %v477_v23  ;;  %v942_v33 = vpack.c.bf16 %v858_v30, %v854_v25  ;;  %v479_v35 = vadd.f32 %v2767_v55, %v329_v26 }
  0xa1   :  { %v326_v36 = vmul.f32 %v2771_v58, %v176_v27  ;;  %vm609_vm9 = vcmp.gt.f32.partialorder %v481_v31, 0.0  ;;  %v737_v37 = vmul.f32 0.2, %v481_v31  ;;  %v330_v39 = vmul.f32 %v2771_v58, %v180_v29 }
  0xa2   :  { %v861_v38 = vsel %vm605_vm8, %v477_v23, %v733_v32  ;;  %1501 = vmatmul.mubr.bf16.gmra.mrb[40].mxu1 %v942_v33  ;;  %v483_v40 = vadd.f32 %v2767_v55, %v333_v34  ;;  %vm607_vm10 = vcmp.gt.f32.partialorder %v479_v35, 0.0  ;;  %v735_v41 = vmul.f32 0.2, %v479_v35 }
  0xa3   :  { %v476_v42 = vadd.f32 %v2773_v59, %v326_v36  ;;  %v865_v43 = vsel %vm609_vm9, %v481_v31, %v737_v37  ;;  %v480_v44 = vadd.f32 %v2773_v59, %v330_v39  ;;  %v178_v45 = vunpack.c.l.bf16 %v3100_v6  ;;  %v76_v39 = vld [vmem:[%s3335_s0 + $0x1a0] sm:$0xff] }
  0xa4   :  { %v182_v46 = vunpack.c.l.bf16 %v71_v14  ;;  %v945_v50 = vpack.c.bf16 %v865_v43, %v861_v38  ;;  %vm611_vm11 = vcmp.gt.f32.partialorder %v483_v40, 0.0  ;;  %v739_v51 = vmul.f32 0.2, %v483_v40 }
  0xa5   :  { %v863_v52 = vsel %vm607_vm10, %v479_v35, %v735_v41  ;;  %vm604_vm12 = vcmp.gt.f32.partialorder %v476_v42, 0.0  ;;  %vm608_vm13 = vcmp.gt.f32.partialorder %v480_v44, 0.0  ;;  %v732_v56 = vmul.f32 0.2, %v476_v42 }
  0xa6   :  { %v736_v57 = vmul.f32 0.2, %v480_v44  ;;  %1347 = vmatprep.mubr.bf16.mxu0 %v945_v50  ;;  %v867_v60 = vsel %vm611_vm11, %v483_v40, %v739_v51  ;;  %v328_v61 = vmul.f32 %v2777_v62, %v178_v45  ;;  %v332_v0 = vmul.f32 %v2777_v62, %v182_v46  ;;  %v3160_v50 = vld [vmem:[%s3335_s0 + $0x1a8] sm:$0xff] }
  0xa7   :  { %v185_v1 = vunpack.c.h.bf16 %v72_v47  ;;  %v947_v4 = vpack.c.bf16 %v867_v60, %v863_v52  ;;  %v860_v5 = vsel %vm604_vm12, %v476_v42, %v732_v56  ;;  %v189_v7 = vunpack.c.h.bf16 %v74_v53 }
  0xa8   :  { %v864_v6 = vsel %vm608_vm13, %v480_v44, %v736_v57  ;;  %v478_v9 = vadd.f32 %v2779_v63, %v328_v61  ;;  %v482_v10 = vadd.f32 %v2779_v63, %v332_v0  ;;  %v187_v13 = vunpack.c.h.bf16 %v73_v2  ;;  %v79_v0 = vld [vmem:[%s3335_s0 + $0x1b8] sm:$0xff] }
  0xa9   :  { %v944_v8 = vpack.c.bf16 %v864_v6, %v860_v5  ;;  %v335_v11 = vmul.f32 %v2761_v48, %v185_v1  ;;  %1508 = vmatprep.mubr.bf16.mxu1 %v947_v4  ;;  %v339_v12 = vmul.f32 %v2761_v48, %v189_v7  ;;  %v191_v14 = vunpack.c.h.bf16 %v75_v3 }
  0xaa   :  { %v184_v15 = vunpack.c.l.bf16 %v72_v47  ;;  %vm606_vm14 = vcmp.gt.f32.partialorder %v478_v9, 0.0  ;;  %vm610_vm15 = vcmp.gt.f32.partialorder %v482_v10, 0.0  ;;  %v734_v16 = vmul.f32 0.2, %v478_v9  ;;  %v78_v47 = vld [vmem:[%s3335_s0 + $0x1b0] sm:$0xff] }
  0xab   :  { %1348 = vmatmul.mubr.bf16.gmra.mrb[44].mxu0 %v944_v8  ;;  %v738_v17 = vmul.f32 0.2, %v482_v10  ;;  %v485_v18 = vadd.f32 %v2763_v49, %v335_v11  ;;  %v489_v19 = vadd.f32 %v2763_v49, %v339_v12  ;;  %v337_v20 = vmul.f32 %v2765_v54, %v187_v13 }
  0xac   :  { %v341_v21 = vmul.f32 %v2765_v54, %v191_v14  ;;  %v862_v22 = vsel %vm606_vm14, %v478_v9, %v734_v16  ;;  %v188_v24 = vunpack.c.l.bf16 %v74_v53  ;;  %v334_v25 = vmul.f32 %v2771_v58, %v184_v15 }
  0xad   :  { %v866_v23 = vsel %vm610_vm15, %v482_v10, %v738_v17  ;;  %vm613_vm0 = vcmp.gt.f32.partialorder %v485_v18, 0.0  ;;  %vm617_vm1 = vcmp.gt.f32.partialorder %v489_v19, 0.0  ;;  %v741_v27 = vmul.f32 0.2, %v485_v18 }
  0xae   :  { %v946_v26 = vpack.c.bf16 %v866_v23, %v862_v22  ;;  %v745_v29 = vmul.f32 0.2, %v489_v19  ;;  %v487_v30 = vadd.f32 %v2767_v55, %v337_v20  ;;  %v491_v31 = vadd.f32 %v2767_v55, %v341_v21 }
  0xaf   :  { %v338_v32 = vmul.f32 %v2771_v58, %v188_v24  ;;  %v869_v33 = vsel %vm613_vm0, %v485_v18, %v741_v27  ;;  %v484_v34 = vadd.f32 %v2773_v59, %v334_v25  ;;  %v186_v35 = vunpack.c.l.bf16 %v73_v2 }
  0xb0   :  { %1509 = vmatmul.mubr.bf16.gmra.mrb[44].mxu1 %v946_v26  ;;  %v190_v36 = vunpack.c.l.bf16 %v75_v3  ;;  %v873_v37 = vsel %vm617_vm1, %v489_v19, %v745_v29  ;;  %vm615_vm2 = vcmp.gt.f32.partialorder %v487_v30, 0.0  ;;  %vm619_vm3 = vcmp.gt.f32.partialorder %v491_v31, 0.0 }
  0xb1   :  { %v743_v38 = vmul.f32 0.2, %v487_v30  ;;  %v949_v40 = vpack.c.bf16 %v873_v37, %v869_v33  ;;  %v747_v41 = vmul.f32 0.2, %v491_v31  ;;  %v488_v42 = vadd.f32 %v2773_v59, %v338_v32  ;;  %v80_v33 = vld [vmem:[%s3335_s0 + $0x1c0] sm:$0xff]  ;;  %v82_v37 = vld [vmem:[%s3335_s0 + $0x1d0] sm:$0xff] }
  0xb2   :  { %vm612_vm4 = vcmp.gt.f32.partialorder %v484_v34, 0.0  ;;  %v740_v44 = vmul.f32 0.2, %v484_v34  ;;  %v336_v45 = vmul.f32 %v2777_v62, %v186_v35  ;;  %v340_v46 = vmul.f32 %v2777_v62, %v190_v36 }
  0xb3   :  { %v871_v43 = vsel %vm615_vm2, %v487_v30, %v743_v38  ;;  %1355 = vmatprep.mubr.bf16.mxu0 %v949_v40  ;;  %v875_v51 = vsel %vm619_vm3, %v491_v31, %v747_v41  ;;  %vm616_vm5 = vcmp.gt.f32.partialorder %v488_v42, 0.0  ;;  %v744_v52 = vmul.f32 0.2, %v488_v42 }
  0xb4   :  { %v193_v53 = vunpack.c.h.bf16 %v76_v39  ;;  %v951_v56 = vpack.c.bf16 %v875_v51, %v871_v43  ;;  %v868_v57 = vsel %vm612_vm4, %v484_v34, %v740_v44  ;;  %v486_v60 = vadd.f32 %v2779_v63, %v336_v45  ;;  %v81_v44 = vld [vmem:[%s3335_s0 + $0x1c8] sm:$0xff]  ;;  %v83_v45 = vld [vmem:[%s3335_s0 + $0x1d8] sm:$0xff] }
  0xb5   :  { %v490_v61 = vadd.f32 %v2779_v63, %v340_v46  ;;  %v872_v1 = vsel %vm616_vm5, %v488_v42, %v744_v52  ;;  %v197_v2 = vunpack.c.h.bf16 %v78_v47  ;;  %v195_v4 = vunpack.c.h.bf16 %v3160_v50 }
  0xb6   :  { %v343_v3 = vmul.f32 %v2761_v48, %v193_v53  ;;  %1516 = vmatprep.mubr.bf16.mxu1 %v951_v56  ;;  %v948_v5 = vpack.c.bf16 %v872_v1, %v868_v57  ;;  %vm614_vm6 = vcmp.gt.f32.partialorder %v486_v60, 0.0  ;;  %v742_v6 = vmul.f32 0.2, %v486_v60 }
  0xb7   :  { %vm618_vm7 = vcmp.gt.f32.partialorder %v490_v61, 0.0  ;;  %v746_v7 = vmul.f32 0.2, %v490_v61  ;;  %v347_v8 = vmul.f32 %v2761_v48, %v197_v2  ;;  %v199_v10 = vunpack.c.h.bf16 %v79_v0 }
  0xb8   :  { %v493_v9 = vadd.f32 %v2763_v49, %v343_v3  ;;  %1356 = vmatmul.mubr.bf16.gmra.mrb[48].mxu0 %v948_v5  ;;  %v870_v11 = vsel %vm614_vm6, %v486_v60, %v742_v6  ;;  %v345_v12 = vmul.f32 %v2765_v54, %v195_v4  ;;  %v192_v13 = vunpack.c.l.bf16 %v76_v39 }
  0xb9   :  { %v196_v14 = vunpack.c.l.bf16 %v78_v47  ;;  %v874_v15 = vsel %vm618_vm7, %v490_v61, %v746_v7  ;;  %v497_v16 = vadd.f32 %v2763_v49, %v347_v8  ;;  %v349_v19 = vmul.f32 %v2765_v54, %v199_v10 }
  0xba   :  { %vm621_vm8 = vcmp.gt.f32.partialorder %v493_v9, 0.0  ;;  %v749_v17 = vmul.f32 0.2, %v493_v9  ;;  %v950_v18 = vpack.c.bf16 %v874_v15, %v870_v11  ;;  %v495_v20 = vadd.f32 %v2767_v55, %v345_v12 }
  0xbb   :  { %v342_v21 = vmul.f32 %v2771_v58, %v192_v13  ;;  %vm625_vm9 = vcmp.gt.f32.partialorder %v497_v16, 0.0  ;;  %v753_v22 = vmul.f32 0.2, %v497_v16  ;;  %v346_v24 = vmul.f32 %v2771_v58, %v196_v14 }
  0xbc   :  { %v877_v23 = vsel %vm621_vm8, %v493_v9, %v749_v17  ;;  %1517 = vmatmul.mubr.bf16.gmra.mrb[48].mxu1 %v950_v18  ;;  %v499_v25 = vadd.f32 %v2767_v55, %v349_v19  ;;  %vm623_vm10 = vcmp.gt.f32.partialorder %v495_v20, 0.0  ;;  %v751_v26 = vmul.f32 0.2, %v495_v20 }
  0xbd   :  { %v492_v27 = vadd.f32 %v2773_v59, %v342_v21  ;;  %v881_v29 = vsel %vm625_vm9, %v497_v16, %v753_v22  ;;  %v496_v30 = vadd.f32 %v2773_v59, %v346_v24  ;;  %v194_v31 = vunpack.c.l.bf16 %v3160_v50  ;;  %v84_v24 = vld [vmem:[%s3335_s0 + $0x1e0] sm:$0xff] }
  0xbe   :  { %v198_v32 = vunpack.c.l.bf16 %v79_v0  ;;  %v953_v34 = vpack.c.bf16 %v881_v29, %v877_v23  ;;  %vm627_vm11 = vcmp.gt.f32.partialorder %v499_v25, 0.0  ;;  %v755_v35 = vmul.f32 0.2, %v499_v25 }
  0xbf   :  { %v879_v36 = vsel %vm623_vm10, %v495_v20, %v751_v26  ;;  %vm620_vm12 = vcmp.gt.f32.partialorder %v492_v27, 0.0  ;;  %vm624_vm13 = vcmp.gt.f32.partialorder %v496_v30, 0.0  ;;  %v748_v38 = vmul.f32 0.2, %v492_v27 }
  0xc0   :  { %v752_v39 = vmul.f32 0.2, %v496_v30  ;;  %1363 = vmatprep.mubr.bf16.mxu0 %v953_v34  ;;  %v883_v40 = vsel %vm627_vm11, %v499_v25, %v755_v35  ;;  %v344_v41 = vmul.f32 %v2777_v62, %v194_v31  ;;  %v348_v42 = vmul.f32 %v2777_v62, %v198_v32  ;;  %v85_v34 = vld [vmem:[%s3335_s0 + $0x1e8] sm:$0xff] }
  0xc1   :  { %v201_v43 = vunpack.c.h.bf16 %v80_v33  ;;  %v955_v46 = vpack.c.bf16 %v883_v40, %v879_v36  ;;  %v876_v47 = vsel %vm620_vm12, %v492_v27, %v748_v38  ;;  %v205_v51 = vunpack.c.h.bf16 %v82_v37 }
  0xc2   :  { %v880_v50 = vsel %vm624_vm13, %v496_v30, %v752_v39  ;;  %v494_v53 = vadd.f32 %v2779_v63, %v344_v41  ;;  %v498_v56 = vadd.f32 %v2779_v63, %v348_v42  ;;  %v203_v61 = vunpack.c.h.bf16 %v81_v44  ;;  %v87_v42 = vld [vmem:[%s3335_s0 + $0x1f8] sm:$0xff] }
  0xc3   :  { %v952_v52 = vpack.c.bf16 %v880_v50, %v876_v47  ;;  %v351_v57 = vmul.f32 %v2761_v48, %v201_v43  ;;  %1524 = vmatprep.mubr.bf16.mxu1 %v955_v46  ;;  %v355_v60 = vmul.f32 %v2761_v48, %v205_v51  ;;  %v207_v0 = vunpack.c.h.bf16 %v83_v45 }
  0xc4   :  { %v200_v1 = vunpack.c.l.bf16 %v80_v33  ;;  %vm622_vm14 = vcmp.gt.f32.partialorder %v494_v53, 0.0  ;;  %vm626_vm15 = vcmp.gt.f32.partialorder %v498_v56, 0.0  ;;  %v750_v2 = vmul.f32 0.2, %v494_v53  ;;  %v86_v33 = vld [vmem:[%s3335_s0 + $0x1f0] sm:$0xff] }
  0xc5   :  { %1364 = vmatmul.mubr.bf16.gmra.mrb[52].mxu0 %v952_v52  ;;  %v754_v3 = vmul.f32 0.2, %v498_v56  ;;  %v501_v4 = vadd.f32 %v2763_v49, %v351_v57  ;;  %v505_v5 = vadd.f32 %v2763_v49, %v355_v60  ;;  %v353_v6 = vmul.f32 %v2765_v54, %v203_v61 }
  0xc6   :  { %v357_v7 = vmul.f32 %v2765_v54, %v207_v0  ;;  %v878_v8 = vsel %vm622_vm14, %v494_v53, %v750_v2  ;;  %v204_v10 = vunpack.c.l.bf16 %v82_v37  ;;  %v350_v11 = vmul.f32 %v2771_v58, %v200_v1 }
  0xc7   :  { %v882_v9 = vsel %vm626_vm15, %v498_v56, %v754_v3  ;;  %vm629_vm0 = vcmp.gt.f32.partialorder %v501_v4, 0.0  ;;  %vm633_vm1 = vcmp.gt.f32.partialorder %v505_v5, 0.0  ;;  %v757_v13 = vmul.f32 0.2, %v501_v4 }
  0xc8   :  { %v954_v12 = vpack.c.bf16 %v882_v9, %v878_v8  ;;  %v761_v14 = vmul.f32 0.2, %v505_v5  ;;  %v503_v15 = vadd.f32 %v2767_v55, %v353_v6  ;;  %v507_v16 = vadd.f32 %v2767_v55, %v357_v7 }
  0xc9   :  { %v354_v17 = vmul.f32 %v2771_v58, %v204_v10  ;;  %v885_v18 = vsel %vm629_vm0, %v501_v4, %v757_v13  ;;  %v500_v19 = vadd.f32 %v2773_v59, %v350_v11  ;;  %v202_v20 = vunpack.c.l.bf16 %v81_v44 }
  0xca   :  { %1525 = vmatmul.mubr.bf16.gmra.mrb[52].mxu1 %v954_v12  ;;  %v206_v21 = vunpack.c.l.bf16 %v83_v45  ;;  %v889_v22 = vsel %vm633_vm1, %v505_v5, %v761_v14  ;;  %vm631_vm2 = vcmp.gt.f32.partialorder %v503_v15, 0.0  ;;  %vm635_vm3 = vcmp.gt.f32.partialorder %v507_v16, 0.0 }
  0xcb   :  { %v759_v23 = vmul.f32 0.2, %v503_v15  ;;  %v957_v25 = vpack.c.bf16 %v889_v22, %v885_v18  ;;  %v763_v26 = vmul.f32 0.2, %v507_v16  ;;  %v504_v27 = vadd.f32 %v2773_v59, %v354_v17 }
  0xcc   :  { %vm628_vm4 = vcmp.gt.f32.partialorder %v500_v19, 0.0  ;;  %v756_v30 = vmul.f32 0.2, %v500_v19  ;;  %v352_v31 = vmul.f32 %v2777_v62, %v202_v20  ;;  %v356_v32 = vmul.f32 %v2777_v62, %v206_v21 }
  0xcd   :  { %v887_v29 = vsel %vm631_vm2, %v503_v15, %v759_v23  ;;  %1371 = vmatprep.mubr.bf16.mxu0 %v957_v25  ;;  %v891_v35 = vsel %vm635_vm3, %v507_v16, %v763_v26  ;;  %vm632_vm5 = vcmp.gt.f32.partialorder %v504_v27, 0.0  ;;  %v760_v36 = vmul.f32 0.2, %v504_v27 }
  0xce   :  { %v209_v37 = vunpack.c.h.bf16 %v84_v24  ;;  %v959_v38 = vpack.c.bf16 %v891_v35, %v887_v29  ;;  %v884_v39 = vsel %vm628_vm4, %v500_v19, %v756_v30  ;;  %v502_v40 = vadd.f32 %v2779_v63, %v352_v31 }
  0xcf   :  { %v506_v41 = vadd.f32 %v2779_v63, %v356_v32  ;;  %v888_v43 = vsel %vm632_vm5, %v504_v27, %v760_v36  ;;  %v213_v44 = vunpack.c.h.bf16 %v86_v33  ;;  %v211_v46 = vunpack.c.h.bf16 %v85_v34 }
  0xd0   :  { %v359_v45 = vmul.f32 %v2761_v48, %v209_v37  ;;  %1532 = vmatprep.mubr.bf16.mxu1 %v959_v38  ;;  %v956_v47 = vpack.c.bf16 %v888_v43, %v884_v39  ;;  %vm630_vm6 = vcmp.gt.f32.partialorder %v502_v40, 0.0  ;;  %v758_v50 = vmul.f32 0.2, %v502_v40 }
  0xd1   :  { %vm634_vm7 = vcmp.gt.f32.partialorder %v506_v41, 0.0  ;;  %v762_v51 = vmul.f32 0.2, %v506_v41  ;;  %v363_v52 = vmul.f32 %v2761_v48, %v213_v44  ;;  %v215_v56 = vunpack.c.h.bf16 %v87_v42 }
  0xd2   :  { %v509_v53 = vadd.f32 %v2763_v49, %v359_v45  ;;  %1372 = vmatmul.mubr.bf16.gmra.mrb[56].mxu0 %v956_v47  ;;  %v886_v57 = vsel %vm630_vm6, %v502_v40, %v758_v50  ;;  %v361_v60 = vmul.f32 %v2765_v54, %v211_v46  ;;  %v208_v61 = vunpack.c.l.bf16 %v84_v24 }
  0xd3   :  { %v212_v0 = vunpack.c.l.bf16 %v86_v33  ;;  %v890_v1 = vsel %vm634_vm7, %v506_v41, %v762_v51  ;;  %v513_v2 = vadd.f32 %v2763_v49, %v363_v52  ;;  %v365_v5 = vmul.f32 %v2765_v54, %v215_v56 }
  0xd4   :  { %vm637_vm8 = vcmp.gt.f32.partialorder %v509_v53, 0.0  ;;  %v765_v3 = vmul.f32 0.2, %v509_v53  ;;  %v958_v4 = vpack.c.bf16 %v890_v1, %v886_v57  ;;  %v511_v6 = vadd.f32 %v2767_v55, %v361_v60 }
  0xd5   :  { %v358_v48 = vmul.f32 %v2771_v58, %v208_v61  ;;  %vm641_vm9 = vcmp.gt.f32.partialorder %v513_v2, 0.0  ;;  %v769_v7 = vmul.f32 0.2, %v513_v2  ;;  %v362_v9 = vmul.f32 %v2771_v58, %v212_v0 }
  0xd6   :  { %v893_v8 = vsel %vm637_vm8, %v509_v53, %v765_v3  ;;  %1533 = vmatmul.mubr.bf16.gmra.mrb[56].mxu1 %v958_v4  ;;  %v515_v10 = vadd.f32 %v2767_v55, %v365_v5  ;;  %vm639_vm10 = vcmp.gt.f32.partialorder %v511_v6, 0.0  ;;  %v767_v11 = vmul.f32 0.2, %v511_v6 }
  0xd7   :  { %v508_v49 = vadd.f32 %v2773_v59, %v358_v48  ;;  %v897_v12 = vsel %vm641_vm9, %v513_v2, %v769_v7  ;;  %v512_v13 = vadd.f32 %v2773_v59, %v362_v9  ;;  %v210_v54 = vunpack.c.l.bf16 %v85_v34 }
  0xd8   :  { %v214_v14 = vunpack.c.l.bf16 %v87_v42  ;;  %v961_v15 = vpack.c.bf16 %v897_v12, %v893_v8  ;;  %vm643_vm11 = vcmp.gt.f32.partialorder %v515_v10, 0.0  ;;  %v771_v16 = vmul.f32 0.2, %v515_v10 }
  0xd9   :  { %v895_v17 = vsel %vm639_vm10, %v511_v6, %v767_v11  ;;  %vm636_vm12 = vcmp.gt.f32.partialorder %v508_v49, 0.0  ;;  %vm640_vm13 = vcmp.gt.f32.partialorder %v512_v13, 0.0  ;;  %v764_v18 = vmul.f32 0.2, %v508_v49 }
  0xda   :  { %v768_v58 = vmul.f32 0.2, %v512_v13  ;;  %1379 = vmatprep.mubr.bf16.mxu0 %v961_v15  ;;  %v899_v19 = vsel %vm643_vm11, %v515_v10, %v771_v16  ;;  %v360_v55 = vmul.f32 %v2777_v62, %v210_v54  ;;  %v364_v20 = vmul.f32 %v2777_v62, %v214_v14  ;;  %v3244_v62 = vld [vmem:[%s3338_s4] ss:$0 sm:$0xff] }
  0xdb   :  { %v963_v21 = vpack.c.bf16 %v899_v19, %v895_v17  ;;  %v892_v22 = vsel %vm636_vm12, %v508_v49, %v764_v18  ;;  %vm1971_vm1 = vcmp.eq.s32.totalorder %v2722_v28, 0 }
  0xdc   :  { %v896_v23 = vsel %vm640_vm13, %v512_v13, %v768_v58  ;;  %v510_v24 = vadd.f32 %v2779_v63, %v360_v55  ;;  %v514_v25 = vadd.f32 %v2779_v63, %v364_v20 }
  0xdd   :  { %v960_v59 = vpack.c.bf16 %v896_v23, %v892_v22  ;;  %1540 = vmatprep.mubr.bf16.mxu1 %v963_v21 }
  0xde   :  { %vm638_vm14 = vcmp.gt.f32.partialorder %v510_v24, 0.0  ;;  %vm642_vm15 = vcmp.gt.f32.partialorder %v514_v25, 0.0  ;;  %v766_v26 = vmul.f32 0.2, %v510_v24  ;;  %v770_v27 = vmul.f32 0.2, %v514_v25 }
  0xdf   :  { %1380 = vmatmul.mubr.bf16.gmra.mrb[60].mxu0 %v960_v59 }
  0xe0   :  { %v894_v29 = vsel %vm638_vm14, %v510_v24, %v766_v26  ;;  %v898_v30 = vsel %vm642_vm15, %v514_v25, %v770_v27 }
  0xe1   :  { %v962_v31 = vpack.c.bf16 %v898_v30, %v894_v29 }
  0xe3   :  { %1541 = vmatmul.mubr.bf16.gmra.mrb[60].mxu1 %v962_v31 }
  0xf7   :  { %v2359_v32 = vpop.f32.mrb[0].mxu0  ;;  %v2471_v34 = vpop.f32.mrb[0].mxu1 }
  0xf8   :  { %v2360_v33 = vpop.f32.mrb[1].mxu0  ;;  %v2472_v36 = vpop.f32.mrb[1].mxu1 }
  0xf9   :  { %v2361_v35 = vadd.f32 %v2360_v33, %v2359_v32  ;;  %v2362_v63 = vpop.f32.mrb[2].mxu0  ;;  %v2473_v39 = vadd.f32 %v2472_v36, %v2471_v34  ;;  %v2474_v40 = vpop.f32.mrb[2].mxu1 }
  0xfa   :  { %v2363_v37 = vpop.f32.mrb[3].mxu0  ;;  %v2475_v42 = vpop.f32.mrb[3].mxu1 }
  0xfb   :  { %v1262_v38 = vadd.f32 %v2361_v35, %v3244_v62  ;;  %v2364_v41 = vadd.f32 %v2363_v37, %v2362_v63  ;;  %v2476_v45 = vadd.f32 %v2475_v42, %v2474_v40 }
  0xfd   :  { %v1423_v43 = vadd.f32 %v2473_v39, %v1262_v38  ;;  %v1265_v44 = vadd.f32 %v2364_v41, %v3244_v62 }
  0xff   :  { %v1426_v46 = vadd.f32 %v2476_v45, %v1265_v44  ;;  %v1902_v47 = vmul.f32 %v1423_v43, %v1423_v43  ;;  %v2365_v53 = vpop.f32.mrb[4].mxu0 }
 0x100   :  { %v2366_v57 = vpop.f32.mrb[5].mxu0 }
 0x101   :  { %v1865_v50 = vadd.f32 %v1426_v46, %v1423_v43  ;;  %v1903_v51 = vmul.f32 %v1426_v46, %v1426_v46  ;;  %v2251_v52 = vpack.c.bf16 %v1426_v46, %v1423_v43  ;;  %v2367_v60 = vadd.f32 %v2366_v57, %v2365_v53  ;;  %v2368_v61 = vpop.f32.mrb[6].mxu0  ;;  %v2477_v2 = vpop.f32.mrb[4].mxu1 }
 0x102   :  { %v2369_v0 = vpop.f32.mrb[7].mxu0  ;;  %v2478_v4 = vpop.f32.mrb[5].mxu1 }
 0x103   :  { %v1934_v56 = vadd.f32 %v1903_v51, %v1902_v47  ;;  %2252 = vst [vmem:[%s3339_s5] sm:$0xff] %v2251_v52   ;;  %v2370_v1 = vadd.f32 %v2369_v0, %v2368_v61  ;;  %v1270_v3 = vadd.f32 %v2367_v60, %v3244_v62  ;;  %v2479_v5 = vadd.f32 %v2478_v4, %v2477_v2  ;;  %v2480_v6 = vpop.f32.mrb[6].mxu1 }
 0x104   :  { %v2481_v7 = vpop.f32.mrb[7].mxu1 }
 0x105   :  { %v1273_v48 = vadd.f32 %v2370_v1, %v3244_v62  ;;  %v1431_v8 = vadd.f32 %v2479_v5, %v1270_v3  ;;  %v2482_v9 = vadd.f32 %v2481_v7, %v2480_v6 }
 0x107   :  { %v1866_v10 = vadd.f32 %v1865_v50, %v1431_v8  ;;  %v1904_v11 = vmul.f32 %v1431_v8, %v1431_v8  ;;  %v1434_v49 = vadd.f32 %v2482_v9, %v1273_v48 }
 0x109   :  { %v1935_v12 = vadd.f32 %v1934_v56, %v1904_v11  ;;  %v1867_v13 = vadd.f32 %v1866_v10, %v1434_v49  ;;  %v1905_v54 = vmul.f32 %v1434_v49, %v1434_v49  ;;  %v2256_v14 = vpack.c.bf16 %v1434_v49, %v1431_v8  ;;  %v2371_v15 = vpop.f32.mrb[8].mxu0 }
 0x10a   :  { %v2372_v17 = vpop.f32.mrb[9].mxu0 }
 0x10b   :  { %v1936_v16 = vadd.f32 %v1935_v12, %v1905_v54  ;;  %2328 = vst [vmem:[%s3339_s5 + $0x8] sm:$0xff] %v2256_v14   ;;  %v2373_v18 = vadd.f32 %v2372_v17, %v2371_v15  ;;  %v2374_v58 = vpop.f32.mrb[10].mxu0 }
 0x10c   :  { %v2375_v19 = vpop.f32.mrb[11].mxu0 }
 0x10d   :  { %v2483_v55 = vpop.f32.mrb[8].mxu1  ;;  %v1278_v20 = vadd.f32 %v2373_v18, %v3244_v62  ;;  %v2376_v21 = vadd.f32 %v2375_v19, %v2374_v58 }
 0x10e   :  { %v2484_v22 = vpop.f32.mrb[9].mxu1 }
 0x10f   :  { %v2485_v23 = vadd.f32 %v2484_v22, %v2483_v55  ;;  %v2486_v59 = vpop.f32.mrb[10].mxu1  ;;  %v1281_v24 = vadd.f32 %v2376_v21, %v3244_v62 }
 0x110   :  { %v2487_v25 = vpop.f32.mrb[11].mxu1 }
 0x111   :  { %v1439_v26 = vadd.f32 %v2485_v23, %v1278_v20  ;;  %v2488_v27 = vadd.f32 %v2487_v25, %v2486_v59 }
 0x113   :  { %v1868_v29 = vadd.f32 %v1867_v13, %v1439_v26  ;;  %v1906_v30 = vmul.f32 %v1439_v26, %v1439_v26  ;;  %v1442_v31 = vadd.f32 %v2488_v27, %v1281_v24 }
 0x115   :  { %v1937_v32 = vadd.f32 %v1936_v16, %v1906_v30  ;;  %v1869_v33 = vadd.f32 %v1868_v29, %v1442_v31  ;;  %v1907_v34 = vmul.f32 %v1442_v31, %v1442_v31  ;;  %v2261_v35 = vpack.c.bf16 %v1442_v31, %v1439_v26 }
 0x116   :  { %v2377_v63 = vpop.f32.mrb[12].mxu0 }
 0x117   :  { %v2378_v36 = vpop.f32.mrb[13].mxu0  ;;  %v1938_v37 = vadd.f32 %v1937_v32, %v1907_v34  ;;  %2329 = vst [vmem:[%s3339_s5 + $0x10] sm:$0xff] %v2261_v35  }
 0x118   :  { %v2379_v38 = vadd.f32 %v2378_v36, %v2377_v63  ;;  %v2380_v39 = vpop.f32.mrb[14].mxu0 }
 0x119   :  { %v2381_v40 = vpop.f32.mrb[15].mxu0 }
 0x11a   :  { %v2382_v41 = vadd.f32 %v2381_v40, %v2380_v39  ;;  %v1286_v43 = vadd.f32 %v2379_v38, %v3244_v62 }
 0x11b   :  { %v2489_v42 = vpop.f32.mrb[12].mxu1 }
 0x11c   :  { %v2490_v44 = vpop.f32.mrb[13].mxu1  ;;  %v1289_v47 = vadd.f32 %v2382_v41, %v3244_v62 }
 0x11d   :  { %v2491_v45 = vadd.f32 %v2490_v44, %v2489_v42  ;;  %v2492_v46 = vpop.f32.mrb[14].mxu1 }
 0x11e   :  { %v2493_v50 = vpop.f32.mrb[15].mxu1 }
 0x11f   :  { %v1447_v51 = vadd.f32 %v2491_v45, %v1286_v43  ;;  %v2494_v52 = vadd.f32 %v2493_v50, %v2492_v46 }
 0x121   :  { %v1870_v53 = vadd.f32 %v1869_v33, %v1447_v51  ;;  %v1908_v56 = vmul.f32 %v1447_v51, %v1447_v51  ;;  %v1450_v57 = vadd.f32 %v2494_v52, %v1289_v47 }
 0x123   :  { %v1939_v60 = vadd.f32 %v1938_v37, %v1908_v56  ;;  %v1871_v61 = vadd.f32 %v1870_v53, %v1450_v57  ;;  %v1909_v0 = vmul.f32 %v1450_v57, %v1450_v57  ;;  %v2266_v1 = vpack.c.bf16 %v1450_v57, %v1447_v51  ;;  %v2383_v2 = vpop.f32.mrb[16].mxu0 }
 0x124   :  { %v2384_v4 = vpop.f32.mrb[17].mxu0 }
 0x125   :  { %v1940_v3 = vadd.f32 %v1939_v60, %v1909_v0  ;;  %2330 = vst [vmem:[%s3339_s5 + $0x18] sm:$0xff] %v2266_v1   ;;  %v2385_v5 = vadd.f32 %v2384_v4, %v2383_v2  ;;  %v2386_v6 = vpop.f32.mrb[18].mxu0 }
 0x126   :  { %v2387_v48 = vpop.f32.mrb[19].mxu0 }
 0x127   :  { %v2495_v7 = vpop.f32.mrb[16].mxu1  ;;  %v1294_v8 = vadd.f32 %v2385_v5, %v3244_v62  ;;  %v2388_v9 = vadd.f32 %v2387_v48, %v2386_v6 }
 0x128   :  { %v2496_v10 = vpop.f32.mrb[17].mxu1 }
 0x129   :  { %v2497_v11 = vadd.f32 %v2496_v10, %v2495_v7  ;;  %v2498_v49 = vpop.f32.mrb[18].mxu1  ;;  %v1297_v12 = vadd.f32 %v2388_v9, %v3244_v62 }
 0x12a   :  { %v2499_v13 = vpop.f32.mrb[19].mxu1 }
 0x12b   :  { %v1455_v54 = vadd.f32 %v2497_v11, %v1294_v8  ;;  %v2500_v14 = vadd.f32 %v2499_v13, %v2498_v49 }
 0x12d   :  { %v1872_v15 = vadd.f32 %v1871_v61, %v1455_v54  ;;  %v1910_v16 = vmul.f32 %v1455_v54, %v1455_v54  ;;  %v1458_v17 = vadd.f32 %v2500_v14, %v1297_v12 }
 0x12f   :  { %v1941_v18 = vadd.f32 %v1940_v3, %v1910_v16  ;;  %v1873_v58 = vadd.f32 %v1872_v15, %v1458_v17  ;;  %v1911_v19 = vmul.f32 %v1458_v17, %v1458_v17  ;;  %v2271_v55 = vpack.c.bf16 %v1458_v17, %v1455_v54 }
 0x130   :  { %v2389_v20 = vpop.f32.mrb[20].mxu0 }
 0x131   :  { %v2390_v21 = vpop.f32.mrb[21].mxu0  ;;  %v1942_v22 = vadd.f32 %v1941_v18, %v1911_v19  ;;  %2331 = vst [vmem:[%s3339_s5 + $0x20] sm:$0xff] %v2271_v55  }
 0x132   :  { %v2391_v23 = vadd.f32 %v2390_v21, %v2389_v20  ;;  %v2392_v59 = vpop.f32.mrb[22].mxu0 }
 0x133   :  { %v2393_v24 = vpop.f32.mrb[23].mxu0 }
 0x134   :  { %v2394_v25 = vadd.f32 %v2393_v24, %v2392_v59  ;;  %v1302_v27 = vadd.f32 %v2391_v23, %v3244_v62 }
 0x135   :  { %v2501_v26 = vpop.f32.mrb[20].mxu1 }
 0x136   :  { %v2502_v29 = vpop.f32.mrb[21].mxu1  ;;  %v1305_v32 = vadd.f32 %v2394_v25, %v3244_v62 }
 0x137   :  { %v2503_v30 = vadd.f32 %v2502_v29, %v2501_v26  ;;  %v2504_v31 = vpop.f32.mrb[22].mxu1 }
 0x138   :  { %v2505_v33 = vpop.f32.mrb[23].mxu1 }
 0x139   :  { %v1463_v34 = vadd.f32 %v2503_v30, %v1302_v27  ;;  %v2506_v35 = vadd.f32 %v2505_v33, %v2504_v31 }
 0x13b   :  { %v1874_v63 = vadd.f32 %v1873_v58, %v1463_v34  ;;  %v1912_v36 = vmul.f32 %v1463_v34, %v1463_v34  ;;  %v1466_v37 = vadd.f32 %v2506_v35, %v1305_v32 }
 0x13d   :  { %v1943_v38 = vadd.f32 %v1942_v22, %v1912_v36  ;;  %v1875_v39 = vadd.f32 %v1874_v63, %v1466_v37  ;;  %v1913_v40 = vmul.f32 %v1466_v37, %v1466_v37  ;;  %v2276_v41 = vpack.c.bf16 %v1466_v37, %v1463_v34  ;;  %v2395_v42 = vpop.f32.mrb[24].mxu0 }
 0x13e   :  { %v2396_v44 = vpop.f32.mrb[25].mxu0 }
 0x13f   :  { %v1944_v43 = vadd.f32 %v1943_v38, %v1913_v40  ;;  %2332 = vst [vmem:[%s3339_s5 + $0x28] sm:$0xff] %v2276_v41   ;;  %v2397_v45 = vadd.f32 %v2396_v44, %v2395_v42  ;;  %v2398_v46 = vpop.f32.mrb[26].mxu0 }
 0x140   :  { %v2399_v47 = vpop.f32.mrb[27].mxu0 }
 0x141   :  { %v2507_v50 = vpop.f32.mrb[24].mxu1  ;;  %v1310_v51 = vadd.f32 %v2397_v45, %v3244_v62  ;;  %v2400_v52 = vadd.f32 %v2399_v47, %v2398_v46 }
 0x142   :  { %v2508_v53 = vpop.f32.mrb[25].mxu1 }
 0x143   :  { %v2509_v56 = vadd.f32 %v2508_v53, %v2507_v50  ;;  %v2510_v57 = vpop.f32.mrb[26].mxu1  ;;  %v1313_v60 = vadd.f32 %v2400_v52, %v3244_v62 }
 0x144   :  { %v2511_v61 = vpop.f32.mrb[27].mxu1 }
 0x145   :  { %v1471_v0 = vadd.f32 %v2509_v56, %v1310_v51  ;;  %v2512_v1 = vadd.f32 %v2511_v61, %v2510_v57 }
 0x147   :  { %v1876_v2 = vadd.f32 %v1875_v39, %v1471_v0  ;;  %v1914_v3 = vmul.f32 %v1471_v0, %v1471_v0  ;;  %v1474_v4 = vadd.f32 %v2512_v1, %v1313_v60 }
 0x149   :  { %v1945_v5 = vadd.f32 %v1944_v43, %v1914_v3  ;;  %v1877_v6 = vadd.f32 %v1876_v2, %v1474_v4  ;;  %v1915_v48 = vmul.f32 %v1474_v4, %v1474_v4  ;;  %v2281_v7 = vpack.c.bf16 %v1474_v4, %v1471_v0 }
 0x14a   :  { %v2401_v8 = vpop.f32.mrb[28].mxu0 }
 0x14b   :  { %v2402_v9 = vpop.f32.mrb[29].mxu0  ;;  %v1946_v10 = vadd.f32 %v1945_v5, %v1915_v48  ;;  %2333 = vst [vmem:[%s3339_s5 + $0x30] sm:$0xff] %v2281_v7  }
 0x14c   :  { %v2403_v11 = vadd.f32 %v2402_v9, %v2401_v8  ;;  %v2404_v49 = vpop.f32.mrb[30].mxu0 }
 0x14d   :  { %v2405_v12 = vpop.f32.mrb[31].mxu0 }
 0x14e   :  { %v2406_v13 = vadd.f32 %v2405_v12, %v2404_v49  ;;  %v1318_v14 = vadd.f32 %v2403_v11, %v3244_v62 }
 0x14f   :  { %v2513_v54 = vpop.f32.mrb[28].mxu1 }
 0x150   :  { %v2514_v15 = vpop.f32.mrb[29].mxu1  ;;  %v1321_v18 = vadd.f32 %v2406_v13, %v3244_v62 }
 0x151   :  { %v2515_v16 = vadd.f32 %v2514_v15, %v2513_v54  ;;  %v2516_v17 = vpop.f32.mrb[30].mxu1 }
 0x152   :  { %v2517_v58 = vpop.f32.mrb[31].mxu1 }
 0x153   :  { %v1479_v19 = vadd.f32 %v2515_v16, %v1318_v14  ;;  %v2518_v55 = vadd.f32 %v2517_v58, %v2516_v17 }
 0x155   :  { %v1878_v20 = vadd.f32 %v1877_v6, %v1479_v19  ;;  %v1916_v21 = vmul.f32 %v1479_v19, %v1479_v19  ;;  %v1482_v22 = vadd.f32 %v2518_v55, %v1321_v18 }
 0x157   :  { %v1947_v23 = vadd.f32 %v1946_v10, %v1916_v21  ;;  %v1879_v59 = vadd.f32 %v1878_v20, %v1482_v22  ;;  %v1917_v24 = vmul.f32 %v1482_v22, %v1482_v22  ;;  %v2286_v25 = vpack.c.bf16 %v1482_v22, %v1479_v19  ;;  %v2407_v26 = vpop.f32.mrb[32].mxu0 }
 0x158   :  { %v2408_v29 = vpop.f32.mrb[33].mxu0 }
 0x159   :  { %v1948_v27 = vadd.f32 %v1947_v23, %v1917_v24  ;;  %2334 = vst [vmem:[%s3339_s5 + $0x38] sm:$0xff] %v2286_v25   ;;  %v2409_v30 = vadd.f32 %v2408_v29, %v2407_v26  ;;  %v2410_v31 = vpop.f32.mrb[34].mxu0 }
 0x15a   :  { %v2411_v32 = vpop.f32.mrb[35].mxu0 }
 0x15b   :  { %v2519_v33 = vpop.f32.mrb[32].mxu1  ;;  %v1326_v34 = vadd.f32 %v2409_v30, %v3244_v62  ;;  %v2412_v35 = vadd.f32 %v2411_v32, %v2410_v31 }
 0x15c   :  { %v2520_v63 = vpop.f32.mrb[33].mxu1 }
 0x15d   :  { %v2521_v36 = vadd.f32 %v2520_v63, %v2519_v33  ;;  %v2522_v37 = vpop.f32.mrb[34].mxu1  ;;  %v1329_v38 = vadd.f32 %v2412_v35, %v3244_v62 }
 0x15e   :  { %v2523_v39 = vpop.f32.mrb[35].mxu1 }
 0x15f   :  { %v1487_v40 = vadd.f32 %v2521_v36, %v1326_v34  ;;  %v2524_v41 = vadd.f32 %v2523_v39, %v2522_v37 }
 0x161   :  { %v1880_v42 = vadd.f32 %v1879_v59, %v1487_v40  ;;  %v1918_v43 = vmul.f32 %v1487_v40, %v1487_v40  ;;  %v1490_v44 = vadd.f32 %v2524_v41, %v1329_v38 }
 0x163   :  { %v1949_v45 = vadd.f32 %v1948_v27, %v1918_v43  ;;  %v1881_v46 = vadd.f32 %v1880_v42, %v1490_v44  ;;  %v1919_v47 = vmul.f32 %v1490_v44, %v1490_v44  ;;  %v2291_v50 = vpack.c.bf16 %v1490_v44, %v1487_v40 }
 0x164   :  { %v2413_v51 = vpop.f32.mrb[36].mxu0 }
 0x165   :  { %v2414_v52 = vpop.f32.mrb[37].mxu0  ;;  %v1950_v53 = vadd.f32 %v1949_v45, %v1919_v47  ;;  %2335 = vst [vmem:[%s3339_s5 + $0x40] sm:$0xff] %v2291_v50  }
 0x166   :  { %v2415_v56 = vadd.f32 %v2414_v52, %v2413_v51  ;;  %v2416_v57 = vpop.f32.mrb[38].mxu0 }
 0x167   :  { %v2417_v60 = vpop.f32.mrb[39].mxu0 }
 0x168   :  { %v2418_v61 = vadd.f32 %v2417_v60, %v2416_v57  ;;  %v1334_v1 = vadd.f32 %v2415_v56, %v3244_v62 }
 0x169   :  { %v2525_v0 = vpop.f32.mrb[36].mxu1 }
 0x16a   :  { %v2526_v2 = vpop.f32.mrb[37].mxu1  ;;  %v1337_v5 = vadd.f32 %v2418_v61, %v3244_v62 }
 0x16b   :  { %v2527_v3 = vadd.f32 %v2526_v2, %v2525_v0  ;;  %v2528_v4 = vpop.f32.mrb[38].mxu1 }
 0x16c   :  { %v2529_v6 = vpop.f32.mrb[39].mxu1 }
 0x16d   :  { %v1495_v48 = vadd.f32 %v2527_v3, %v1334_v1  ;;  %v2530_v7 = vadd.f32 %v2529_v6, %v2528_v4 }
 0x16f   :  { %v1882_v8 = vadd.f32 %v1881_v46, %v1495_v48  ;;  %v1920_v9 = vmul.f32 %v1495_v48, %v1495_v48  ;;  %v1498_v10 = vadd.f32 %v2530_v7, %v1337_v5 }
 0x171   :  { %v1951_v11 = vadd.f32 %v1950_v53, %v1920_v9  ;;  %v1883_v49 = vadd.f32 %v1882_v8, %v1498_v10  ;;  %v1921_v12 = vmul.f32 %v1498_v10, %v1498_v10  ;;  %v2296_v13 = vpack.c.bf16 %v1498_v10, %v1495_v48  ;;  %v2419_v54 = vpop.f32.mrb[40].mxu0 }
 0x172   :  { %v2420_v15 = vpop.f32.mrb[41].mxu0 }
 0x173   :  { %v1952_v14 = vadd.f32 %v1951_v11, %v1921_v12  ;;  %2336 = vst [vmem:[%s3339_s5 + $0x48] sm:$0xff] %v2296_v13   ;;  %v2421_v16 = vadd.f32 %v2420_v15, %v2419_v54  ;;  %v2422_v17 = vpop.f32.mrb[42].mxu0 }
 0x174   :  { %v2423_v18 = vpop.f32.mrb[43].mxu0 }
 0x175   :  { %v2531_v58 = vpop.f32.mrb[40].mxu1  ;;  %v1342_v19 = vadd.f32 %v2421_v16, %v3244_v62  ;;  %v2424_v55 = vadd.f32 %v2423_v18, %v2422_v17 }
 0x176   :  { %v2532_v20 = vpop.f32.mrb[41].mxu1 }
 0x177   :  { %v2533_v21 = vadd.f32 %v2532_v20, %v2531_v58  ;;  %v2534_v22 = vpop.f32.mrb[42].mxu1  ;;  %v1345_v23 = vadd.f32 %v2424_v55, %v3244_v62 }
 0x178   :  { %v2535_v59 = vpop.f32.mrb[43].mxu1 }
 0x179   :  { %v1503_v24 = vadd.f32 %v2533_v21, %v1342_v19  ;;  %v2536_v25 = vadd.f32 %v2535_v59, %v2534_v22 }
 0x17b   :  { %v1884_v26 = vadd.f32 %v1883_v49, %v1503_v24  ;;  %v1922_v27 = vmul.f32 %v1503_v24, %v1503_v24  ;;  %v1506_v29 = vadd.f32 %v2536_v25, %v1345_v23 }
 0x17d   :  { %v1953_v30 = vadd.f32 %v1952_v14, %v1922_v27  ;;  %v1885_v31 = vadd.f32 %v1884_v26, %v1506_v29  ;;  %v1923_v32 = vmul.f32 %v1506_v29, %v1506_v29  ;;  %v2301_v33 = vpack.c.bf16 %v1506_v29, %v1503_v24 }
 0x17e   :  { %v2425_v34 = vpop.f32.mrb[44].mxu0 }
 0x17f   :  { %v2426_v35 = vpop.f32.mrb[45].mxu0  ;;  %v1954_v63 = vadd.f32 %v1953_v30, %v1923_v32  ;;  %2337 = vst [vmem:[%s3339_s5 + $0x50] sm:$0xff] %v2301_v33  }
 0x180   :  { %v2427_v36 = vadd.f32 %v2426_v35, %v2425_v34  ;;  %v2428_v37 = vpop.f32.mrb[46].mxu0 }
 0x181   :  { %v2429_v38 = vpop.f32.mrb[47].mxu0 }
 0x182   :  { %v2430_v39 = vadd.f32 %v2429_v38, %v2428_v37  ;;  %v1350_v41 = vadd.f32 %v2427_v36, %v3244_v62 }
 0x183   :  { %v2537_v40 = vpop.f32.mrb[44].mxu1 }
 0x184   :  { %v2538_v42 = vpop.f32.mrb[45].mxu1  ;;  %v1353_v45 = vadd.f32 %v2430_v39, %v3244_v62 }
 0x185   :  { %v2539_v43 = vadd.f32 %v2538_v42, %v2537_v40  ;;  %v2540_v44 = vpop.f32.mrb[46].mxu1 }
 0x186   :  { %v2541_v46 = vpop.f32.mrb[47].mxu1 }
 0x187   :  { %v1511_v47 = vadd.f32 %v2539_v43, %v1350_v41  ;;  %v2542_v50 = vadd.f32 %v2541_v46, %v2540_v44 }
 0x189   :  { %v1886_v51 = vadd.f32 %v1885_v31, %v1511_v47  ;;  %v1924_v52 = vmul.f32 %v1511_v47, %v1511_v47  ;;  %v1514_v53 = vadd.f32 %v2542_v50, %v1353_v45 }
 0x18b   :  { %v1955_v56 = vadd.f32 %v1954_v63, %v1924_v52  ;;  %v1887_v57 = vadd.f32 %v1886_v51, %v1514_v53  ;;  %v1925_v60 = vmul.f32 %v1514_v53, %v1514_v53  ;;  %v2306_v61 = vpack.c.bf16 %v1514_v53, %v1511_v47  ;;  %v2431_v0 = vpop.f32.mrb[48].mxu0 }
 0x18c   :  { %v2432_v2 = vpop.f32.mrb[49].mxu0 }
 0x18d   :  { %v1956_v1 = vadd.f32 %v1955_v56, %v1925_v60  ;;  %2338 = vst [vmem:[%s3339_s5 + $0x58] sm:$0xff] %v2306_v61   ;;  %v2433_v3 = vadd.f32 %v2432_v2, %v2431_v0  ;;  %v2434_v4 = vpop.f32.mrb[50].mxu0 }
 0x18e   :  { %v2435_v5 = vpop.f32.mrb[51].mxu0 }
 0x18f   :  { %v2543_v6 = vpop.f32.mrb[48].mxu1  ;;  %v1358_v48 = vadd.f32 %v2433_v3, %v3244_v62  ;;  %v2436_v7 = vadd.f32 %v2435_v5, %v2434_v4 }
 0x190   :  { %v2544_v8 = vpop.f32.mrb[49].mxu1 }
 0x191   :  { %v2545_v9 = vadd.f32 %v2544_v8, %v2543_v6  ;;  %v2546_v10 = vpop.f32.mrb[50].mxu1  ;;  %v1361_v11 = vadd.f32 %v2436_v7, %v3244_v62  ;;  %v1702_v8 = vadd.s32 240, %v2722_v28 }
 0x192   :  { %v2547_v49 = vpop.f32.mrb[51].mxu1 }
 0x193   :  { %v1519_v12 = vadd.f32 %v2545_v9, %v1358_v48  ;;  %v2548_v13 = vadd.f32 %v2547_v49, %v2546_v10  ;;  %vm1767_vm0 = vcmp.lt.s32.totalorder %v1702_v8, 242 }
 0x195   :  { %v1888_v54 = vadd.f32 %v1887_v57, %v1519_v12  ;;  %v1926_v14 = vmul.f32 %v1519_v12, %v1519_v12  ;;  %v1522_v15 = vadd.f32 %v2548_v13, %v1361_v11 }
 0x197   :  { %v1957_v16 = vadd.f32 %v1956_v1, %v1926_v14  ;;  %v1889_v17 = vadd.f32 %v1888_v54, %v1522_v15  ;;  %v1927_v18 = vmul.f32 %v1522_v15, %v1522_v15  ;;  %v2311_v58 = vpack.c.bf16 %v1522_v15, %v1519_v12 }
 0x198   :  { %v2437_v19 = vpop.f32.mrb[52].mxu0 }
 0x199   :  { %v2438_v55 = vpop.f32.mrb[53].mxu0  ;;  %v1958_v20 = vadd.f32 %v1957_v16, %v1927_v18  ;;  %2339 = vst [vmem:[%s3339_s5 + $0x60] sm:$0xff] %v2311_v58   ;;  %v2600_v18 = vmov 0.0  }
 0x19a   :  { %v2439_v21 = vadd.f32 %v2438_v55, %v2437_v19  ;;  %v2440_v22 = vpop.f32.mrb[54].mxu0  ;;  %v2183_v58 = vsel %vm1767_vm0, 1.0, %v2600_v18 }
 0x19b   :  { %v2441_v23 = vpop.f32.mrb[55].mxu0 }
 0x19c   :  { %v2442_v59 = vadd.f32 %v2441_v23, %v2440_v22  ;;  %v1366_v25 = vadd.f32 %v2439_v21, %v3244_v62 }
 0x19d   :  { %v2549_v24 = vpop.f32.mrb[52].mxu1 }
 0x19e   :  { %v2550_v26 = vpop.f32.mrb[53].mxu1  ;;  %v1369_v30 = vadd.f32 %v2442_v59, %v3244_v62 }
 0x19f   :  { %v2551_v27 = vadd.f32 %v2550_v26, %v2549_v24  ;;  %v2552_v29 = vpop.f32.mrb[54].mxu1 }
 0x1a0   :  { %v2553_v31 = vpop.f32.mrb[55].mxu1 }
 0x1a1   :  { %v1527_v32 = vadd.f32 %v2551_v27, %v1366_v25  ;;  %v2554_v33 = vadd.f32 %v2553_v31, %v2552_v29 }
 0x1a3   :  { %v1890_v34 = vadd.f32 %v1889_v17, %v1527_v32  ;;  %v1928_v35 = vmul.f32 %v1527_v32, %v1527_v32  ;;  %v1530_v63 = vadd.f32 %v2554_v33, %v1369_v30 }
 0x1a5   :  { %v1959_v36 = vadd.f32 %v1958_v20, %v1928_v35  ;;  %v1891_v37 = vadd.f32 %v1890_v34, %v1530_v63  ;;  %v1929_v38 = vmul.f32 %v1530_v63, %v1530_v63  ;;  %v2316_v39 = vpack.c.bf16 %v1530_v63, %v1527_v32  ;;  %v2443_v40 = vpop.f32.mrb[56].mxu0 }
 0x1a6   :  { %v2444_v42 = vpop.f32.mrb[57].mxu0 }
 0x1a7   :  { %v1960_v41 = vadd.f32 %v1959_v36, %v1929_v38  ;;  %2340 = vst [vmem:[%s3339_s5 + $0x68] sm:$0xff] %v2316_v39   ;;  %v2445_v43 = vadd.f32 %v2444_v42, %v2443_v40  ;;  %v2446_v44 = vpop.f32.mrb[58].mxu0 }
 0x1a8   :  { %v2447_v45 = vpop.f32.mrb[59].mxu0 }
 0x1a9   :  { %v2555_v46 = vpop.f32.mrb[56].mxu1  ;;  %v1374_v47 = vadd.f32 %v2445_v43, %v3244_v62  ;;  %v2448_v50 = vadd.f32 %v2447_v45, %v2446_v44 }
 0x1aa   :  { %v2556_v51 = vpop.f32.mrb[57].mxu1 }
 0x1ab   :  { %v2557_v52 = vadd.f32 %v2556_v51, %v2555_v46  ;;  %v2558_v53 = vpop.f32.mrb[58].mxu1  ;;  %v1377_v56 = vadd.f32 %v2448_v50, %v3244_v62 }
 0x1ac   :  { %v2559_v57 = vpop.f32.mrb[59].mxu1 }
 0x1ad   :  { %v1535_v60 = vadd.f32 %v2557_v52, %v1374_v47  ;;  %v2560_v61 = vadd.f32 %v2559_v57, %v2558_v53 }
 0x1af   :  { %v1892_v0 = vadd.f32 %v1891_v37, %v1535_v60  ;;  %v1930_v1 = vmul.f32 %v1535_v60, %v1535_v60  ;;  %v1538_v2 = vadd.f32 %v2560_v61, %v1377_v56 }
 0x1b1   :  { %v1961_v3 = vadd.f32 %v1960_v41, %v1930_v1  ;;  %v1893_v4 = vadd.f32 %v1892_v0, %v1538_v2  ;;  %v1931_v5 = vmul.f32 %v1538_v2, %v1538_v2  ;;  %v2321_v6 = vpack.c.bf16 %v1538_v2, %v1535_v60 }
 0x1b2   :  { %v2449_v48 = vpop.f32.mrb[60].mxu0 }
 0x1b3   :  { %v2450_v7 = vpop.f32.mrb[61].mxu0  ;;  %v1962_v9 = vadd.f32 %v1961_v3, %v1931_v5  ;;  %2341 = vst [vmem:[%s3339_s5 + $0x70] sm:$0xff] %v2321_v6  }
 0x1b4   :  { %v2451_v10 = vadd.f32 %v2450_v7, %v2449_v48  ;;  %v2452_v11 = vpop.f32.mrb[62].mxu0 }
 0x1b5   :  { %v2453_v49 = vpop.f32.mrb[63].mxu0 }
 0x1b6   :  { %v2454_v12 = vadd.f32 %v2453_v49, %v2452_v11  ;;  %v2561_v13 = vpop.f32.mrb[60].mxu1  ;;  %v1382_v54 = vadd.f32 %v2451_v10, %v3244_v62 }
 0x1b7   :  { %v2562_v14 = vpop.f32.mrb[61].mxu1 }
 0x1b8   :  { %v2563_v15 = vadd.f32 %v2562_v14, %v2561_v13  ;;  %v2564_v16 = vpop.f32.mrb[62].mxu1  ;;  %v1385_v17 = vadd.f32 %v2454_v12, %v3244_v62 }
 0x1b9   :  { %v2565_v19 = vpop.f32.mrb[63].mxu1 }
 0x1ba   :  { %v1543_v55 = vadd.f32 %v2563_v15, %v1382_v54  ;;  %v2566_v20 = vadd.f32 %v2565_v19, %v2564_v16 }
 0x1bc   :  { %v1863_v21 = vmul.f32 %v2183_v58, %v1543_v55  ;;  %v1546_v22 = vadd.f32 %v2566_v20, %v1385_v17 }
 0x1be   :  { %v1894_v23 = vadd.f32 %v1893_v4, %v1863_v21  ;;  %v1932_v59 = vmul.f32 %v1863_v21, %v1543_v55  ;;  %v1864_v24 = vmul.f32 0.0, %v1546_v22  ;;  %v2326_v25 = vpack.c.bf16 %v1546_v22, %v1543_v55 }
 0x1c0   :  { %v1963_v26 = vadd.f32 %v1962_v9, %v1932_v59  ;;  %v1895_v27 = vadd.f32 %v1894_v23, %v1864_v24  ;;  %v1933_v29 = vmul.f32 %v1864_v24, %v1546_v22  ;;  %2342 = vst [vmem:[%s3339_s5 + $0x78] sm:$0xff] %v2326_v25  }
 0x1c2   :  { %v1896_v30 = vrot.slane %v1895_v27, 4  ;;  %v1964_v62 = vadd.f32 %v1963_v26, %v1933_v29 }
 0x1c4   :  { %v1897_v31 = vadd.f32 %v1896_v30, %v1895_v27  ;;  %v1965_v32 = vrot.slane %v1964_v62, 4 }
 0x1c6   :  { %v1898_v33 = vrot.slane %v1897_v31, 2  ;;  %v1966_v34 = vadd.f32 %v1965_v32, %v1964_v62 }
 0x1c8   :  { %v1899_v35 = vadd.f32 %v1898_v33, %v1897_v31  ;;  %v1967_v63 = vrot.slane %v1966_v34, 2 }
 0x1ca   :  { %v1900_v36 = vrot.slane %v1899_v35, 1  ;;  %v1968_v37 = vadd.f32 %v1967_v63, %v1966_v34 }
 0x1cc   :  { %v1901_v38 = vadd.f32 %v1900_v36, %v1899_v35  ;;  %v1969_v39 = vrot.slane %v1968_v37, 1 }
 0x1ce   :  { %v1970_v40 = vadd.f32 %v1969_v39, %v1968_v37  ;;  %v1974_v41 = vsel %vm1971_vm1, %v1901_v38, 0.0 }
 0x1cf   :  { %1975 = vst [vmem:[%s3340_s6] sm:$0xff] %v1974_v41 }
 0x1d0   :  { %v1976_v42 = vsel %vm1971_vm1, %v1970_v40, 0.0 }
 0x1d1   :  { %1977 = vst [vmem:[%s3341_s7] sm:$0xff] %v1976_v42 }

// kernel: discriminator_forward.7
= control target key start
LH: loop header
LB: loop body
LE: loop exit
PB: predicated region body
PF: predicated region fallthrough
CT: control target
= control target key end

     0   :  { %v74_v23 = vlaneseq  ;;  %s1871_s3 = inlined_call_operand.vmem [shape: bf16[1024,128], index: 3, kind: input, shape index: {}]   ;;  %s1872_s0 = inlined_call_operand.vmem [shape: bf16[32,1024], index: 0, kind: input, shape index: {}]   ;;  %s1873_s1 = inlined_call_operand.vmem [shape: f32[1,1024], index: 1, kind: input, shape index: {}]   ;;  %s1874_s2 = inlined_call_operand.vmem [shape: f32[1,1024], index: 2, kind: input, shape index: {}]   ;;  %s1875_s4 = inlined_call_operand.vmem [shape: f32[1,128], index: 4, kind: input, shape index: {}]   ;;  %s1876_s5 = inlined_call_operand.vmem [shape: bf16[32,128], index: 5, kind: output, shape index: {0}]   ;;  %s1877_s6 = inlined_call_operand.vmem [shape: f32[8,128], index: 6, kind: output, shape index: {1}]   ;;  %s1878_s7 = inlined_call_operand.vmem [shape: f32[8,128], index: 7, kind: output, shape index: {2}]  }
   0x1   :  { %v1368_v0 = vld [vmem:[%s1871_s3 + $0x40] sm:$0xff]   ;;  %v1372_v4 = vld [vmem:[%s1871_s3 + $0x48] sm:$0xff]   ;;  %v1376_v8 = vld [vmem:[%s1871_s3 + $0x50] sm:$0xff]  }
   0x2   :  { %v1369_v1 = vld [vmem:[%s1871_s3 + $0xc0] sm:$0xff]   ;;  %1256 = vmatprep.subr.bf16.mxu0 %v1368_v0  ;;  %v1373_v5 = vld [vmem:[%s1871_s3 + $0xc8] sm:$0xff]   ;;  %v1377_v9 = vld [vmem:[%s1871_s3 + $0xd0] sm:$0xff]   ;;  %v1553_v28 = vshrl.u32 %v74_v23, 7 }
   0x3   :  { %v1370_v2 = vld [vmem:[%s1871_s3] sm:$0xff]   ;;  %1284 = vmatprep.subr.bf16.mxu1 %v1369_v1  ;;  %v1374_v6 = vld [vmem:[%s1871_s3 + $0x8] sm:$0xff]   ;;  %v1378_v10 = vld [vmem:[%s1871_s3 + $0x10] sm:$0xff]  }
   0x4   :  { %v1371_v3 = vld [vmem:[%s1871_s3 + $0x80] sm:$0xff]   ;;  %1257 = vmatpush3.bf16.msra.mxu0 %v1370_v2  ;;  %v1375_v7 = vld [vmem:[%s1871_s3 + $0x88] sm:$0xff]   ;;  %v1379_v11 = vld [vmem:[%s1871_s3 + $0x90] sm:$0xff]   ;;  %v80_v33 = vsub.s32 1, %v1553_v28  ;;  %v88_v35 = vsub.s32 3, %v1553_v28  ;;  %v76_v39 = vsub.s32 0, %v1553_v28 }
   0x5   :  { %1285 = vmatpush3.bf16.msra.mxu1 %v1371_v3  ;;  %1258 = vmatprep.subr.bf16.mxu0 %v1372_v4  ;;  %v1380_v12 = vld [vmem:[%s1871_s3 + $0x58] sm:$0xff]   ;;  %v1384_v16 = vld [vmem:[%s1871_s3 + $0x60] sm:$0xff]   ;;  %v1388_v20 = vld [vmem:[%s1871_s3 + $0x68] sm:$0xff]   ;;  %v84_v40 = vsub.s32 2, %v1553_v28 }
   0x6   :  { %1286 = vmatprep.subr.bf16.mxu1 %v1373_v5  ;;  %v1381_v13 = vld [vmem:[%s1871_s3 + $0xd8] sm:$0xff]   ;;  %v1385_v17 = vld [vmem:[%s1871_s3 + $0xe0] sm:$0xff]   ;;  %v1389_v21 = vld [vmem:[%s1871_s3 + $0xe8] sm:$0xff]  }
   0x7   :  { %v1382_v14 = vld [vmem:[%s1871_s3 + $0x18] sm:$0xff]   ;;  %v1386_v18 = vld [vmem:[%s1871_s3 + $0x20] sm:$0xff]   ;;  %v1390_v22 = vld [vmem:[%s1871_s3 + $0x28] sm:$0xff]  }
   0x8   :  { %1259 = vmatpush3.bf16.msra.mxu0 %v1374_v6  ;;  %v1383_v15 = vld [vmem:[%s1871_s3 + $0x98] sm:$0xff]   ;;  %v1387_v19 = vld [vmem:[%s1871_s3 + $0xa0] sm:$0xff]   ;;  %v1391_v24 = vld [vmem:[%s1871_s3 + $0xa8] sm:$0xff]  }
   0x9   :  { %1287 = vmatpush3.bf16.msra.mxu1 %v1375_v7  ;;  %1260 = vmatprep.subr.bf16.mxu0 %v1376_v8  ;;  %v1392_v25 = vld [vmem:[%s1871_s3 + $0x70] sm:$0xff]   ;;  %v1396_v30 = vld [vmem:[%s1871_s3 + $0x78] sm:$0xff]   ;;  %v24_v36 = vld [vmem:[%s1872_s0] sm:$0xff] }
   0xa   :  { %1288 = vmatprep.subr.bf16.mxu1 %v1377_v9  ;;  %v1393_v26 = vld [vmem:[%s1871_s3 + $0xf0] sm:$0xff]   ;;  %v1397_v31 = vld [vmem:[%s1871_s3 + $0xf8] sm:$0xff]   ;;  %v28_v37 = vld [vmem:[%s1872_s0 + $0x20] sm:$0xff]  ;;  %v40_v41 = vunpack.c.l.bf16 %v24_v36  ;;  %v41_v42 = vunpack.c.h.bf16 %v24_v36 }
   0xb   :  { %v1394_v27 = vld [vmem:[%s1871_s3 + $0x30] sm:$0xff]   ;;  %v1398_v32 = vld [vmem:[%s1871_s3 + $0x38] sm:$0xff]   ;;  %v1581_v38 = vld [vmem:[%s1873_s1] sm:$0xff]  ;;  %v48_v43 = vunpack.c.l.bf16 %v28_v37  ;;  %v49_v44 = vunpack.c.h.bf16 %v28_v37 }
   0xc   :  { %1261 = vmatpush3.bf16.msra.mxu0 %v1378_v10  ;;  %v1395_v29 = vld [vmem:[%s1871_s3 + $0xb0] sm:$0xff]   ;;  %v1399_v34 = vld [vmem:[%s1871_s3 + $0xb8] sm:$0xff]   ;;  %v1588_v45 = vld [vmem:[%s1874_s2] sm:$0xff]  ;;  %v1597_v48 = vrot.slane %v1581_v38, %v80_v33  ;;  %v1606_v55 = vrot.slane %v1581_v38, %v88_v35  ;;  %v1617_v60 = vrot.slane %v1581_v38, %v76_v39  ;;  %v1625_v0 = vrot.slane %v1581_v38, %v84_v40 }
   0xd   :  { %1289 = vmatpush3.bf16.msra.mxu1 %v1379_v11  ;;  %1262 = vmatprep.subr.bf16.mxu0 %v1380_v12  ;;  %v25_v46 = vld [vmem:[%s1872_s0 + $0x8] sm:$0xff]  ;;  %v1600_v49 = vrot.slane %v1588_v45, %v80_v33  ;;  %v1400_v52 = vld [vmem:[%s1871_s3 + $0x140] sm:$0xff]   ;;  %v1609_v56 = vrot.slane %v1588_v45, %v88_v35  ;;  %v1620_v61 = vrot.slane %v1588_v45, %v76_v39 }
   0xe   :  { %1290 = vmatprep.subr.bf16.mxu1 %v1381_v13  ;;  %v29_v47 = vld [vmem:[%s1872_s0 + $0x28] sm:$0xff]  ;;  %v42_v50 = vunpack.c.l.bf16 %v25_v46  ;;  %v43_v51 = vunpack.c.h.bf16 %v25_v46  ;;  %v1401_v57 = vld [vmem:[%s1871_s3 + $0x1c0] sm:$0xff]   ;;  %v115_v58 = vmul.f32 %v1597_v48, %v41_v42  ;;  %v123_v59 = vmul.f32 %v1597_v48, %v49_v44  ;;  %v1408_v42 = vld [vmem:[%s1871_s3 + $0x150] sm:$0xff]  }
   0xf   :  { %v50_v53 = vunpack.c.l.bf16 %v29_v47  ;;  %v51_v54 = vunpack.c.h.bf16 %v29_v47  ;;  %v1628_v1 = vrot.slane %v1588_v45, %v84_v40  ;;  %v114_v4 = vmul.f32 %v1617_v60, %v40_v41  ;;  %v1403_v33 = vld [vmem:[%s1871_s3 + $0x180] sm:$0xff]   ;;  %v1404_v35 = vld [vmem:[%s1871_s3 + $0x148] sm:$0xff]   ;;  %v1410_v44 = vld [vmem:[%s1871_s3 + $0x110] sm:$0xff]  }
  0x10   :  { %1263 = vmatpush3.bf16.msra.mxu0 %v1382_v14  ;;  %v117_v62 = vmul.f32 %v1606_v55, %v43_v51  ;;  %v189_v2 = vadd.f32 %v1600_v49, %v115_v58  ;;  %v197_v3 = vadd.f32 %v1600_v49, %v123_v59  ;;  %v122_v5 = vmul.f32 %v1617_v60, %v48_v43  ;;  %v1405_v37 = vld [vmem:[%s1871_s3 + $0x1c8] sm:$0xff]   ;;  %v1409_v43 = vld [vmem:[%s1871_s3 + $0x1d0] sm:$0xff]   ;;  %v1412_v47 = vld [vmem:[%s1871_s3 + $0x158] sm:$0xff]  }
  0x11   :  { %1291 = vmatpush3.bf16.msra.mxu1 %v1383_v15  ;;  %1264 = vmatprep.subr.bf16.mxu0 %v1384_v16  ;;  %v125_v63 = vmul.f32 %v1606_v55, %v51_v54  ;;  %v116_v8 = vmul.f32 %v1625_v0, %v42_v50  ;;  %v124_v9 = vmul.f32 %v1625_v0, %v50_v53  ;;  %v1406_v40 = vld [vmem:[%s1871_s3 + $0x108] sm:$0xff]   ;;  %v1411_v46 = vld [vmem:[%s1871_s3 + $0x190] sm:$0xff]   ;;  %v1413_v50 = vld [vmem:[%s1871_s3 + $0x1d8] sm:$0xff]  }
  0x12   :  { %1292 = vmatprep.subr.bf16.mxu1 %v1385_v17  ;;  %v191_v6 = vadd.f32 %v1609_v56, %v117_v62  ;;  %vm221_vm0 = vcmp.gt.f32.partialorder %v189_v2, 0.0  ;;  %vm229_vm1 = vcmp.gt.f32.partialorder %v197_v3, 0.0  ;;  %v253_v10 = vmul.f32 0.2, %v189_v2  ;;  %v1407_v41 = vld [vmem:[%s1871_s3 + $0x188] sm:$0xff]   ;;  %v1414_v51 = vld [vmem:[%s1871_s3 + $0x118] sm:$0xff]  }
  0x13   :  { %v199_v7 = vadd.f32 %v1609_v56, %v125_v63  ;;  %v261_v11 = vmul.f32 0.2, %v197_v3  ;;  %v188_v16 = vadd.f32 %v1620_v61, %v114_v4  ;;  %v196_v17 = vadd.f32 %v1620_v61, %v122_v5  ;;  %v36_v53 = vld [vmem:[%s1872_s0 + $0x60] sm:$0xff]  ;;  %v1415_v58 = vld [vmem:[%s1871_s3 + $0x198] sm:$0xff]  }
  0x14   :  { %1265 = vmatpush3.bf16.msra.mxu0 %v1386_v18  ;;  %vm223_vm2 = vcmp.gt.f32.partialorder %v191_v6, 0.0  ;;  %v255_v12 = vmul.f32 0.2, %v191_v6  ;;  %v285_v14 = vsel %vm221_vm0, %v189_v2, %v253_v10  ;;  %v65_v59 = vunpack.c.h.bf16 %v36_v53  ;;  %v1416_v63 = vld [vmem:[%s1871_s3 + $0x160] sm:$0xff]  }
  0x15   :  { %1293 = vmatpush3.bf16.msra.mxu1 %v1387_v19  ;;  %1266 = vmatprep.subr.bf16.mxu0 %v1388_v20  ;;  %vm231_vm3 = vcmp.gt.f32.partialorder %v199_v7, 0.0  ;;  %v263_v13 = vmul.f32 0.2, %v199_v7  ;;  %v293_v15 = vsel %vm229_vm1, %v197_v3, %v261_v11  ;;  %vm220_vm4 = vcmp.gt.f32.partialorder %v188_v16, 0.0  ;;  %v1417_v4 = vld [vmem:[%s1871_s3 + $0x1e0] sm:$0xff]   ;;  %v33_v11 = vld [vmem:[%s1872_s0 + $0x48] sm:$0xff] }
  0x16   :  { %1294 = vmatprep.subr.bf16.mxu1 %v1389_v21  ;;  %v317_v18 = vpack.c.bf16 %v293_v15, %v285_v14  ;;  %v287_v19 = vsel %vm223_vm2, %v191_v6, %v255_v12  ;;  %v190_v21 = vadd.f32 %v1628_v1, %v116_v8  ;;  %vm228_vm5 = vcmp.gt.f32.partialorder %v196_v17, 0.0  ;;  %v1418_v8 = vld [vmem:[%s1871_s3 + $0x120] sm:$0xff]   ;;  %v1420_v15 = vld [vmem:[%s1871_s3 + $0x168] sm:$0xff]  }
  0x17   :  { %v295_v20 = vsel %vm231_vm3, %v199_v7, %v263_v13  ;;  %v252_v23 = vmul.f32 0.2, %v188_v16  ;;  %v64_v62 = vunpack.c.l.bf16 %v36_v53  ;;  %v139_v5 = vmul.f32 %v1597_v48, %v65_v59  ;;  %v1419_v13 = vld [vmem:[%s1871_s3 + $0x1a0] sm:$0xff]   ;;  %v1428_v53 = vld [vmem:[%s1871_s3 + $0x178] sm:$0xff]  }
  0x18   :  { %1267 = vmatpush3.bf16.msra.mxu0 %v1390_v22  ;;  %v319_v22 = vpack.c.bf16 %v295_v20, %v287_v19  ;;  %883 = vmatprep.mubr.bf16.mxu0 %v317_v18  ;;  %vm222_vm6 = vcmp.gt.f32.partialorder %v190_v21, 0.0  ;;  %v92_v7 = vsub.s32 4, %v1553_v28  ;;  %v100_v12 = vsub.s32 6, %v1553_v28  ;;  %v1421_v20 = vld [vmem:[%s1871_s3 + $0x1e8] sm:$0xff]  }
  0x19   :  { %1295 = vmatpush3.bf16.msra.mxu1 %v1391_v24  ;;  %1268 = vmatprep.subr.bf16.mxu0 %v1392_v25  ;;  %v260_v24 = vmul.f32 0.2, %v196_v17  ;;  %v198_v25 = vadd.f32 %v1628_v1, %v124_v9  ;;  %v138_v6 = vmul.f32 %v1617_v60, %v64_v62  ;;  %v213_v14 = vadd.f32 %v1600_v49, %v139_v5  ;;  %v1429_v62 = vld [vmem:[%s1871_s3 + $0x1f8] sm:$0xff]  }
  0x1a   :  { %1296 = vmatprep.subr.bf16.mxu1 %v1393_v26  ;;  %v254_v26 = vmul.f32 0.2, %v190_v21  ;;  %932 = vmatprep.mubr.bf16.mxu1 %v319_v22 }
  0x1b   :  { %vm230_vm7 = vcmp.gt.f32.partialorder %v198_v25, 0.0  ;;  %vm245_vm10 = vcmp.gt.f32.partialorder %v213_v14, 0.0 }
  0x1c   :  { %1269 = vmatpush3.bf16.msra.mxu0 %v1394_v27  ;;  %v1402_v27 = vld [vmem:[%s1871_s3 + $0x100] sm:$0xff]  }
  0x1d   :  { %1297 = vmatpush3.bf16.msra.mxu1 %v1395_v29  ;;  %1270 = vmatprep.subr.bf16.mxu0 %v1396_v30  ;;  %v284_v29 = vsel %vm220_vm4, %v188_v16, %v252_v23  ;;  %v292_v30 = vsel %vm228_vm5, %v196_v17, %v260_v24  ;;  %v212_v16 = vadd.f32 %v1620_v61, %v138_v6  ;;  %v59_v17 = vunpack.c.h.bf16 %v33_v11  ;;  %v30_v6 = vld [vmem:[%s1872_s0 + $0x30] sm:$0xff] }
  0x1e   :  { %1298 = vmatprep.subr.bf16.mxu1 %v1397_v31  ;;  %v262_v31 = vmul.f32 0.2, %v198_v25 }
  0x1f   :  { %vm244_vm11 = vcmp.gt.f32.partialorder %v212_v16, 0.0  ;;  %v276_v22 = vmul.f32 0.2, %v212_v16 }
  0x20   :  { %1271 = vmatpush3.bf16.msra.mxu0 %v1398_v32  ;;  %v286_v32 = vsel %vm222_vm6, %v190_v21, %v254_v26  ;;  %v294_v36 = vsel %vm230_vm7, %v198_v25, %v262_v31  ;;  %v133_v25 = vmul.f32 %v1606_v55, %v59_v17  ;;  %v58_v31 = vunpack.c.l.bf16 %v33_v11 }
  0x21   :  { %1299 = vmatpush3.bf16.msra.mxu1 %v1399_v34  ;;  %1312 = vmatprep.subr.bf16.mxu0 %v1400_v52  ;;  %v316_v34 = vpack.c.bf16 %v292_v30, %v284_v29  ;;  %v318_v39 = vpack.c.bf16 %v294_v36, %v286_v32  ;;  %v32_v52 = vld [vmem:[%s1872_s0 + $0x40] sm:$0xff]  ;;  %v308_v29 = vsel %vm244_vm11, %v212_v16, %v276_v22  ;;  %v1423_v30 = vld [vmem:[%s1871_s3 + $0x1a8] sm:$0xff]   ;;  %v1431_v16 = vld [vmem:[%s1871_s3 + $0x1b8] sm:$0xff]  }
  0x22   :  { %1340 = vmatprep.subr.bf16.mxu1 %v1401_v57  ;;  %v57_v54 = vunpack.c.h.bf16 %v32_v52  ;;  %v56_v57 = vunpack.c.l.bf16 %v32_v52 }
  0x23   :  { %884 = vmatmul.mubr.bf16.vlgmr.msra.gmra.mrb[0].mxu0 %v316_v34 }
  0x24   :  { %1313 = vmatpush3.bf16.msra.mxu0 %v1402_v27  ;;  %933 = vmatmul.mubr.bf16.vlgmr.msra.gmra.mrb[0].mxu1 %v318_v39  ;;  %v131_v2 = vmul.f32 %v1597_v48, %v57_v54  ;;  %v130_v3 = vmul.f32 %v1617_v60, %v56_v57  ;;  %v37_v48 = vld [vmem:[%s1872_s0 + $0x68] sm:$0xff]  ;;  %v96_v60 = vsub.s32 5, %v1553_v28  ;;  %v1769_v54 = vrot.slane %v1581_v38, %v100_v12 }
  0x25   :  { %1314 = vmatprep.subr.bf16.mxu0 %v1404_v35  ;;  %1341 = vmatpush3.bf16.msra.mxu1 %v1403_v33  ;;  %v67_v18 = vunpack.c.h.bf16 %v37_v48  ;;  %v66_v32 = vunpack.c.l.bf16 %v37_v48  ;;  %v207_v35 = vadd.f32 %v1609_v56, %v133_v25  ;;  %v1430_v48 = vld [vmem:[%s1871_s3 + $0x138] sm:$0xff]  }
  0x26   :  { %1342 = vmatprep.subr.bf16.mxu1 %v1405_v37  ;;  %v205_v9 = vadd.f32 %v1600_v49, %v131_v2  ;;  %v204_v10 = vadd.f32 %v1620_v61, %v130_v3  ;;  %v277_v49 = vmul.f32 0.2, %v213_v14  ;;  %v1422_v61 = vld [vmem:[%s1871_s3 + $0x128] sm:$0xff]   ;;  %v132_v37 = vmul.f32 %v1625_v0, %v58_v31 }
  0x27   :  { %v141_v26 = vmul.f32 %v1606_v55, %v67_v18  ;;  %v1424_v55 = vld [vmem:[%s1871_s3 + $0x170] sm:$0xff]   ;;  %v140_v39 = vmul.f32 %v1625_v0, %v66_v32  ;;  %vm239_vm12 = vcmp.gt.f32.partialorder %v207_v35, 0.0 }
  0x28   :  { %1315 = vmatpush3.bf16.msra.mxu0 %v1406_v40  ;;  %vm237_vm8 = vcmp.gt.f32.partialorder %v205_v9, 0.0  ;;  %v269_v19 = vmul.f32 0.2, %v205_v9  ;;  %vm236_vm9 = vcmp.gt.f32.partialorder %v204_v10, 0.0  ;;  %v268_v21 = vmul.f32 0.2, %v204_v10 }
  0x29   :  { %1316 = vmatprep.subr.bf16.mxu0 %v1408_v42  ;;  %1343 = vmatpush3.bf16.msra.mxu1 %v1407_v41  ;;  %v309_v27 = vsel %vm245_vm10, %v213_v14, %v277_v49  ;;  %v215_v36 = vadd.f32 %v1609_v56, %v141_v26  ;;  %v1425_v40 = vld [vmem:[%s1871_s3 + $0x1f0] sm:$0xff]   ;;  %v104_v41 = vsub.s32 7, %v1553_v28  ;;  %v271_v56 = vmul.f32 0.2, %v207_v35 }
  0x2a   :  { %1344 = vmatprep.subr.bf16.mxu1 %v1409_v43  ;;  %v301_v23 = vsel %vm237_vm8, %v205_v9, %v269_v19  ;;  %v300_v24 = vsel %vm236_vm9, %v204_v10, %v268_v21  ;;  %v1426_v43 = vld [vmem:[%s1871_s3 + $0x130] sm:$0xff]   ;;  %v214_v0 = vadd.f32 %v1628_v1, %v140_v39  ;;  %v31_v10 = vld [vmem:[%s1872_s0 + $0x38] sm:$0xff] }
  0x2b   :  { %v325_v33 = vpack.c.bf16 %v309_v27, %v301_v23  ;;  %v324_v34 = vpack.c.bf16 %v308_v29, %v300_v24  ;;  %vm247_vm13 = vcmp.gt.f32.partialorder %v215_v36, 0.0  ;;  %v279_v42 = vmul.f32 0.2, %v215_v36 }
  0x2c   :  { %1317 = vmatpush3.bf16.msra.mxu0 %v1410_v44  ;;  %v206_v44 = vadd.f32 %v1628_v1, %v132_v37  ;;  %v1764_v1 = vrot.slane %v1588_v45, %v96_v60  ;;  %vm246_vm15 = vcmp.gt.f32.partialorder %v214_v0, 0.0  ;;  %v278_v59 = vmul.f32 0.2, %v214_v0 }
  0x2d   :  { %1318 = vmatprep.subr.bf16.mxu0 %v1412_v47  ;;  %1345 = vmatpush3.bf16.msra.mxu1 %v1411_v46  ;;  %v1427_v46 = vld [vmem:[%s1871_s3 + $0x1b0] sm:$0xff]   ;;  %v1755_v47 = vrot.slane %v1581_v38, %v92_v7  ;;  %v311_v52 = vsel %vm247_vm13, %v215_v36, %v279_v42  ;;  %v1778_v2 = vrot.slane %v1581_v38, %v104_v41  ;;  %v55_v21 = vunpack.c.h.bf16 %v31_v10 }
  0x2e   :  { %1346 = vmatprep.subr.bf16.mxu1 %v1413_v50  ;;  %891 = vmatprep.mubr.bf16.mxu0 %v325_v33  ;;  %v1758_v50 = vrot.slane %v1581_v38, %v96_v60  ;;  %vm238_vm14 = vcmp.gt.f32.partialorder %v206_v44, 0.0  ;;  %v1781_v3 = vrot.slane %v1588_v45, %v104_v41  ;;  %v27_v38 = vld [vmem:[%s1872_s0 + $0x18] sm:$0xff]  ;;  %v310_v11 = vsel %vm246_vm15, %v214_v0, %v278_v59  ;;  %v34_v36 = vld [vmem:[%s1872_s0 + $0x50] sm:$0xff] }
  0x2f   :  { %892 = vmatmul.mubr.bf16.gmra.mrb[4].mxu0 %v324_v34  ;;  %v52_v60 = vunpack.c.l.bf16 %v30_v6  ;;  %v46_v14 = vunpack.c.l.bf16 %v27_v38  ;;  %v47_v17 = vunpack.c.h.bf16 %v27_v38  ;;  %v129_v26 = vmul.f32 %v1778_v2, %v55_v21 }
  0x30   :  { %1319 = vmatpush3.bf16.msra.mxu0 %v1414_v51  ;;  %v303_v51 = vsel %vm239_vm12, %v207_v35, %v271_v56  ;;  %v60_v38 = vunpack.c.l.bf16 %v34_v36 }
  0x31   :  { %1320 = vmatprep.subr.bf16.mxu0 %v1416_v63  ;;  %1347 = vmatpush3.bf16.msra.mxu1 %v1415_v58  ;;  %v327_v57 = vpack.c.bf16 %v311_v52, %v303_v51  ;;  %v270_v58 = vmul.f32 0.2, %v206_v44  ;;  %v26_v63 = vld [vmem:[%s1872_s0 + $0x10] sm:$0xff]  ;;  %v126_v18 = vmul.f32 %v1755_v47, %v52_v60  ;;  %v120_v22 = vmul.f32 %v1769_v54, %v46_v14  ;;  %v35_v52 = vld [vmem:[%s1872_s0 + $0x58] sm:$0xff] }
  0x32   :  { %1348 = vmatprep.subr.bf16.mxu1 %v1417_v4  ;;  %v1786_v4 = vrot.slane %v1588_v45, %v92_v7  ;;  %v45_v9 = vunpack.c.h.bf16 %v26_v63  ;;  %v1800_v7 = vrot.slane %v1588_v45, %v100_v12  ;;  %v121_v23 = vmul.f32 %v1778_v2, %v47_v17 }
  0x33   :  { %940 = vmatprep.mubr.bf16.mxu1 %v327_v57  ;;  %v302_v5 = vsel %vm238_vm14, %v206_v44, %v270_v58  ;;  %v203_v32 = vadd.f32 %v1781_v3, %v129_v26  ;;  %v61_v51 = vunpack.c.h.bf16 %v34_v36 }
  0x34   :  { %1321 = vmatpush3.bf16.msra.mxu0 %v1418_v8  ;;  %v44_v8 = vunpack.c.l.bf16 %v26_v63  ;;  %v119_v12 = vmul.f32 %v1758_v50, %v45_v9  ;;  %v200_v27 = vadd.f32 %v1786_v4, %v126_v18  ;;  %v194_v42 = vadd.f32 %v1800_v7, %v120_v22 }
  0x35   :  { %1322 = vmatprep.subr.bf16.mxu0 %v1420_v15  ;;  %1349 = vmatpush3.bf16.msra.mxu1 %v1419_v13  ;;  %v53_v13 = vunpack.c.h.bf16 %v30_v6  ;;  %v326_v15 = vpack.c.bf16 %v310_v11, %v302_v5  ;;  %vm235_vm5 = vcmp.gt.f32.partialorder %v203_v32, 0.0  ;;  %v267_v37 = vmul.f32 0.2, %v203_v32 }
  0x36   :  { %1350 = vmatprep.subr.bf16.mxu1 %v1421_v20  ;;  %v118_v45 = vmul.f32 %v1755_v47, %v44_v8  ;;  %v54_v20 = vunpack.c.l.bf16 %v31_v10  ;;  %v193_v49 = vadd.f32 %v1764_v1, %v119_v12  ;;  %vm232_vm3 = vcmp.gt.f32.partialorder %v200_v27, 0.0 }
  0x37   :  { %v127_v19 = vmul.f32 %v1758_v50, %v53_v13  ;;  %941 = vmatmul.mubr.bf16.gmra.mrb[4].mxu1 %v326_v15  ;;  %v264_v39 = vmul.f32 0.2, %v200_v27  ;;  %v299_v44 = vsel %vm235_vm5, %v203_v32, %v267_v37  ;;  %vm226_vm6 = vcmp.gt.f32.partialorder %v194_v42, 0.0 }
  0x38   :  { %1323 = vmatpush3.bf16.msra.mxu0 %v1422_v61  ;;  %v192_v24 = vadd.f32 %v1786_v4, %v118_v45  ;;  %v128_v25 = vmul.f32 %v1769_v54, %v54_v20  ;;  %vm225_vm0 = vcmp.gt.f32.partialorder %v193_v49, 0.0  ;;  %v257_v29 = vmul.f32 0.2, %v193_v49 }
  0x39   :  { %1351 = vmatpush3.bf16.msra.mxu1 %v1423_v30  ;;  %1324 = vmatprep.subr.bf16.mxu0 %v1424_v55  ;;  %v201_v61 = vadd.f32 %v1764_v1, %v127_v19  ;;  %v195_v30 = vadd.f32 %v1781_v3, %v121_v23  ;;  %v296_v0 = vsel %vm232_vm3, %v200_v27, %v264_v39  ;;  %v258_v59 = vmul.f32 0.2, %v194_v42 }
  0x3a   :  { %1352 = vmatprep.subr.bf16.mxu1 %v1425_v40  ;;  %vm224_vm1 = vcmp.gt.f32.partialorder %v192_v24, 0.0  ;;  %v289_v33 = vsel %vm225_vm0, %v193_v49, %v257_v29  ;;  %v256_v35 = vmul.f32 0.2, %v192_v24  ;;  %v135_v5 = vmul.f32 %v1758_v50, %v61_v51 }
  0x3b   :  { %vm233_vm2 = vcmp.gt.f32.partialorder %v201_v61, 0.0  ;;  %v265_v31 = vmul.f32 0.2, %v201_v61  ;;  %vm227_vm4 = vcmp.gt.f32.partialorder %v195_v30, 0.0  ;;  %v259_v34 = vmul.f32 0.2, %v195_v30 }
  0x3c   :  { %1325 = vmatpush3.bf16.msra.mxu0 %v1426_v43  ;;  %v288_v56 = vsel %vm224_vm1, %v192_v24, %v256_v35  ;;  %v38_v43 = vld [vmem:[%s1872_s0 + $0x70] sm:$0xff]  ;;  %v290_v6 = vsel %vm226_vm6, %v194_v42, %v258_v59  ;;  %v63_v8 = vunpack.c.h.bf16 %v35_v52  ;;  %v62_v20 = vunpack.c.l.bf16 %v35_v52 }
  0x3d   :  { %1353 = vmatpush3.bf16.msra.mxu1 %v1427_v46  ;;  %1326 = vmatprep.subr.bf16.mxu0 %v1428_v53  ;;  %v297_v55 = vsel %vm233_vm2, %v201_v61, %v265_v31  ;;  %v291_v41 = vsel %vm227_vm4, %v195_v30, %v259_v34  ;;  %v202_v46 = vadd.f32 %v1800_v7, %v128_v25  ;;  %v39_v53 = vld [vmem:[%s1872_s0 + $0x78] sm:$0xff]  ;;  %v69_v63 = vunpack.c.h.bf16 %v38_v43 }
  0x3e   :  { %1354 = vmatprep.subr.bf16.mxu1 %v1429_v62  ;;  %v321_v40 = vpack.c.bf16 %v297_v55, %v289_v33  ;;  %v323_v57 = vpack.c.bf16 %v299_v44, %v291_v41  ;;  %v320_v58 = vpack.c.bf16 %v296_v0, %v288_v56  ;;  %v71_v9 = vunpack.c.h.bf16 %v39_v53  ;;  %v1172_v41 = vld [vmem:[%s1875_s4] ss:$0 sm:$0xff] }
  0x3f   :  { %vm234_vm7 = vcmp.gt.f32.partialorder %v202_v46, 0.0  ;;  %v266_v62 = vmul.f32 0.2, %v202_v46  ;;  %v143_v11 = vmul.f32 %v1758_v50, %v69_v63  ;;  %v68_v60 = vunpack.c.l.bf16 %v38_v43 }
  0x40   :  { %1327 = vmatpush3.bf16.msra.mxu0 %v1430_v48  ;;  %981 = vmatprep.mubr.bf16.mxu0 %v321_v40  ;;  %v209_v48 = vadd.f32 %v1764_v1, %v135_v5  ;;  %v137_v14 = vmul.f32 %v1778_v2, %v63_v8  ;;  %v145_v15 = vmul.f32 %v1778_v2, %v71_v9  ;;  %v70_v29 = vunpack.c.l.bf16 %v39_v53 }
  0x41   :  { %1355 = vmatpush3.bf16.msra.mxu1 %v1431_v16  ;;  %1030 = vmatprep.mubr.bf16.mxu1 %v323_v57  ;;  %v298_v10 = vsel %vm234_vm7, %v202_v46, %v266_v62  ;;  %v134_v16 = vmul.f32 %v1755_v47, %v60_v38  ;;  %v217_v45 = vadd.f32 %v1764_v1, %v143_v11  ;;  %vm1133_vm0 = vcmp.eq.s32.totalorder %v1553_v28, 0 }
  0x42   :  { %v322_v13 = vpack.c.bf16 %v298_v10, %v290_v6  ;;  %vm241_vm8 = vcmp.gt.f32.partialorder %v209_v48, 0.0  ;;  %v273_v12 = vmul.f32 0.2, %v209_v48  ;;  %v142_v17 = vmul.f32 %v1755_v47, %v68_v60 }
  0x43   :  { %982 = vmatmul.mubr.bf16.vlgmr.msra.gmra.mrb[8].mxu0 %v320_v58  ;;  %v211_v18 = vadd.f32 %v1781_v3, %v137_v14  ;;  %v219_v50 = vadd.f32 %v1781_v3, %v145_v15  ;;  %v208_v19 = vadd.f32 %v1786_v4, %v134_v16  ;;  %vm249_vm9 = vcmp.gt.f32.partialorder %v217_v45, 0.0 }
  0x44   :  { %1031 = vmatmul.mubr.bf16.vlgmr.msra.gmra.mrb[8].mxu1 %v322_v13  ;;  %v281_v21 = vmul.f32 0.2, %v217_v45  ;;  %v305_v49 = vsel %vm241_vm8, %v209_v48, %v273_v12  ;;  %v216_v2 = vadd.f32 %v1786_v4, %v142_v17  ;;  %v136_v30 = vmul.f32 %v1769_v54, %v62_v20 }
  0x45   :  { %vm243_vm10 = vcmp.gt.f32.partialorder %v211_v18, 0.0  ;;  %vm251_vm11 = vcmp.gt.f32.partialorder %v219_v50, 0.0  ;;  %v275_v1 = vmul.f32 0.2, %v211_v18  ;;  %v283_v22 = vmul.f32 0.2, %v219_v50 }
  0x46   :  { %v313_v23 = vsel %vm249_vm9, %v217_v45, %v281_v21  ;;  %vm240_vm12 = vcmp.gt.f32.partialorder %v208_v19, 0.0  ;;  %vm248_vm13 = vcmp.gt.f32.partialorder %v216_v2, 0.0  ;;  %v272_v47 = vmul.f32 0.2, %v208_v19 }
  0x47   :  { %v329_v24 = vpack.c.bf16 %v313_v23, %v305_v49  ;;  %v307_v61 = vsel %vm243_vm10, %v211_v18, %v275_v1  ;;  %v315_v25 = vsel %vm251_vm11, %v219_v50, %v283_v22  ;;  %v280_v3 = vmul.f32 0.2, %v216_v2 }
  0x48   :  { %v331_v26 = vpack.c.bf16 %v315_v25, %v307_v61  ;;  %v304_v27 = vsel %vm240_vm12, %v208_v19, %v272_v47  ;;  %v144_v32 = vmul.f32 %v1769_v54, %v70_v29  ;;  %v210_v33 = vadd.f32 %v1800_v7, %v136_v30 }
  0x49   :  { %989 = vmatprep.mubr.bf16.mxu0 %v329_v24  ;;  %v312_v31 = vsel %vm248_vm13, %v216_v2, %v280_v3 }
  0x4a   :  { %1038 = vmatprep.mubr.bf16.mxu1 %v331_v26  ;;  %v328_v4 = vpack.c.bf16 %v312_v31, %v304_v27  ;;  %v218_v34 = vadd.f32 %v1800_v7, %v144_v32  ;;  %vm242_vm14 = vcmp.gt.f32.partialorder %v210_v33, 0.0  ;;  %v274_v35 = vmul.f32 0.2, %v210_v33 }
  0x4c   :  { %990 = vmatmul.mubr.bf16.gmra.mrb[12].mxu0 %v328_v4  ;;  %vm250_vm15 = vcmp.gt.f32.partialorder %v218_v34, 0.0  ;;  %v282_v36 = vmul.f32 0.2, %v218_v34  ;;  %v306_v55 = vsel %vm242_vm14, %v210_v33, %v274_v35 }
  0x4e   :  { %v314_v37 = vsel %vm250_vm15, %v218_v34, %v282_v36 }
  0x4f   :  { %v330_v39 = vpack.c.bf16 %v314_v37, %v306_v55 }
  0x51   :  { %1039 = vmatmul.mubr.bf16.gmra.mrb[12].mxu1 %v330_v39 }
  0xf6   :  { %v1272_v40 = vpop.f32.mrb[0].mxu0 }
  0xf7   :  { %v1273_v56 = vpop.f32.mrb[1].mxu0  ;;  %v1300_v54 = vpop.f32.mrb[0].mxu1 }
  0xf8   :  { %v1274_v42 = vadd.f32 %v1273_v56, %v1272_v40  ;;  %v1275_v43 = vpop.f32.mrb[2].mxu0  ;;  %v1301_v44 = vpop.f32.mrb[1].mxu1 }
  0xf9   :  { %v1276_v0 = vpop.f32.mrb[3].mxu0  ;;  %v1302_v46 = vadd.f32 %v1301_v44, %v1300_v54  ;;  %v1303_v51 = vpop.f32.mrb[2].mxu1 }
  0xfa   :  { %v886_v7 = vadd.f32 %v1274_v42, %v1172_v41  ;;  %v1277_v52 = vadd.f32 %v1276_v0, %v1275_v43  ;;  %v1304_v53 = vpop.f32.mrb[3].mxu1 }
  0xfb   :  { %v1305_v59 = vadd.f32 %v1304_v53, %v1303_v51 }
  0xfc   :  { %v935_v57 = vadd.f32 %v1302_v46, %v886_v7  ;;  %v889_v58 = vadd.f32 %v1277_v52, %v1172_v41 }
  0xfe   :  { %v938_v62 = vadd.f32 %v1305_v59, %v889_v58 }
 0x102   :  { %v1278_v63 = vpop.f32.mrb[4].mxu0 }
 0x103   :  { %v1279_v5 = vpop.f32.mrb[5].mxu0 }
 0x104   :  { %v1280_v6 = vadd.f32 %v1279_v5, %v1278_v63  ;;  %v1281_v8 = vpop.f32.mrb[6].mxu0 }
 0x105   :  { %v1282_v9 = vpop.f32.mrb[7].mxu0 }
 0x106   :  { %v1283_v38 = vadd.f32 %v1282_v9, %v1281_v8  ;;  %v894_v10 = vadd.f32 %v1280_v6, %v1172_v41 }
 0x108   :  { %v897_v60 = vadd.f32 %v1283_v38, %v1172_v41 }
 0x10a   :  { %v1306_v11 = vpop.f32.mrb[4].mxu1 }
 0x10b   :  { %v1307_v48 = vpop.f32.mrb[5].mxu1 }
 0x10c   :  { %v1308_v13 = vadd.f32 %v1307_v48, %v1306_v11  ;;  %v1309_v14 = vpop.f32.mrb[6].mxu1 }
 0x10d   :  { %v1310_v15 = vpop.f32.mrb[7].mxu1 }
 0x10e   :  { %v943_v16 = vadd.f32 %v1308_v13, %v894_v10  ;;  %v1311_v45 = vadd.f32 %v1310_v15, %v1309_v14 }
 0x110   :  { %v946_v12 = vadd.f32 %v1311_v45, %v897_v60 }
 0x116   :  { %v1328_v17 = vpop.f32.mrb[8].mxu0 }
 0x117   :  { %v1329_v18 = vpop.f32.mrb[9].mxu0  ;;  %v1356_v21 = vpop.f32.mrb[8].mxu1 }
 0x118   :  { %v1330_v50 = vadd.f32 %v1329_v18, %v1328_v17  ;;  %v1331_v19 = vpop.f32.mrb[10].mxu0  ;;  %v1357_v1 = vpop.f32.mrb[9].mxu1 }
 0x119   :  { %v1332_v20 = vpop.f32.mrb[11].mxu0  ;;  %v1358_v22 = vadd.f32 %v1357_v1, %v1356_v21  ;;  %v1359_v23 = vpop.f32.mrb[10].mxu1 }
 0x11a   :  { %v984_v49 = vadd.f32 %v1330_v50, %v935_v57  ;;  %v1333_v2 = vadd.f32 %v1332_v20, %v1331_v19  ;;  %v1360_v24 = vpop.f32.mrb[11].mxu1 }
 0x11b   :  { %v1361_v25 = vadd.f32 %v1360_v24, %v1359_v23 }
 0x11c   :  { %v987_v47 = vadd.f32 %v1333_v2, %v938_v62  ;;  %v1033_v61 = vadd.f32 %v1358_v22, %v984_v49 }
 0x11e   :  { %v1036_v3 = vadd.f32 %v1361_v25, %v987_v47  ;;  %v1120_v26 = vmul.f32 %v1033_v61, %v1033_v61 }
 0x11f   :  { %v1334_v31 = vpop.f32.mrb[12].mxu0 }
 0x120   :  { %v1111_v27 = vadd.f32 %v1036_v3, %v1033_v61  ;;  %v1121_v29 = vmul.f32 %v1036_v3, %v1036_v3  ;;  %v1248_v30 = vpack.c.bf16 %v1036_v3, %v1033_v61  ;;  %v1335_v32 = vpop.f32.mrb[13].mxu0 }
 0x121   :  { %v1336_v33 = vadd.f32 %v1335_v32, %v1334_v31  ;;  %v1337_v34 = vpop.f32.mrb[14].mxu0 }
 0x122   :  { %v1124_v4 = vadd.f32 %v1121_v29, %v1120_v26  ;;  %1249 = vst [vmem:[%s1876_s5] sm:$0xff] %v1248_v30   ;;  %v1338_v35 = vpop.f32.mrb[15].mxu0 }
 0x123   :  { %v992_v36 = vadd.f32 %v1336_v33, %v943_v16  ;;  %v1339_v55 = vadd.f32 %v1338_v35, %v1337_v34 }
 0x124   :  { %v1362_v39 = vpop.f32.mrb[12].mxu1 }
 0x125   :  { %v995_v37 = vadd.f32 %v1339_v55, %v946_v12  ;;  %v1363_v40 = vpop.f32.mrb[13].mxu1 }
 0x126   :  { %v1364_v41 = vadd.f32 %v1363_v40, %v1362_v39  ;;  %v1365_v56 = vpop.f32.mrb[14].mxu1 }
 0x127   :  { %v1366_v54 = vpop.f32.mrb[15].mxu1 }
 0x128   :  { %v1041_v42 = vadd.f32 %v1364_v41, %v992_v36  ;;  %v1367_v43 = vadd.f32 %v1366_v54, %v1365_v56 }
 0x12a   :  { %v1112_v44 = vadd.f32 %v1111_v27, %v1041_v42  ;;  %v1122_v0 = vmul.f32 %v1041_v42, %v1041_v42  ;;  %v1044_v7 = vadd.f32 %v1367_v43, %v995_v37 }
 0x12c   :  { %v1125_v46 = vadd.f32 %v1124_v4, %v1122_v0  ;;  %v1113_v51 = vadd.f32 %v1112_v44, %v1044_v7  ;;  %v1123_v52 = vmul.f32 %v1044_v7, %v1044_v7  ;;  %v1253_v53 = vpack.c.bf16 %v1044_v7, %v1041_v42 }
 0x12e   :  { %v1114_v57 = vrot.slane %v1113_v51, 4  ;;  %v1126_v58 = vadd.f32 %v1125_v46, %v1123_v52  ;;  %1255 = vst [vmem:[%s1876_s5 + $0x8] sm:$0xff] %v1253_v53  }
 0x130   :  { %v1115_v59 = vadd.f32 %v1114_v57, %v1113_v51  ;;  %v1127_v62 = vrot.slane %v1126_v58, 4 }
 0x132   :  { %v1116_v63 = vrot.slane %v1115_v59, 2  ;;  %v1128_v5 = vadd.f32 %v1127_v62, %v1126_v58 }
 0x134   :  { %v1117_v6 = vadd.f32 %v1116_v63, %v1115_v59  ;;  %v1129_v8 = vrot.slane %v1128_v5, 2 }
 0x136   :  { %v1118_v9 = vrot.slane %v1117_v6, 1  ;;  %v1130_v38 = vadd.f32 %v1129_v8, %v1128_v5 }
 0x138   :  { %v1119_v10 = vadd.f32 %v1118_v9, %v1117_v6  ;;  %v1131_v11 = vrot.slane %v1130_v38, 1 }
 0x13a   :  { %v1132_v48 = vadd.f32 %v1131_v11, %v1130_v38  ;;  %v1136_v60 = vsel %vm1133_vm0, %v1119_v10, 0.0 }
 0x13b   :  { %1137 = vst [vmem:[%s1877_s6] sm:$0xff] %v1136_v60 }
 0x13c   :  { %v1138_v13 = vsel %vm1133_vm0, %v1132_v48, 0.0 }
 0x13d   :  { %1139 = vst [vmem:[%s1878_s7] sm:$0xff] %v1138_v13 }

</bundles_post_ra>
